<compile_context>
chip_gen: v5e
topology: v5e:2x2
jax: 0.10.0
libtpu: 0.0.40
codegen_flags: <defaults>
</compile_context>

<pallas_src>
import jax
import jax.numpy as jnp
from jax import lax
from jax.experimental import pallas as pl
from jax.experimental.pallas import tpu as pltpu

HIDDEN = 54            # LSTM hidden size (3 layers)
HID_PAD = 128          # per-gate lane-aligned padding inside the LSTM kernels
GATES_PAD = 4 * HID_PAD
KSIZE = 15             # conv kernel size
STRIDE = 2             # conv stride


def _round_up(n, m):
    return ((n + m - 1) // m) * m


# -------- Pallas kernel 1: LIF membrane recurrence (serial over T) ------------
# Block = (T, tile) of ONE batch element: serial axis T on sublanes, features
# lane-dense.  Grid = (batch, feature-tiles); no HBM transposes anywhere.
def _lif_kernel(x_ref, s_ref):
    n_t, width = x_ref.shape

    def step(t, m):
        m = m + x_ref[pl.ds(t, 1), :]            # membrane += conv increment
        spk = m > 1.0                            # F.threshold(m, 1, 0) > 0
        s_ref[pl.ds(t, 1), :] = spk.astype(jnp.float32)
        return jnp.where(spk, 0.0, m)            # hard reset-to-zero

    # Bounded unroll: scheduler visibility without unbounded vreg live ranges.
    lax.fori_loop(0, n_t, step, jnp.zeros((1, width), jnp.float32),
                  unroll=min(8, n_t))


def lif_scan(conv_out, batch, n_frames, max_block_bytes=4 << 20):
    """conv_out: (B*T, C, h, w) membrane increments -> spikes, same shape."""
    bt_frames, c, h, w = conv_out.shape
    feat = c * h * w
    # (B*T,C,h,w) -> (B,T,feat): rows are already batch-major with time
    # contiguous, so this is a pure contiguous reshape (no transpose).
    x = conv_out.reshape(batch, n_frames, feat)
    max_tile = max(128, (max_block_bytes // (4 * n_frames)) // 128 * 128)
    tile = feat if feat <= max_tile else max_tile
    grid = (batch, pl.cdiv(feat, tile))          # ragged last tile masked by Pallas
    spikes = pl.pallas_call(
        _lif_kernel,
        out_shape=jax.ShapeDtypeStruct((batch, n_frames, feat), jnp.float32),
        grid=grid,
        in_specs=[pl.BlockSpec((None, n_frames, tile), lambda b, i: (b, 0, i))],
        out_specs=pl.BlockSpec((None, n_frames, tile), lambda b, i: (b, 0, i)),
        compiler_params=pltpu.CompilerParams(
            dimension_semantics=("parallel", "parallel")),
    )(x)
    return spikes.reshape(bt_frames, c, h, w)


# -------- Pallas kernel 2: hoisted LSTM layer-0 input GEMM (+ bias) -----------
def _gemm_bias_kernel(a_ref, w_ref, b_ref, o_ref):
    o_ref[...] = (jnp.dot(a_ref[...], w_ref[...],
                          preferred_element_type=jnp.float32) + b_ref[...])


def gemm_bias(a, w, b, tm_max=1024):
    """a @ w + b; a:(M,K) bf16 spikes, w:(K,N) bf16, b:(N,) f32 -> (M,N) f32."""
    m, k = a.shape
    n = w.shape[1]
    # >= 2 M-blocks when possible (v7x megacore); no input padding, the ragged
    # last block is masked by Pallas (pl.cdiv grid).
    tm = max(8, min(tm_max, _round_up((m + 1) // 2, 8)))
    grid_m = pl.cdiv(m, tm)
    cost = pl.CostEstimate(
        flops=2 * m * k * n, transcendentals=0,
        bytes_accessed=(m * k * a.dtype.itemsize
                        + k * n * w.dtype.itemsize + m * n * 4))
    return pl.pallas_call(
        _gemm_bias_kernel,
        out_shape=jax.ShapeDtypeStruct((m, n), jnp.float32),
        grid=(grid_m,),
        in_specs=[pl.BlockSpec((tm, k), lambda i: (i, 0)),
                  pl.BlockSpec((k, n), lambda i: (0, 0)),
                  pl.BlockSpec((1, n), lambda i: (0, 0))],
        out_specs=pl.BlockSpec((tm, n), lambda i: (i, 0)),
        compiler_params=pltpu.CompilerParams(
            dimension_semantics=("parallel",),
            vmem_limit_bytes=32 << 20),
        cost_estimate=cost,
    )(a, w, b.reshape(1, n))


# -------- Pallas kernel 3: 3-layer LSTM recurrence + sum over time ------------
def _lstm_kernel(xg_ref, whh0_ref, w1_ref, w2_ref, b_ref, o_ref):
    n_t, bt, _ = xg_ref.shape

    whh0 = whh0_ref[...]
    w1 = w1_ref[...]
    w2 = w2_ref[...]
    b0, b1, b2 = b_ref[0], b_ref[1], b_ref[2]

    def sigmoid(v):                          # EUP exp + approx EUP reciprocal
        return pl.reciprocal(1.0 + jnp.exp(-v), approx=True)

    def cell(g, c):
        # Gates are per-gate padded to 128 lanes: each slice is whole-vreg
        # aligned, so no cross-lane relayout in the serial chain.
        i = sigmoid(g[:, 0 * HID_PAD:1 * HID_PAD])
        f = sigmoid(g[:, 1 * HID_PAD:2 * HID_PAD])
        gg = jnp.tanh(g[:, 2 * HID_PAD:3 * HID_PAD])
        o = sigmoid(g[:, 3 * HID_PAD:4 * HID_PAD])
        c = f * c + i * gg
        return o * jnp.tanh(c), c

    z = jnp.zeros((bt, HID_PAD), jnp.float32)

    def step(t, carry):
        h0, c0, h1, c1, h2, c2, acc = carry
        # Layer 0: input projection hoisted (xg precomputed); only the tiny
        # hidden-hidden matmul remains in the serial chain.
        g0 = xg_ref[t] + jnp.dot(h0, whh0, preferred_element_type=jnp.float32) + b0
        h0, c0 = cell(g0, c0)
        # Layers 1/2: one fused matmul each ([h_below, h_prev] @ [W_ih; W_hh]).
        g1 = jnp.dot(jnp.concatenate([h0, h1], axis=1), w1,
                     preferred_element_type=jnp.float32) + b1
        h1, c1 = cell(g1, c1)
        g2 = jnp.dot(jnp.concatenate([h1, h2], axis=1), w2,
                     preferred_element_type=jnp.float32) + b2
        h2, c2 = cell(g2, c2)
        return h0, c0, h1, c1, h2, c2, acc + h2   # sum of top-layer h over time

    carry = lax.fori_loop(0, n_t, step, (z,) * 7, unroll=min(4, n_t))
    o_ref[...] = carry[6]


def _pad_gate_cols(w):
    """Last axis 4*HIDDEN (gate order i|f|g|o) -> 4*HID_PAD, zero-padded per gate."""
    lead = w.shape[:-1]
    w4 = w.reshape(lead + (4, HIDDEN))
    out = jnp.zeros(lead + (4, HID_PAD), w.dtype).at[..., :HIDDEN].set(w4)
    return out.reshape(lead + (GATES_PAD,))


def _pad_rows(w, rows):
    return jnp.pad(w, ((0, rows - w.shape[0]), (0, 0)))


def lstm3_sum(feats, params):
    """feats: (B, T, F) spikes -> sum_t output_t of the 3-layer LSTM(hidden=54)."""
    bsz, n_t, f = feats.shape
    # Hoisted layer-0 input projection over all B*T timesteps.  Spikes are
    # exactly 0/1 -> bf16 A stream is lossless; bf16 weights, f32 accumulate.
    w_ih0 = _pad_gate_cols(params["w_ih0"]).astype(jnp.bfloat16)
    b_ih0 = _pad_gate_cols(params["b_ih0"])
    xg = gemm_bias(feats.reshape(bsz * n_t, f).astype(jnp.bfloat16), w_ih0, b_ih0)
    xg = xg.reshape(bsz, n_t, GATES_PAD).transpose(1, 0, 2)   # (T,B,4Hp): tiny tensor

    pad = lambda w: _pad_rows(_pad_gate_cols(w), HID_PAD)
    whh0 = pad(params["w_hh0"])                                            # (128,512)
    w1 = jnp.concatenate([pad(params["w_ih1"]), pad(params["w_hh1"])], 0)  # (256,512)
    w2 = jnp.concatenate([pad(params["w_ih2"]), pad(params["w_hh2"])], 0)
    b_loop = jnp.stack([_pad_gate_cols(params["b_hh0"]),
                        _pad_gate_cols(params["b_ih1"] + params["b_hh1"]),
                        _pad_gate_cols(params["b_ih2"] + params["b_hh2"])])
    b_loop = b_loop.reshape(3, 1, GATES_PAD)

    # Batch-tile grid: for B >= 16 split into >= 2 tiles so the latency-bound
    # recurrence shards across both v7x TensorCores; tiny B -> one program.
    bt = bsz if bsz < 16 else max(8, _round_up((bsz + 1) // 2, 8))
    n_b = pl.cdiv(bsz, bt)
    # TODO(synk): for very long T, stream xg over a T grid axis ("arbitrary")
    # with h/c/acc carried in VMEM scratch instead of one (T,B,4Hp) block.
    out = pl.pallas_call(
        _lstm_kernel,
        out_shape=jax.ShapeDtypeStruct((bsz, HID_PAD), jnp.float32),
        grid=(n_b,),
        in_specs=[pl.BlockSpec((n_t, bt, GATES_PAD), lambda j: (0, j, 0)),
                  pl.BlockSpec((HID_PAD, GATES_PAD), lambda j: (0, 0)),
                  pl.BlockSpec((2 * HID_PAD, GATES_PAD), lambda j: (0, 0)),
                  pl.BlockSpec((2 * HID_PAD, GATES_PAD), lambda j: (0, 0)),
                  pl.BlockSpec((3, 1, GATES_PAD), lambda j: (0, 0, 0))],
        out_specs=pl.BlockSpec((bt, HID_PAD), lambda j: (j, 0)),
        compiler_params=pltpu.CompilerParams(dimension_semantics=("parallel",)),
    )(xg, whh0, w1, w2, b_loop)
    return out[:, :HIDDEN]    # padded hidden columns are identically zero


# -------- conv + forward pass --------------------------------------------------
def conv2d_bias(x, w, b):
    """NCHW VALID conv, stride 2, + bias.  Channel counts are 1..4 -> HBM-bound;
    use lax.conv (no im2col read/write amplification in HBM)."""
    # TODO(synk): for large channel counts, fuse patch extraction into a Pallas
    # GEMM via manual DMA (memory_space=pl.ANY) instead of lax.conv.
    out = lax.conv_general_dilated(
        x, w, window_strides=(STRIDE, STRIDE), padding="VALID",
        dimension_numbers=("NCHW", "OIHW", "NCHW"))
    return out + b[None, :, None, None]


def forward(params, x):
    b, t, h, w = x.shape
    # F.avg_pool2d(x, 2): 2x2 mean over (H, W)  (layout glue, kept in JAX).
    xp = x.reshape(b, t, h // 2, 2, w // 2, 2).mean(axis=(3, 5))
    # Every conv depends only on the previous layer's spikes, so all three are
    # hoisted out of the time loop and batched over B*T frames.
    c1 = conv2d_bias(xp.reshape(b * t, 1, h // 2, w // 2),
                     params["conv1_w"], params["conv1_b"])
    s1 = lif_scan(c1, b, t)            # membrane_c1 recurrence -> spikes
    c2 = conv2d_bias(s1, params["conv2_w"], params["conv2_b"])
    s2 = lif_scan(c2, b, t)            # membrane_c2
    c3 = conv2d_bias(s2, params["conv3_w"], params["conv3_b"])
    s3 = lif_scan(c3, b, t)            # membrane_c3 -> c3o spikes
    feats = s3.reshape(b, t, -1)       # torch.flatten(c3o, 2)
    return lstm3_sum(feats, params)    # LSTM(3 layers) + sum over time


# -------- deterministic parameter init -----------------------------------------
def init_params(key, channel, lstm_in):
    c0, c1, c2 = channel
    ks = jax.random.split(key, 20)

    def u(k, shape, fan_in):
        bound = 1.0 / (fan_in ** 0.5)
        return jax.random.uniform(k, shape, jnp.float32, -bound, bound)

    kk = KSIZE * KSIZE
    h4 = 4 * HIDDEN
    p = {
        "conv1_w": u(ks[0], (c0, 1, KSIZE, KSIZE), 1 * kk),
        "conv1_b": u(ks[1], (c0,), 1 * kk),
        "conv2_w": u(ks[2], (c1, c0, KSIZE, KSIZE), c0 * kk),
        "conv2_b": u(ks[3], (c1,), c0 * kk),
        "conv3_w": u(ks[4], (c2, c1, KSIZE, KSIZE), c1 * kk),
        "conv3_b": u(ks[5], (c2,), c1 * kk),
    }
    # LSTM weights stored transposed (in, 4*hidden) relative to PyTorch (4H, in);
    # gate order i|f|g|o.  PyTorch init bound = 1/sqrt(hidden).
    layer_in = [("w_ih0", lstm_in), ("w_hh0", HIDDEN),
                ("w_ih1", HIDDEN), ("w_hh1", HIDDEN),
                ("w_ih2", HIDDEN), ("w_hh2", HIDDEN)]
    i = 6
    for name, fan in layer_in:
        p[name] = u(ks[i], (fan, h4), HIDDEN); i += 1
        p["b" + name[1:]] = u(ks[i], (h4,), HIDDEN); i += 1
    return p


if __name__ == "__main__":
    # Small input that survives three 15x15 / stride-2 convs after avg_pool2d(2)
    # with a non-degenerate flatten: 230 -> pooled 115 -> 51 -> 19 -> 3.
    B, T, H, W = 2, 4, 230, 230
    channel = (2, 3, 4)

    def co(n):
        return (n - KSIZE) // STRIDE + 1

    h3 = co(co(co(H // 2)))
    lstm_in = channel[2] * h3 * h3
    # NOTE: the module hard-codes lstm in_features = channel[2]*26*26 (the
    # canonical 598x598 input); here it is sized from the actual flatten of
    # this small demo input (same semantics).

    key = jax.random.PRNGKey(0)
    kx, kp = jax.random.split(key)
    x = jax.random.normal(kx, (B, T, H, W), jnp.float32)
    params = init_params(kp, channel, lstm_in)

    out = jax.jit(forward)(params, x)
    out = jax.block_until_ready(out)
    assert out.shape == (B, HIDDEN) and out.dtype == jnp.float32
    print("KERNEL_OK")
</pallas_src>

<mosaic_0001>
module attributes {stable_mosaic.version = 11 : i64} {
  func.func @_lif_kernel(%arg0: i32, %arg1: i32, %arg2: memref<1x4x5202xf32, #tpu.memory_space<vmem>>, %arg3: memref<1x4x5202xf32, #tpu.memory_space<vmem>>) attributes {dimension_semantics = [#tpu.dimension_semantics<parallel>, #tpu.dimension_semantics<parallel>], iteration_bounds = array<i64: 2, 1>, scalar_prefetch = 0 : i64, scratch_operands = 0 : i64, tpu.core_type = #tpu.core_type<tc>, window_params = [{transform_indices = @transform_0, window_bounds = array<i64: 1, 4, 5202>}, {transform_indices = @transform_1, window_bounds = array<i64: 1, 4, 5202>}]} {
    %cst = arith.constant 0.000000e+00 : f32
    %0 = vector.broadcast %cst : f32 to vector<1x5202xf32>
    %c0_i32 = arith.constant 0 : i32
    %c0 = arith.constant 0 : index
    %1 = arith.index_cast %c0_i32 : i32 to index
    %c0_0 = arith.constant 0 : index
    %2 = vector.load %arg2[%c0, %1, %c0_0] : memref<1x4x5202xf32, #tpu.memory_space<vmem>>, vector<1x1x5202xf32>
    %3 = vector.shape_cast %2 : vector<1x1x5202xf32> to vector<1x5202xf32>
    %4 = arith.addf %0, %3 : vector<1x5202xf32>
    %cst_1 = arith.constant 1.000000e+00 : f32
    %5 = vector.broadcast %cst_1 : f32 to vector<1x5202xf32>
    %6 = arith.cmpf ogt, %4, %5 : vector<1x5202xf32>
    %7 = arith.extui %6 : vector<1x5202xi1> to vector<1x5202xi32>
    %8 = arith.sitofp %7 : vector<1x5202xi32> to vector<1x5202xf32>
    %c0_2 = arith.constant 0 : index
    %9 = arith.index_cast %c0_i32 : i32 to index
    %c0_3 = arith.constant 0 : index
    %10 = vector.load %arg3[%c0_2, %9, %c0_3] : memref<1x4x5202xf32, #tpu.memory_space<vmem>>, vector<1x1x5202xf32>
    %11 = vector.shape_cast %10 : vector<1x1x5202xf32> to vector<1x5202xf32>
    %12 = vector.shape_cast %8 : vector<1x5202xf32> to vector<1x1x5202xf32>
    tpu.vector_store %arg3[%c0_2, %9, %c0_3], %12 {strides = array<i32>} : memref<1x4x5202xf32, #tpu.memory_space<vmem>>, vector<1x1x5202xf32>,
    %cst_4 = arith.constant 0.000000e+00 : f32
    %13 = vector.broadcast %cst_4 : f32 to vector<1x5202xf32>
    %14 = arith.select %6, %13, %4 : vector<1x5202xi1>, vector<1x5202xf32>
    %c1_i32 = arith.constant 1 : i32
    %c0_5 = arith.constant 0 : index
    %15 = arith.index_cast %c1_i32 : i32 to index
    %c0_6 = arith.constant 0 : index
    %16 = vector.load %arg2[%c0_5, %15, %c0_6] : memref<1x4x5202xf32, #tpu.memory_space<vmem>>, vector<1x1x5202xf32>
    %17 = vector.shape_cast %16 : vector<1x1x5202xf32> to vector<1x5202xf32>
    %18 = arith.addf %14, %17 : vector<1x5202xf32>
    %cst_7 = arith.constant 1.000000e+00 : f32
    %19 = vector.broadcast %cst_7 : f32 to vector<1x5202xf32>
    %20 = arith.cmpf ogt, %18, %19 : vector<1x5202xf32>
    %21 = arith.extui %20 : vector<1x5202xi1> to vector<1x5202xi32>
    %22 = arith.sitofp %21 : vector<1x5202xi32> to vector<1x5202xf32>
    %c0_8 = arith.constant 0 : index
    %23 = arith.index_cast %c1_i32 : i32 to index
    %c0_9 = arith.constant 0 : index
    %24 = vector.load %arg3[%c0_8, %23, %c0_9] : memref<1x4x5202xf32, #tpu.memory_space<vmem>>, vector<1x1x5202xf32>
    %25 = vector.shape_cast %24 : vector<1x1x5202xf32> to vector<1x5202xf32>
    %26 = vector.shape_cast %22 : vector<1x5202xf32> to vector<1x1x5202xf32>
    tpu.vector_store %arg3[%c0_8, %23, %c0_9], %26 {strides = array<i32>} : memref<1x4x5202xf32, #tpu.memory_space<vmem>>, vector<1x1x5202xf32>,
    %cst_10 = arith.constant 0.000000e+00 : f32
    %27 = vector.broadcast %cst_10 : f32 to vector<1x5202xf32>
    %28 = arith.select %20, %27, %18 : vector<1x5202xi1>, vector<1x5202xf32>
    %c2_i32 = arith.constant 2 : i32
    %c0_11 = arith.constant 0 : index
    %29 = arith.index_cast %c2_i32 : i32 to index
    %c0_12 = arith.constant 0 : index
    %30 = vector.load %arg2[%c0_11, %29, %c0_12] : memref<1x4x5202xf32, #tpu.memory_space<vmem>>, vector<1x1x5202xf32>
    %31 = vector.shape_cast %30 : vector<1x1x5202xf32> to vector<1x5202xf32>
    %32 = arith.addf %28, %31 : vector<1x5202xf32>
    %cst_13 = arith.constant 1.000000e+00 : f32
    %33 = vector.broadcast %cst_13 : f32 to vector<1x5202xf32>
    %34 = arith.cmpf ogt, %32, %33 : vector<1x5202xf32>
    %35 = arith.extui %34 : vector<1x5202xi1> to vector<1x5202xi32>
    %36 = arith.sitofp %35 : vector<1x5202xi32> to vector<1x5202xf32>
    %c0_14 = arith.constant 0 : index
    %37 = arith.index_cast %c2_i32 : i32 to index
    %c0_15 = arith.constant 0 : index
    %38 = vector.load %arg3[%c0_14, %37, %c0_15] : memref<1x4x5202xf32, #tpu.memory_space<vmem>>, vector<1x1x5202xf32>
    %39 = vector.shape_cast %38 : vector<1x1x5202xf32> to vector<1x5202xf32>
    %40 = vector.shape_cast %36 : vector<1x5202xf32> to vector<1x1x5202xf32>
    tpu.vector_store %arg3[%c0_14, %37, %c0_15], %40 {strides = array<i32>} : memref<1x4x5202xf32, #tpu.memory_space<vmem>>, vector<1x1x5202xf32>,
    %cst_16 = arith.constant 0.000000e+00 : f32
    %41 = vector.broadcast %cst_16 : f32 to vector<1x5202xf32>
    %42 = arith.select %34, %41, %32 : vector<1x5202xi1>, vector<1x5202xf32>
    %c3_i32 = arith.constant 3 : i32
    %c0_17 = arith.constant 0 : index
    %43 = arith.index_cast %c3_i32 : i32 to index
    %c0_18 = arith.constant 0 : index
    %44 = vector.load %arg2[%c0_17, %43, %c0_18] : memref<1x4x5202xf32, #tpu.memory_space<vmem>>, vector<1x1x5202xf32>
    %45 = vector.shape_cast %44 : vector<1x1x5202xf32> to vector<1x5202xf32>
    %46 = arith.addf %42, %45 : vector<1x5202xf32>
    %cst_19 = arith.constant 1.000000e+00 : f32
    %47 = vector.broadcast %cst_19 : f32 to vector<1x5202xf32>
    %48 = arith.cmpf ogt, %46, %47 : vector<1x5202xf32>
    %49 = arith.extui %48 : vector<1x5202xi1> to vector<1x5202xi32>
    %50 = arith.sitofp %49 : vector<1x5202xi32> to vector<1x5202xf32>
    %c0_20 = arith.constant 0 : index
    %51 = arith.index_cast %c3_i32 : i32 to index
    %c0_21 = arith.constant 0 : index
    %52 = vector.load %arg3[%c0_20, %51, %c0_21] : memref<1x4x5202xf32, #tpu.memory_space<vmem>>, vector<1x1x5202xf32>
    %53 = vector.shape_cast %52 : vector<1x1x5202xf32> to vector<1x5202xf32>
    %54 = vector.shape_cast %50 : vector<1x5202xf32> to vector<1x1x5202xf32>
    tpu.vector_store %arg3[%c0_20, %51, %c0_21], %54 {strides = array<i32>} : memref<1x4x5202xf32, #tpu.memory_space<vmem>>, vector<1x1x5202xf32>,
    %cst_22 = arith.constant 0.000000e+00 : f32
    %55 = vector.broadcast %cst_22 : f32 to vector<1x5202xf32>
    %56 = arith.select %48, %55, %46 : vector<1x5202xi1>, vector<1x5202xf32>
    %c4_i32 = arith.constant 4 : i32
    return
  }
  func.func @transform_0(%arg0: i32, %arg1: i32) -> (i32, i32, i32) {
    %c0_i32 = arith.constant 0 : i32
    %c0_i32_0 = arith.constant 0 : i32
    return %arg0, %c0_i32, %arg1 : i32, i32, i32
  }
  func.func @transform_1(%arg0: i32, %arg1: i32) -> (i32, i32, i32) {
    %c0_i32 = arith.constant 0 : i32
    %c0_i32_0 = arith.constant 0 : i32
    return %arg0, %c0_i32, %arg1 : i32, i32, i32
  }
}

module attributes {stable_mosaic.version = 11 : i64} {
  func.func @_lif_kernel(%arg0: i32, %arg1: i32, %arg2: memref<1x4x1083xf32, #tpu.memory_space<vmem>>, %arg3: memref<1x4x1083xf32, #tpu.memory_space<vmem>>) attributes {dimension_semantics = [#tpu.dimension_semantics<parallel>, #tpu.dimension_semantics<parallel>], iteration_bounds = array<i64: 2, 1>, scalar_prefetch = 0 : i64, scratch_operands = 0 : i64, tpu.core_type = #tpu.core_type<tc>, window_params = [{transform_indices = @transform_0, window_bounds = array<i64: 1, 4, 1083>}, {transform_indices = @transform_1, window_bounds = array<i64: 1, 4, 1083>}]} {
    %cst = arith.constant 0.000000e+00 : f32
    %0 = vector.broadcast %cst : f32 to vector<1x1083xf32>
    %c0_i32 = arith.constant 0 : i32
    %c0 = arith.constant 0 : index
    %1 = arith.index_cast %c0_i32 : i32 to index
    %c0_0 = arith.constant 0 : index
    %2 = vector.load %arg2[%c0, %1, %c0_0] : memref<1x4x1083xf32, #tpu.memory_space<vmem>>, vector<1x1x1083xf32>
    %3 = vector.shape_cast %2 : vector<1x1x1083xf32> to vector<1x1083xf32>
    %4 = arith.addf %0, %3 : vector<1x1083xf32>
    %cst_1 = arith.constant 1.000000e+00 : f32
    %5 = vector.broadcast %cst_1 : f32 to vector<1x1083xf32>
    %6 = arith.cmpf ogt, %4, %5 : vector<1x1083xf32>
    %7 = arith.extui %6 : vector<1x1083xi1> to vector<1x1083xi32>
    %8 = arith.sitofp %7 : vector<1x1083xi32> to vector<1x1083xf32>
    %c0_2 = arith.constant 0 : index
    %9 = arith.index_cast %c0_i32 : i32 to index
    %c0_3 = arith.constant 0 : index
    %10 = vector.load %arg3[%c0_2, %9, %c0_3] : memref<1x4x1083xf32, #tpu.memory_space<vmem>>, vector<1x1x1083xf32>
    %11 = vector.shape_cast %10 : vector<1x1x1083xf32> to vector<1x1083xf32>
    %12 = vector.shape_cast %8 : vector<1x1083xf32> to vector<1x1x1083xf32>
    tpu.vector_store %arg3[%c0_2, %9, %c0_3], %12 {strides = array<i32>} : memref<1x4x1083xf32, #tpu.memory_space<vmem>>, vector<1x1x1083xf32>,
    %cst_4 = arith.constant 0.000000e+00 : f32
    %13 = vector.broadcast %cst_4 : f32 to vector<1x1083xf32>
    %14 = arith.select %6, %13, %4 : vector<1x1083xi1>, vector<1x1083xf32>
    %c1_i32 = arith.constant 1 : i32
    %c0_5 = arith.constant 0 : index
    %15 = arith.index_cast %c1_i32 : i32 to index
    %c0_6 = arith.constant 0 : index
    %16 = vector.load %arg2[%c0_5, %15, %c0_6] : memref<1x4x1083xf32, #tpu.memory_space<vmem>>, vector<1x1x1083xf32>
    %17 = vector.shape_cast %16 : vector<1x1x1083xf32> to vector<1x1083xf32>
    %18 = arith.addf %14, %17 : vector<1x1083xf32>
    %cst_7 = arith.constant 1.000000e+00 : f32
    %19 = vector.broadcast %cst_7 : f32 to vector<1x1083xf32>
    %20 = arith.cmpf ogt, %18, %19 : vector<1x1083xf32>
    %21 = arith.extui %20 : vector<1x1083xi1> to vector<1x1083xi32>
    %22 = arith.sitofp %21 : vector<1x1083xi32> to vector<1x1083xf32>
    %c0_8 = arith.constant 0 : index
    %23 = arith.index_cast %c1_i32 : i32 to index
    %c0_9 = arith.constant 0 : index
    %24 = vector.load %arg3[%c0_8, %23, %c0_9] : memref<1x4x1083xf32, #tpu.memory_space<vmem>>, vector<1x1x1083xf32>
    %25 = vector.shape_cast %24 : vector<1x1x1083xf32> to vector<1x1083xf32>
    %26 = vector.shape_cast %22 : vector<1x1083xf32> to vector<1x1x1083xf32>
    tpu.vector_store %arg3[%c0_8, %23, %c0_9], %26 {strides = array<i32>} : memref<1x4x1083xf32, #tpu.memory_space<vmem>>, vector<1x1x1083xf32>,
    %cst_10 = arith.constant 0.000000e+00 : f32
    %27 = vector.broadcast %cst_10 : f32 to vector<1x1083xf32>
    %28 = arith.select %20, %27, %18 : vector<1x1083xi1>, vector<1x1083xf32>
    %c2_i32 = arith.constant 2 : i32
    %c0_11 = arith.constant 0 : index
    %29 = arith.index_cast %c2_i32 : i32 to index
    %c0_12 = arith.constant 0 : index
    %30 = vector.load %arg2[%c0_11, %29, %c0_12] : memref<1x4x1083xf32, #tpu.memory_space<vmem>>, vector<1x1x1083xf32>
    %31 = vector.shape_cast %30 : vector<1x1x1083xf32> to vector<1x1083xf32>
    %32 = arith.addf %28, %31 : vector<1x1083xf32>
    %cst_13 = arith.constant 1.000000e+00 : f32
    %33 = vector.broadcast %cst_13 : f32 to vector<1x1083xf32>
    %34 = arith.cmpf ogt, %32, %33 : vector<1x1083xf32>
    %35 = arith.extui %34 : vector<1x1083xi1> to vector<1x1083xi32>
    %36 = arith.sitofp %35 : vector<1x1083xi32> to vector<1x1083xf32>
    %c0_14 = arith.constant 0 : index
    %37 = arith.index_cast %c2_i32 : i32 to index
    %c0_15 = arith.constant 0 : index
    %38 = vector.load %arg3[%c0_14, %37, %c0_15] : memref<1x4x1083xf32, #tpu.memory_space<vmem>>, vector<1x1x1083xf32>
    %39 = vector.shape_cast %38 : vector<1x1x1083xf32> to vector<1x1083xf32>
    %40 = vector.shape_cast %36 : vector<1x1083xf32> to vector<1x1x1083xf32>
    tpu.vector_store %arg3[%c0_14, %37, %c0_15], %40 {strides = array<i32>} : memref<1x4x1083xf32, #tpu.memory_space<vmem>>, vector<1x1x1083xf32>,
    %cst_16 = arith.constant 0.000000e+00 : f32
    %41 = vector.broadcast %cst_16 : f32 to vector<1x1083xf32>
    %42 = arith.select %34, %41, %32 : vector<1x1083xi1>, vector<1x1083xf32>
    %c3_i32 = arith.constant 3 : i32
    %c0_17 = arith.constant 0 : index
    %43 = arith.index_cast %c3_i32 : i32 to index
    %c0_18 = arith.constant 0 : index
    %44 = vector.load %arg2[%c0_17, %43, %c0_18] : memref<1x4x1083xf32, #tpu.memory_space<vmem>>, vector<1x1x1083xf32>
    %45 = vector.shape_cast %44 : vector<1x1x1083xf32> to vector<1x1083xf32>
    %46 = arith.addf %42, %45 : vector<1x1083xf32>
    %cst_19 = arith.constant 1.000000e+00 : f32
    %47 = vector.broadcast %cst_19 : f32 to vector<1x1083xf32>
    %48 = arith.cmpf ogt, %46, %47 : vector<1x1083xf32>
    %49 = arith.extui %48 : vector<1x1083xi1> to vector<1x1083xi32>
    %50 = arith.sitofp %49 : vector<1x1083xi32> to vector<1x1083xf32>
    %c0_20 = arith.constant 0 : index
    %51 = arith.index_cast %c3_i32 : i32 to index
    %c0_21 = arith.constant 0 : index
    %52 = vector.load %arg3[%c0_20, %51, %c0_21] : memref<1x4x1083xf32, #tpu.memory_space<vmem>>, vector<1x1x1083xf32>
    %53 = vector.shape_cast %52 : vector<1x1x1083xf32> to vector<1x1083xf32>
    %54 = vector.shape_cast %50 : vector<1x1083xf32> to vector<1x1x1083xf32>
    tpu.vector_store %arg3[%c0_20, %51, %c0_21], %54 {strides = array<i32>} : memref<1x4x1083xf32, #tpu.memory_space<vmem>>, vector<1x1x1083xf32>,
    %cst_22 = arith.constant 0.000000e+00 : f32
    %55 = vector.broadcast %cst_22 : f32 to vector<1x1083xf32>
    %56 = arith.select %48, %55, %46 : vector<1x1083xi1>, vector<1x1083xf32>
    %c4_i32 = arith.constant 4 : i32
    return
  }
  func.func @transform_0(%arg0: i32, %arg1: i32) -> (i32, i32, i32) {
    %c0_i32 = arith.constant 0 : i32
    %c0_i32_0 = arith.constant 0 : i32
    return %arg0, %c0_i32, %arg1 : i32, i32, i32
  }
  func.func @transform_1(%arg0: i32, %arg1: i32) -> (i32, i32, i32) {
    %c0_i32 = arith.constant 0 : i32
    %c0_i32_0 = arith.constant 0 : i32
    return %arg0, %c0_i32, %arg1 : i32, i32, i32
  }
}

module attributes {stable_mosaic.version = 11 : i64} {
  func.func @_lif_kernel(%arg0: i32, %arg1: i32, %arg2: memref<1x4x36xf32, #tpu.memory_space<vmem>>, %arg3: memref<1x4x36xf32, #tpu.memory_space<vmem>>) attributes {dimension_semantics = [#tpu.dimension_semantics<parallel>, #tpu.dimension_semantics<parallel>], iteration_bounds = array<i64: 2, 1>, scalar_prefetch = 0 : i64, scratch_operands = 0 : i64, tpu.core_type = #tpu.core_type<tc>, window_params = [{transform_indices = @transform_0, window_bounds = array<i64: 1, 4, 36>}, {transform_indices = @transform_1, window_bounds = array<i64: 1, 4, 36>}]} {
    %cst = arith.constant 0.000000e+00 : f32
    %0 = vector.broadcast %cst : f32 to vector<1x36xf32>
    %c0_i32 = arith.constant 0 : i32
    %c0 = arith.constant 0 : index
    %1 = arith.index_cast %c0_i32 : i32 to index
    %c0_0 = arith.constant 0 : index
    %2 = vector.load %arg2[%c0, %1, %c0_0] : memref<1x4x36xf32, #tpu.memory_space<vmem>>, vector<1x1x36xf32>
    %3 = vector.shape_cast %2 : vector<1x1x36xf32> to vector<1x36xf32>
    %4 = arith.addf %0, %3 : vector<1x36xf32>
    %cst_1 = arith.constant 1.000000e+00 : f32
    %5 = vector.broadcast %cst_1 : f32 to vector<1x36xf32>
    %6 = arith.cmpf ogt, %4, %5 : vector<1x36xf32>
    %7 = arith.extui %6 : vector<1x36xi1> to vector<1x36xi32>
    %8 = arith.sitofp %7 : vector<1x36xi32> to vector<1x36xf32>
    %c0_2 = arith.constant 0 : index
    %9 = arith.index_cast %c0_i32 : i32 to index
    %c0_3 = arith.constant 0 : index
    %10 = vector.load %arg3[%c0_2, %9, %c0_3] : memref<1x4x36xf32, #tpu.memory_space<vmem>>, vector<1x1x36xf32>
    %11 = vector.shape_cast %10 : vector<1x1x36xf32> to vector<1x36xf32>
    %12 = vector.shape_cast %8 : vector<1x36xf32> to vector<1x1x36xf32>
    tpu.vector_store %arg3[%c0_2, %9, %c0_3], %12 {strides = array<i32>} : memref<1x4x36xf32, #tpu.memory_space<vmem>>, vector<1x1x36xf32>,
    %cst_4 = arith.constant 0.000000e+00 : f32
    %13 = vector.broadcast %cst_4 : f32 to vector<1x36xf32>
    %14 = arith.select %6, %13, %4 : vector<1x36xi1>, vector<1x36xf32>
    %c1_i32 = arith.constant 1 : i32
    %c0_5 = arith.constant 0 : index
    %15 = arith.index_cast %c1_i32 : i32 to index
    %c0_6 = arith.constant 0 : index
    %16 = vector.load %arg2[%c0_5, %15, %c0_6] : memref<1x4x36xf32, #tpu.memory_space<vmem>>, vector<1x1x36xf32>
    %17 = vector.shape_cast %16 : vector<1x1x36xf32> to vector<1x36xf32>
    %18 = arith.addf %14, %17 : vector<1x36xf32>
    %cst_7 = arith.constant 1.000000e+00 : f32
    %19 = vector.broadcast %cst_7 : f32 to vector<1x36xf32>
    %20 = arith.cmpf ogt, %18, %19 : vector<1x36xf32>
    %21 = arith.extui %20 : vector<1x36xi1> to vector<1x36xi32>
    %22 = arith.sitofp %21 : vector<1x36xi32> to vector<1x36xf32>
    %c0_8 = arith.constant 0 : index
    %23 = arith.index_cast %c1_i32 : i32 to index
    %c0_9 = arith.constant 0 : index
    %24 = vector.load %arg3[%c0_8, %23, %c0_9] : memref<1x4x36xf32, #tpu.memory_space<vmem>>, vector<1x1x36xf32>
    %25 = vector.shape_cast %24 : vector<1x1x36xf32> to vector<1x36xf32>
    %26 = vector.shape_cast %22 : vector<1x36xf32> to vector<1x1x36xf32>
    tpu.vector_store %arg3[%c0_8, %23, %c0_9], %26 {strides = array<i32>} : memref<1x4x36xf32, #tpu.memory_space<vmem>>, vector<1x1x36xf32>,
    %cst_10 = arith.constant 0.000000e+00 : f32
    %27 = vector.broadcast %cst_10 : f32 to vector<1x36xf32>
    %28 = arith.select %20, %27, %18 : vector<1x36xi1>, vector<1x36xf32>
    %c2_i32 = arith.constant 2 : i32
    %c0_11 = arith.constant 0 : index
    %29 = arith.index_cast %c2_i32 : i32 to index
    %c0_12 = arith.constant 0 : index
    %30 = vector.load %arg2[%c0_11, %29, %c0_12] : memref<1x4x36xf32, #tpu.memory_space<vmem>>, vector<1x1x36xf32>
    %31 = vector.shape_cast %30 : vector<1x1x36xf32> to vector<1x36xf32>
    %32 = arith.addf %28, %31 : vector<1x36xf32>
    %cst_13 = arith.constant 1.000000e+00 : f32
    %33 = vector.broadcast %cst_13 : f32 to vector<1x36xf32>
    %34 = arith.cmpf ogt, %32, %33 : vector<1x36xf32>
    %35 = arith.extui %34 : vector<1x36xi1> to vector<1x36xi32>
    %36 = arith.sitofp %35 : vector<1x36xi32> to vector<1x36xf32>
    %c0_14 = arith.constant 0 : index
    %37 = arith.index_cast %c2_i32 : i32 to index
    %c0_15 = arith.constant 0 : index
    %38 = vector.load %arg3[%c0_14, %37, %c0_15] : memref<1x4x36xf32, #tpu.memory_space<vmem>>, vector<1x1x36xf32>
    %39 = vector.shape_cast %38 : vector<1x1x36xf32> to vector<1x36xf32>
    %40 = vector.shape_cast %36 : vector<1x36xf32> to vector<1x1x36xf32>
    tpu.vector_store %arg3[%c0_14, %37, %c0_15], %40 {strides = array<i32>} : memref<1x4x36xf32, #tpu.memory_space<vmem>>, vector<1x1x36xf32>,
    %cst_16 = arith.constant 0.000000e+00 : f32
    %41 = vector.broadcast %cst_16 : f32 to vector<1x36xf32>
    %42 = arith.select %34, %41, %32 : vector<1x36xi1>, vector<1x36xf32>
    %c3_i32 = arith.constant 3 : i32
    %c0_17 = arith.constant 0 : index
    %43 = arith.index_cast %c3_i32 : i32 to index
    %c0_18 = arith.constant 0 : index
    %44 = vector.load %arg2[%c0_17, %43, %c0_18] : memref<1x4x36xf32, #tpu.memory_space<vmem>>, vector<1x1x36xf32>
    %45 = vector.shape_cast %44 : vector<1x1x36xf32> to vector<1x36xf32>
    %46 = arith.addf %42, %45 : vector<1x36xf32>
    %cst_19 = arith.constant 1.000000e+00 : f32
    %47 = vector.broadcast %cst_19 : f32 to vector<1x36xf32>
    %48 = arith.cmpf ogt, %46, %47 : vector<1x36xf32>
    %49 = arith.extui %48 : vector<1x36xi1> to vector<1x36xi32>
    %50 = arith.sitofp %49 : vector<1x36xi32> to vector<1x36xf32>
    %c0_20 = arith.constant 0 : index
    %51 = arith.index_cast %c3_i32 : i32 to index
    %c0_21 = arith.constant 0 : index
    %52 = vector.load %arg3[%c0_20, %51, %c0_21] : memref<1x4x36xf32, #tpu.memory_space<vmem>>, vector<1x1x36xf32>
    %53 = vector.shape_cast %52 : vector<1x1x36xf32> to vector<1x36xf32>
    %54 = vector.shape_cast %50 : vector<1x36xf32> to vector<1x1x36xf32>
    tpu.vector_store %arg3[%c0_20, %51, %c0_21], %54 {strides = array<i32>} : memref<1x4x36xf32, #tpu.memory_space<vmem>>, vector<1x1x36xf32>,
    %cst_22 = arith.constant 0.000000e+00 : f32
    %55 = vector.broadcast %cst_22 : f32 to vector<1x36xf32>
    %56 = arith.select %48, %55, %46 : vector<1x36xi1>, vector<1x36xf32>
    %c4_i32 = arith.constant 4 : i32
    return
  }
  func.func @transform_0(%arg0: i32, %arg1: i32) -> (i32, i32, i32) {
    %c0_i32 = arith.constant 0 : i32
    %c0_i32_0 = arith.constant 0 : i32
    return %arg0, %c0_i32, %arg1 : i32, i32, i32
  }
  func.func @transform_1(%arg0: i32, %arg1: i32) -> (i32, i32, i32) {
    %c0_i32 = arith.constant 0 : i32
    %c0_i32_0 = arith.constant 0 : i32
    return %arg0, %c0_i32, %arg1 : i32, i32, i32
  }
}

module attributes {stable_mosaic.version = 11 : i64} {
  func.func @_gemm_bias_kernel(%arg0: i32, %arg1: memref<8x36xbf16, #tpu.memory_space<vmem>>, %arg2: memref<36x512xbf16, #tpu.memory_space<vmem>>, %arg3: memref<1x512xf32, #tpu.memory_space<vmem>>, %arg4: memref<8x512xf32, #tpu.memory_space<vmem>>) attributes {dimension_semantics = [#tpu.dimension_semantics<parallel>], iteration_bounds = array<i64: 1>, scalar_prefetch = 0 : i64, scratch_operands = 0 : i64, tpu.core_type = #tpu.core_type<tc>, window_params = [{transform_indices = @transform_0, window_bounds = array<i64: 8, 36>}, {pipeline_mode = #tpu.pipeline_mode<synchronous>, transform_indices = @transform_1, window_bounds = array<i64: 36, 512>}, {pipeline_mode = #tpu.pipeline_mode<synchronous>, transform_indices = @transform_2, window_bounds = array<i64: 1, 512>}, {transform_indices = @transform_3, window_bounds = array<i64: 8, 512>}]} {
    %c0 = arith.constant 0 : index
    %c0_0 = arith.constant 0 : index
    %0 = vector.load %arg1[%c0, %c0_0] : memref<8x36xbf16, #tpu.memory_space<vmem>>, vector<8x36xbf16>
    %c0_1 = arith.constant 0 : index
    %c0_2 = arith.constant 0 : index
    %1 = vector.load %arg2[%c0_1, %c0_2] : memref<36x512xbf16, #tpu.memory_space<vmem>>, vector<36x512xbf16>
    %cst = arith.constant dense<0.000000e+00> : vector<8x512xf32>
    %2 = tpu.matmul %0, %1, %cst {dimension_numbers = #tpu.dot_dimension_numbers<[1], [0], [0], [1], [0, 0, 1, 1], [], []>} : vector<8x36xbf16>, vector<36x512xbf16>, vector<8x512xf32> -> vector<8x512xf32>
    %c0_3 = arith.constant 0 : index
    %c0_4 = arith.constant 0 : index
    %3 = vector.load %arg3[%c0_3, %c0_4] : memref<1x512xf32, #tpu.memory_space<vmem>>, vector<1x512xf32>
    %4 = vector.broadcast %3 : vector<1x512xf32> to vector<8x512xf32>
    %5 = arith.addf %2, %4 : vector<8x512xf32>
    %c0_5 = arith.constant 0 : index
    %c0_6 = arith.constant 0 : index
    %6 = vector.load %arg4[%c0_5, %c0_6] : memref<8x512xf32, #tpu.memory_space<vmem>>, vector<8x512xf32>
    tpu.vector_store %arg4[%c0_5, %c0_6], %5 {strides = array<i32>} : memref<8x512xf32, #tpu.memory_space<vmem>>, vector<8x512xf32>,
    return
  }
  func.func @transform_0(%arg0: i32) -> (i32, i32) {
    %c0_i32 = arith.constant 0 : i32
    %c0_i32_0 = arith.constant 0 : i32
    return %arg0, %c0_i32 : i32, i32
  }
  func.func @transform_1(%arg0: i32) -> (i32, i32) {
    %c0_i32 = arith.constant 0 : i32
    %c0_i32_0 = arith.constant 0 : i32
    %c0_i32_1 = arith.constant 0 : i32
    return %c0_i32, %c0_i32_0 : i32, i32
  }
  func.func @transform_2(%arg0: i32) -> (i32, i32) {
    %c0_i32 = arith.constant 0 : i32
    %c0_i32_0 = arith.constant 0 : i32
    %c0_i32_1 = arith.constant 0 : i32
    return %c0_i32, %c0_i32_0 : i32, i32
  }
  func.func @transform_3(%arg0: i32) -> (i32, i32) {
    %c0_i32 = arith.constant 0 : i32
    %c0_i32_0 = arith.constant 0 : i32
    return %arg0, %c0_i32 : i32, i32
  }
}

module attributes {stable_mosaic.version = 11 : i64} {
  func.func @_lstm_kernel(%arg0: i32, %arg1: memref<4x2x512xf32, #tpu.memory_space<vmem>>, %arg2: memref<128x512xf32, #tpu.memory_space<vmem>>, %arg3: memref<256x512xf32, #tpu.memory_space<vmem>>, %arg4: memref<256x512xf32, #tpu.memory_space<vmem>>, %arg5: memref<3x1x512xf32, #tpu.memory_space<vmem>>, %arg6: memref<2x128xf32, #tpu.memory_space<vmem>>) attributes {dimension_semantics = [#tpu.dimension_semantics<parallel>], iteration_bounds = array<i64: 1>, scalar_prefetch = 0 : i64, scratch_operands = 0 : i64, tpu.core_type = #tpu.core_type<tc>, window_params = [{transform_indices = @transform_0, window_bounds = array<i64: 4, 2, 512>}, {pipeline_mode = #tpu.pipeline_mode<synchronous>, transform_indices = @transform_1, window_bounds = array<i64: 128, 512>}, {pipeline_mode = #tpu.pipeline_mode<synchronous>, transform_indices = @transform_2, window_bounds = array<i64: 256, 512>}, {pipeline_mode = #tpu.pipeline_mode<synchronous>, transform_indices = @transform_3, window_bounds = array<i64: 256, 512>}, {pipeline_mode = #tpu.pipeline_mode<synchronous>, transform_indices = @transform_4, window_bounds = array<i64: 3, 1, 512>}, {transform_indices = @transform_5, window_bounds = array<i64: 2, 128>}]} {
    %c0 = arith.constant 0 : index
    %c0_0 = arith.constant 0 : index
    %0 = vector.load %arg2[%c0, %c0_0] : memref<128x512xf32, #tpu.memory_space<vmem>>, vector<128x512xf32>
    %c0_1 = arith.constant 0 : index
    %c0_2 = arith.constant 0 : index
    %1 = vector.load %arg3[%c0_1, %c0_2] : memref<256x512xf32, #tpu.memory_space<vmem>>, vector<256x512xf32>
    %c0_3 = arith.constant 0 : index
    %c0_4 = arith.constant 0 : index
    %2 = vector.load %arg4[%c0_3, %c0_4] : memref<256x512xf32, #tpu.memory_space<vmem>>, vector<256x512xf32>
    %c0_5 = arith.constant 0 : index
    %c0_6 = arith.constant 0 : index
    %c0_7 = arith.constant 0 : index
    %3 = vector.load %arg5[%c0_5, %c0_6, %c0_7] : memref<3x1x512xf32, #tpu.memory_space<vmem>>, vector<1x1x512xf32>
    %4 = vector.shape_cast %3 : vector<1x1x512xf32> to vector<1x512xf32>
    %c1 = arith.constant 1 : index
    %c0_8 = arith.constant 0 : index
    %c0_9 = arith.constant 0 : index
    %5 = vector.load %arg5[%c1, %c0_8, %c0_9] : memref<3x1x512xf32, #tpu.memory_space<vmem>>, vector<1x1x512xf32>
    %6 = vector.shape_cast %5 : vector<1x1x512xf32> to vector<1x512xf32>
    %c2 = arith.constant 2 : index
    %c0_10 = arith.constant 0 : index
    %c0_11 = arith.constant 0 : index
    %7 = vector.load %arg5[%c2, %c0_10, %c0_11] : memref<3x1x512xf32, #tpu.memory_space<vmem>>, vector<1x1x512xf32>
    %8 = vector.shape_cast %7 : vector<1x1x512xf32> to vector<1x512xf32>
    %cst = arith.constant 0.000000e+00 : f32
    %9 = vector.broadcast %cst : f32 to vector<2x128xf32>
    %c0_i32 = arith.constant 0 : i32
    %10 = arith.index_cast %c0_i32 : i32 to index
    %c0_12 = arith.constant 0 : index
    %c0_13 = arith.constant 0 : index
    %11 = vector.load %arg1[%10, %c0_12, %c0_13] : memref<4x2x512xf32, #tpu.memory_space<vmem>>, vector<1x2x512xf32>
    %12 = vector.shape_cast %11 : vector<1x2x512xf32> to vector<2x512xf32>
    %cst_14 = arith.constant dense<0.000000e+00> : vector<2x512xf32>
    %13 = tpu.matmul %9, %0, %cst_14 {dimension_numbers = #tpu.dot_dimension_numbers<[1], [0], [0], [1], [0, 0, 1, 1], [], []>} : vector<2x128xf32>, vector<128x512xf32>, vector<2x512xf32> -> vector<2x512xf32>
    %14 = arith.addf %12, %13 : vector<2x512xf32>
    %15 = vector.broadcast %4 : vector<1x512xf32> to vector<2x512xf32>
    %16 = arith.addf %14, %15 : vector<2x512xf32>
    %17 = vector.extract_strided_slice %16 {offsets = [0, 0], sizes = [2, 128], strides = [1, 1]} : vector<2x512xf32> to vector<2x128xf32>
    %cst_15 = arith.constant 0.000000e+00 : f32
    %18 = vector.broadcast %cst_15 : f32 to vector<2x128xf32>
    %19 = arith.subf %18, %17 : vector<2x128xf32>
    %20 = math.exp %19 : vector<2x128xf32>
    %cst_16 = arith.constant 1.000000e+00 : f32
    %21 = vector.broadcast %cst_16 : f32 to vector<2x128xf32>
    %22 = arith.addf %21, %20 : vector<2x128xf32>
    %23 = tpu.reciprocal %22 {approx = true} : vector<2x128xf32> -> vector<2x128xf32>
    %24 = vector.extract_strided_slice %16 {offsets = [0, 128], sizes = [2, 128], strides = [1, 1]} : vector<2x512xf32> to vector<2x128xf32>
    %cst_17 = arith.constant 0.000000e+00 : f32
    %25 = vector.broadcast %cst_17 : f32 to vector<2x128xf32>
    %26 = arith.subf %25, %24 : vector<2x128xf32>
    %27 = math.exp %26 : vector<2x128xf32>
    %cst_18 = arith.constant 1.000000e+00 : f32
    %28 = vector.broadcast %cst_18 : f32 to vector<2x128xf32>
    %29 = arith.addf %28, %27 : vector<2x128xf32>
    %30 = tpu.reciprocal %29 {approx = true} : vector<2x128xf32> -> vector<2x128xf32>
    %31 = vector.extract_strided_slice %16 {offsets = [0, 256], sizes = [2, 128], strides = [1, 1]} : vector<2x512xf32> to vector<2x128xf32>
    %32 = math.tanh %31 : vector<2x128xf32>
    %33 = vector.extract_strided_slice %16 {offsets = [0, 384], sizes = [2, 128], strides = [1, 1]} : vector<2x512xf32> to vector<2x128xf32>
    %cst_19 = arith.constant 0.000000e+00 : f32
    %34 = vector.broadcast %cst_19 : f32 to vector<2x128xf32>
    %35 = arith.subf %34, %33 : vector<2x128xf32>
    %36 = math.exp %35 : vector<2x128xf32>
    %cst_20 = arith.constant 1.000000e+00 : f32
    %37 = vector.broadcast %cst_20 : f32 to vector<2x128xf32>
    %38 = arith.addf %37, %36 : vector<2x128xf32>
    %39 = tpu.reciprocal %38 {approx = true} : vector<2x128xf32> -> vector<2x128xf32>
    %40 = arith.mulf %30, %9 : vector<2x128xf32>
    %41 = arith.mulf %23, %32 : vector<2x128xf32>
    %42 = arith.addf %40, %41 : vector<2x128xf32>
    %43 = math.tanh %42 : vector<2x128xf32>
    %44 = arith.mulf %39, %43 : vector<2x128xf32>
    %45 = tpu.concatenate %44, %9 in 1 : vector<2x128xf32>, vector<2x128xf32> -> vector<2x256xf32>
    %cst_21 = arith.constant dense<0.000000e+00> : vector<2x512xf32>
    %46 = tpu.matmul %45, %1, %cst_21 {dimension_numbers = #tpu.dot_dimension_numbers<[1], [0], [0], [1], [0, 0, 1, 1], [], []>} : vector<2x256xf32>, vector<256x512xf32>, vector<2x512xf32> -> vector<2x512xf32>
    %47 = vector.broadcast %6 : vector<1x512xf32> to vector<2x512xf32>
    %48 = arith.addf %46, %47 : vector<2x512xf32>
    %49 = vector.extract_strided_slice %48 {offsets = [0, 0], sizes = [2, 128], strides = [1, 1]} : vector<2x512xf32> to vector<2x128xf32>
    %cst_22 = arith.constant 0.000000e+00 : f32
    %50 = vector.broadcast %cst_22 : f32 to vector<2x128xf32>
    %51 = arith.subf %50, %49 : vector<2x128xf32>
    %52 = math.exp %51 : vector<2x128xf32>
    %cst_23 = arith.constant 1.000000e+00 : f32
    %53 = vector.broadcast %cst_23 : f32 to vector<2x128xf32>
    %54 = arith.addf %53, %52 : vector<2x128xf32>
    %55 = tpu.reciprocal %54 {approx = true} : vector<2x128xf32> -> vector<2x128xf32>
    %56 = vector.extract_strided_slice %48 {offsets = [0, 128], sizes = [2, 128], strides = [1, 1]} : vector<2x512xf32> to vector<2x128xf32>
    %cst_24 = arith.constant 0.000000e+00 : f32
    %57 = vector.broadcast %cst_24 : f32 to vector<2x128xf32>
    %58 = arith.subf %57, %56 : vector<2x128xf32>
    %59 = math.exp %58 : vector<2x128xf32>
    %cst_25 = arith.constant 1.000000e+00 : f32
    %60 = vector.broadcast %cst_25 : f32 to vector<2x128xf32>
    %61 = arith.addf %60, %59 : vector<2x128xf32>
    %62 = tpu.reciprocal %61 {approx = true} : vector<2x128xf32> -> vector<2x128xf32>
    %63 = vector.extract_strided_slice %48 {offsets = [0, 256], sizes = [2, 128], strides = [1, 1]} : vector<2x512xf32> to vector<2x128xf32>
    %64 = math.tanh %63 : vector<2x128xf32>
    %65 = vector.extract_strided_slice %48 {offsets = [0, 384], sizes = [2, 128], strides = [1, 1]} : vector<2x512xf32> to vector<2x128xf32>
    %cst_26 = arith.constant 0.000000e+00 : f32
    %66 = vector.broadcast %cst_26 : f32 to vector<2x128xf32>
    %67 = arith.subf %66, %65 : vector<2x128xf32>
    %68 = math.exp %67 : vector<2x128xf32>
    %cst_27 = arith.constant 1.000000e+00 : f32
    %69 = vector.broadcast %cst_27 : f32 to vector<2x128xf32>
    %70 = arith.addf %69, %68 : vector<2x128xf32>
    %71 = tpu.reciprocal %70 {approx = true} : vector<2x128xf32> -> vector<2x128xf32>
    %72 = arith.mulf %62, %9 : vector<2x128xf32>
    %73 = arith.mulf %55, %64 : vector<2x128xf32>
    %74 = arith.addf %72, %73 : vector<2x128xf32>
    %75 = math.tanh %74 : vector<2x128xf32>
    %76 = arith.mulf %71, %75 : vector<2x128xf32>
    %77 = tpu.concatenate %76, %9 in 1 : vector<2x128xf32>, vector<2x128xf32> -> vector<2x256xf32>
    %cst_28 = arith.constant dense<0.000000e+00> : vector<2x512xf32>
    %78 = tpu.matmul %77, %2, %cst_28 {dimension_numbers = #tpu.dot_dimension_numbers<[1], [0], [0], [1], [0, 0, 1, 1], [], []>} : vector<2x256xf32>, vector<256x512xf32>, vector<2x512xf32> -> vector<2x512xf32>
    %79 = vector.broadcast %8 : vector<1x512xf32> to vector<2x512xf32>
    %80 = arith.addf %78, %79 : vector<2x512xf32>
    %81 = vector.extract_strided_slice %80 {offsets = [0, 0], sizes = [2, 128], strides = [1, 1]} : vector<2x512xf32> to vector<2x128xf32>
    %cst_29 = arith.constant 0.000000e+00 : f32
    %82 = vector.broadcast %cst_29 : f32 to vector<2x128xf32>
    %83 = arith.subf %82, %81 : vector<2x128xf32>
    %84 = math.exp %83 : vector<2x128xf32>
    %cst_30 = arith.constant 1.000000e+00 : f32
    %85 = vector.broadcast %cst_30 : f32 to vector<2x128xf32>
    %86 = arith.addf %85, %84 : vector<2x128xf32>
    %87 = tpu.reciprocal %86 {approx = true} : vector<2x128xf32> -> vector<2x128xf32>
    %88 = vector.extract_strided_slice %80 {offsets = [0, 128], sizes = [2, 128], strides = [1, 1]} : vector<2x512xf32> to vector<2x128xf32>
    %cst_31 = arith.constant 0.000000e+00 : f32
    %89 = vector.broadcast %cst_31 : f32 to vector<2x128xf32>
    %90 = arith.subf %89, %88 : vector<2x128xf32>
    %91 = math.exp %90 : vector<2x128xf32>
    %cst_32 = arith.constant 1.000000e+00 : f32
    %92 = vector.broadcast %cst_32 : f32 to vector<2x128xf32>
    %93 = arith.addf %92, %91 : vector<2x128xf32>
    %94 = tpu.reciprocal %93 {approx = true} : vector<2x128xf32> -> vector<2x128xf32>
    %95 = vector.extract_strided_slice %80 {offsets = [0, 256], sizes = [2, 128], strides = [1, 1]} : vector<2x512xf32> to vector<2x128xf32>
    %96 = math.tanh %95 : vector<2x128xf32>
    %97 = vector.extract_strided_slice %80 {offsets = [0, 384], sizes = [2, 128], strides = [1, 1]} : vector<2x512xf32> to vector<2x128xf32>
    %cst_33 = arith.constant 0.000000e+00 : f32
    %98 = vector.broadcast %cst_33 : f32 to vector<2x128xf32>
    %99 = arith.subf %98, %97 : vector<2x128xf32>
    %100 = math.exp %99 : vector<2x128xf32>
    %cst_34 = arith.constant 1.000000e+00 : f32
    %101 = vector.broadcast %cst_34 : f32 to vector<2x128xf32>
    %102 = arith.addf %101, %100 : vector<2x128xf32>
    %103 = tpu.reciprocal %102 {approx = true} : vector<2x128xf32> -> vector<2x128xf32>
    %104 = arith.mulf %94, %9 : vector<2x128xf32>
    %105 = arith.mulf %87, %96 : vector<2x128xf32>
    %106 = arith.addf %104, %105 : vector<2x128xf32>
    %107 = math.tanh %106 : vector<2x128xf32>
    %108 = arith.mulf %103, %107 : vector<2x128xf32>
    %109 = arith.addf %9, %108 : vector<2x128xf32>
    %c1_i32 = arith.constant 1 : i32
    %110 = arith.index_cast %c1_i32 : i32 to index
    %c0_35 = arith.constant 0 : index
    %c0_36 = arith.constant 0 : index
    %111 = vector.load %arg1[%110, %c0_35, %c0_36] : memref<4x2x512xf32, #tpu.memory_space<vmem>>, vector<1x2x512xf32>
    %112 = vector.shape_cast %111 : vector<1x2x512xf32> to vector<2x512xf32>
    %cst_37 = arith.constant dense<0.000000e+00> : vector<2x512xf32>
    %113 = tpu.matmul %44, %0, %cst_37 {dimension_numbers = #tpu.dot_dimension_numbers<[1], [0], [0], [1], [0, 0, 1, 1], [], []>} : vector<2x128xf32>, vector<128x512xf32>, vector<2x512xf32> -> vector<2x512xf32>
    %114 = arith.addf %112, %113 : vector<2x512xf32>
    %115 = vector.broadcast %4 : vector<1x512xf32> to vector<2x512xf32>
    %116 = arith.addf %114, %115 : vector<2x512xf32>
    %117 = vector.extract_strided_slice %116 {offsets = [0, 0], sizes = [2, 128], strides = [1, 1]} : vector<2x512xf32> to vector<2x128xf32>
    %cst_38 = arith.constant 0.000000e+00 : f32
    %118 = vector.broadcast %cst_38 : f32 to vector<2x128xf32>
    %119 = arith.subf %118, %117 : vector<2x128xf32>
    %120 = math.exp %119 : vector<2x128xf32>
    %cst_39 = arith.constant 1.000000e+00 : f32
    %121 = vector.broadcast %cst_39 : f32 to vector<2x128xf32>
    %122 = arith.addf %121, %120 : vector<2x128xf32>
    %123 = tpu.reciprocal %122 {approx = true} : vector<2x128xf32> -> vector<2x128xf32>
    %124 = vector.extract_strided_slice %116 {offsets = [0, 128], sizes = [2, 128], strides = [1, 1]} : vector<2x512xf32> to vector<2x128xf32>
    %cst_40 = arith.constant 0.000000e+00 : f32
    %125 = vector.broadcast %cst_40 : f32 to vector<2x128xf32>
    %126 = arith.subf %125, %124 : vector<2x128xf32>
    %127 = math.exp %126 : vector<2x128xf32>
    %cst_41 = arith.constant 1.000000e+00 : f32
    %128 = vector.broadcast %cst_41 : f32 to vector<2x128xf32>
    %129 = arith.addf %128, %127 : vector<2x128xf32>
    %130 = tpu.reciprocal %129 {approx = true} : vector<2x128xf32> -> vector<2x128xf32>
    %131 = vector.extract_strided_slice %116 {offsets = [0, 256], sizes = [2, 128], strides = [1, 1]} : vector<2x512xf32> to vector<2x128xf32>
    %132 = math.tanh %131 : vector<2x128xf32>
    %133 = vector.extract_strided_slice %116 {offsets = [0, 384], sizes = [2, 128], strides = [1, 1]} : vector<2x512xf32> to vector<2x128xf32>
    %cst_42 = arith.constant 0.000000e+00 : f32
    %134 = vector.broadcast %cst_42 : f32 to vector<2x128xf32>
    %135 = arith.subf %134, %133 : vector<2x128xf32>
    %136 = math.exp %135 : vector<2x128xf32>
    %cst_43 = arith.constant 1.000000e+00 : f32
    %137 = vector.broadcast %cst_43 : f32 to vector<2x128xf32>
    %138 = arith.addf %137, %136 : vector<2x128xf32>
    %139 = tpu.reciprocal %138 {approx = true} : vector<2x128xf32> -> vector<2x128xf32>
    %140 = arith.mulf %130, %42 : vector<2x128xf32>
    %141 = arith.mulf %123, %132 : vector<2x128xf32>
    %142 = arith.addf %140, %141 : vector<2x128xf32>
    %143 = math.tanh %142 : vector<2x128xf32>
    %144 = arith.mulf %139, %143 : vector<2x128xf32>
    %145 = tpu.concatenate %144, %76 in 1 : vector<2x128xf32>, vector<2x128xf32> -> vector<2x256xf32>
    %cst_44 = arith.constant dense<0.000000e+00> : vector<2x512xf32>
    %146 = tpu.matmul %145, %1, %cst_44 {dimension_numbers = #tpu.dot_dimension_numbers<[1], [0], [0], [1], [0, 0, 1, 1], [], []>} : vector<2x256xf32>, vector<256x512xf32>, vector<2x512xf32> -> vector<2x512xf32>
    %147 = vector.broadcast %6 : vector<1x512xf32> to vector<2x512xf32>
    %148 = arith.addf %146, %147 : vector<2x512xf32>
    %149 = vector.extract_strided_slice %148 {offsets = [0, 0], sizes = [2, 128], strides = [1, 1]} : vector<2x512xf32> to vector<2x128xf32>
    %cst_45 = arith.constant 0.000000e+00 : f32
    %150 = vector.broadcast %cst_45 : f32 to vector<2x128xf32>
    %151 = arith.subf %150, %149 : vector<2x128xf32>
    %152 = math.exp %151 : vector<2x128xf32>
    %cst_46 = arith.constant 1.000000e+00 : f32
    %153 = vector.broadcast %cst_46 : f32 to vector<2x128xf32>
    %154 = arith.addf %153, %152 : vector<2x128xf32>
    %155 = tpu.reciprocal %154 {approx = true} : vector<2x128xf32> -> vector<2x128xf32>
    %156 = vector.extract_strided_slice %148 {offsets = [0, 128], sizes = [2, 128], strides = [1, 1]} : vector<2x512xf32> to vector<2x128xf32>
    %cst_47 = arith.constant 0.000000e+00 : f32
    %157 = vector.broadcast %cst_47 : f32 to vector<2x128xf32>
    %158 = arith.subf %157, %156 : vector<2x128xf32>
    %159 = math.exp %158 : vector<2x128xf32>
    %cst_48 = arith.constant 1.000000e+00 : f32
    %160 = vector.broadcast %cst_48 : f32 to vector<2x128xf32>
    %161 = arith.addf %160, %159 : vector<2x128xf32>
    %162 = tpu.reciprocal %161 {approx = true} : vector<2x128xf32> -> vector<2x128xf32>
    %163 = vector.extract_strided_slice %148 {offsets = [0, 256], sizes = [2, 128], strides = [1, 1]} : vector<2x512xf32> to vector<2x128xf32>
    %164 = math.tanh %163 : vector<2x128xf32>
    %165 = vector.extract_strided_slice %148 {offsets = [0, 384], sizes = [2, 128], strides = [1, 1]} : vector<2x512xf32> to vector<2x128xf32>
    %cst_49 = arith.constant 0.000000e+00 : f32
    %166 = vector.broadcast %cst_49 : f32 to vector<2x128xf32>
    %167 = arith.subf %166, %165 : vector<2x128xf32>
    %168 = math.exp %167 : vector<2x128xf32>
    %cst_50 = arith.constant 1.000000e+00 : f32
    %169 = vector.broadcast %cst_50 : f32 to vector<2x128xf32>
    %170 = arith.addf %169, %168 : vector<2x128xf32>
    %171 = tpu.reciprocal %170 {approx = true} : vector<2x128xf32> -> vector<2x128xf32>
    %172 = arith.mulf %162, %74 : vector<2x128xf32>
    %173 = arith.mulf %155, %164 : vector<2x128xf32>
    %174 = arith.addf %172, %173 : vector<2x128xf32>
    %175 = math.tanh %174 : vector<2x128xf32>
    %176 = arith.mulf %171, %175 : vector<2x128xf32>
    %177 = tpu.concatenate %176, %108 in 1 : vector<2x128xf32>, vector<2x128xf32> -> vector<2x256xf32>
    %cst_51 = arith.constant dense<0.000000e+00> : vector<2x512xf32>
    %178 = tpu.matmul %177, %2, %cst_51 {dimension_numbers = #tpu.dot_dimension_numbers<[1], [0], [0], [1], [0, 0, 1, 1], [], []>} : vector<2x256xf32>, vector<256x512xf32>, vector<2x512xf32> -> vector<2x512xf32>
    %179 = vector.broadcast %8 : vector<1x512xf32> to vector<2x512xf32>
    %180 = arith.addf %178, %179 : vector<2x512xf32>
    %181 = vector.extract_strided_slice %180 {offsets = [0, 0], sizes = [2, 128], strides = [1, 1]} : vector<2x512xf32> to vector<2x128xf32>
    %cst_52 = arith.constant 0.000000e+00 : f32
    %182 = vector.broadcast %cst_52 : f32 to vector<2x128xf32>
    %183 = arith.subf %182, %181 : vector<2x128xf32>
    %184 = math.exp %183 : vector<2x128xf32>
    %cst_53 = arith.constant 1.000000e+00 : f32
    %185 = vector.broadcast %cst_53 : f32 to vector<2x128xf32>
    %186 = arith.addf %185, %184 : vector<2x128xf32>
    %187 = tpu.reciprocal %186 {approx = true} : vector<2x128xf32> -> vector<2x128xf32>
    %188 = vector.extract_strided_slice %180 {offsets = [0, 128], sizes = [2, 128], strides = [1, 1]} : vector<2x512xf32> to vector<2x128xf32>
    %cst_54 = arith.constant 0.000000e+00 : f32
    %189 = vector.broadcast %cst_54 : f32 to vector<2x128xf32>
    %190 = arith.subf %189, %188 : vector<2x128xf32>
    %191 = math.exp %190 : vector<2x128xf32>
    %cst_55 = arith.constant 1.000000e+00 : f32
    %192 = vector.broadcast %cst_55 : f32 to vector<2x128xf32>
    %193 = arith.addf %192, %191 : vector<2x128xf32>
    %194 = tpu.reciprocal %193 {approx = true} : vector<2x128xf32> -> vector<2x128xf32>
    %195 = vector.extract_strided_slice %180 {offsets = [0, 256], sizes = [2, 128], strides = [1, 1]} : vector<2x512xf32> to vector<2x128xf32>
    %196 = math.tanh %195 : vector<2x128xf32>
    %197 = vector.extract_strided_slice %180 {offsets = [0, 384], sizes = [2, 128], strides = [1, 1]} : vector<2x512xf32> to vector<2x128xf32>
    %cst_56 = arith.constant 0.000000e+00 : f32
    %198 = vector.broadcast %cst_56 : f32 to vector<2x128xf32>
    %199 = arith.subf %198, %197 : vector<2x128xf32>
    %200 = math.exp %199 : vector<2x128xf32>
    %cst_57 = arith.constant 1.000000e+00 : f32
    %201 = vector.broadcast %cst_57 : f32 to vector<2x128xf32>
    %202 = arith.addf %201, %200 : vector<2x128xf32>
    %203 = tpu.reciprocal %202 {approx = true} : vector<2x128xf32> -> vector<2x128xf32>
    %204 = arith.mulf %194, %106 : vector<2x128xf32>
    %205 = arith.mulf %187, %196 : vector<2x128xf32>
    %206 = arith.addf %204, %205 : vector<2x128xf32>
    %207 = math.tanh %206 : vector<2x128xf32>
    %208 = arith.mulf %203, %207 : vector<2x128xf32>
    %209 = arith.addf %109, %208 : vector<2x128xf32>
    %c2_i32 = arith.constant 2 : i32
    %210 = arith.index_cast %c2_i32 : i32 to index
    %c0_58 = arith.constant 0 : index
    %c0_59 = arith.constant 0 : index
    %211 = vector.load %arg1[%210, %c0_58, %c0_59] : memref<4x2x512xf32, #tpu.memory_space<vmem>>, vector<1x2x512xf32>
    %212 = vector.shape_cast %211 : vector<1x2x512xf32> to vector<2x512xf32>
    %cst_60 = arith.constant dense<0.000000e+00> : vector<2x512xf32>
    %213 = tpu.matmul %144, %0, %cst_60 {dimension_numbers = #tpu.dot_dimension_numbers<[1], [0], [0], [1], [0, 0, 1, 1], [], []>} : vector<2x128xf32>, vector<128x512xf32>, vector<2x512xf32> -> vector<2x512xf32>
    %214 = arith.addf %212, %213 : vector<2x512xf32>
    %215 = vector.broadcast %4 : vector<1x512xf32> to vector<2x512xf32>
    %216 = arith.addf %214, %215 : vector<2x512xf32>
    %217 = vector.extract_strided_slice %216 {offsets = [0, 0], sizes = [2, 128], strides = [1, 1]} : vector<2x512xf32> to vector<2x128xf32>
    %cst_61 = arith.constant 0.000000e+00 : f32
    %218 = vector.broadcast %cst_61 : f32 to vector<2x128xf32>
    %219 = arith.subf %218, %217 : vector<2x128xf32>
    %220 = math.exp %219 : vector<2x128xf32>
    %cst_62 = arith.constant 1.000000e+00 : f32
    %221 = vector.broadcast %cst_62 : f32 to vector<2x128xf32>
    %222 = arith.addf %221, %220 : vector<2x128xf32>
    %223 = tpu.reciprocal %222 {approx = true} : vector<2x128xf32> -> vector<2x128xf32>
    %224 = vector.extract_strided_slice %216 {offsets = [0, 128], sizes = [2, 128], strides = [1, 1]} : vector<2x512xf32> to vector<2x128xf32>
    %cst_63 = arith.constant 0.000000e+00 : f32
    %225 = vector.broadcast %cst_63 : f32 to vector<2x128xf32>
    %226 = arith.subf %225, %224 : vector<2x128xf32>
    %227 = math.exp %226 : vector<2x128xf32>
    %cst_64 = arith.constant 1.000000e+00 : f32
    %228 = vector.broadcast %cst_64 : f32 to vector<2x128xf32>
    %229 = arith.addf %228, %227 : vector<2x128xf32>
    %230 = tpu.reciprocal %229 {approx = true} : vector<2x128xf32> -> vector<2x128xf32>
    %231 = vector.extract_strided_slice %216 {offsets = [0, 256], sizes = [2, 128], strides = [1, 1]} : vector<2x512xf32> to vector<2x128xf32>
    %232 = math.tanh %231 : vector<2x128xf32>
    %233 = vector.extract_strided_slice %216 {offsets = [0, 384], sizes = [2, 128], strides = [1, 1]} : vector<2x512xf32> to vector<2x128xf32>
    %cst_65 = arith.constant 0.000000e+00 : f32
    %234 = vector.broadcast %cst_65 : f32 to vector<2x128xf32>
    %235 = arith.subf %234, %233 : vector<2x128xf32>
    %236 = math.exp %235 : vector<2x128xf32>
    %cst_66 = arith.constant 1.000000e+00 : f32
    %237 = vector.broadcast %cst_66 : f32 to vector<2x128xf32>
    %238 = arith.addf %237, %236 : vector<2x128xf32>
    %239 = tpu.reciprocal %238 {approx = true} : vector<2x128xf32> -> vector<2x128xf32>
    %240 = arith.mulf %230, %142 : vector<2x128xf32>
    %241 = arith.mulf %223, %232 : vector<2x128xf32>
    %242 = arith.addf %240, %241 : vector<2x128xf32>
    %243 = math.tanh %242 : vector<2x128xf32>
    %244 = arith.mulf %239, %243 : vector<2x128xf32>
    %245 = tpu.concatenate %244, %176 in 1 : vector<2x128xf32>, vector<2x128xf32> -> vector<2x256xf32>
    %cst_67 = arith.constant dense<0.000000e+00> : vector<2x512xf32>
    %246 = tpu.matmul %245, %1, %cst_67 {dimension_numbers = #tpu.dot_dimension_numbers<[1], [0], [0], [1], [0, 0, 1, 1], [], []>} : vector<2x256xf32>, vector<256x512xf32>, vector<2x512xf32> -> vector<2x512xf32>
    %247 = vector.broadcast %6 : vector<1x512xf32> to vector<2x512xf32>
    %248 = arith.addf %246, %247 : vector<2x512xf32>
    %249 = vector.extract_strided_slice %248 {offsets = [0, 0], sizes = [2, 128], strides = [1, 1]} : vector<2x512xf32> to vector<2x128xf32>
    %cst_68 = arith.constant 0.000000e+00 : f32
    %250 = vector.broadcast %cst_68 : f32 to vector<2x128xf32>
    %251 = arith.subf %250, %249 : vector<2x128xf32>
    %252 = math.exp %251 : vector<2x128xf32>
    %cst_69 = arith.constant 1.000000e+00 : f32
    %253 = vector.broadcast %cst_69 : f32 to vector<2x128xf32>
    %254 = arith.addf %253, %252 : vector<2x128xf32>
    %255 = tpu.reciprocal %254 {approx = true} : vector<2x128xf32> -> vector<2x128xf32>
    %256 = vector.extract_strided_slice %248 {offsets = [0, 128], sizes = [2, 128], strides = [1, 1]} : vector<2x512xf32> to vector<2x128xf32>
    %cst_70 = arith.constant 0.000000e+00 : f32
    %257 = vector.broadcast %cst_70 : f32 to vector<2x128xf32>
    %258 = arith.subf %257, %256 : vector<2x128xf32>
    %259 = math.exp %258 : vector<2x128xf32>
    %cst_71 = arith.constant 1.000000e+00 : f32
    %260 = vector.broadcast %cst_71 : f32 to vector<2x128xf32>
    %261 = arith.addf %260, %259 : vector<2x128xf32>
    %262 = tpu.reciprocal %261 {approx = true} : vector<2x128xf32> -> vector<2x128xf32>
    %263 = vector.extract_strided_slice %248 {offsets = [0, 256], sizes = [2, 128], strides = [1, 1]} : vector<2x512xf32> to vector<2x128xf32>
    %264 = math.tanh %263 : vector<2x128xf32>
    %265 = vector.extract_strided_slice %248 {offsets = [0, 384], sizes = [2, 128], strides = [1, 1]} : vector<2x512xf32> to vector<2x128xf32>
    %cst_72 = arith.constant 0.000000e+00 : f32
    %266 = vector.broadcast %cst_72 : f32 to vector<2x128xf32>
    %267 = arith.subf %266, %265 : vector<2x128xf32>
    %268 = math.exp %267 : vector<2x128xf32>
    %cst_73 = arith.constant 1.000000e+00 : f32
    %269 = vector.broadcast %cst_73 : f32 to vector<2x128xf32>
    %270 = arith.addf %269, %268 : vector<2x128xf32>
    %271 = tpu.reciprocal %270 {approx = true} : vector<2x128xf32> -> vector<2x128xf32>
    %272 = arith.mulf %262, %174 : vector<2x128xf32>
    %273 = arith.mulf %255, %264 : vector<2x128xf32>
    %274 = arith.addf %272, %273 : vector<2x128xf32>
    %275 = math.tanh %274 : vector<2x128xf32>
    %276 = arith.mulf %271, %275 : vector<2x128xf32>
    %277 = tpu.concatenate %276, %208 in 1 : vector<2x128xf32>, vector<2x128xf32> -> vector<2x256xf32>
    %cst_74 = arith.constant dense<0.000000e+00> : vector<2x512xf32>
    %278 = tpu.matmul %277, %2, %cst_74 {dimension_numbers = #tpu.dot_dimension_numbers<[1], [0], [0], [1], [0, 0, 1, 1], [], []>} : vector<2x256xf32>, vector<256x512xf32>, vector<2x512xf32> -> vector<2x512xf32>
    %279 = vector.broadcast %8 : vector<1x512xf32> to vector<2x512xf32>
    %280 = arith.addf %278, %279 : vector<2x512xf32>
    %281 = vector.extract_strided_slice %280 {offsets = [0, 0], sizes = [2, 128], strides = [1, 1]} : vector<2x512xf32> to vector<2x128xf32>
    %cst_75 = arith.constant 0.000000e+00 : f32
    %282 = vector.broadcast %cst_75 : f32 to vector<2x128xf32>
    %283 = arith.subf %282, %281 : vector<2x128xf32>
    %284 = math.exp %283 : vector<2x128xf32>
    %cst_76 = arith.constant 1.000000e+00 : f32
    %285 = vector.broadcast %cst_76 : f32 to vector<2x128xf32>
    %286 = arith.addf %285, %284 : vector<2x128xf32>
    %287 = tpu.reciprocal %286 {approx = true} : vector<2x128xf32> -> vector<2x128xf32>
    %288 = vector.extract_strided_slice %280 {offsets = [0, 128], sizes = [2, 128], strides = [1, 1]} : vector<2x512xf32> to vector<2x128xf32>
    %cst_77 = arith.constant 0.000000e+00 : f32
    %289 = vector.broadcast %cst_77 : f32 to vector<2x128xf32>
    %290 = arith.subf %289, %288 : vector<2x128xf32>
    %291 = math.exp %290 : vector<2x128xf32>
    %cst_78 = arith.constant 1.000000e+00 : f32
    %292 = vector.broadcast %cst_78 : f32 to vector<2x128xf32>
    %293 = arith.addf %292, %291 : vector<2x128xf32>
    %294 = tpu.reciprocal %293 {approx = true} : vector<2x128xf32> -> vector<2x128xf32>
    %295 = vector.extract_strided_slice %280 {offsets = [0, 256], sizes = [2, 128], strides = [1, 1]} : vector<2x512xf32> to vector<2x128xf32>
    %296 = math.tanh %295 : vector<2x128xf32>
    %297 = vector.extract_strided_slice %280 {offsets = [0, 384], sizes = [2, 128], strides = [1, 1]} : vector<2x512xf32> to vector<2x128xf32>
    %cst_79 = arith.constant 0.000000e+00 : f32
    %298 = vector.broadcast %cst_79 : f32 to vector<2x128xf32>
    %299 = arith.subf %298, %297 : vector<2x128xf32>
    %300 = math.exp %299 : vector<2x128xf32>
    %cst_80 = arith.constant 1.000000e+00 : f32
    %301 = vector.broadcast %cst_80 : f32 to vector<2x128xf32>
    %302 = arith.addf %301, %300 : vector<2x128xf32>
    %303 = tpu.reciprocal %302 {approx = true} : vector<2x128xf32> -> vector<2x128xf32>
    %304 = arith.mulf %294, %206 : vector<2x128xf32>
    %305 = arith.mulf %287, %296 : vector<2x128xf32>
    %306 = arith.addf %304, %305 : vector<2x128xf32>
    %307 = math.tanh %306 : vector<2x128xf32>
    %308 = arith.mulf %303, %307 : vector<2x128xf32>
    %309 = arith.addf %209, %308 : vector<2x128xf32>
    %c3_i32 = arith.constant 3 : i32
    %310 = arith.index_cast %c3_i32 : i32 to index
    %c0_81 = arith.constant 0 : index
    %c0_82 = arith.constant 0 : index
    %311 = vector.load %arg1[%310, %c0_81, %c0_82] : memref<4x2x512xf32, #tpu.memory_space<vmem>>, vector<1x2x512xf32>
    %312 = vector.shape_cast %311 : vector<1x2x512xf32> to vector<2x512xf32>
    %cst_83 = arith.constant dense<0.000000e+00> : vector<2x512xf32>
    %313 = tpu.matmul %244, %0, %cst_83 {dimension_numbers = #tpu.dot_dimension_numbers<[1], [0], [0], [1], [0, 0, 1, 1], [], []>} : vector<2x128xf32>, vector<128x512xf32>, vector<2x512xf32> -> vector<2x512xf32>
    %314 = arith.addf %312, %313 : vector<2x512xf32>
    %315 = vector.broadcast %4 : vector<1x512xf32> to vector<2x512xf32>
    %316 = arith.addf %314, %315 : vector<2x512xf32>
    %317 = vector.extract_strided_slice %316 {offsets = [0, 0], sizes = [2, 128], strides = [1, 1]} : vector<2x512xf32> to vector<2x128xf32>
    %cst_84 = arith.constant 0.000000e+00 : f32
    %318 = vector.broadcast %cst_84 : f32 to vector<2x128xf32>
    %319 = arith.subf %318, %317 : vector<2x128xf32>
    %320 = math.exp %319 : vector<2x128xf32>
    %cst_85 = arith.constant 1.000000e+00 : f32
    %321 = vector.broadcast %cst_85 : f32 to vector<2x128xf32>
    %322 = arith.addf %321, %320 : vector<2x128xf32>
    %323 = tpu.reciprocal %322 {approx = true} : vector<2x128xf32> -> vector<2x128xf32>
    %324 = vector.extract_strided_slice %316 {offsets = [0, 128], sizes = [2, 128], strides = [1, 1]} : vector<2x512xf32> to vector<2x128xf32>
    %cst_86 = arith.constant 0.000000e+00 : f32
    %325 = vector.broadcast %cst_86 : f32 to vector<2x128xf32>
    %326 = arith.subf %325, %324 : vector<2x128xf32>
    %327 = math.exp %326 : vector<2x128xf32>
    %cst_87 = arith.constant 1.000000e+00 : f32
    %328 = vector.broadcast %cst_87 : f32 to vector<2x128xf32>
    %329 = arith.addf %328, %327 : vector<2x128xf32>
    %330 = tpu.reciprocal %329 {approx = true} : vector<2x128xf32> -> vector<2x128xf32>
    %331 = vector.extract_strided_slice %316 {offsets = [0, 256], sizes = [2, 128], strides = [1, 1]} : vector<2x512xf32> to vector<2x128xf32>
    %332 = math.tanh %331 : vector<2x128xf32>
    %333 = vector.extract_strided_slice %316 {offsets = [0, 384], sizes = [2, 128], strides = [1, 1]} : vector<2x512xf32> to vector<2x128xf32>
    %cst_88 = arith.constant 0.000000e+00 : f32
    %334 = vector.broadcast %cst_88 : f32 to vector<2x128xf32>
    %335 = arith.subf %334, %333 : vector<2x128xf32>
    %336 = math.exp %335 : vector<2x128xf32>
    %cst_89 = arith.constant 1.000000e+00 : f32
    %337 = vector.broadcast %cst_89 : f32 to vector<2x128xf32>
    %338 = arith.addf %337, %336 : vector<2x128xf32>
    %339 = tpu.reciprocal %338 {approx = true} : vector<2x128xf32> -> vector<2x128xf32>
    %340 = arith.mulf %330, %242 : vector<2x128xf32>
    %341 = arith.mulf %323, %332 : vector<2x128xf32>
    %342 = arith.addf %340, %341 : vector<2x128xf32>
    %343 = math.tanh %342 : vector<2x128xf32>
    %344 = arith.mulf %339, %343 : vector<2x128xf32>
    %345 = tpu.concatenate %344, %276 in 1 : vector<2x128xf32>, vector<2x128xf32> -> vector<2x256xf32>
    %cst_90 = arith.constant dense<0.000000e+00> : vector<2x512xf32>
    %346 = tpu.matmul %345, %1, %cst_90 {dimension_numbers = #tpu.dot_dimension_numbers<[1], [0], [0], [1], [0, 0, 1, 1], [], []>} : vector<2x256xf32>, vector<256x512xf32>, vector<2x512xf32> -> vector<2x512xf32>
    %347 = vector.broadcast %6 : vector<1x512xf32> to vector<2x512xf32>
    %348 = arith.addf %346, %347 : vector<2x512xf32>
    %349 = vector.extract_strided_slice %348 {offsets = [0, 0], sizes = [2, 128], strides = [1, 1]} : vector<2x512xf32> to vector<2x128xf32>
    %cst_91 = arith.constant 0.000000e+00 : f32
    %350 = vector.broadcast %cst_91 : f32 to vector<2x128xf32>
    %351 = arith.subf %350, %349 : vector<2x128xf32>
    %352 = math.exp %351 : vector<2x128xf32>
    %cst_92 = arith.constant 1.000000e+00 : f32
    %353 = vector.broadcast %cst_92 : f32 to vector<2x128xf32>
    %354 = arith.addf %353, %352 : vector<2x128xf32>
    %355 = tpu.reciprocal %354 {approx = true} : vector<2x128xf32> -> vector<2x128xf32>
    %356 = vector.extract_strided_slice %348 {offsets = [0, 128], sizes = [2, 128], strides = [1, 1]} : vector<2x512xf32> to vector<2x128xf32>
    %cst_93 = arith.constant 0.000000e+00 : f32
    %357 = vector.broadcast %cst_93 : f32 to vector<2x128xf32>
    %358 = arith.subf %357, %356 : vector<2x128xf32>
    %359 = math.exp %358 : vector<2x128xf32>
    %cst_94 = arith.constant 1.000000e+00 : f32
    %360 = vector.broadcast %cst_94 : f32 to vector<2x128xf32>
    %361 = arith.addf %360, %359 : vector<2x128xf32>
    %362 = tpu.reciprocal %361 {approx = true} : vector<2x128xf32> -> vector<2x128xf32>
    %363 = vector.extract_strided_slice %348 {offsets = [0, 256], sizes = [2, 128], strides = [1, 1]} : vector<2x512xf32> to vector<2x128xf32>
    %364 = math.tanh %363 : vector<2x128xf32>
    %365 = vector.extract_strided_slice %348 {offsets = [0, 384], sizes = [2, 128], strides = [1, 1]} : vector<2x512xf32> to vector<2x128xf32>
    %cst_95 = arith.constant 0.000000e+00 : f32
    %366 = vector.broadcast %cst_95 : f32 to vector<2x128xf32>
    %367 = arith.subf %366, %365 : vector<2x128xf32>
    %368 = math.exp %367 : vector<2x128xf32>
    %cst_96 = arith.constant 1.000000e+00 : f32
    %369 = vector.broadcast %cst_96 : f32 to vector<2x128xf32>
    %370 = arith.addf %369, %368 : vector<2x128xf32>
    %371 = tpu.reciprocal %370 {approx = true} : vector<2x128xf32> -> vector<2x128xf32>
    %372 = arith.mulf %362, %274 : vector<2x128xf32>
    %373 = arith.mulf %355, %364 : vector<2x128xf32>
    %374 = arith.addf %372, %373 : vector<2x128xf32>
    %375 = math.tanh %374 : vector<2x128xf32>
    %376 = arith.mulf %371, %375 : vector<2x128xf32>
    %377 = tpu.concatenate %376, %308 in 1 : vector<2x128xf32>, vector<2x128xf32> -> vector<2x256xf32>
    %cst_97 = arith.constant dense<0.000000e+00> : vector<2x512xf32>
    %378 = tpu.matmul %377, %2, %cst_97 {dimension_numbers = #tpu.dot_dimension_numbers<[1], [0], [0], [1], [0, 0, 1, 1], [], []>} : vector<2x256xf32>, vector<256x512xf32>, vector<2x512xf32> -> vector<2x512xf32>
    %379 = vector.broadcast %8 : vector<1x512xf32> to vector<2x512xf32>
    %380 = arith.addf %378, %379 : vector<2x512xf32>
    %381 = vector.extract_strided_slice %380 {offsets = [0, 0], sizes = [2, 128], strides = [1, 1]} : vector<2x512xf32> to vector<2x128xf32>
    %cst_98 = arith.constant 0.000000e+00 : f32
    %382 = vector.broadcast %cst_98 : f32 to vector<2x128xf32>
    %383 = arith.subf %382, %381 : vector<2x128xf32>
    %384 = math.exp %383 : vector<2x128xf32>
    %cst_99 = arith.constant 1.000000e+00 : f32
    %385 = vector.broadcast %cst_99 : f32 to vector<2x128xf32>
    %386 = arith.addf %385, %384 : vector<2x128xf32>
    %387 = tpu.reciprocal %386 {approx = true} : vector<2x128xf32> -> vector<2x128xf32>
    %388 = vector.extract_strided_slice %380 {offsets = [0, 128], sizes = [2, 128], strides = [1, 1]} : vector<2x512xf32> to vector<2x128xf32>
    %cst_100 = arith.constant 0.000000e+00 : f32
    %389 = vector.broadcast %cst_100 : f32 to vector<2x128xf32>
    %390 = arith.subf %389, %388 : vector<2x128xf32>
    %391 = math.exp %390 : vector<2x128xf32>
    %cst_101 = arith.constant 1.000000e+00 : f32
    %392 = vector.broadcast %cst_101 : f32 to vector<2x128xf32>
    %393 = arith.addf %392, %391 : vector<2x128xf32>
    %394 = tpu.reciprocal %393 {approx = true} : vector<2x128xf32> -> vector<2x128xf32>
    %395 = vector.extract_strided_slice %380 {offsets = [0, 256], sizes = [2, 128], strides = [1, 1]} : vector<2x512xf32> to vector<2x128xf32>
    %396 = math.tanh %395 : vector<2x128xf32>
    %397 = vector.extract_strided_slice %380 {offsets = [0, 384], sizes = [2, 128], strides = [1, 1]} : vector<2x512xf32> to vector<2x128xf32>
    %cst_102 = arith.constant 0.000000e+00 : f32
    %398 = vector.broadcast %cst_102 : f32 to vector<2x128xf32>
    %399 = arith.subf %398, %397 : vector<2x128xf32>
    %400 = math.exp %399 : vector<2x128xf32>
    %cst_103 = arith.constant 1.000000e+00 : f32
    %401 = vector.broadcast %cst_103 : f32 to vector<2x128xf32>
    %402 = arith.addf %401, %400 : vector<2x128xf32>
    %403 = tpu.reciprocal %402 {approx = true} : vector<2x128xf32> -> vector<2x128xf32>
    %404 = arith.mulf %394, %306 : vector<2x128xf32>
    %405 = arith.mulf %387, %396 : vector<2x128xf32>
    %406 = arith.addf %404, %405 : vector<2x128xf32>
    %407 = math.tanh %406 : vector<2x128xf32>
    %408 = arith.mulf %403, %407 : vector<2x128xf32>
    %409 = arith.addf %309, %408 : vector<2x128xf32>
    %c4_i32 = arith.constant 4 : i32
    %c0_104 = arith.constant 0 : index
    %c0_105 = arith.constant 0 : index
    %410 = vector.load %arg6[%c0_104, %c0_105] : memref<2x128xf32, #tpu.memory_space<vmem>>, vector<2x128xf32>
    tpu.vector_store %arg6[%c0_104, %c0_105], %409 {strides = array<i32>} : memref<2x128xf32, #tpu.memory_space<vmem>>, vector<2x128xf32>,
    return
  }
  func.func @transform_0(%arg0: i32) -> (i32, i32, i32) {
    %c0_i32 = arith.constant 0 : i32
    %c0_i32_0 = arith.constant 0 : i32
    %c0_i32_1 = arith.constant 0 : i32
    return %c0_i32, %arg0, %c0_i32_0 : i32, i32, i32
  }
  func.func @transform_1(%arg0: i32) -> (i32, i32) {
    %c0_i32 = arith.constant 0 : i32
    %c0_i32_0 = arith.constant 0 : i32
    %c0_i32_1 = arith.constant 0 : i32
    return %c0_i32, %c0_i32_0 : i32, i32
  }
  func.func @transform_2(%arg0: i32) -> (i32, i32) {
    %c0_i32 = arith.constant 0 : i32
    %c0_i32_0 = arith.constant 0 : i32
    %c0_i32_1 = arith.constant 0 : i32
    return %c0_i32, %c0_i32_0 : i32, i32
  }
  func.func @transform_3(%arg0: i32) -> (i32, i32) {
    %c0_i32 = arith.constant 0 : i32
    %c0_i32_0 = arith.constant 0 : i32
    %c0_i32_1 = arith.constant 0 : i32
    return %c0_i32, %c0_i32_0 : i32, i32
  }
  func.func @transform_4(%arg0: i32) -> (i32, i32, i32) {
    %c0_i32 = arith.constant 0 : i32
    %c0_i32_0 = arith.constant 0 : i32
    %c0_i32_1 = arith.constant 0 : i32
    %c0_i32_2 = arith.constant 0 : i32
    return %c0_i32, %c0_i32_0, %c0_i32_1 : i32, i32, i32
  }
  func.func @transform_5(%arg0: i32) -> (i32, i32) {
    %c0_i32 = arith.constant 0 : i32
    %c0_i32_0 = arith.constant 0 : i32
    return %arg0, %c0_i32 : i32, i32
  }
}

</mosaic_0001>

<bundles_post_ra>
// kernel: forward.5
= control target key start
LH: loop header
LB: loop body
LE: loop exit
PB: predicated region body
PF: predicated region fallthrough
CT: control target
= control target key end

     0   :  { %s595_s6 = smov 0   ;;  %s597_s7 = smov 0   ;;  %s724_s0 = inlined_call_operand.vmem [shape: f32[2,4,5202], index: 0, kind: input, shape index: {}]   ;;  %s725_s1 = inlined_call_operand.vmem [shape: f32[2,4,5202], index: 1, kind: output, shape index: {}]  }
   0x1   :  { %s599_s8 = smov 0  }
   0x2 LB: > { %s23_s9 = sadd.s32 1, %s578_s7  ;;  %p459_p0 = scmp.ge.s32.totalorder %s582_s8, 1  ;;  %s582_s8 = sphi %s599_s8, %s11_s8   ;;  %s578_s7 = sphi %s597_s7, %s729_s7   ;;  %s574_s6 = sphi %s595_s6, %s728_s6  }
   0x3   : > { %p25_p1 = scmp.ge.s32.totalorder %s23_s9, 2  ;;  %p108_p2 = scmp.lt.s32.totalorder %s582_s8, 3 }
   0x5   : > { %s731_s9 = smov (%p25_p1, %s23_s9), 0  ;;  %p109_p3 = pnand %p459_p0, %p108_p2 }
   0x6   : > { %p137_p4 = scmp.lt.s32.totalorder (!%p109_p3), %s574_s6, 1 }
   0x7   : > { %112 = sbr.rel (%p109_p3) target bundleno = 49 (0x31), region = 24 }
   0xc   : > { %s733_s6 = smov (!%p137_p4, %s574_s6), 1  ;;  %v200_v3 = vlaneseq  ;;  %v584_v5 = vmov 0.0  }
   0xd   : > { %s534_s10 = smul.u32 164, %s733_s6 }
   0xe   : > { %vm637_vm5 = vcmp.lt.s32.totalorder %v200_v3, 82 }
   0xf   : > { %s616_s13 = scalar_lea.vmem %s724_s0, %s534_s10  ;;  %s621_s16 = scalar_lea.vmem %s725_s1, %s534_s10 }
  0x10   : > { %v156_v0 = vld [vmem:[%s616_s13] ss:$4 sm:$0xff]  ;;  %v478_v17 = vld [vmem:[%s616_s13 + $0x1] ss:$4 sm:$0xff]  ;;  %v496_v44 = vld [vmem:[%s616_s13 + $0x2] ss:$4 sm:$0xff] }
  0x11   : > { %v462_v1 = vld [vmem:[%s616_s13 + $0x20] ss:$4 sm:$0xff]  ;;  %vm173_vm0 = vcmp.gt.f32.partialorder %v156_v0, 1.0  ;;  %v479_v21 = vld [vmem:[%s616_s13 + $0x21] ss:$4 sm:$0xff] }
  0x12   : > { %v463_v2 = vld [vmem:[%s616_s13 + $0x40] ss:$4 sm:$0xff]  ;;  %vm174_vm1 = vcmp.gt.f32.partialorder %v462_v1, 1.0  ;;  %v467_v6 = vsel %vm173_vm0, 1.0, %v584_v5  ;;  %v206_v10 = vsel %vm173_vm0, 0.0, %v156_v0 }
  0x13   : > { %v464_v4 = vld [vmem:[%s616_s13 + $0x60] ss:$4 sm:$0xff]  ;;  %v468_v7 = vsel %vm174_vm1, 1.0, %v584_v5  ;;  %vm175_vm2 = vcmp.gt.f32.partialorder %v463_v2, 1.0  ;;  %191 = vst [vmem:[%s621_s16] ss:$4 sm:$0xff] %v467_v6  ;;  %v207_v14 = vsel %vm174_vm1, 0.0, %v462_v1  ;;  %v224_v20 = vadd.f32 %v478_v17, %v206_v10 }
  0x14   : > { %v465_v8 = vld [vmem:[%s616_s13 + $0x80] ss:$4 sm:$0xff]  ;;  %v469_v9 = vsel %vm175_vm2, 1.0, %v584_v5  ;;  %vm176_vm3 = vcmp.gt.f32.partialorder %v464_v4, 1.0  ;;  %473 = vst [vmem:[%s621_s16 + $0x20] ss:$4 sm:$0xff] %v468_v7  ;;  %v225_v23 = vadd.f32 %v479_v21, %v207_v14 }
  0x15   : > { %vm177_vm4 = vcmp.gt.f32.partialorder %v465_v8, 1.0  ;;  %v470_v11 = vsel %vm176_vm3, 1.0, %v584_v5  ;;  %474 = vst [vmem:[%s621_s16 + $0x40] ss:$4 sm:$0xff] %v469_v9  ;;  %v208_v16 = vsel %vm175_vm2, 0.0, %v463_v2  ;;  %v209_v18 = vsel %vm176_vm3, 0.0, %v464_v4 }
  0x16   : > { %v471_v12 = vsel %vm177_vm4, 1.0, %v584_v5  ;;  %v466_v15 = vld [vmem:[%s616_s13 + $0xa0] ss:$4 sm:$0x1]  ;;  %475 = vst [vmem:[%s621_s16 + $0x60] ss:$4 sm:$0xff] %v470_v11 }
  0x17   : > { %vm178_vm6 = vcmp.gt.f32.partialorder %v466_v15, 1.0  ;;  %476 = vst [vmem:[%s621_s16 + $0x80] ss:$4 sm:$0xff] %v471_v12  ;;  %v210_v22 = vsel %vm177_vm4, 0.0, %v465_v8  ;;  %v480_v24 = vld [vmem:[%s616_s13 + $0x41] ss:$4 sm:$0xff] }
  0x18   : > { %v472_v19 = vsel %vm178_vm6, 1.0, %v584_v5  ;;  %v211_v25 = vsel %vm178_vm6, 0.0, %v466_v15  ;;  %vm230_vm7 = vcmp.gt.f32.partialorder %v224_v20, 1.0  ;;  %v226_v26 = vadd.f32 %v480_v24, %v208_v16  ;;  %v481_v27 = vld [vmem:[%s616_s13 + $0x61] ss:$4 sm:$0xff] }
  0x19   : > { %477 = vst.msk [vmem:[%s621_s16 + $0xa0] ss:$4 sm:$0x1] %vm637_vm5, %v472_v19  ;;  %v482_v28 = vld [vmem:[%s616_s13 + $0x81] ss:$4 sm:$0xff]  ;;  %v484_v29 = vsel %vm230_vm7, 1.0, %v584_v5  ;;  %v227_v30 = vadd.f32 %v481_v27, %v209_v18 }
  0x1a   : > { %vm231_vm8 = vcmp.gt.f32.partialorder %v225_v23, 1.0  ;;  %v483_v31 = vld [vmem:[%s616_s13 + $0xa1] ss:$4 sm:$0x1]  ;;  %490 = vst [vmem:[%s621_s16 + $0x1] ss:$4 sm:$0xff] %v484_v29  ;;  %v228_v33 = vadd.f32 %v482_v28, %v210_v22 }
  0x1b   : > { %v485_v32 = vsel %vm231_vm8, 1.0, %v584_v5  ;;  %vm232_vm9 = vcmp.gt.f32.partialorder %v226_v26, 1.0  ;;  %vm233_vm10 = vcmp.gt.f32.partialorder %v227_v30, 1.0  ;;  %v229_v35 = vadd.f32 %v483_v31, %v211_v25  ;;  %v497_v47 = vld [vmem:[%s616_s13 + $0x22] ss:$4 sm:$0xff] }
  0x1c   : > { %491 = vst [vmem:[%s621_s16 + $0x21] ss:$4 sm:$0xff] %v485_v32  ;;  %v486_v34 = vsel %vm232_vm9, 1.0, %v584_v5  ;;  %v260_v36 = vsel %vm230_vm7, 0.0, %v224_v20  ;;  %v261_v37 = vsel %vm231_vm8, 0.0, %v225_v23  ;;  %v487_v38 = vsel %vm233_vm10, 1.0, %v584_v5 }
  0x1d   : > { %492 = vst [vmem:[%s621_s16 + $0x41] ss:$4 sm:$0xff] %v486_v34  ;;  %vm234_vm11 = vcmp.gt.f32.partialorder %v228_v33, 1.0  ;;  %v262_v39 = vsel %vm232_vm9, 0.0, %v226_v26  ;;  %v263_v40 = vsel %vm233_vm10, 0.0, %v227_v30  ;;  %vm235_vm12 = vcmp.gt.f32.partialorder %v229_v35, 1.0 }
  0x1e   : > { %493 = vst [vmem:[%s621_s16 + $0x61] ss:$4 sm:$0xff] %v487_v38  ;;  %v488_v41 = vsel %vm234_vm11, 1.0, %v584_v5  ;;  %v264_v42 = vsel %vm234_vm11, 0.0, %v228_v33  ;;  %v489_v43 = vsel %vm235_vm12, 1.0, %v584_v5  ;;  %v265_v45 = vsel %vm235_vm12, 0.0, %v229_v35 }
  0x1f   : > { %494 = vst [vmem:[%s621_s16 + $0x81] ss:$4 sm:$0xff] %v488_v41  ;;  %v278_v46 = vadd.f32 %v496_v44, %v260_v36  ;;  %v279_v48 = vadd.f32 %v497_v47, %v261_v37  ;;  %v498_v49 = vld [vmem:[%s616_s13 + $0x42] ss:$4 sm:$0xff]  ;;  %v514_v56 = vld [vmem:[%s616_s13 + $0x3] ss:$4 sm:$0xff] }
  0x20   : > { %495 = vst.msk [vmem:[%s621_s16 + $0xa1] ss:$4 sm:$0x1] %vm637_vm5, %v489_v43  ;;  %v499_v50 = vld [vmem:[%s616_s13 + $0x62] ss:$4 sm:$0xff]  ;;  %v280_v52 = vadd.f32 %v498_v49, %v262_v39 }
  0x21   : > { %v500_v51 = vld [vmem:[%s616_s13 + $0x82] ss:$4 sm:$0xff]  ;;  %vm284_vm13 = vcmp.gt.f32.partialorder %v278_v46, 1.0  ;;  %v281_v53 = vadd.f32 %v499_v50, %v263_v40  ;;  %vm285_vm14 = vcmp.gt.f32.partialorder %v279_v48, 1.0  ;;  %v515_v60 = vld [vmem:[%s616_s13 + $0x23] ss:$4 sm:$0xff] }
  0x22   : > { %v282_v54 = vadd.f32 %v500_v51, %v264_v42  ;;  %v501_v55 = vld [vmem:[%s616_s13 + $0xa2] ss:$4 sm:$0x1]  ;;  %v502_v57 = vsel %vm284_vm13, 1.0, %v584_v5  ;;  %v314_v58 = vsel %vm284_vm13, 0.0, %v278_v46  ;;  %v503_v61 = vsel %vm285_vm14, 1.0, %v584_v5 }
  0x23   : > { %v283_v59 = vadd.f32 %v501_v55, %v265_v45  ;;  %508 = vst [vmem:[%s621_s16 + $0x2] ss:$4 sm:$0xff] %v502_v57  ;;  %v315_v62 = vsel %vm285_vm14, 0.0, %v279_v48  ;;  %vm286_vm15 = vcmp.gt.f32.partialorder %v280_v52, 1.0  ;;  %vm287_vm0 = vcmp.gt.f32.partialorder %v281_v53, 1.0 }
  0x24   : > { %509 = vst [vmem:[%s621_s16 + $0x22] ss:$4 sm:$0xff] %v503_v61  ;;  %v504_v63 = vsel %vm286_vm15, 1.0, %v584_v5  ;;  %v316_v0 = vsel %vm286_vm15, 0.0, %v280_v52  ;;  %v505_v1 = vsel %vm287_vm0, 1.0, %v584_v5  ;;  %v317_v2 = vsel %vm287_vm0, 0.0, %v281_v53 }
  0x25   : > { %510 = vst [vmem:[%s621_s16 + $0x42] ss:$4 sm:$0xff] %v504_v63  ;;  %vm288_vm1 = vcmp.gt.f32.partialorder %v282_v54, 1.0  ;;  %vm289_vm2 = vcmp.gt.f32.partialorder %v283_v59, 1.0  ;;  %v332_v3 = vadd.f32 %v514_v56, %v314_v58  ;;  %v333_v4 = vadd.f32 %v515_v60, %v315_v62  ;;  %v516_v6 = vld [vmem:[%s616_s13 + $0x43] ss:$4 sm:$0xff] }
  0x26   : > { %511 = vst [vmem:[%s621_s16 + $0x62] ss:$4 sm:$0xff] %v505_v1  ;;  %v506_v7 = vsel %vm288_vm1, 1.0, %v584_v5  ;;  %v318_v8 = vsel %vm288_vm1, 0.0, %v282_v54  ;;  %v507_v9 = vsel %vm289_vm2, 1.0, %v584_v5  ;;  %v334_v10 = vadd.f32 %v516_v6, %v316_v0 }
  0x27   : > { %512 = vst [vmem:[%s621_s16 + $0x82] ss:$4 sm:$0xff] %v506_v7  ;;  %vm338_vm3 = vcmp.gt.f32.partialorder %v332_v3, 1.0  ;;  %vm339_vm4 = vcmp.gt.f32.partialorder %v333_v4, 1.0  ;;  %v517_v11 = vld [vmem:[%s616_s13 + $0x63] ss:$4 sm:$0xff] }
  0x28   : > { %513 = vst.msk [vmem:[%s621_s16 + $0xa2] ss:$4 sm:$0x1] %vm637_vm5, %v507_v9  ;;  %v520_v12 = vsel %vm338_vm3, 1.0, %v584_v5  ;;  %v521_v14 = vsel %vm339_vm4, 1.0, %v584_v5  ;;  %v335_v15 = vadd.f32 %v517_v11, %v317_v2  ;;  %v319_v16 = vsel %vm289_vm2, 0.0, %v283_v59 }
  0x29   : > { %526 = vst [vmem:[%s621_s16 + $0x3] ss:$4 sm:$0xff] %v520_v12  ;;  %vm340_vm6 = vcmp.gt.f32.partialorder %v334_v10, 1.0  ;;  %v518_v17 = vld [vmem:[%s616_s13 + $0x83] ss:$4 sm:$0xff] }
  0x2a   : > { %527 = vst [vmem:[%s621_s16 + $0x23] ss:$4 sm:$0xff] %v521_v14  ;;  %v522_v18 = vsel %vm340_vm6, 1.0, %v584_v5  ;;  %vm341_vm7 = vcmp.gt.f32.partialorder %v335_v15, 1.0  ;;  %v336_v19 = vadd.f32 %v518_v17, %v318_v8 }
  0x2b   : > { %528 = vst [vmem:[%s621_s16 + $0x43] ss:$4 sm:$0xff] %v522_v18  ;;  %v523_v20 = vsel %vm341_vm7, 1.0, %v584_v5  ;;  %v519_v21 = vld [vmem:[%s616_s13 + $0xa3] ss:$4 sm:$0x1] }
  0x2c   : > { %529 = vst [vmem:[%s621_s16 + $0x63] ss:$4 sm:$0xff] %v523_v20  ;;  %vm342_vm8 = vcmp.gt.f32.partialorder %v336_v19, 1.0  ;;  %v337_v22 = vadd.f32 %v519_v21, %v319_v16 }
  0x2d   : > { %v524_v23 = vsel %vm342_vm8, 1.0, %v584_v5 }
  0x2e   : > { %530 = vst [vmem:[%s621_s16 + $0x83] ss:$4 sm:$0xff] %v524_v23  ;;  %vm343_vm9 = vcmp.gt.f32.partialorder %v337_v22, 1.0 }
  0x2f   : > { %v525_v24 = vsel %vm343_vm9, 1.0, %v584_v5 }
  0x30   : > { %531 = vst.msk [vmem:[%s621_s16 + $0xa3] ss:$4 sm:$0x1] %vm637_vm5, %v525_v24 }
  0x31 PF: > { %s11_s8 = sadd.s32 1, %s582_s8   ;;  %s728_s6 = smov %s578_s7 }
  0x32   : > { %p8_p5 = scmp.ge.s32.totalorder %s11_s8, 4   ;;  %s729_s7 = smov %s731_s9 }
  0x34   :  { %10 = sbr.rel (!%p8_p5) target bundleno = 2 (0x2), region = 100 }

// kernel: forward.6
= control target key start
LH: loop header
LB: loop body
LE: loop exit
PB: predicated region body
PF: predicated region fallthrough
CT: control target
= control target key end

     0   :  { %s407_s6 = smov 0   ;;  %s409_s7 = smov 0   ;;  %s472_s0 = inlined_call_operand.vmem [shape: f32[2,4,1083], index: 0, kind: input, shape index: {}]   ;;  %s473_s1 = inlined_call_operand.vmem [shape: f32[2,4,1083], index: 1, kind: output, shape index: {}]  }
   0x1   :  { %s411_s8 = smov 0  }
   0x2 LB: > { %s23_s9 = sadd.s32 1, %s390_s7  ;;  %p319_p0 = scmp.ge.s32.totalorder %s394_s8, 1  ;;  %s394_s8 = sphi %s411_s8, %s11_s8   ;;  %s390_s7 = sphi %s409_s7, %s477_s7   ;;  %s386_s6 = sphi %s407_s6, %s476_s6  }
   0x3   : > { %p25_p1 = scmp.ge.s32.totalorder %s23_s9, 2  ;;  %p108_p2 = scmp.lt.s32.totalorder %s394_s8, 3 }
   0x5   : > { %s479_s9 = smov (%p25_p1, %s23_s9), 0  ;;  %p109_p3 = pnand %p319_p0, %p108_p2 }
   0x6   : > { %p137_p4 = scmp.lt.s32.totalorder (!%p109_p3), %s386_s6, 1 }
   0x7   : > { %112 = sbr.rel (%p109_p3) target bundleno = 33 (0x21), region = 24 }
   0xc   : > { %s481_s6 = smov (!%p137_p4, %s386_s6), 1  ;;  %v168_v0 = vlaneseq  ;;  %v396_v5 = vmov 0.0  }
   0xd   : > { %s346_s10 = smul.u32 36, %s481_s6 }
   0xe   : > { %vm437_vm2 = vcmp.lt.s32.totalorder %v168_v0, 59 }
   0xf   : > { %s428_s13 = scalar_lea.vmem %s472_s0, %s346_s10  ;;  %s433_s16 = scalar_lea.vmem %s473_s1, %s346_s10 }
  0x10   : > { %v156_v1 = vld [vmem:[%s428_s13] ss:$4 sm:$0xff]  ;;  %v326_v4 = vld [vmem:[%s428_s13 + $0x1] ss:$4 sm:$0xff]  ;;  %v332_v13 = vld [vmem:[%s428_s13 + $0x2] ss:$4 sm:$0xff] }
  0x11   : > { %v322_v2 = vld [vmem:[%s428_s13 + $0x20] ss:$4 sm:$0x1]  ;;  %vm161_vm0 = vcmp.gt.f32.partialorder %v156_v1, 1.0  ;;  %v338_v21 = vld [vmem:[%s428_s13 + $0x3] ss:$4 sm:$0xff] }
  0x12   : > { %vm162_vm1 = vcmp.gt.f32.partialorder %v322_v2, 1.0  ;;  %v323_v6 = vsel %vm161_vm0, 1.0, %v396_v5  ;;  %v174_v7 = vsel %vm161_vm0, 0.0, %v156_v1  ;;  %v327_v11 = vld [vmem:[%s428_s13 + $0x21] ss:$4 sm:$0x1] }
  0x13   : > { %v324_v8 = vsel %vm162_vm1, 1.0, %v396_v5  ;;  %v175_v9 = vsel %vm162_vm1, 0.0, %v322_v2  ;;  %167 = vst [vmem:[%s433_s16] ss:$4 sm:$0xff] %v323_v6  ;;  %v180_v10 = vadd.f32 %v326_v4, %v174_v7  ;;  %v333_v14 = vld [vmem:[%s428_s13 + $0x22] ss:$4 sm:$0x1] }
  0x14   : > { %325 = vst.msk [vmem:[%s433_s16 + $0x20] ss:$4 sm:$0x1] %vm437_vm2, %v324_v8  ;;  %v181_v12 = vadd.f32 %v327_v11, %v175_v9  ;;  %v339_v22 = vld [vmem:[%s428_s13 + $0x23] ss:$4 sm:$0x1] }
  0x15   : > { %vm182_vm3 = vcmp.gt.f32.partialorder %v180_v10, 1.0 }
  0x16   : > { %v328_v15 = vsel %vm182_vm3, 1.0, %v396_v5  ;;  %v192_v16 = vsel %vm182_vm3, 0.0, %v180_v10  ;;  %vm183_vm4 = vcmp.gt.f32.partialorder %v181_v12, 1.0 }
  0x17   : > { %330 = vst [vmem:[%s433_s16 + $0x1] ss:$4 sm:$0xff] %v328_v15  ;;  %v329_v17 = vsel %vm183_vm4, 1.0, %v396_v5  ;;  %v193_v18 = vsel %vm183_vm4, 0.0, %v181_v12  ;;  %v198_v19 = vadd.f32 %v332_v13, %v192_v16 }
  0x18   : > { %331 = vst.msk [vmem:[%s433_s16 + $0x21] ss:$4 sm:$0x1] %vm437_vm2, %v329_v17  ;;  %v199_v20 = vadd.f32 %v333_v14, %v193_v18 }
  0x19   : > { %vm200_vm5 = vcmp.gt.f32.partialorder %v198_v19, 1.0 }
  0x1a   : > { %v334_v23 = vsel %vm200_vm5, 1.0, %v396_v5  ;;  %v210_v24 = vsel %vm200_vm5, 0.0, %v198_v19  ;;  %vm201_vm6 = vcmp.gt.f32.partialorder %v199_v20, 1.0 }
  0x1b   : > { %336 = vst [vmem:[%s433_s16 + $0x2] ss:$4 sm:$0xff] %v334_v23  ;;  %v335_v25 = vsel %vm201_vm6, 1.0, %v396_v5  ;;  %v211_v26 = vsel %vm201_vm6, 0.0, %v199_v20  ;;  %v216_v27 = vadd.f32 %v338_v21, %v210_v24 }
  0x1c   : > { %337 = vst.msk [vmem:[%s433_s16 + $0x22] ss:$4 sm:$0x1] %vm437_vm2, %v335_v25  ;;  %v217_v28 = vadd.f32 %v339_v22, %v211_v26 }
  0x1d   : > { %vm218_vm7 = vcmp.gt.f32.partialorder %v216_v27, 1.0 }
  0x1e   : > { %v340_v29 = vsel %vm218_vm7, 1.0, %v396_v5  ;;  %vm219_vm8 = vcmp.gt.f32.partialorder %v217_v28, 1.0 }
  0x1f   : > { %342 = vst [vmem:[%s433_s16 + $0x3] ss:$4 sm:$0xff] %v340_v29  ;;  %v341_v30 = vsel %vm219_vm8, 1.0, %v396_v5 }
  0x20   : > { %343 = vst.msk [vmem:[%s433_s16 + $0x23] ss:$4 sm:$0x1] %vm437_vm2, %v341_v30 }
  0x21 PF: > { %s11_s8 = sadd.s32 1, %s394_s8   ;;  %s476_s6 = smov %s390_s7 }
  0x22   : > { %p8_p5 = scmp.ge.s32.totalorder %s11_s8, 4   ;;  %s477_s7 = smov %s479_s9 }
  0x24   :  { %10 = sbr.rel (!%p8_p5) target bundleno = 2 (0x2), region = 68 }

// kernel: forward.7
= control target key start
LH: loop header
LB: loop body
LE: loop exit
PB: predicated region body
PF: predicated region fallthrough
CT: control target
= control target key end

     0   :  { %s318_s6 = smov 0   ;;  %s320_s7 = smov 0   ;;  %s355_s0 = inlined_call_operand.vmem [shape: f32[2,4,36], index: 0, kind: input, shape index: {}]   ;;  %s356_s1 = inlined_call_operand.vmem [shape: f32[2,4,36], index: 1, kind: output, shape index: {}]  }
   0x1   :  { %s322_s8 = smov 0  }
   0x2 LB: > { %s23_s9 = sadd.s32 1, %s301_s7  ;;  %p249_p0 = scmp.ge.s32.totalorder %s305_s8, 1  ;;  %s305_s8 = sphi %s322_s8, %s11_s8   ;;  %s301_s7 = sphi %s320_s7, %s358_s7   ;;  %s297_s6 = sphi %s318_s6, %s357_s6  }
   0x3   : > { %p25_p1 = scmp.ge.s32.totalorder %s23_s9, 2  ;;  %p105_p2 = scmp.lt.s32.totalorder %s305_s8, 3 }
   0x5   : > { %s360_s9 = smov (%p25_p1, %s23_s9), 0  ;;  %p106_p3 = pnand %p249_p0, %p105_p2 }
   0x6   : > { %p129_p4 = scmp.lt.s32.totalorder (!%p106_p3), %s297_s6, 1 }
   0x7   : > { %109 = sbr.rel (%p106_p3) target bundleno = 31 (0x1f), region = 24 }
   0xc   : > { %s362_s6 = smov (!%p129_p4, %s297_s6), 1  ;;  %vm148_vm0 = vcmask 286720   ;;  %v307_v2 = vmov 0.0  }
   0xd   : > { %s250_s10 = sshll.u32 %s362_s6, 2 }
   0xe   : > { %s135_s13 = scalar_lea.vmem %s355_s0, %s250_s10  ;;  %s142_s16 = scalar_lea.vmem %s356_s1, %s250_s10 }
   0xf   : > { %v143_v0 = vld [vmem:[%s135_s13] sm:$0x1]  ;;  %v151_v1 = vld [vmem:[%s135_s13 + $0x1] sm:$0x1]  ;;  %v158_v6 = vld [vmem:[%s135_s13 + $0x2] sm:$0x1] }
  0x10   : > { %vm145_vm1 = vcmp.gt.f32.partialorder %v143_v0, 1.0  ;;  %v165_v10 = vld [vmem:[%s135_s13 + $0x3] sm:$0x1] }
  0x11   : > { %v252_v3 = vsel %vm145_vm1, 1.0, %v307_v2  ;;  %v150_v4 = vsel %vm145_vm1, 0.0, %v143_v0 }
  0x12   : > { %149 = vst.msk [vmem:[%s142_s16] sm:$0x1] %vm148_vm0, %v252_v3  ;;  %v152_v5 = vadd.f32 %v151_v1, %v150_v4 }
  0x14   : > { %vm153_vm2 = vcmp.gt.f32.partialorder %v152_v5, 1.0 }
  0x15   : > { %v253_v7 = vsel %vm153_vm2, 1.0, %v307_v2  ;;  %v157_v8 = vsel %vm153_vm2, 0.0, %v152_v5 }
  0x16   : > { %156 = vst.msk [vmem:[%s142_s16 + $0x1] sm:$0x1] %vm148_vm0, %v253_v7  ;;  %v159_v9 = vadd.f32 %v158_v6, %v157_v8 }
  0x18   : > { %vm160_vm3 = vcmp.gt.f32.partialorder %v159_v9, 1.0 }
  0x19   : > { %v254_v11 = vsel %vm160_vm3, 1.0, %v307_v2  ;;  %v164_v12 = vsel %vm160_vm3, 0.0, %v159_v9 }
  0x1a   : > { %163 = vst.msk [vmem:[%s142_s16 + $0x2] sm:$0x1] %vm148_vm0, %v254_v11  ;;  %v166_v13 = vadd.f32 %v165_v10, %v164_v12 }
  0x1c   : > { %vm167_vm4 = vcmp.gt.f32.partialorder %v166_v13, 1.0 }
  0x1d   : > { %v255_v14 = vsel %vm167_vm4, 1.0, %v307_v2 }
  0x1e   : > { %170 = vst.msk [vmem:[%s142_s16 + $0x3] sm:$0x1] %vm148_vm0, %v255_v14 }
  0x1f PF: > { %s11_s8 = sadd.s32 1, %s305_s8   ;;  %s357_s6 = smov %s301_s7 }
  0x20   : > { %p8_p5 = scmp.ge.s32.totalorder %s11_s8, 4   ;;  %s358_s7 = smov %s360_s9 }
  0x22   :  { %10 = sbr.rel (!%p8_p5) target bundleno = 2 (0x2), region = 54 }

// kernel: forward.8
= control target key start
LH: loop header
LB: loop body
LE: loop exit
PB: predicated region body
PF: predicated region fallthrough
CT: control target
= control target key end

     0   :  { %vm90_vm0 = vcmask 1041408   ;;  %vm86_vm1 = vcmask 293888   ;;  %s303_s1 = inlined_call_operand.vmem [shape: bf16[36,512], index: 1, kind: input, shape index: {}]   ;;  %s304_s0 = inlined_call_operand.vmem [shape: bf16[8,36], index: 0, kind: input, shape index: {}]   ;;  %s305_s2 = inlined_call_operand.vmem [shape: f32[1,512], index: 2, kind: input, shape index: {}]   ;;  %s306_s3 = inlined_call_operand.vmem [shape: f32[8,512], index: 3, kind: output, shape index: {}]  }
   0x1   :  { %v24_v0 = vld [vmem:[%s303_s1 + $0x40] sm:$0x33]  ;;  %v25_v1 = vld [vmem:[%s303_s1 + $0x48] sm:$0x33]  ;;  %v205_v7 = vld [vmem:[%s303_s1 + $0x2c] sm:$0xf0] }
   0x2   :  { %v62_v2 = vunpack.c.l.b16 %v24_v0  ;;  %v63_v3 = vunpack.c.h.b16 %v24_v0  ;;  %v64_v4 = vunpack.c.l.b16 %v25_v1  ;;  %v65_v5 = vunpack.c.h.b16 %v25_v1  ;;  %v181_v6 = vld [vmem:[%s303_s1 + $0x20] sm:$0xf]  ;;  %v203_v12 = vld [vmem:[%s303_s1 + $0x24] sm:$0xf]  ;;  %v183_v13 = vld [vmem:[%s303_s1 + $0x30] sm:$0xf0] }
   0x3   :  { %v189_v14 = vld [vmem:[%s303_s1 + $0x28] sm:$0xf]  ;;  %v206_v15 = vld [vmem:[%s303_s1 + $0x34] sm:$0xf0]  ;;  %v204_v16 = vld [vmem:[%s303_s1 + $0x2c] sm:$0xf]  ;;  %v182_v22 = vor.u32 %v205_v7, %v181_v6  ;;  %v186_v23 = vor.u32 %v203_v12, %v183_v13 }
   0x4   :  { %v74_v8 = vpack.c.b16 %v62_v2, %v62_v2  ;;  %v75_v9 = vpack.c.b16 %v63_v3, %v63_v3  ;;  %v76_v10 = vpack.c.b16 %v64_v4, %v64_v4  ;;  %v77_v11 = vpack.c.b16 %v65_v5, %v65_v5  ;;  %v191_v17 = vld [vmem:[%s303_s1 + $0x38] sm:$0xf0]  ;;  %v165_v24 = vld [vmem:[%s303_s1] sm:$0xf]  ;;  %v201_v25 = vld [vmem:[%s303_s1 + $0xc] sm:$0xf0] }
   0x5   :  { %v190_v26 = vor.u32 %v206_v15, %v189_v14  ;;  %v194_v27 = vor.u32 %v204_v16, %v191_v17  ;;  %v199_v28 = vld [vmem:[%s303_s1 + $0x4] sm:$0xf]  ;;  %v167_v29 = vld [vmem:[%s303_s1 + $0x10] sm:$0xf0]  ;;  %v173_v30 = vld [vmem:[%s303_s1 + $0x8] sm:$0xf]  ;;  %v166_v34 = vor.u32 %v201_v25, %v165_v24 }
   0x6   :  { %v92_v18 = vsel %vm90_vm0, %v74_v8, 0  ;;  %v95_v19 = vsel %vm90_vm0, %v75_v9, 0  ;;  %v98_v20 = vsel %vm90_vm0, %v76_v10, 0  ;;  %v101_v21 = vsel %vm90_vm0, %v77_v11, 0  ;;  %v202_v31 = vld [vmem:[%s303_s1 + $0x14] sm:$0xf0] }
   0x7   :  { %108 = vmatpush.bf16.msra.mxu0 %v92_v18  ;;  %121 = vmatpush.bf16.msra.mxu1 %v95_v19  ;;  %v200_v32 = vld [vmem:[%s303_s1 + $0xc] sm:$0xf]  ;;  %v175_v33 = vld [vmem:[%s303_s1 + $0x18] sm:$0xf0]  ;;  %v170_v35 = vor.u32 %v199_v28, %v167_v29  ;;  %v174_v36 = vor.u32 %v202_v31, %v173_v30  ;;  %v15_v38 = vld [vmem:[%s304_s0] sm:$0xf] }
   0x8   :  { %134 = vmatpush.bf16.msra.mxu2 %v98_v20  ;;  %147 = vmatpush.bf16.msra.mxu3 %v101_v21  ;;  %v178_v37 = vor.u32 %v200_v32, %v175_v33  ;;  %v26_v39 = vld [vmem:[%s305_s2] sm:$0xf] }
   0x9   :  { %v28_v40 = vperm.slane %v26_v39, 0  ;;  %v29_v41 = vperm.slane %v26_v39, 1  ;;  %v30_v46 = vperm.slane %v26_v39, 2  ;;  %v31_v47 = vperm.slane %v26_v39, 3 }
   0xb   :  { %109 = vmatpush.bf16.msra.mxu0 %v182_v22  ;;  %122 = vmatpush.bf16.msra.mxu1 %v186_v23 }
   0xc   :  { %135 = vmatpush.bf16.msra.mxu2 %v190_v26  ;;  %148 = vmatpush.bf16.msra.mxu3 %v194_v27 }
   0xf   :  { %110 = vmatpush.bf16.msra.mxu0 %v166_v34  ;;  %123 = vmatpush.bf16.msra.mxu1 %v170_v35 }
  0x10   :  { %136 = vmatpush.bf16.msra.mxu2 %v174_v36  ;;  %149 = vmatpush.bf16.msra.mxu3 %v178_v37 }
  0x12   :  { %195 = vmatmul.msk.bf16.vlgmr.msra.gmra.mxu0 %vm86_vm1, %v15_v38  ;;  %196 = vmatmul.msk.bf16.vlgmr.msra.gmra.mxu1 %vm86_vm1, %v15_v38 }
  0x13   :  { %197 = vmatmul.msk.bf16.vlgmr.msra.gmra.mxu2 %vm86_vm1, %v15_v38  ;;  %198 = vmatmul.msk.bf16.vlgmr.msra.gmra.mxu3 %vm86_vm1, %v15_v38 }
  0x8f   :  { %v112_v42 = vpop.f32.mrf.mxu0  ;;  %v125_v43 = vpop.f32.mrf.mxu1 }
  0x90   :  { %v113_v44 = vadd.f32 %v112_v42, %v28_v40  ;;  %v126_v45 = vadd.f32 %v125_v43, %v29_v41 }
  0x92   :  { %155 = vst [vmem:[%s306_s3] sm:$0xff] %v113_v44 }
  0x93   :  { %156 = vst [vmem:[%s306_s3 + $0x8] sm:$0xff] %v126_v45 }
  0x96   :  { %v138_v48 = vpop.f32.mrf.mxu2  ;;  %v151_v49 = vpop.f32.mrf.mxu3 }
  0x97   :  { %v139_v50 = vadd.f32 %v138_v48, %v30_v46  ;;  %v152_v51 = vadd.f32 %v151_v49, %v31_v47  ;;  %v114_v52 = vpop.f32.mrf.mxu0  ;;  %v127_v53 = vpop.f32.mrf.mxu1 }
  0x99   :  { %157 = vst [vmem:[%s306_s3 + $0x10] sm:$0xff] %v139_v50 }
  0x9a   :  { %158 = vst [vmem:[%s306_s3 + $0x18] sm:$0xff] %v152_v51 }
  0x9e   :  { %v140_v54 = vpop.f32.mrf.mxu2  ;;  %v153_v55 = vpop.f32.mrf.mxu3 }

// kernel: forward.9
= control target key start
LH: loop header
LB: loop body
LE: loop exit
PB: predicated region body
PF: predicated region fallthrough
CT: control target
= control target key end

     0   :  { %s7590_s0 = inlined_call_operand.vmem [shape: f32[4,2,512], index: 0, kind: input, shape index: {}]   ;;  %s7591_s1 = inlined_call_operand.vmem [shape: f32[128,512], index: 1, kind: input, shape index: {}]   ;;  %s7592_s2 = inlined_call_operand.vmem [shape: f32[256,512], index: 2, kind: input, shape index: {}]   ;;  %s7593_s3 = inlined_call_operand.vmem [shape: f32[256,512], index: 3, kind: input, shape index: {}]   ;;  %s7594_s4 = inlined_call_operand.vmem [shape: f32[3,1,512], index: 4, kind: input, shape index: {}]   ;;  %s7595_s5 = inlined_call_operand.hbm [shape: f32[2,128], index: 5, kind: output, shape index: {}]  }
   0x1   :  { %v83_v0 = vld [vmem:[%s7591_s1 + $0x1f0] sm:$0xff]  ;;  %v3074_v1 = vld [vmem:[%s7591_s1 + $0x1f8] sm:$0xff]  ;;  %v3096_v6 = vld [vmem:[%s7591_s1 + $0x1e8] sm:$0xff] }
   0x2   :  { %v79_v2 = vld [vmem:[%s7591_s1 + $0x1d0] sm:$0xff]  ;;  %387 = vmatpush.msra.mxu2 %v83_v0  ;;  %407 = vmatpush.msra.mxu3 %v3074_v1  ;;  %v3083_v3 = vld [vmem:[%s7591_s1 + $0x1d8] sm:$0xff]  ;;  %v81_v7 = vld [vmem:[%s7591_s1 + $0x1e0] sm:$0xff] }
   0x3   :  { %v75_v4 = vld [vmem:[%s7591_s1 + $0x1b0] sm:$0xff]  ;;  %v3091_v5 = vld [vmem:[%s7591_s1 + $0x1b8] sm:$0xff]  ;;  %v3105_v8 = vld [vmem:[%s7591_s1 + $0x1c8] sm:$0xff]  ;;  %367 = vmatpush.msra.mxu1 %v3096_v6  ;;  %347 = vmatpush.msra.mxu0 %v81_v7 }
   0x4   :  { %388 = vmatpush.msra.mxu2 %v79_v2  ;;  %408 = vmatpush.msra.mxu3 %v3083_v3  ;;  %v71_v9 = vld [vmem:[%s7591_s1 + $0x190] sm:$0xff]  ;;  %v3114_v10 = vld [vmem:[%s7591_s1 + $0x198] sm:$0xff]  ;;  %v77_v11 = vld [vmem:[%s7591_s1 + $0x1c0] sm:$0xff] }
   0x5   :  { %v3123_v12 = vld [vmem:[%s7591_s1 + $0x1a8] sm:$0xff]  ;;  %v73_v13 = vld [vmem:[%s7591_s1 + $0x1a0] sm:$0xff]  ;;  %368 = vmatpush.msra.mxu1 %v3105_v8  ;;  %v67_v14 = vld [vmem:[%s7591_s1 + $0x170] sm:$0xff]  ;;  %348 = vmatpush.msra.mxu0 %v77_v11 }
   0x6   :  { %389 = vmatpush.msra.mxu2 %v75_v4  ;;  %409 = vmatpush.msra.mxu3 %v3091_v5  ;;  %v3135_v15 = vld [vmem:[%s7591_s1 + $0x178] sm:$0xff]  ;;  %v3141_v16 = vld [vmem:[%s7591_s1 + $0x188] sm:$0xff]  ;;  %v69_v17 = vld [vmem:[%s7591_s1 + $0x180] sm:$0xff] }
   0x7   :  { %369 = vmatpush.msra.mxu1 %v3123_v12  ;;  %v63_v18 = vld [vmem:[%s7591_s1 + $0x150] sm:$0xff]  ;;  %v3153_v19 = vld [vmem:[%s7591_s1 + $0x158] sm:$0xff]  ;;  %349 = vmatpush.msra.mxu0 %v73_v13  ;;  %v3159_v20 = vld [vmem:[%s7591_s1 + $0x168] sm:$0xff] }
   0x8   :  { %390 = vmatpush.msra.mxu2 %v71_v9  ;;  %410 = vmatpush.msra.mxu3 %v3114_v10  ;;  %v65_v21 = vld [vmem:[%s7591_s1 + $0x160] sm:$0xff]  ;;  %v59_v22 = vld [vmem:[%s7591_s1 + $0x130] sm:$0xff]  ;;  %v3171_v23 = vld [vmem:[%s7591_s1 + $0x138] sm:$0xff] }
   0x9   :  { %370 = vmatpush.msra.mxu1 %v3141_v16  ;;  %350 = vmatpush.msra.mxu0 %v69_v17  ;;  %v3177_v24 = vld [vmem:[%s7591_s1 + $0x148] sm:$0xff]  ;;  %v61_v25 = vld [vmem:[%s7591_s1 + $0x140] sm:$0xff]  ;;  %v55_v26 = vld [vmem:[%s7591_s1 + $0x110] sm:$0xff] }
   0xa   :  { %391 = vmatpush.msra.mxu2 %v67_v14  ;;  %411 = vmatpush.msra.mxu3 %v3135_v15  ;;  %v3189_v27 = vld [vmem:[%s7591_s1 + $0x118] sm:$0xff]  ;;  %v3195_v28 = vld [vmem:[%s7591_s1 + $0x128] sm:$0xff]  ;;  %v57_v29 = vld [vmem:[%s7591_s1 + $0x120] sm:$0xff] }
   0xb   :  { %371 = vmatpush.msra.mxu1 %v3159_v20  ;;  %351 = vmatpush.msra.mxu0 %v65_v21  ;;  %v51_v30 = vld [vmem:[%s7591_s1 + $0xf0] sm:$0xff]  ;;  %v3207_v31 = vld [vmem:[%s7591_s1 + $0xf8] sm:$0xff]  ;;  %v3213_v32 = vld [vmem:[%s7591_s1 + $0x108] sm:$0xff] }
   0xc   :  { %392 = vmatpush.msra.mxu2 %v63_v18  ;;  %412 = vmatpush.msra.mxu3 %v3153_v19  ;;  %v53_v33 = vld [vmem:[%s7591_s1 + $0x100] sm:$0xff]  ;;  %v47_v34 = vld [vmem:[%s7591_s1 + $0xd0] sm:$0xff]  ;;  %v3225_v35 = vld [vmem:[%s7591_s1 + $0xd8] sm:$0xff] }
   0xd   :  { %372 = vmatpush.msra.mxu1 %v3177_v24  ;;  %352 = vmatpush.msra.mxu0 %v61_v25  ;;  %v3231_v36 = vld [vmem:[%s7591_s1 + $0xe8] sm:$0xff]  ;;  %v49_v37 = vld [vmem:[%s7591_s1 + $0xe0] sm:$0xff]  ;;  %v43_v38 = vld [vmem:[%s7591_s1 + $0xb0] sm:$0xff] }
   0xe   :  { %393 = vmatpush.msra.mxu2 %v59_v22  ;;  %413 = vmatpush.msra.mxu3 %v3171_v23  ;;  %v3243_v39 = vld [vmem:[%s7591_s1 + $0xb8] sm:$0xff]  ;;  %v3249_v40 = vld [vmem:[%s7591_s1 + $0xc8] sm:$0xff]  ;;  %v45_v41 = vld [vmem:[%s7591_s1 + $0xc0] sm:$0xff] }
   0xf   :  { %373 = vmatpush.msra.mxu1 %v3195_v28  ;;  %353 = vmatpush.msra.mxu0 %v57_v29  ;;  %v39_v42 = vld [vmem:[%s7591_s1 + $0x90] sm:$0xff]  ;;  %v3261_v43 = vld [vmem:[%s7591_s1 + $0x98] sm:$0xff]  ;;  %v3267_v44 = vld [vmem:[%s7591_s1 + $0xa8] sm:$0xff] }
  0x10   :  { %394 = vmatpush.msra.mxu2 %v55_v26  ;;  %414 = vmatpush.msra.mxu3 %v3189_v27  ;;  %v41_v45 = vld [vmem:[%s7591_s1 + $0xa0] sm:$0xff]  ;;  %v35_v46 = vld [vmem:[%s7591_s1 + $0x70] sm:$0xff]  ;;  %v3279_v47 = vld [vmem:[%s7591_s1 + $0x78] sm:$0xff] }
  0x11   :  { %374 = vmatpush.msra.mxu1 %v3213_v32  ;;  %354 = vmatpush.msra.mxu0 %v53_v33  ;;  %v3285_v48 = vld [vmem:[%s7591_s1 + $0x88] sm:$0xff]  ;;  %v37_v49 = vld [vmem:[%s7591_s1 + $0x80] sm:$0xff]  ;;  %v31_v50 = vld [vmem:[%s7591_s1 + $0x50] sm:$0xff] }
  0x12   :  { %395 = vmatpush.msra.mxu2 %v51_v30  ;;  %415 = vmatpush.msra.mxu3 %v3207_v31  ;;  %v3297_v51 = vld [vmem:[%s7591_s1 + $0x58] sm:$0xff]  ;;  %v3303_v52 = vld [vmem:[%s7591_s1 + $0x68] sm:$0xff]  ;;  %v33_v53 = vld [vmem:[%s7591_s1 + $0x60] sm:$0xff] }
  0x13   :  { %375 = vmatpush.msra.mxu1 %v3231_v36  ;;  %355 = vmatpush.msra.mxu0 %v49_v37  ;;  %v27_v54 = vld [vmem:[%s7591_s1 + $0x30] sm:$0xff]  ;;  %v3315_v55 = vld [vmem:[%s7591_s1 + $0x38] sm:$0xff]  ;;  %v3321_v56 = vld [vmem:[%s7591_s1 + $0x48] sm:$0xff] }
  0x14   :  { %396 = vmatpush.msra.mxu2 %v47_v34  ;;  %416 = vmatpush.msra.mxu3 %v3225_v35  ;;  %v29_v57 = vld [vmem:[%s7591_s1 + $0x40] sm:$0xff]  ;;  %v23_v58 = vld [vmem:[%s7591_s1 + $0x10] sm:$0xff]  ;;  %v3333_v59 = vld [vmem:[%s7591_s1 + $0x18] sm:$0xff] }
  0x15   :  { %376 = vmatpush.msra.mxu1 %v3249_v40  ;;  %356 = vmatpush.msra.mxu0 %v45_v41  ;;  %v3340_v60 = vld [vmem:[%s7591_s1 + $0x28] sm:$0xff]  ;;  %v25_v61 = vld [vmem:[%s7591_s1 + $0x20] sm:$0xff] }
  0x16   :  { %397 = vmatpush.msra.mxu2 %v43_v38  ;;  %417 = vmatpush.msra.mxu3 %v3243_v39 }
  0x17   :  { %377 = vmatpush.msra.mxu1 %v3267_v44  ;;  %357 = vmatpush.msra.mxu0 %v41_v45 }
  0x18   :  { %398 = vmatpush.msra.mxu2 %v39_v42  ;;  %418 = vmatpush.msra.mxu3 %v3261_v43 }
  0x19   :  { %378 = vmatpush.msra.mxu1 %v3285_v48  ;;  %358 = vmatpush.msra.mxu0 %v37_v49 }
  0x1a   :  { %399 = vmatpush.msra.mxu2 %v35_v46  ;;  %419 = vmatpush.msra.mxu3 %v3279_v47 }
  0x1b   :  { %379 = vmatpush.msra.mxu1 %v3303_v52  ;;  %359 = vmatpush.msra.mxu0 %v33_v53 }
  0x1c   :  { %400 = vmatpush.msra.mxu2 %v31_v50  ;;  %420 = vmatpush.msra.mxu3 %v3297_v51 }
  0x1d   :  { %380 = vmatpush.msra.mxu1 %v3321_v56  ;;  %360 = vmatpush.msra.mxu0 %v29_v57 }
  0x1e   :  { %401 = vmatpush.msra.mxu2 %v27_v54  ;;  %421 = vmatpush.msra.mxu3 %v3315_v55 }
  0x1f   :  { %10 = vsyncpa [#allocation3], 0  ;;  %v3349_v62 = vld [vmem:[%s7592_s2 + $0x3e8] sm:$0xff]  ;;  %v7596_v63 = vmov 0.0   ;;  %v21_v2 = vld [vmem:[%s7591_s1] sm:$0xff]  ;;  %381 = vmatpush.msra.mxu1 %v3340_v60  ;;  %361 = vmatpush.msra.mxu0 %v25_v61  ;;  %vm434_vm0 = vcmask 1041408  }
  0x20   :  { %402 = vmatpush.msra.mxu2 %v23_v58  ;;  %422 = vmatpush.msra.mxu3 %v3333_v59  ;;  %v3356_v0 = vld [vmem:[%s7591_s1 + $0x8] sm:$0xff]  ;;  %v3365_v4 = vld [vmem:[%s7592_s2 + $0x3e0] sm:$0xff]  ;;  %vm436_vm1 = vcmask 1045508   ;;  %vm438_vm2 = vcmask 1043456  }
  0x21   :  { %403 = vmatmul.f32.vlgmr.msra.gmra.mxu2 %v7596_v63  ;;  %423 = vmatmul.f32.vlgmr.msra.gmra.mxu3 %v7596_v63  ;;  %v3371_v7 = vld [vmem:[%s7592_s2 + $0x3c8] sm:$0xff]  ;;  %v3379_v9 = vld [vmem:[%s7592_s2 + $0x3c0] sm:$0xff] }
  0x22   :  { %552 = vmatpush.msrb.mxu3 %v3349_v62  ;;  %382 = vmatpush.msra.mxu1 %v3356_v0  ;;  %v3384_v11 = vld [vmem:[%s7592_s2 + $0x3a8] sm:$0xff]  ;;  %v3391_v13 = vld [vmem:[%s7592_s2 + $0x3a0] sm:$0xff] }
  0x23   :  { %362 = vmatpush.msra.mxu0 %v21_v2  ;;  %383 = vmatmul.f32.vlgmr.msra.gmra.mxu1 %v7596_v63  ;;  %v3396_v14 = vld [vmem:[%s7592_s2 + $0x388] sm:$0xff]  ;;  %v3403_v17 = vld [vmem:[%s7592_s2 + $0x380] sm:$0xff] }
  0x24   :  { %363 = vmatmul.f32.vlgmr.msra.gmra.mxu0 %v7596_v63  ;;  %512 = vmatpush.msrb.mxu1 %v3365_v4  ;;  %v3408_v18 = vld [vmem:[%s7592_s2 + $0x368] sm:$0xff]  ;;  %v3415_v21 = vld [vmem:[%s7592_s2 + $0x360] sm:$0xff]  ;;  %v3547_v63 = vld [vmem:[%s7592_s2 + $0x3f8] sm:$0xff] }
  0x25   :  { %553 = vmatpush.msrb.mxu3 %v3371_v7  ;;  %v3420_v22 = vld [vmem:[%s7592_s2 + $0x348] sm:$0xff]  ;;  %v3427_v25 = vld [vmem:[%s7592_s2 + $0x340] sm:$0xff]  ;;  %7960 = vst [vmem:[#allocation21_spill] sm:$0xff] %v3547_v63 }
  0x26   :  { %513 = vmatpush.msrb.mxu1 %v3379_v9  ;;  %v3432_v26 = vld [vmem:[%s7592_s2 + $0x328] sm:$0xff]  ;;  %v3439_v29 = vld [vmem:[%s7592_s2 + $0x320] sm:$0xff] }
  0x27   :  { %554 = vmatpush.msrb.mxu3 %v3384_v11  ;;  %v3444_v30 = vld [vmem:[%s7592_s2 + $0x308] sm:$0xff]  ;;  %v3451_v33 = vld [vmem:[%s7592_s2 + $0x300] sm:$0xff] }
  0x28   :  { %514 = vmatpush.msrb.mxu1 %v3391_v13  ;;  %7944 = vst [vmem:[#allocation5_spill] sm:$0xff] %v3451_v33  ;;  %v3456_v34 = vld [vmem:[%s7592_s2 + $0x2e8] sm:$0xff]  ;;  %v3463_v37 = vld [vmem:[%s7592_s2 + $0x2e0] sm:$0xff] }
  0x29   :  { %555 = vmatpush.msrb.mxu3 %v3396_v14  ;;  %7945 = vst [vmem:[#allocation6_spill] sm:$0xff] %v3456_v34  ;;  %v3468_v38 = vld [vmem:[%s7592_s2 + $0x2c8] sm:$0xff]  ;;  %v3475_v41 = vld [vmem:[%s7592_s2 + $0x2c0] sm:$0xff] }
  0x2a   :  { %515 = vmatpush.msrb.mxu1 %v3403_v17  ;;  %7946 = vst [vmem:[#allocation7_spill] sm:$0xff] %v3463_v37  ;;  %v3480_v42 = vld [vmem:[%s7592_s2 + $0x2a8] sm:$0xff]  ;;  %v3487_v45 = vld [vmem:[%s7592_s2 + $0x2a0] sm:$0xff] }
  0x2b   :  { %556 = vmatpush.msrb.mxu3 %v3408_v18  ;;  %7947 = vst [vmem:[#allocation8_spill] sm:$0xff] %v3468_v38  ;;  %v3492_v46 = vld [vmem:[%s7592_s2 + $0x288] sm:$0xff]  ;;  %v3499_v49 = vld [vmem:[%s7592_s2 + $0x280] sm:$0xff] }
  0x2c   :  { %516 = vmatpush.msrb.mxu1 %v3415_v21  ;;  %7948 = vst [vmem:[#allocation9_spill] sm:$0xff] %v3475_v41  ;;  %v3504_v50 = vld [vmem:[%s7592_s2 + $0x268] sm:$0xff]  ;;  %v3511_v53 = vld [vmem:[%s7592_s2 + $0x260] sm:$0xff] }
  0x2d   :  { %557 = vmatpush.msrb.mxu3 %v3420_v22  ;;  %7949 = vst [vmem:[#allocation10_spill] sm:$0xff] %v3480_v42  ;;  %v3516_v54 = vld [vmem:[%s7592_s2 + $0x248] sm:$0xff]  ;;  %v3523_v57 = vld [vmem:[%s7592_s2 + $0x240] sm:$0xff] }
  0x2e   :  { %517 = vmatpush.msrb.mxu1 %v3427_v25  ;;  %7950 = vst [vmem:[#allocation11_spill] sm:$0xff] %v3487_v45  ;;  %v3528_v58 = vld [vmem:[%s7592_s2 + $0x228] sm:$0xff]  ;;  %v3535_v61 = vld [vmem:[%s7592_s2 + $0x220] sm:$0xff] }
  0x2f   :  { %558 = vmatpush.msrb.mxu3 %v3432_v26  ;;  %7951 = vst [vmem:[#allocation12_spill] sm:$0xff] %v3492_v46  ;;  %v3540_v2 = vld [vmem:[%s7592_s2 + $0x208] sm:$0xff] }
  0x30   :  { %518 = vmatpush.msrb.mxu1 %v3439_v29  ;;  %7952 = vst [vmem:[#allocation13_spill] sm:$0xff] %v3499_v49 }
  0x31   :  { %559 = vmatpush.msrb.mxu3 %v3444_v30  ;;  %7953 = vst [vmem:[#allocation14_spill] sm:$0xff] %v3504_v50 }
  0x32   :  { %519 = vmatpush.msrb.mxu1 %v3451_v33  ;;  %7954 = vst [vmem:[#allocation15_spill] sm:$0xff] %v3511_v53 }
  0x33   :  { %560 = vmatpush.msrb.mxu3 %v3456_v34  ;;  %7955 = vst [vmem:[#allocation16_spill] sm:$0xff] %v3516_v54  ;;  %v140_v34 = vld [vmem:[%s7592_s2 + $0x1b8] sm:$0xff] }
  0x34   :  { %520 = vmatpush.msrb.mxu1 %v3463_v37  ;;  %7956 = vst [vmem:[#allocation17_spill] sm:$0xff] %v3523_v57  ;;  %v279_v37 = vld [vmem:[%s7593_s3 + $0x210] sm:$0xff] }
  0x35   :  { %561 = vmatpush.msrb.mxu3 %v3468_v38  ;;  %7957 = vst [vmem:[#allocation18_spill] sm:$0xff] %v3528_v58  ;;  %v283_v38 = vld [vmem:[%s7593_s3 + $0x230] sm:$0xff] }
  0x36   :  { %521 = vmatpush.msrb.mxu1 %v3475_v41  ;;  %7958 = vst [vmem:[#allocation19_spill] sm:$0xff] %v3535_v61 }
  0x37   :  { %562 = vmatpush.msrb.mxu3 %v3480_v42  ;;  %7959 = vst [vmem:[#allocation20_spill] sm:$0xff] %v3540_v2  ;;  %v284_v42 = vld [vmem:[%s7593_s3 + $0x238] sm:$0xff] }
  0x38   :  { %522 = vmatpush.msrb.mxu1 %v3487_v45  ;;  %v142_v45 = vld [vmem:[%s7592_s2 + $0x1c8] sm:$0xff] }
  0x39   :  { %563 = vmatpush.msrb.mxu3 %v3492_v46  ;;  %v141_v46 = vld [vmem:[%s7592_s2 + $0x1c0] sm:$0xff] }
  0x3a   :  { %523 = vmatpush.msrb.mxu1 %v3499_v49  ;;  %v318_v49 = vld [vmem:[%s7593_s3 + $0x348] sm:$0xff] }
  0x3b   :  { %564 = vmatpush.msrb.mxu3 %v3504_v50  ;;  %v337_v50 = vld [vmem:[%s7593_s3 + $0x3e0] sm:$0xff] }
  0x3c   :  { %524 = vmatpush.msrb.mxu1 %v3511_v53  ;;  %v7966_v53 = vmov 0.0  }
  0x3d   :  { %565 = vmatpush.msrb.mxu3 %v3516_v54  ;;  %v3552_v54 = vld [vmem:[%s7592_s2 + $0x200] sm:$0xff] }
  0x3e   :  { %525 = vmatpush.msrb.mxu1 %v3523_v57  ;;  %7961 = vst [vmem:[#allocation22_spill] sm:$0xff] %v3552_v54  ;;  %v3559_v57 = vld [vmem:[%s7592_s2 + $0x3f0] sm:$0xff] }
  0x3f   :  { %566 = vmatpush.msrb.mxu3 %v3528_v58  ;;  %7962 = vst [vmem:[#allocation23_spill] sm:$0xff] %v3559_v57  ;;  %v3564_v58 = vld [vmem:[%s7592_s2 + $0x3d8] sm:$0xff] }
  0x40   :  { %526 = vmatpush.msrb.mxu1 %v3535_v61  ;;  %7963 = vst [vmem:[#allocation24_spill] sm:$0xff] %v3564_v58  ;;  %v3571_v61 = vld [vmem:[%s7592_s2 + $0x3d0] sm:$0xff] }
  0x41   :  { %567 = vmatpush.msrb.mxu3 %v3540_v2  ;;  %7964 = vst [vmem:[#allocation25_spill] sm:$0xff] %v3571_v61  ;;  %v3576_v2 = vld [vmem:[%s7592_s2 + $0x3b8] sm:$0xff] }
  0x42   :  { %527 = vmatpush.msrb.mxu1 %v3552_v54  ;;  %7965 = vst [vmem:[#allocation26_spill] sm:$0xff] %v3576_v2  ;;  %568 = vmatmul.f32.vlgmr.msrb.gmra.mxu3 %v7966_v53  ;;  %v3584_v54 = vld [vmem:[%s7592_s2 + $0x3b0] sm:$0xff] }
  0x43   :  { %632 = vmatpush.msra.mxu3 %v3547_v63  ;;  %7967 = vst [vmem:[#allocation27_spill] sm:$0xff] %v3584_v54  ;;  %v3589_v63 = vld [vmem:[%s7592_s2 + $0x398] sm:$0xff]  ;;  %528 = vmatmul.f32.vlgmr.msrb.gmra.mxu1 %v7966_v53 }
  0x44   :  { %592 = vmatpush.msra.mxu1 %v3559_v57  ;;  %7968 = vst [vmem:[#allocation28_spill] sm:$0xff] %v3589_v63  ;;  %v3602_v57 = vld [vmem:[%s7592_s2 + $0x378] sm:$0xff] }
  0x45   :  { %633 = vmatpush.msra.mxu3 %v3564_v58  ;;  %v3597_v58 = vld [vmem:[%s7592_s2 + $0x390] sm:$0xff]  ;;  %7970 = vst [vmem:[#allocation30_spill] sm:$0xff] %v3602_v57 }
  0x46   :  { %593 = vmatpush.msra.mxu1 %v3571_v61  ;;  %7969 = vst [vmem:[#allocation29_spill] sm:$0xff] %v3597_v58  ;;  %v3609_v61 = vld [vmem:[%s7592_s2 + $0x370] sm:$0xff] }
  0x47   :  { %634 = vmatpush.msra.mxu3 %v3576_v2  ;;  %7971 = vst [vmem:[#allocation31_spill] sm:$0xff] %v3609_v61  ;;  %v3614_v2 = vld [vmem:[%s7592_s2 + $0x358] sm:$0xff] }
  0x48   :  { %594 = vmatpush.msra.mxu1 %v3584_v54  ;;  %7972 = vst [vmem:[#allocation32_spill] sm:$0xff] %v3614_v2  ;;  %v3621_v54 = vld [vmem:[%s7592_s2 + $0x350] sm:$0xff] }
  0x49   :  { %635 = vmatpush.msra.mxu3 %v3589_v63  ;;  %7973 = vst [vmem:[#allocation33_spill] sm:$0xff] %v3621_v54  ;;  %v3626_v63 = vld [vmem:[%s7592_s2 + $0x338] sm:$0xff] }
  0x4a   :  { %595 = vmatpush.msra.mxu1 %v3597_v58  ;;  %7974 = vst [vmem:[#allocation34_spill] sm:$0xff] %v3626_v63  ;;  %v3633_v58 = vld [vmem:[%s7592_s2 + $0x330] sm:$0xff] }
  0x4b   :  { %636 = vmatpush.msra.mxu3 %v3602_v57  ;;  %7975 = vst [vmem:[#allocation35_spill] sm:$0xff] %v3633_v58  ;;  %v3638_v57 = vld [vmem:[%s7592_s2 + $0x318] sm:$0xff] }
  0x4c   :  { %596 = vmatpush.msra.mxu1 %v3609_v61  ;;  %7976 = vst [vmem:[#allocation36_spill] sm:$0xff] %v3638_v57  ;;  %v3645_v61 = vld [vmem:[%s7592_s2 + $0x310] sm:$0xff] }
  0x4d   :  { %637 = vmatpush.msra.mxu3 %v3614_v2  ;;  %7977 = vst [vmem:[#allocation37_spill] sm:$0xff] %v3645_v61  ;;  %v3650_v2 = vld [vmem:[%s7592_s2 + $0x2f8] sm:$0xff] }
  0x4e   :  { %597 = vmatpush.msra.mxu1 %v3621_v54  ;;  %7978 = vst [vmem:[#allocation38_spill] sm:$0xff] %v3650_v2  ;;  %v3657_v54 = vld [vmem:[%s7592_s2 + $0x2f0] sm:$0xff] }
  0x4f   :  { %638 = vmatpush.msra.mxu3 %v3626_v63  ;;  %7979 = vst [vmem:[#allocation39_spill] sm:$0xff] %v3657_v54  ;;  %v3662_v63 = vld [vmem:[%s7592_s2 + $0x2d8] sm:$0xff] }
  0x50   :  { %598 = vmatpush.msra.mxu1 %v3633_v58  ;;  %7980 = vst [vmem:[#allocation40_spill] sm:$0xff] %v3662_v63  ;;  %v3669_v58 = vld [vmem:[%s7592_s2 + $0x2d0] sm:$0xff] }
  0x51   :  { %639 = vmatpush.msra.mxu3 %v3638_v57  ;;  %7981 = vst [vmem:[#allocation41_spill] sm:$0xff] %v3669_v58  ;;  %v3674_v57 = vld [vmem:[%s7592_s2 + $0x2b8] sm:$0xff] }
  0x52   :  { %599 = vmatpush.msra.mxu1 %v3645_v61  ;;  %7982 = vst [vmem:[#allocation42_spill] sm:$0xff] %v3674_v57  ;;  %v3681_v61 = vld [vmem:[%s7592_s2 + $0x2b0] sm:$0xff] }
  0x53   :  { %640 = vmatpush.msra.mxu3 %v3650_v2  ;;  %7983 = vst [vmem:[#allocation43_spill] sm:$0xff] %v3681_v61  ;;  %v3686_v2 = vld [vmem:[%s7592_s2 + $0x298] sm:$0xff] }
  0x54   :  { %600 = vmatpush.msra.mxu1 %v3657_v54  ;;  %7984 = vst [vmem:[#allocation44_spill] sm:$0xff] %v3686_v2  ;;  %v3693_v54 = vld [vmem:[%s7592_s2 + $0x290] sm:$0xff] }
  0x55   :  { %641 = vmatpush.msra.mxu3 %v3662_v63  ;;  %7985 = vst [vmem:[#allocation45_spill] sm:$0xff] %v3693_v54  ;;  %v3698_v63 = vld [vmem:[%s7592_s2 + $0x278] sm:$0xff] }
  0x56   :  { %601 = vmatpush.msra.mxu1 %v3669_v58  ;;  %7986 = vst [vmem:[#allocation46_spill] sm:$0xff] %v3698_v63  ;;  %v3705_v58 = vld [vmem:[%s7592_s2 + $0x270] sm:$0xff] }
  0x57   :  { %642 = vmatpush.msra.mxu3 %v3674_v57  ;;  %7987 = vst [vmem:[#allocation47_spill] sm:$0xff] %v3705_v58  ;;  %v3710_v57 = vld [vmem:[%s7592_s2 + $0x258] sm:$0xff] }
  0x58   :  { %602 = vmatpush.msra.mxu1 %v3681_v61  ;;  %7988 = vst [vmem:[#allocation48_spill] sm:$0xff] %v3710_v57  ;;  %v3717_v61 = vld [vmem:[%s7592_s2 + $0x250] sm:$0xff] }
  0x59   :  { %643 = vmatpush.msra.mxu3 %v3686_v2  ;;  %7989 = vst [vmem:[#allocation49_spill] sm:$0xff] %v3717_v61  ;;  %v3722_v2 = vld [vmem:[%s7592_s2 + $0x238] sm:$0xff] }
  0x5a   :  { %603 = vmatpush.msra.mxu1 %v3693_v54  ;;  %7990 = vst [vmem:[#allocation50_spill] sm:$0xff] %v3722_v2  ;;  %v3729_v54 = vld [vmem:[%s7592_s2 + $0x230] sm:$0xff] }
  0x5b   :  { %644 = vmatpush.msra.mxu3 %v3698_v63  ;;  %7991 = vst [vmem:[#allocation51_spill] sm:$0xff] %v3729_v54  ;;  %v3734_v63 = vld [vmem:[%s7592_s2 + $0x218] sm:$0xff] }
  0x5c   :  { %604 = vmatpush.msra.mxu1 %v3705_v58  ;;  %7992 = vst [vmem:[#allocation52_spill] sm:$0xff] %v3734_v63  ;;  %v338_v58 = vld [vmem:[%s7593_s3 + $0x3e8] sm:$0xff] }
  0x5d   :  { %645 = vmatpush.msra.mxu3 %v3710_v57  ;;  %v3744_v57 = vld [vmem:[%s7592_s2 + $0x210] sm:$0xff] }
  0x5e   :  { %605 = vmatpush.msra.mxu1 %v3717_v61  ;;  %7993 = vst [vmem:[#allocation53_spill] sm:$0xff] %v3744_v57  ;;  %v333_v61 = vld [vmem:[%s7593_s3 + $0x3c0] sm:$0xff] }
  0x5f   :  { %646 = vmatpush.msra.mxu3 %v3722_v2  ;;  %v334_v2 = vld [vmem:[%s7593_s3 + $0x3c8] sm:$0xff] }
  0x60   :  { %606 = vmatpush.msra.mxu1 %v3729_v54  ;;  %v330_v54 = vld [vmem:[%s7593_s3 + $0x3a8] sm:$0xff] }
  0x61   :  { %647 = vmatpush.msra.mxu3 %v3734_v63  ;;  %v329_v63 = vld [vmem:[%s7593_s3 + $0x3a0] sm:$0xff] }
  0x62   :  { %607 = vmatpush.msra.mxu1 %v3744_v57  ;;  %648 = vmatmul.f32.vlgmr.msra.gmra.mxu3 %v7966_v53  ;;  %v325_v57 = vld [vmem:[%s7593_s3 + $0x380] sm:$0xff] }
  0x63   :  { %742 = vmatpush.msrb.mxu3 %v338_v58  ;;  %v326_v58 = vld [vmem:[%s7593_s3 + $0x388] sm:$0xff]  ;;  %608 = vmatmul.f32.vlgmr.msra.gmra.mxu1 %v7966_v53 }
  0x64   :  { %702 = vmatpush.msrb.mxu1 %v337_v50  ;;  %v322_v50 = vld [vmem:[%s7593_s3 + $0x368] sm:$0xff] }
  0x65   :  { %743 = vmatpush.msrb.mxu3 %v334_v2  ;;  %v321_v2 = vld [vmem:[%s7593_s3 + $0x360] sm:$0xff] }
  0x66   :  { %703 = vmatpush.msrb.mxu1 %v333_v61  ;;  %v146_v61 = vld [vmem:[%s7592_s2 + $0x1e8] sm:$0xff] }
  0x67   :  { %744 = vmatpush.msrb.mxu3 %v330_v54  ;;  %v145_v54 = vld [vmem:[%s7592_s2 + $0x1e0] sm:$0xff]  ;;  %532 = vmatpush.msrb.mxu2 %v146_v61  ;;  %v138_v61 = vld [vmem:[%s7592_s2 + $0x1a8] sm:$0xff] }
  0x68   :  { %704 = vmatpush.msrb.mxu1 %v329_v63  ;;  %v317_v63 = vld [vmem:[%s7593_s3 + $0x340] sm:$0xff]  ;;  %492 = vmatpush.msrb.mxu0 %v145_v54 }
  0x69   :  { %745 = vmatpush.msrb.mxu3 %v326_v58  ;;  %v314_v58 = vld [vmem:[%s7593_s3 + $0x328] sm:$0xff]  ;;  %533 = vmatpush.msrb.mxu2 %v142_v45  ;;  %v137_v54 = vld [vmem:[%s7592_s2 + $0x1a0] sm:$0xff] }
  0x6a   :  { %705 = vmatpush.msrb.mxu1 %v325_v57  ;;  %v313_v57 = vld [vmem:[%s7593_s3 + $0x320] sm:$0xff]  ;;  %493 = vmatpush.msrb.mxu0 %v141_v46  ;;  %v134_v46 = vld [vmem:[%s7592_s2 + $0x188] sm:$0xff] }
  0x6b   :  { %746 = vmatpush.msrb.mxu3 %v322_v50  ;;  %v310_v50 = vld [vmem:[%s7593_s3 + $0x308] sm:$0xff]  ;;  %534 = vmatpush.msrb.mxu2 %v138_v61  ;;  %v133_v45 = vld [vmem:[%s7592_s2 + $0x180] sm:$0xff] }
  0x6c   :  { %706 = vmatpush.msrb.mxu1 %v321_v2  ;;  %v306_v2 = vld [vmem:[%s7593_s3 + $0x2e8] sm:$0xff]  ;;  %494 = vmatpush.msrb.mxu0 %v137_v54  ;;  %v129_v54 = vld [vmem:[%s7592_s2 + $0x160] sm:$0xff] }
  0x6d   :  { %747 = vmatpush.msrb.mxu3 %v318_v49  ;;  %v309_v49 = vld [vmem:[%s7593_s3 + $0x300] sm:$0xff]  ;;  %535 = vmatpush.msrb.mxu2 %v134_v46  ;;  %v130_v61 = vld [vmem:[%s7592_s2 + $0x168] sm:$0xff] }
  0x6e   :  { %707 = vmatpush.msrb.mxu1 %v317_v63  ;;  %v305_v63 = vld [vmem:[%s7593_s3 + $0x2e0] sm:$0xff]  ;;  %495 = vmatpush.msrb.mxu0 %v133_v45  ;;  %v290_v46 = vld [vmem:[%s7593_s3 + $0x268] sm:$0xff] }
  0x6f   :  { %748 = vmatpush.msrb.mxu3 %v314_v58  ;;  %v302_v58 = vld [vmem:[%s7593_s3 + $0x2c8] sm:$0xff]  ;;  %536 = vmatpush.msrb.mxu2 %v130_v61  ;;  %v297_v45 = vld [vmem:[%s7593_s3 + $0x2a0] sm:$0xff] }
  0x70   :  { %708 = vmatpush.msrb.mxu1 %v313_v57  ;;  %v301_v57 = vld [vmem:[%s7593_s3 + $0x2c0] sm:$0xff]  ;;  %496 = vmatpush.msrb.mxu0 %v129_v54  ;;  %v282_v61 = vld [vmem:[%s7593_s3 + $0x228] sm:$0xff] }
  0x71   :  { %749 = vmatpush.msrb.mxu3 %v310_v50  ;;  %v298_v50 = vld [vmem:[%s7593_s3 + $0x2a8] sm:$0xff]  ;;  %v285_v54 = vld [vmem:[%s7593_s3 + $0x240] sm:$0xff] }
  0x72   :  { %709 = vmatpush.msrb.mxu1 %v309_v49  ;;  %v294_v49 = vld [vmem:[%s7593_s3 + $0x288] sm:$0xff] }
  0x73   :  { %750 = vmatpush.msrb.mxu3 %v306_v2  ;;  %v293_v2 = vld [vmem:[%s7593_s3 + $0x280] sm:$0xff] }
  0x74   :  { %710 = vmatpush.msrb.mxu1 %v305_v63  ;;  %v289_v63 = vld [vmem:[%s7593_s3 + $0x260] sm:$0xff] }
  0x75   :  { %751 = vmatpush.msrb.mxu3 %v302_v58  ;;  %v286_v58 = vld [vmem:[%s7593_s3 + $0x248] sm:$0xff] }
  0x76   :  { %711 = vmatpush.msrb.mxu1 %v301_v57  ;;  %v281_v57 = vld [vmem:[%s7593_s3 + $0x220] sm:$0xff] }
  0x77   :  { %752 = vmatpush.msrb.mxu3 %v298_v50  ;;  %v278_v50 = vld [vmem:[%s7593_s3 + $0x208] sm:$0xff] }
  0x78   :  { %712 = vmatpush.msrb.mxu1 %v297_v45  ;;  %v340_v45 = vld [vmem:[%s7593_s3 + $0x3f8] sm:$0xff] }
  0x79   :  { %753 = vmatpush.msrb.mxu3 %v294_v49  ;;  %v277_v49 = vld [vmem:[%s7593_s3 + $0x200] sm:$0xff] }
  0x7a   :  { %713 = vmatpush.msrb.mxu1 %v293_v2  ;;  %v339_v2 = vld [vmem:[%s7593_s3 + $0x3f0] sm:$0xff] }
  0x7b   :  { %754 = vmatpush.msrb.mxu3 %v290_v46  ;;  %v336_v46 = vld [vmem:[%s7593_s3 + $0x3d8] sm:$0xff] }
  0x7c   :  { %714 = vmatpush.msrb.mxu1 %v289_v63  ;;  %v335_v63 = vld [vmem:[%s7593_s3 + $0x3d0] sm:$0xff] }
  0x7d   :  { %755 = vmatpush.msrb.mxu3 %v286_v58  ;;  %v332_v58 = vld [vmem:[%s7593_s3 + $0x3b8] sm:$0xff] }
  0x7e   :  { %715 = vmatpush.msrb.mxu1 %v285_v54  ;;  %v125_v54 = vld [vmem:[%s7592_s2 + $0x140] sm:$0xff] }
  0x7f   :  { %756 = vmatpush.msrb.mxu3 %v282_v61  ;;  %v126_v61 = vld [vmem:[%s7592_s2 + $0x148] sm:$0xff]  ;;  %497 = vmatpush.msrb.mxu0 %v125_v54  ;;  %v117_v54 = vld [vmem:[%s7592_s2 + $0x100] sm:$0xff] }
  0x80   :  { %716 = vmatpush.msrb.mxu1 %v281_v57  ;;  %v331_v57 = vld [vmem:[%s7593_s3 + $0x3b0] sm:$0xff]  ;;  %537 = vmatpush.msrb.mxu2 %v126_v61  ;;  %v118_v61 = vld [vmem:[%s7592_s2 + $0x108] sm:$0xff] }
  0x81   :  { %757 = vmatpush.msrb.mxu3 %v278_v50  ;;  %v328_v50 = vld [vmem:[%s7593_s3 + $0x398] sm:$0xff] }
  0x82   :  { %717 = vmatpush.msrb.mxu1 %v277_v49  ;;  %758 = vmatmul.f32.vlgmr.msrb.gmra.mxu3 %v7966_v53  ;;  %v324_v49 = vld [vmem:[%s7593_s3 + $0x378] sm:$0xff] }
  0x83   :  { %822 = vmatpush.msra.mxu3 %v340_v45  ;;  %v327_v45 = vld [vmem:[%s7593_s3 + $0x390] sm:$0xff]  ;;  %718 = vmatmul.f32.vlgmr.msrb.gmra.mxu1 %v7966_v53 }
  0x84   :  { %782 = vmatpush.msra.mxu1 %v339_v2  ;;  %v121_v2 = vld [vmem:[%s7592_s2 + $0x120] sm:$0xff] }
  0x85   :  { %823 = vmatpush.msra.mxu3 %v336_v46  ;;  %v122_v46 = vld [vmem:[%s7592_s2 + $0x128] sm:$0xff]  ;;  %498 = vmatpush.msrb.mxu0 %v121_v2  ;;  %v113_v2 = vld [vmem:[%s7592_s2 + $0xe0] sm:$0xff] }
  0x86   :  { %783 = vmatpush.msra.mxu1 %v335_v63  ;;  %v323_v63 = vld [vmem:[%s7593_s3 + $0x370] sm:$0xff]  ;;  %538 = vmatpush.msrb.mxu2 %v122_v46  ;;  %v114_v46 = vld [vmem:[%s7592_s2 + $0xe8] sm:$0xff] }
  0x87   :  { %824 = vmatpush.msra.mxu3 %v332_v58  ;;  %v320_v58 = vld [vmem:[%s7593_s3 + $0x358] sm:$0xff]  ;;  %499 = vmatpush.msrb.mxu0 %v117_v54  ;;  %v109_v54 = vld [vmem:[%s7592_s2 + $0xc0] sm:$0xff] }
  0x88   :  { %784 = vmatpush.msra.mxu1 %v331_v57  ;;  %v319_v57 = vld [vmem:[%s7593_s3 + $0x350] sm:$0xff]  ;;  %539 = vmatpush.msrb.mxu2 %v118_v61  ;;  %v110_v61 = vld [vmem:[%s7592_s2 + $0xc8] sm:$0xff] }
  0x89   :  { %825 = vmatpush.msra.mxu3 %v328_v50  ;;  %v316_v50 = vld [vmem:[%s7593_s3 + $0x338] sm:$0xff]  ;;  %500 = vmatpush.msrb.mxu0 %v113_v2  ;;  %v105_v2 = vld [vmem:[%s7592_s2 + $0xa0] sm:$0xff] }
  0x8a   :  { %785 = vmatpush.msra.mxu1 %v327_v45  ;;  %v315_v45 = vld [vmem:[%s7593_s3 + $0x330] sm:$0xff]  ;;  %540 = vmatpush.msrb.mxu2 %v114_v46  ;;  %v106_v46 = vld [vmem:[%s7592_s2 + $0xa8] sm:$0xff] }
  0x8b   :  { %826 = vmatpush.msra.mxu3 %v324_v49  ;;  %v312_v49 = vld [vmem:[%s7593_s3 + $0x318] sm:$0xff]  ;;  %501 = vmatpush.msrb.mxu0 %v109_v54  ;;  %v101_v54 = vld [vmem:[%s7592_s2 + $0x80] sm:$0xff] }
  0x8c   :  { %786 = vmatpush.msra.mxu1 %v323_v63  ;;  %v311_v63 = vld [vmem:[%s7593_s3 + $0x310] sm:$0xff]  ;;  %541 = vmatpush.msrb.mxu2 %v110_v61  ;;  %v102_v61 = vld [vmem:[%s7592_s2 + $0x88] sm:$0xff] }
  0x8d   :  { %827 = vmatpush.msra.mxu3 %v320_v58  ;;  %v308_v58 = vld [vmem:[%s7593_s3 + $0x2f8] sm:$0xff]  ;;  %502 = vmatpush.msrb.mxu0 %v105_v2  ;;  %v97_v2 = vld [vmem:[%s7592_s2 + $0x60] sm:$0xff] }
  0x8e   :  { %787 = vmatpush.msra.mxu1 %v319_v57  ;;  %v307_v57 = vld [vmem:[%s7593_s3 + $0x2f0] sm:$0xff]  ;;  %542 = vmatpush.msrb.mxu2 %v106_v46  ;;  %v98_v46 = vld [vmem:[%s7592_s2 + $0x68] sm:$0xff] }
  0x8f   :  { %828 = vmatpush.msra.mxu3 %v316_v50  ;;  %v304_v50 = vld [vmem:[%s7593_s3 + $0x2d8] sm:$0xff]  ;;  %503 = vmatpush.msrb.mxu0 %v101_v54  ;;  %v93_v54 = vld [vmem:[%s7592_s2 + $0x40] sm:$0xff] }
  0x90   :  { %788 = vmatpush.msra.mxu1 %v315_v45  ;;  %v303_v45 = vld [vmem:[%s7593_s3 + $0x2d0] sm:$0xff]  ;;  %543 = vmatpush.msrb.mxu2 %v102_v61  ;;  %v94_v61 = vld [vmem:[%s7592_s2 + $0x48] sm:$0xff] }
  0x91   :  { %829 = vmatpush.msra.mxu3 %v312_v49  ;;  %v300_v49 = vld [vmem:[%s7593_s3 + $0x2b8] sm:$0xff]  ;;  %504 = vmatpush.msrb.mxu0 %v97_v2  ;;  %v89_v2 = vld [vmem:[%s7592_s2 + $0x20] sm:$0xff] }
  0x92   :  { %789 = vmatpush.msra.mxu1 %v311_v63  ;;  %v299_v63 = vld [vmem:[%s7593_s3 + $0x2b0] sm:$0xff]  ;;  %544 = vmatpush.msrb.mxu2 %v98_v46  ;;  %v90_v46 = vld [vmem:[%s7592_s2 + $0x28] sm:$0xff] }
  0x93   :  { %830 = vmatpush.msra.mxu3 %v308_v58  ;;  %v296_v58 = vld [vmem:[%s7593_s3 + $0x298] sm:$0xff]  ;;  %505 = vmatpush.msrb.mxu0 %v93_v54  ;;  %v85_v54 = vld [vmem:[%s7592_s2] sm:$0xff] }
  0x94   :  { %790 = vmatpush.msra.mxu1 %v307_v57  ;;  %v295_v57 = vld [vmem:[%s7593_s3 + $0x290] sm:$0xff]  ;;  %545 = vmatpush.msrb.mxu2 %v94_v61  ;;  %v86_v61 = vld [vmem:[%s7592_s2 + $0x8] sm:$0xff] }
  0x95   :  { %831 = vmatpush.msra.mxu3 %v304_v50  ;;  %v292_v50 = vld [vmem:[%s7593_s3 + $0x278] sm:$0xff]  ;;  %506 = vmatpush.msrb.mxu0 %v89_v2 }
  0x96   :  { %791 = vmatpush.msra.mxu1 %v303_v45  ;;  %v291_v45 = vld [vmem:[%s7593_s3 + $0x270] sm:$0xff]  ;;  %546 = vmatpush.msrb.mxu2 %v90_v46  ;;  %v148_v2 = vld [vmem:[%s7592_s2 + $0x1f8] sm:$0xff] }
  0x97   :  { %832 = vmatpush.msra.mxu3 %v300_v49  ;;  %v288_v49 = vld [vmem:[%s7593_s3 + $0x258] sm:$0xff]  ;;  %v287_v46 = vld [vmem:[%s7593_s3 + $0x250] sm:$0xff]  ;;  %507 = vmatpush.msrb.mxu0 %v85_v54 }
  0x98   :  { %792 = vmatpush.msra.mxu1 %v299_v63  ;;  %v341_v63 = vld [vmem:[%s7594_s4] sm:$0xf]  ;;  %547 = vmatpush.msrb.mxu2 %v86_v61  ;;  %v280_v54 = vld [vmem:[%s7593_s3 + $0x218] sm:$0xff]  ;;  %v139_v61 = vld [vmem:[%s7592_s2 + $0x1b0] sm:$0xff] }
  0x99   :  { %833 = vmatpush.msra.mxu3 %v296_v58  ;;  %v147_v58 = vld [vmem:[%s7592_s2 + $0x1f0] sm:$0xff]  ;;  %v444_v41 = vperm.slane %v341_v63, 1 }
  0x9a   :  { %793 = vmatpush.msra.mxu1 %v295_v57  ;;  %v143_v57 = vld [vmem:[%s7592_s2 + $0x1d0] sm:$0xff]  ;;  %572 = vmatpush.msra.mxu0 %v147_v58  ;;  %v443_v58 = vperm.slane %v341_v63, 0 }
  0x9b   :  { %834 = vmatpush.msra.mxu3 %v292_v50  ;;  %v144_v50 = vld [vmem:[%s7592_s2 + $0x1d8] sm:$0xff]  ;;  %612 = vmatpush.msra.mxu2 %v148_v2  ;;  %v447_v2 = vrot.slane %v444_v41, 6 }
  0x9c   :  { %794 = vmatpush.msra.mxu1 %v291_v45  ;;  %v445_v45 = vperm.slane %v341_v63, 2  ;;  %573 = vmatpush.msra.mxu0 %v143_v57  ;;  %v132_v41 = vld [vmem:[%s7592_s2 + $0x178] sm:$0xff] }
  0x9d   :  { %835 = vmatpush.msra.mxu3 %v288_v49  ;;  %v446_v49 = vperm.slane %v341_v63, 3  ;;  %613 = vmatpush.msra.mxu2 %v144_v50 }
  0x9e   :  { %795 = vmatpush.msra.mxu1 %v287_v46  ;;  %574 = vmatpush.msra.mxu0 %v139_v61  ;;  %v136_v46 = vld [vmem:[%s7592_s2 + $0x198] sm:$0xff]  ;;  %v448_v57 = vrot.slane %v445_v45, 4 }
  0x9f   :  { %836 = vmatpush.msra.mxu3 %v284_v42  ;;  %v135_v42 = vld [vmem:[%s7592_s2 + $0x190] sm:$0xff]  ;;  %v449_v50 = vrot.slane %v446_v49, 2  ;;  %614 = vmatpush.msra.mxu2 %v140_v34 }
  0xa0   :  { %796 = vmatpush.msra.mxu1 %v283_v38  ;;  %v384_v33 = vpop.f32.mrf.mxu1  ;;  %575 = vmatpush.msra.mxu0 %v135_v42 }
  0xa1   :  { %837 = vmatpush.msra.mxu3 %v280_v54  ;;  %v364_v38 = vpop.f32.mrf.mxu0  ;;  %v431_v63 = vrot.slane %v384_v33, 6  ;;  %615 = vmatpush.msra.mxu2 %v136_v46  ;;  %v450_v54 = vsel %vm434_vm0, %v443_v58, %v447_v2  ;;  %v451_v61 = vsel %vm436_vm1, %v448_v57, %v449_v50  ;;  %v4098_v58 = vld [vmem:[%s7592_s2 + $0x138] sm:$0xff] }
  0xa2   :  { %797 = vmatpush.msra.mxu1 %v279_v37  ;;  %v4115_v46 = vld [vmem:[%s7592_s2 + $0x118] sm:$0xff]  ;;  %838 = vmatmul.f32.vlgmr.msra.gmra.mxu3 %v7966_v53 }
  0xa3   :  { %926 = vmatpush.msrb.mxu3 %v3074_v1  ;;  %v131_v1 = vld [vmem:[%s7592_s2 + $0x170] sm:$0xff]  ;;  %v435_v49 = vsel %vm434_vm0, %v364_v38, %v431_v63  ;;  %616 = vmatpush.msra.mxu2 %v132_v41 }
  0xa4   :  { %886 = vmatpush.msrb.mxu1 %v3096_v6  ;;  %v404_v37 = vpop.f32.mrf.mxu2  ;;  %v424_v34 = vpop.f32.mrf.mxu3  ;;  %v128_v6 = vld [vmem:[%s7592_s2 + $0x158] sm:$0xff]  ;;  %576 = vmatpush.msra.mxu0 %v131_v1 }
  0xa5   :  { %927 = vmatpush.msrb.mxu3 %v3083_v3  ;;  %v127_v3 = vld [vmem:[%s7592_s2 + $0x150] sm:$0xff]  ;;  %v432_v33 = vrot.slane %v404_v37, 4  ;;  %v433_v45 = vrot.slane %v424_v34, 2  ;;  %617 = vmatpush.msra.mxu2 %v128_v6 }
  0xa6   :  { %887 = vmatpush.msrb.mxu1 %v3105_v8  ;;  %v4093_v8 = vld [vmem:[%s7592_s2 + $0x130] sm:$0xff]  ;;  %577 = vmatpush.msra.mxu0 %v127_v3  ;;  %v4224_v3 = vld [vmem:[%s7592_s2 + $0x38] sm:$0xff] }
  0xa7   :  { %928 = vmatpush.msrb.mxu3 %v3091_v5  ;;  %v346_v5 = vld [vmem:[%s7590_s0] sm:$0xff]  ;;  %v437_v2 = vsel %vm436_vm1, %v432_v33, %v433_v45  ;;  %618 = vmatpush.msra.mxu2 %v4098_v58  ;;  %v4238_v33 = vld [vmem:[%s7592_s2 + $0x18] sm:$0xff] }
  0xa8   :  { %888 = vmatpush.msrb.mxu1 %v3123_v12  ;;  %v439_v42 = vsel %vm438_vm2, %v435_v49, %v437_v2  ;;  %v4103_v12 = vsel %vm438_vm2, %v450_v54, %v451_v61  ;;  %578 = vmatpush.msra.mxu0 %v4093_v8  ;;  %v8006_v2 = vld [vmem:[#allocation17_spill] sm:$0xff] }
  0xa9   :  { %929 = vmatpush.msrb.mxu3 %v3114_v10  ;;  %v4110_v10 = vld [vmem:[%s7592_s2 + $0x110] sm:$0xff]  ;;  %v441_v57 = vadd.f32 %v439_v42, %v346_v5  ;;  %619 = vmatpush.msra.mxu2 %v4115_v46  ;;  %v8005_v5 = vld [vmem:[#allocation16_spill] sm:$0xff] }
  0xaa   :  { %889 = vmatpush.msrb.mxu1 %v3141_v16  ;;  %579 = vmatpush.msra.mxu0 %v4110_v10  ;;  %v4131_v16 = vld [vmem:[%s7592_s2 + $0xf0] sm:$0xff] }
  0xab   :  { %930 = vmatpush.msrb.mxu3 %v3135_v15  ;;  %v4122_v15 = vadd.f32 %v4103_v12, %v441_v57  ;;  %798 = vmatmul.f32.vlgmr.msra.gmra.mxu1 %v7966_v53  ;;  %v8007_v42 = vld [vmem:[#allocation18_spill] sm:$0xff]  ;;  %v8008_v57 = vld [vmem:[#allocation19_spill] sm:$0xff] }
  0xac   :  { %890 = vmatpush.msrb.mxu1 %v3159_v20  ;;  %580 = vmatpush.msra.mxu0 %v4131_v16 }
  0xad   :  { %931 = vmatpush.msrb.mxu3 %v3153_v19  ;;  %v4136_v19 = vld [vmem:[%s7592_s2 + $0xf8] sm:$0xff]  ;;  %v455_v20 = vsub.f32 0.0, %v4122_v15  ;;  %v461_v50 = vrot.slane %v4122_v15, 2  ;;  %v471_v38 = vrot.slane %v4122_v15, 6  ;;  %v468_v54 = vrot.slane %v4122_v15, 4 }
  0xae   :  { %891 = vmatpush.msrb.mxu1 %v3177_v24  ;;  %v4153_v24 = vld [vmem:[%s7592_s2 + $0xd8] sm:$0xff]  ;;  %620 = vmatpush.msra.mxu2 %v4136_v19 }
  0xaf   :  { %932 = vmatpush.msrb.mxu3 %v3171_v23  ;;  %v4148_v23 = vld [vmem:[%s7592_s2 + $0xd0] sm:$0xff]  ;;  %v456_v1 = vmul.f32 1.442695, %v455_v20  ;;  %v463_v41 = vsub.f32 0.0, %v461_v50  ;;  %v473_v63 = vsub.f32 0.0, %v471_v38  ;;  %v8009_v15 = vld [vmem:[#allocation20_spill] sm:$0xff] }
  0xb0   :  { %892 = vmatpush.msrb.mxu1 %v3195_v28  ;;  %v4167_v28 = vld [vmem:[%s7592_s2 + $0xb8] sm:$0xff]  ;;  %581 = vmatpush.msra.mxu0 %v4148_v23  ;;  %v8010_v20 = vld [vmem:[#allocation21_spill] sm:$0xff]  ;;  %v8011_v50 = vld [vmem:[#allocation22_spill] sm:$0xff] }
  0xb1   :  { %933 = vmatpush.msrb.mxu3 %v3189_v27  ;;  %v4162_v27 = vld [vmem:[%s7592_s2 + $0xb0] sm:$0xff]  ;;  %2346 = vpow2.f32 %v456_v1  ;;  %v464_v53 = vmul.f32 1.442695, %v463_v41  ;;  %621 = vmatpush.msra.mxu2 %v4153_v24  ;;  %v474_v37 = vmul.f32 1.442695, %v473_v63  ;;  %v8013_v1 = vld [vmem:[#allocation24_spill] sm:$0xff] }
  0xb2   :  { %893 = vmatpush.msrb.mxu1 %v3213_v32  ;;  %v4181_v32 = vld [vmem:[%s7592_s2 + $0x98] sm:$0xff]  ;;  %582 = vmatpush.msra.mxu0 %v4162_v27  ;;  %v270_v41 = vld [vmem:[%s7593_s3 + $0x1c8] sm:$0xff] }
  0xb3   :  { %934 = vmatpush.msrb.mxu3 %v3207_v31  ;;  %v4176_v31 = vld [vmem:[%s7592_s2 + $0x90] sm:$0xff]  ;;  %2348 = vpow2.f32 %v464_v53  ;;  %622 = vmatpush.msra.mxu2 %v4167_v28  ;;  %v265_v53 = vld [vmem:[%s7593_s3 + $0x1a0] sm:$0xff]  ;;  %v266_v63 = vld [vmem:[%s7593_s3 + $0x1a8] sm:$0xff] }
  0xb4   :  { %894 = vmatpush.msrb.mxu1 %v3231_v36  ;;  %v4195_v36 = vld [vmem:[%s7592_s2 + $0x78] sm:$0xff]  ;;  %583 = vmatpush.msra.mxu0 %v4176_v31  ;;  %2350 = vpow2.f32 %v474_v37  ;;  %v261_v37 = vld [vmem:[%s7593_s3 + $0x180] sm:$0xff] }
  0xb5   :  { %935 = vmatpush.msrb.mxu3 %v3225_v35  ;;  %v4190_v35 = vld [vmem:[%s7592_s2 + $0x70] sm:$0xff]  ;;  %623 = vmatpush.msra.mxu2 %v4181_v32 }
  0xb6   :  { %895 = vmatpush.msrb.mxu1 %v3249_v40  ;;  %v4209_v40 = vld [vmem:[%s7592_s2 + $0x58] sm:$0xff]  ;;  %584 = vmatpush.msra.mxu0 %v4190_v35 }
  0xb7   :  { %936 = vmatpush.msrb.mxu3 %v3243_v39  ;;  %v4204_v39 = vld [vmem:[%s7592_s2 + $0x50] sm:$0xff]  ;;  %v2347_v34 = vpop.eup %2346  ;;  %624 = vmatpush.msra.mxu2 %v4195_v36 }
  0xb8   :  { %896 = vmatpush.msrb.mxu1 %v3267_v44  ;;  %v458_v44 = vadd.f32 1.0, %v2347_v34  ;;  %585 = vmatpush.msra.mxu0 %v4204_v39  ;;  %v8012_v38 = vld [vmem:[#allocation23_spill] sm:$0xff]  ;;  %v262_v34 = vld [vmem:[%s7593_s3 + $0x188] sm:$0xff] }
  0xb9   :  { %937 = vmatpush.msrb.mxu3 %v3261_v43  ;;  %v4219_v43 = vld [vmem:[%s7592_s2 + $0x30] sm:$0xff]  ;;  %v2349_v6 = vpop.eup %2348  ;;  %625 = vmatpush.msra.mxu2 %v4209_v40 }
  0xba   :  { %897 = vmatpush.msrb.mxu1 %v3285_v48  ;;  %2352 = vrcp.f32 %v458_v44  ;;  %v466_v48 = vadd.f32 1.0, %v2349_v6  ;;  %586 = vmatpush.msra.mxu0 %v4219_v43  ;;  %v8014_v44 = vld [vmem:[#allocation25_spill] sm:$0xff]  ;;  %v8015_v6 = vld [vmem:[#allocation26_spill] sm:$0xff] }
  0xbb   :  { %938 = vmatpush.msrb.mxu3 %v3279_v47  ;;  %v4233_v47 = vld [vmem:[%s7592_s2 + $0x10] sm:$0xff]  ;;  %2354 = vtanh.f32 %v468_v54  ;;  %626 = vmatpush.msra.mxu2 %v4224_v3  ;;  %v257_v54 = vld [vmem:[%s7593_s3 + $0x160] sm:$0xff] }
  0xbc   :  { %898 = vmatpush.msrb.mxu1 %v3303_v52  ;;  %2356 = vrcp.f32 %v466_v48  ;;  %587 = vmatpush.msra.mxu0 %v4233_v47  ;;  %v258_v48 = vld [vmem:[%s7593_s3 + $0x168] sm:$0xff] }
  0xbd   :  { %939 = vmatpush.msrb.mxu3 %v3297_v51  ;;  %627 = vmatpush.msra.mxu2 %v4238_v33  ;;  %v2351_v51 = vpop.eup %2350 }
  0xbe   :  { %899 = vmatpush.msrb.mxu1 %v3321_v56  ;;  %v476_v56 = vadd.f32 1.0, %v2351_v51  ;;  %v253_v51 = vld [vmem:[%s7593_s3 + $0x140] sm:$0xff] }
  0xbf   :  { %940 = vmatpush.msrb.mxu3 %v3315_v55 }
  0xc0   :  { %900 = vmatpush.msrb.mxu1 %v3340_v60  ;;  %v2353_v52 = vpop.eup %2352  ;;  %2358 = vrcp.f32 %v476_v56  ;;  %v8018_v56 = vld [vmem:[#allocation29_spill] sm:$0xff] }
  0xc1   :  { %941 = vmatpush.msrb.mxu3 %v3333_v59  ;;  %v2355_v45 = vpop.eup %2354 }
  0xc2   :  { %901 = vmatpush.msrb.mxu1 %v3356_v0  ;;  %v2357_v55 = vpop.eup %2356  ;;  %v479_v61 = vmul.f32 %v2355_v45, %v2353_v52  ;;  %v8016_v52 = vld [vmem:[#allocation27_spill] sm:$0xff]  ;;  %v8017_v45 = vld [vmem:[#allocation28_spill] sm:$0xff] }
  0xc3   :  { %1047 = vmatpush.msra.mxu3 %v3349_v62  ;;  %v478_v49 = vmul.f32 0.0, %v2357_v55  ;;  %v254_v55 = vld [vmem:[%s7593_s3 + $0x148] sm:$0xff] }
  0xc4   :  { %1007 = vmatpush.msra.mxu1 %v3365_v4  ;;  %v273_v4 = vld [vmem:[%s7593_s3 + $0x1e0] sm:$0xff] }
  0xc5   :  { %1048 = vmatpush.msra.mxu3 %v3371_v7  ;;  %v4254_v59 = vadd.f32 %v479_v61, %v478_v49  ;;  %v274_v7 = vld [vmem:[%s7593_s3 + $0x1e8] sm:$0xff]  ;;  %v8020_v61 = vld [vmem:[#allocation31_spill] sm:$0xff] }
  0xc6   :  { %1008 = vmatpush.msra.mxu1 %v3379_v9  ;;  %v2359_v60 = vpop.eup %2358  ;;  %v7994_v9 = vld [vmem:[#allocation5_spill] sm:$0xff]  ;;  %v8019_v49 = vld [vmem:[#allocation30_spill] sm:$0xff] }
  0xc7   :  { %1049 = vmatpush.msra.mxu3 %v3384_v11  ;;  %2360 = vtanh.f32 %v4254_v59  ;;  %v7995_v11 = vld [vmem:[#allocation6_spill] sm:$0xff] }
  0xc8   :  { %1009 = vmatpush.msra.mxu1 %v3391_v13  ;;  %v269_v13 = vld [vmem:[%s7593_s3 + $0x1c0] sm:$0xff] }
  0xc9   :  { %1050 = vmatpush.msra.mxu3 %v3396_v14  ;;  %v7996_v14 = vld [vmem:[#allocation7_spill] sm:$0xff] }
  0xca   :  { %1010 = vmatpush.msra.mxu1 %v3403_v17  ;;  %v7997_v17 = vld [vmem:[#allocation8_spill] sm:$0xff] }
  0xcb   :  { %1051 = vmatpush.msra.mxu3 %v3408_v18  ;;  %v7998_v18 = vld [vmem:[#allocation9_spill] sm:$0xff] }
  0xcc   :  { %1011 = vmatpush.msra.mxu1 %v3415_v21  ;;  %v7999_v21 = vld [vmem:[#allocation10_spill] sm:$0xff] }
  0xcd   :  { %1052 = vmatpush.msra.mxu3 %v3420_v22  ;;  %v2361_v62 = vpop.eup %2360  ;;  %v8000_v22 = vld [vmem:[#allocation11_spill] sm:$0xff] }
  0xce   :  { %1012 = vmatpush.msra.mxu1 %v3427_v25  ;;  %v4267_v0 = vmul.f32 %v2361_v62, %v2359_v60  ;;  %v8001_v25 = vld [vmem:[#allocation12_spill] sm:$0xff]  ;;  %v8022_v62 = vld [vmem:[#allocation33_spill] sm:$0xff] }
  0xcf   :  { %1053 = vmatpush.msra.mxu3 %v3432_v26  ;;  %v8002_v26 = vld [vmem:[#allocation13_spill] sm:$0xff]  ;;  %v8021_v60 = vld [vmem:[#allocation32_spill] sm:$0xff] }
  0xd0   :  { %1013 = vmatpush.msra.mxu1 %v3439_v29  ;;  %508 = vmatmul.f32.vlgmr.msrb.gmra.mxu0 %v4267_v0  ;;  %v8003_v29 = vld [vmem:[#allocation14_spill] sm:$0xff] }
  0xd1   :  { %1054 = vmatpush.msra.mxu3 %v3444_v30  ;;  %548 = vmatmul.f32.vlgmr.msrb.gmra.mxu2 %v4267_v0  ;;  %v8004_v30 = vld [vmem:[#allocation15_spill] sm:$0xff] }
  0xd2   :  { %1014 = vmatpush.msra.mxu1 %v7994_v9  ;;  %942 = vmatmul.f32.vlgmr.msrb.gmra.mxu3 %v4267_v0  ;;  %v8025_v9 = vld [vmem:[#allocation36_spill] sm:$0xff] }
  0xd3   :  { %1055 = vmatpush.msra.mxu3 %v7995_v11  ;;  %902 = vmatmul.f32.vlgmr.msrb.gmra.mxu1 %v4267_v0  ;;  %v8026_v11 = vld [vmem:[#allocation37_spill] sm:$0xff] }
  0xd4   :  { %682 = vmatpush.msrb.mxu0 %v273_v4  ;;  %722 = vmatpush.msrb.mxu2 %v274_v7  ;;  %v8023_v4 = vld [vmem:[#allocation34_spill] sm:$0xff]  ;;  %v8024_v7 = vld [vmem:[#allocation35_spill] sm:$0xff] }
  0xd5   :  { %1015 = vmatpush.msra.mxu1 %v7996_v14  ;;  %1056 = vmatpush.msra.mxu3 %v7997_v17  ;;  %v8028_v14 = vld [vmem:[#allocation39_spill] sm:$0xff]  ;;  %v8029_v17 = vld [vmem:[#allocation40_spill] sm:$0xff] }
  0xd6   :  { %683 = vmatpush.msrb.mxu0 %v269_v13  ;;  %723 = vmatpush.msrb.mxu2 %v270_v41  ;;  %v8027_v13 = vld [vmem:[#allocation38_spill] sm:$0xff] }
  0xd7   :  { %1016 = vmatpush.msra.mxu1 %v7998_v18  ;;  %1057 = vmatpush.msra.mxu3 %v7999_v21  ;;  %v8030_v18 = vld [vmem:[#allocation41_spill] sm:$0xff]  ;;  %v8031_v21 = vld [vmem:[#allocation42_spill] sm:$0xff] }
  0xd8   :  { %588 = vmatmul.f32.vlgmr.msra.gmra.mxu0 %v4267_v0  ;;  %724 = vmatpush.msrb.mxu2 %v266_v63  ;;  %v4380_v41 = vld [vmem:[%s7593_s3 + $0x108] sm:$0xff] }
  0xd9   :  { %1017 = vmatpush.msra.mxu1 %v8000_v22  ;;  %1058 = vmatpush.msra.mxu3 %v8001_v25  ;;  %v8032_v22 = vld [vmem:[#allocation43_spill] sm:$0xff]  ;;  %v8033_v25 = vld [vmem:[#allocation44_spill] sm:$0xff]  ;;  %v4390_v63 = vld [vmem:[%s7593_s3 + $0xe8] sm:$0xff] }
  0xda   :  { %628 = vmatmul.f32.vlgmr.msra.gmra.mxu2 %v4267_v0  ;;  %684 = vmatpush.msrb.mxu0 %v265_v53  ;;  %v4385_v53 = vld [vmem:[%s7593_s3 + $0xe0] sm:$0xff] }
  0xdb   :  { %1018 = vmatpush.msra.mxu1 %v8002_v26  ;;  %1059 = vmatpush.msra.mxu3 %v8003_v29  ;;  %v8034_v26 = vld [vmem:[#allocation45_spill] sm:$0xff]  ;;  %v8035_v29 = vld [vmem:[#allocation46_spill] sm:$0xff] }
  0xdc   :  { %685 = vmatpush.msrb.mxu0 %v261_v37  ;;  %725 = vmatpush.msrb.mxu2 %v262_v34  ;;  %v4399_v37 = vld [vmem:[%s7593_s3 + $0xc0] sm:$0xff]  ;;  %v4404_v34 = vld [vmem:[%s7593_s3 + $0xc8] sm:$0xff] }
  0xdd   :  { %1019 = vmatpush.msra.mxu1 %v8004_v30  ;;  %1060 = vmatpush.msra.mxu3 %v8005_v5  ;;  %v8036_v30 = vld [vmem:[#allocation47_spill] sm:$0xff]  ;;  %v8037_v5 = vld [vmem:[#allocation48_spill] sm:$0xff] }
  0xde   :  { %686 = vmatpush.msrb.mxu0 %v257_v54  ;;  %726 = vmatpush.msrb.mxu2 %v258_v48  ;;  %v4411_v54 = vld [vmem:[%s7593_s3 + $0xa0] sm:$0xff]  ;;  %v4428_v48 = vld [vmem:[%s7593_s3 + $0x88] sm:$0xff] }
  0xdf   :  { %1020 = vmatpush.msra.mxu1 %v8006_v2  ;;  %1061 = vmatpush.msra.mxu3 %v8007_v42  ;;  %v8038_v2 = vld [vmem:[#allocation49_spill] sm:$0xff]  ;;  %v8039_v42 = vld [vmem:[#allocation50_spill] sm:$0xff] }
  0xe0   :  { %687 = vmatpush.msrb.mxu0 %v253_v51  ;;  %727 = vmatpush.msrb.mxu2 %v254_v55  ;;  %v4435_v51 = vld [vmem:[%s7593_s3 + $0x60] sm:$0xff]  ;;  %v4452_v55 = vld [vmem:[%s7593_s3 + $0x48] sm:$0xff] }
  0xe1   :  { %1021 = vmatpush.msra.mxu1 %v8008_v57  ;;  %1062 = vmatpush.msra.mxu3 %v8009_v15  ;;  %v8040_v57 = vld [vmem:[#allocation51_spill] sm:$0xff]  ;;  %v8041_v15 = vld [vmem:[#allocation52_spill] sm:$0xff] }
  0xe3   :  { %1127 = vmatpush.msrb.mxu3 %v8010_v20  ;;  %1022 = vmatpush.msra.mxu1 %v8011_v50  ;;  %v8042_v20 = vld [vmem:[#allocation53_spill] sm:$0xff] }
  0xe4   :  { %v4363_v50 = vld [vmem:[%s7593_s3 + $0x120] sm:$0xff] }
  0xe5   :  { %1087 = vmatpush.msrb.mxu1 %v8012_v38  ;;  %1128 = vmatpush.msrb.mxu3 %v8013_v1  ;;  %v4368_v38 = vld [vmem:[%s7593_s3 + $0x128] sm:$0xff]  ;;  %v4373_v1 = vld [vmem:[%s7593_s3 + $0x100] sm:$0xff] }
  0xe6   :  { %688 = vmatpush.msrb.mxu0 %v4363_v50  ;;  %728 = vmatpush.msrb.mxu2 %v4368_v38 }
  0xe7   :  { %1088 = vmatpush.msrb.mxu1 %v8014_v44  ;;  %1129 = vmatpush.msrb.mxu3 %v8015_v6  ;;  %v4416_v44 = vld [vmem:[%s7593_s3 + $0xa8] sm:$0xff]  ;;  %v4423_v6 = vld [vmem:[%s7593_s3 + $0x80] sm:$0xff] }
  0xe8   :  { %689 = vmatpush.msrb.mxu0 %v4373_v1  ;;  %729 = vmatpush.msrb.mxu2 %v4380_v41 }
  0xe9   :  { %1089 = vmatpush.msrb.mxu1 %v8016_v52  ;;  %1130 = vmatpush.msrb.mxu3 %v8017_v45  ;;  %v4440_v52 = vld [vmem:[%s7593_s3 + $0x68] sm:$0xff]  ;;  %v4447_v45 = vld [vmem:[%s7593_s3 + $0x40] sm:$0xff] }
  0xea   :  { %690 = vmatpush.msrb.mxu0 %v4385_v53  ;;  %730 = vmatpush.msrb.mxu2 %v4390_v63 }
  0xeb   :  { %1090 = vmatpush.msrb.mxu1 %v8018_v56  ;;  %1131 = vmatpush.msrb.mxu3 %v8019_v49  ;;  %v4459_v56 = vld [vmem:[%s7593_s3 + $0x20] sm:$0xff]  ;;  %v4464_v49 = vld [vmem:[%s7593_s3 + $0x28] sm:$0xff] }
  0xec   :  { %691 = vmatpush.msrb.mxu0 %v4399_v37  ;;  %731 = vmatpush.msrb.mxu2 %v4404_v34 }
  0xed   :  { %1091 = vmatpush.msrb.mxu1 %v8020_v61  ;;  %1132 = vmatpush.msrb.mxu3 %v8021_v60  ;;  %v4471_v61 = vld [vmem:[%s7593_s3] sm:$0xff]  ;;  %v4476_v60 = vld [vmem:[%s7593_s3 + $0x8] sm:$0xff] }
  0xee   :  { %692 = vmatpush.msrb.mxu0 %v4411_v54  ;;  %732 = vmatpush.msrb.mxu2 %v4416_v44 }
  0xef   :  { %1092 = vmatpush.msrb.mxu1 %v8022_v62  ;;  %1133 = vmatpush.msrb.mxu3 %v8023_v4  ;;  %v4483_v62 = vld [vmem:[%s7593_s3 + $0x1f0] sm:$0xff]  ;;  %v4488_v4 = vld [vmem:[%s7593_s3 + $0x1f8] sm:$0xff] }
  0xf0   :  { %693 = vmatpush.msrb.mxu0 %v4423_v6  ;;  %733 = vmatpush.msrb.mxu2 %v4428_v48  ;;  %8043 = vst [vmem:[#allocation5_spill] sm:$0xff] %v4488_v4 }
  0xf1   :  { %1093 = vmatpush.msrb.mxu1 %v8024_v7  ;;  %1134 = vmatpush.msrb.mxu3 %v8025_v9  ;;  %v4495_v7 = vld [vmem:[%s7593_s3 + $0x1d0] sm:$0xff]  ;;  %v4500_v9 = vld [vmem:[%s7593_s3 + $0x1d8] sm:$0xff] }
  0xf2   :  { %694 = vmatpush.msrb.mxu0 %v4435_v51  ;;  %734 = vmatpush.msrb.mxu2 %v4440_v52  ;;  %8044 = vst [vmem:[#allocation6_spill] sm:$0xff] %v4495_v7 }
  0xf3   :  { %1094 = vmatpush.msrb.mxu1 %v8026_v11  ;;  %1135 = vmatpush.msrb.mxu3 %v8027_v13  ;;  %8045 = vst [vmem:[#allocation7_spill] sm:$0xff] %v4500_v9  ;;  %v4507_v11 = vld [vmem:[%s7593_s3 + $0x1b0] sm:$0xff]  ;;  %v4512_v13 = vld [vmem:[%s7593_s3 + $0x1b8] sm:$0xff] }
  0xf4   :  { %695 = vmatpush.msrb.mxu0 %v4447_v45  ;;  %735 = vmatpush.msrb.mxu2 %v4452_v55  ;;  %8046 = vst [vmem:[#allocation8_spill] sm:$0xff] %v4507_v11 }
  0xf5   :  { %1095 = vmatpush.msrb.mxu1 %v8028_v14  ;;  %1136 = vmatpush.msrb.mxu3 %v8029_v17  ;;  %8047 = vst [vmem:[#allocation9_spill] sm:$0xff] %v4512_v13  ;;  %v4519_v14 = vld [vmem:[%s7593_s3 + $0x190] sm:$0xff]  ;;  %v4524_v17 = vld [vmem:[%s7593_s3 + $0x198] sm:$0xff] }
  0xf6   :  { %696 = vmatpush.msrb.mxu0 %v4459_v56  ;;  %736 = vmatpush.msrb.mxu2 %v4464_v49  ;;  %8048 = vst [vmem:[#allocation10_spill] sm:$0xff] %v4519_v14 }
  0xf7   :  { %1096 = vmatpush.msrb.mxu1 %v8030_v18  ;;  %1137 = vmatpush.msrb.mxu3 %v8031_v21  ;;  %8049 = vst [vmem:[#allocation11_spill] sm:$0xff] %v4524_v17  ;;  %v4531_v18 = vld [vmem:[%s7593_s3 + $0x170] sm:$0xff]  ;;  %v4536_v21 = vld [vmem:[%s7593_s3 + $0x178] sm:$0xff] }
  0xf8   :  { %697 = vmatpush.msrb.mxu0 %v4471_v61  ;;  %737 = vmatpush.msrb.mxu2 %v4476_v60  ;;  %8050 = vst [vmem:[#allocation12_spill] sm:$0xff] %v4531_v18 }
  0xf9   :  { %1097 = vmatpush.msrb.mxu1 %v8032_v22  ;;  %1138 = vmatpush.msrb.mxu3 %v8033_v25  ;;  %8051 = vst [vmem:[#allocation13_spill] sm:$0xff] %v4536_v21  ;;  %v4543_v22 = vld [vmem:[%s7593_s3 + $0x150] sm:$0xff]  ;;  %v4548_v25 = vld [vmem:[%s7593_s3 + $0x158] sm:$0xff] }
  0xfa   :  { %762 = vmatpush.msra.mxu0 %v4483_v62  ;;  %802 = vmatpush.msra.mxu2 %v4488_v4  ;;  %8052 = vst [vmem:[#allocation14_spill] sm:$0xff] %v4543_v22 }
  0xfb   :  { %1098 = vmatpush.msrb.mxu1 %v8034_v26  ;;  %1139 = vmatpush.msrb.mxu3 %v8035_v29  ;;  %8053 = vst [vmem:[#allocation15_spill] sm:$0xff] %v4548_v25  ;;  %v4555_v26 = vld [vmem:[%s7593_s3 + $0x130] sm:$0xff]  ;;  %v4560_v29 = vld [vmem:[%s7593_s3 + $0x138] sm:$0xff] }
  0xfc   :  { %763 = vmatpush.msra.mxu0 %v4495_v7  ;;  %803 = vmatpush.msra.mxu2 %v4500_v9  ;;  %8054 = vst [vmem:[#allocation16_spill] sm:$0xff] %v4555_v26 }
  0xfd   :  { %1099 = vmatpush.msrb.mxu1 %v8036_v30  ;;  %1140 = vmatpush.msrb.mxu3 %v8037_v5  ;;  %8055 = vst [vmem:[#allocation17_spill] sm:$0xff] %v4560_v29  ;;  %v2339_v30 = vld [vmem:[%s7594_s4 + $0x4] sm:$0xf]  ;;  %v4570_v5 = vld [vmem:[%s7593_s3 + $0x110] sm:$0xff] }
  0xfe   :  { %764 = vmatpush.msra.mxu0 %v4507_v11  ;;  %804 = vmatpush.msra.mxu2 %v4512_v13  ;;  %8056 = vst [vmem:[#allocation18_spill] sm:$0xff] %v4570_v5 }
  0xff   :  { %1100 = vmatpush.msrb.mxu1 %v8038_v2  ;;  %1141 = vmatpush.msrb.mxu3 %v8039_v42  ;;  %v4575_v2 = vld [vmem:[%s7593_s3 + $0x118] sm:$0xff]  ;;  %v4579_v42 = vperm.slane %v2339_v30, 0 }
 0x100   :  { %765 = vmatpush.msra.mxu0 %v4519_v14  ;;  %805 = vmatpush.msra.mxu2 %v4524_v17  ;;  %8057 = vst [vmem:[#allocation19_spill] sm:$0xff] %v4575_v2 }
 0x101   :  { %1101 = vmatpush.msrb.mxu1 %v8040_v57  ;;  %1142 = vmatpush.msrb.mxu3 %v8041_v15  ;;  %8058 = vst [vmem:[#allocation20_spill] sm:$0xff] %v4579_v42  ;;  %v4584_v57 = vld [vmem:[%s7593_s3 + $0xf0] sm:$0xff]  ;;  %v4589_v15 = vld [vmem:[%s7593_s3 + $0xf8] sm:$0xff] }
 0x102   :  { %766 = vmatpush.msra.mxu0 %v4531_v18  ;;  %806 = vmatpush.msra.mxu2 %v4536_v21  ;;  %8059 = vst [vmem:[#allocation21_spill] sm:$0xff] %v4584_v57 }
 0x103   :  { %1102 = vmatpush.msrb.mxu1 %v8042_v20  ;;  %8060 = vst [vmem:[#allocation22_spill] sm:$0xff] %v4589_v15  ;;  %v4596_v20 = vld [vmem:[%s7593_s3 + $0xd0] sm:$0xff] }
 0x104   :  { %767 = vmatpush.msra.mxu0 %v4543_v22  ;;  %807 = vmatpush.msra.mxu2 %v4548_v25  ;;  %8061 = vst [vmem:[#allocation23_spill] sm:$0xff] %v4596_v20  ;;  %v4618_v25 = vperm.slane %v2339_v30, 1  ;;  %v4653_v22 = vld [vmem:[%s7593_s3 + $0x58] sm:$0xff] }
 0x105   :  { %8071 = vst [vmem:[#allocation33_spill] sm:$0xff] %v4653_v22 }
 0x106   :  { %768 = vmatpush.msra.mxu0 %v4555_v26  ;;  %808 = vmatpush.msra.mxu2 %v4560_v29  ;;  %v529_v26 = vpop.f32.mrf.mxu1  ;;  %8065 = vst [vmem:[#allocation27_spill] sm:$0xff] %v4618_v25 }
 0x108   :  { %769 = vmatpush.msra.mxu0 %v4570_v5  ;;  %809 = vmatpush.msra.mxu2 %v4575_v2  ;;  %v4601_v2 = vld [vmem:[%s7593_s3 + $0xd8] sm:$0xff] }
 0x109   :  { %8062 = vst [vmem:[#allocation24_spill] sm:$0xff] %v4601_v2 }
 0x10a   :  { %770 = vmatpush.msra.mxu0 %v4584_v57  ;;  %810 = vmatpush.msra.mxu2 %v4589_v15  ;;  %v4609_v15 = vld [vmem:[%s7593_s3 + $0xb0] sm:$0xff]  ;;  %v4614_v57 = vld [vmem:[%s7593_s3 + $0xb8] sm:$0xff] }
 0x10b   :  { %8063 = vst [vmem:[#allocation25_spill] sm:$0xff] %v4609_v15 }
 0x10c   :  { %771 = vmatpush.msra.mxu0 %v4596_v20  ;;  %811 = vmatpush.msra.mxu2 %v4601_v2  ;;  %8064 = vst [vmem:[#allocation26_spill] sm:$0xff] %v4614_v57 }
 0x10e   :  { %772 = vmatpush.msra.mxu0 %v4609_v15  ;;  %812 = vmatpush.msra.mxu2 %v4614_v57  ;;  %v569_v57 = vpop.f32.mrf.mxu3  ;;  %v609_v17 = vpop.f32.mrf.mxu1 }
 0x116   :  { %v649_v14 = vpop.f32.mrf.mxu3 }
 0x14d   :  { %v509_v5 = vpop.f32.mrf.mxu0 }
 0x14e   :  { %v510_v29 = vadd.f32 %v509_v5, %v4579_v42  ;;  %v4623_v5 = vld [vmem:[%s7593_s3 + $0x90] sm:$0xff]  ;;  %v4628_v42 = vld [vmem:[%s7593_s3 + $0x98] sm:$0xff] }
 0x14f   :  { %8066 = vst [vmem:[#allocation28_spill] sm:$0xff] %v4623_v5  ;;  %773 = vmatpush.msra.mxu0 %v4623_v5  ;;  %813 = vmatpush.msra.mxu2 %v4628_v42 }
 0x150   :  { %v530_v20 = vadd.f32 %v529_v26, %v510_v29  ;;  %8067 = vst [vmem:[#allocation29_spill] sm:$0xff] %v4628_v42  ;;  %v4635_v26 = vld [vmem:[%s7593_s3 + $0x70] sm:$0xff]  ;;  %v4640_v29 = vld [vmem:[%s7593_s3 + $0x78] sm:$0xff] }
 0x151   :  { %8068 = vst [vmem:[#allocation30_spill] sm:$0xff] %v4635_v26  ;;  %774 = vmatpush.msra.mxu0 %v4635_v26  ;;  %814 = vmatpush.msra.mxu2 %v4640_v29 }
 0x152   :  { %v652_v15 = vsub.f32 0.0, %v530_v20  ;;  %8069 = vst [vmem:[#allocation31_spill] sm:$0xff] %v4640_v29  ;;  %v4648_v20 = vld [vmem:[%s7593_s3 + $0x50] sm:$0xff]  ;;  %v4657_v29 = vperm.slane %v2339_v30, 2 }
 0x153   :  { %8070 = vst [vmem:[#allocation32_spill] sm:$0xff] %v4648_v20  ;;  %775 = vmatpush.msra.mxu0 %v4648_v20  ;;  %815 = vmatpush.msra.mxu2 %v4653_v22  ;;  %v4681_v22 = vperm.slane %v2339_v30, 3 }
 0x154   :  { %v549_v2 = vpop.f32.mrf.mxu2  ;;  %v653_v5 = vmul.f32 1.442695, %v652_v15  ;;  %8072 = vst [vmem:[#allocation34_spill] sm:$0xff] %v4657_v29  ;;  %v4667_v15 = vld [vmem:[%s7593_s3 + $0x38] sm:$0xff] }
 0x155   :  { %v550_v42 = vadd.f32 %v549_v2, %v4618_v25  ;;  %v4662_v2 = vld [vmem:[%s7593_s3 + $0x30] sm:$0xff]  ;;  %8074 = vst [vmem:[#allocation36_spill] sm:$0xff] %v4667_v15  ;;  %v589_v25 = vpop.f32.mrf.mxu0  ;;  %816 = vmatpush.msra.mxu2 %v4667_v15 }
 0x156   :  { %2362 = vpow2.f32 %v653_v5  ;;  %8073 = vst [vmem:[#allocation35_spill] sm:$0xff] %v4662_v2  ;;  %776 = vmatpush.msra.mxu0 %v4662_v2  ;;  %v590_v15 = vadd.f32 %v589_v25, %v4657_v29 }
 0x157   :  { %v570_v26 = vadd.f32 %v569_v57, %v550_v42  ;;  %v4674_v42 = vld [vmem:[%s7593_s3 + $0x10] sm:$0xff]  ;;  %v4679_v57 = vld [vmem:[%s7593_s3 + $0x18] sm:$0xff]  ;;  %8077 = vst [vmem:[#allocation39_spill] sm:$0xff] %v4681_v22 }
 0x158   :  { %8075 = vst [vmem:[#allocation37_spill] sm:$0xff] %v4674_v42  ;;  %777 = vmatpush.msra.mxu0 %v4674_v42  ;;  %817 = vmatpush.msra.mxu2 %v4679_v57  ;;  %v610_v13 = vadd.f32 %v609_v17, %v590_v15  ;;  %v4711_v17 = vld [vmem:[%s7591_s1 + $0x1d0] sm:$0xff] }
 0x159   :  { %8076 = vst [vmem:[#allocation38_spill] sm:$0xff] %v4679_v57  ;;  %v657_v5 = vsub.f32 0.0, %v570_v26  ;;  %v4735_v15 = vld [vmem:[%s7591_s1 + $0x1b0] sm:$0xff] }
 0x15b   :  { %v658_v2 = vmul.f32 1.442695, %v657_v5 }
 0x15c   :  { %v2363_v21 = vpop.eup %2362 }
 0x15d   :  { %v629_v20 = vpop.f32.mrf.mxu2  ;;  %2364 = vpow2.f32 %v658_v2  ;;  %v655_v9 = vadd.f32 1.0, %v2363_v21  ;;  %v4723_v21 = vld [vmem:[%s7593_s3 + $0x3e8] sm:$0xff] }
 0x15e   :  { %v630_v18 = vadd.f32 %v629_v20, %v4681_v22  ;;  %2366 = vtanh.f32 %v610_v13 }
 0x15f   :  { %2368 = vrcp.f32 %v655_v9  ;;  %v4705_v9 = vld [vmem:[%s7591_s1 + $0x1c0] sm:$0xff] }
 0x160   :  { %v650_v11 = vadd.f32 %v649_v14, %v630_v18  ;;  %v4717_v18 = vld [vmem:[%s7593_s3 + $0x3e0] sm:$0xff] }
 0x162   :  { %v663_v26 = vsub.f32 0.0, %v650_v11 }
 0x163   :  { %v2365_v30 = vpop.eup %2364 }
 0x164   :  { %v664_v7 = vmul.f32 1.442695, %v663_v26  ;;  %v660_v42 = vadd.f32 1.0, %v2365_v30  ;;  %v2367_v5 = vpop.eup %2366  ;;  %v4753_v26 = vld [vmem:[%s7591_s1 + $0x180] sm:$0xff]  ;;  %v4759_v30 = vld [vmem:[%s7591_s1 + $0x190] sm:$0xff] }
 0x165   :  { %v2369_v25 = vpop.eup %2368 }
 0x166   :  { %2370 = vpow2.f32 %v664_v7  ;;  %v669_v20 = vmul.f32 %v2369_v25, %v2367_v5  ;;  %v4693_v7 = vld [vmem:[%s7591_s1 + $0x1e0] sm:$0xff]  ;;  %v4771_v25 = vld [vmem:[%s7591_s1 + $0x170] sm:$0xff] }
 0x167   :  { %2372 = vrcp.f32 %v660_v42  ;;  %v4741_v42 = vld [vmem:[%s7593_s3 + $0x3c0] sm:$0xff] }
 0x168   :  { %v4765_v5 = vld [vmem:[%s7591_s1 + $0x160] sm:$0xff] }
 0x16c   :  { %v2371_v29 = vpop.eup %2370 }
 0x16d   :  { %v2373_v57 = vpop.eup %2372  ;;  %v666_v2 = vadd.f32 1.0, %v2371_v29  ;;  %v4729_v29 = vld [vmem:[%s7591_s1 + $0x1a0] sm:$0xff] }
 0x16e   :  { %v668_v4 = vmul.f32 0.0, %v2373_v57  ;;  %v4747_v57 = vld [vmem:[%s7593_s3 + $0x3c8] sm:$0xff] }
 0x16f   :  { %2374 = vrcp.f32 %v666_v2  ;;  %v4777_v2 = vld [vmem:[%s7591_s1 + $0x140] sm:$0xff] }
 0x170   :  { %v4687_v22 = vadd.f32 %v669_v20, %v668_v4  ;;  %v4699_v4 = vld [vmem:[%s7591_s1 + $0x1f0] sm:$0xff] }
 0x171   :  { %v4783_v20 = vld [vmem:[%s7591_s1 + $0x150] sm:$0xff] }
 0x172   :  { %2376 = vtanh.f32 %v4687_v22  ;;  %8078 = vst [vmem:[#allocation40_spill] sm:$0xff] %v4783_v20 }
 0x175   :  { %v2375_v11 = vpop.eup %2374 }
 0x178   :  { %v2377_v14 = vpop.eup %2376 }
 0x179   :  { %v672_v13 = vmul.f32 %v2377_v14, %v2375_v11  ;;  %v4789_v11 = vld [vmem:[%s7593_s3 + $0x3a0] sm:$0xff]  ;;  %v4795_v14 = vld [vmem:[%s7593_s3 + $0x3a8] sm:$0xff] }
 0x17a   :  { %8079 = vst [vmem:[#allocation41_spill] sm:$0xff] %v4789_v11 }
 0x17b   :  { %698 = vmatmul.f32.vlgmr.msrb.gmra.mxu0 %v672_v13  ;;  %738 = vmatmul.f32.vlgmr.msrb.gmra.mxu2 %v672_v13  ;;  %8080 = vst [vmem:[#allocation42_spill] sm:$0xff] %v4795_v14 }
 0x17c   :  { %866 = vmatpush.msrb.mxu0 %v4693_v7  ;;  %906 = vmatpush.msrb.mxu2 %v4699_v4 }
 0x17d   :  { %1023 = vmatmul.f32.vlgmr.msra.gmra.mxu1 %v672_v13  ;;  %1063 = vmatmul.f32.vlgmr.msra.gmra.mxu3 %v672_v13 }
 0x17e   :  { %867 = vmatpush.msrb.mxu0 %v4705_v9  ;;  %907 = vmatpush.msrb.mxu2 %v4711_v17 }
 0x17f   :  { %1188 = vmatpush.msra.mxu1 %v4717_v18  ;;  %1228 = vmatpush.msra.mxu3 %v4723_v21 }
 0x180   :  { %868 = vmatpush.msrb.mxu0 %v4729_v29  ;;  %908 = vmatpush.msrb.mxu2 %v4735_v15 }
 0x181   :  { %1189 = vmatpush.msra.mxu1 %v4741_v42  ;;  %1229 = vmatpush.msra.mxu3 %v4747_v57 }
 0x182   :  { %869 = vmatpush.msrb.mxu0 %v4753_v26  ;;  %909 = vmatpush.msrb.mxu2 %v4759_v30 }
 0x183   :  { %778 = vmatmul.f32.vlgmr.msra.gmra.mxu0 %v672_v13  ;;  %818 = vmatmul.f32.vlgmr.msra.gmra.mxu2 %v672_v13 }
 0x184   :  { %870 = vmatpush.msrb.mxu0 %v4765_v5  ;;  %910 = vmatpush.msrb.mxu2 %v4771_v25 }
 0x185   :  { %1103 = vmatmul.f32.vlgmr.msrb.gmra.mxu1 %v672_v13  ;;  %1143 = vmatmul.f32.vlgmr.msrb.gmra.mxu3 %v672_v13  ;;  %v4801_v13 = vld [vmem:[%s7591_s1 + $0x120] sm:$0xff] }
 0x186   :  { %871 = vmatpush.msrb.mxu0 %v4777_v2  ;;  %911 = vmatpush.msrb.mxu2 %v4783_v20  ;;  %8081 = vst [vmem:[#allocation43_spill] sm:$0xff] %v4801_v13  ;;  %v4807_v20 = vld [vmem:[%s7591_s1 + $0x130] sm:$0xff] }
 0x187   :  { %1190 = vmatpush.msra.mxu1 %v4789_v11  ;;  %1230 = vmatpush.msra.mxu3 %v4795_v14  ;;  %8082 = vst [vmem:[#allocation44_spill] sm:$0xff] %v4807_v20  ;;  %v4813_v11 = vld [vmem:[%s7593_s3 + $0x380] sm:$0xff]  ;;  %v4819_v14 = vld [vmem:[%s7593_s3 + $0x388] sm:$0xff] }
 0x188   :  { %872 = vmatpush.msrb.mxu0 %v4801_v13  ;;  %912 = vmatpush.msrb.mxu2 %v4807_v20  ;;  %8083 = vst [vmem:[#allocation45_spill] sm:$0xff] %v4813_v11  ;;  %v4825_v13 = vld [vmem:[%s7591_s1 + $0x100] sm:$0xff]  ;;  %v4831_v20 = vld [vmem:[%s7591_s1 + $0x110] sm:$0xff] }
 0x189   :  { %1191 = vmatpush.msra.mxu1 %v4813_v11  ;;  %8084 = vst [vmem:[#allocation46_spill] sm:$0xff] %v4819_v14  ;;  %1231 = vmatpush.msra.mxu3 %v4819_v14  ;;  %v4837_v11 = vld [vmem:[%s7593_s3 + $0x360] sm:$0xff]  ;;  %v4843_v14 = vld [vmem:[%s7593_s3 + $0x368] sm:$0xff] }
 0x18a   :  { %8085 = vst [vmem:[#allocation47_spill] sm:$0xff] %v4825_v13  ;;  %873 = vmatpush.msrb.mxu0 %v4825_v13  ;;  %913 = vmatpush.msrb.mxu2 %v4831_v20  ;;  %v4849_v13 = vld [vmem:[%s7591_s1 + $0xe0] sm:$0xff] }
 0x18b   :  { %8086 = vst [vmem:[#allocation48_spill] sm:$0xff] %v4831_v20  ;;  %1192 = vmatpush.msra.mxu1 %v4837_v11  ;;  %1232 = vmatpush.msra.mxu3 %v4843_v14  ;;  %v4855_v20 = vld [vmem:[%s7591_s1 + $0xf0] sm:$0xff] }
 0x18c   :  { %8087 = vst [vmem:[#allocation49_spill] sm:$0xff] %v4837_v11  ;;  %874 = vmatpush.msrb.mxu0 %v4849_v13  ;;  %914 = vmatpush.msrb.mxu2 %v4855_v20  ;;  %v4861_v11 = vld [vmem:[%s7593_s3 + $0x340] sm:$0xff] }
 0x18d   :  { %8088 = vst [vmem:[#allocation50_spill] sm:$0xff] %v4843_v14  ;;  %1193 = vmatpush.msra.mxu1 %v4861_v11  ;;  %v4867_v14 = vld [vmem:[%s7593_s3 + $0x348] sm:$0xff] }
 0x18e   :  { %8089 = vst [vmem:[#allocation51_spill] sm:$0xff] %v4849_v13  ;;  %1233 = vmatpush.msra.mxu3 %v4867_v14  ;;  %v4873_v13 = vld [vmem:[%s7591_s1 + $0xc0] sm:$0xff] }
 0x18f   :  { %8090 = vst [vmem:[#allocation52_spill] sm:$0xff] %v4855_v20  ;;  %875 = vmatpush.msrb.mxu0 %v4873_v13  ;;  %v4879_v20 = vld [vmem:[%s7591_s1 + $0xd0] sm:$0xff] }
 0x190   :  { %8091 = vst [vmem:[#allocation53_spill] sm:$0xff] %v4861_v11  ;;  %915 = vmatpush.msrb.mxu2 %v4879_v20  ;;  %v4885_v11 = vld [vmem:[%s7593_s3 + $0x320] sm:$0xff] }
 0x191   :  { %8092 = vst [vmem:[#allocation54_spill] sm:$0xff] %v4867_v14  ;;  %1194 = vmatpush.msra.mxu1 %v4885_v11  ;;  %v4891_v14 = vld [vmem:[%s7593_s3 + $0x328] sm:$0xff] }
 0x192   :  { %8093 = vst [vmem:[#allocation55_spill] sm:$0xff] %v4873_v13  ;;  %1234 = vmatpush.msra.mxu3 %v4891_v14  ;;  %v4897_v13 = vld [vmem:[%s7591_s1 + $0xa0] sm:$0xff] }
 0x193   :  { %8094 = vst [vmem:[#allocation56_spill] sm:$0xff] %v4879_v20  ;;  %876 = vmatpush.msrb.mxu0 %v4897_v13  ;;  %v4903_v20 = vld [vmem:[%s7591_s1 + $0xb0] sm:$0xff] }
 0x194   :  { %8095 = vst [vmem:[#allocation57_spill] sm:$0xff] %v4885_v11  ;;  %916 = vmatpush.msrb.mxu2 %v4903_v20  ;;  %v4909_v11 = vld [vmem:[%s7593_s3 + $0x300] sm:$0xff] }
 0x195   :  { %8096 = vst [vmem:[#allocation58_spill] sm:$0xff] %v4891_v14  ;;  %1195 = vmatpush.msra.mxu1 %v4909_v11  ;;  %v4915_v14 = vld [vmem:[%s7593_s3 + $0x308] sm:$0xff] }
 0x196   :  { %8097 = vst [vmem:[#allocation59_spill] sm:$0xff] %v4897_v13  ;;  %1235 = vmatpush.msra.mxu3 %v4915_v14  ;;  %v4921_v13 = vld [vmem:[%s7591_s1 + $0x80] sm:$0xff] }
 0x197   :  { %8098 = vst [vmem:[#allocation60_spill] sm:$0xff] %v4903_v20  ;;  %877 = vmatpush.msrb.mxu0 %v4921_v13  ;;  %v4927_v20 = vld [vmem:[%s7591_s1 + $0x90] sm:$0xff] }
 0x198   :  { %8099 = vst [vmem:[#allocation61_spill] sm:$0xff] %v4909_v11  ;;  %917 = vmatpush.msrb.mxu2 %v4927_v20  ;;  %v4933_v11 = vld [vmem:[%s7593_s3 + $0x2e0] sm:$0xff] }
 0x199   :  { %8100 = vst [vmem:[#allocation62_spill] sm:$0xff] %v4915_v14  ;;  %1196 = vmatpush.msra.mxu1 %v4933_v11  ;;  %v4939_v14 = vld [vmem:[%s7593_s3 + $0x2e8] sm:$0xff] }
 0x19a   :  { %8101 = vst [vmem:[#allocation63_spill] sm:$0xff] %v4921_v13  ;;  %1236 = vmatpush.msra.mxu3 %v4939_v14  ;;  %v4945_v13 = vld [vmem:[%s7591_s1 + $0x60] sm:$0xff] }
 0x19b   :  { %8102 = vst [vmem:[#allocation64_spill] sm:$0xff] %v4927_v20  ;;  %878 = vmatpush.msrb.mxu0 %v4945_v13  ;;  %v4951_v20 = vld [vmem:[%s7591_s1 + $0x70] sm:$0xff] }
 0x19c   :  { %8103 = vst [vmem:[#allocation65_spill] sm:$0xff] %v4933_v11  ;;  %918 = vmatpush.msrb.mxu2 %v4951_v20  ;;  %v4957_v11 = vld [vmem:[%s7593_s3 + $0x2c0] sm:$0xff] }
 0x19d   :  { %8104 = vst [vmem:[#allocation66_spill] sm:$0xff] %v4939_v14  ;;  %1197 = vmatpush.msra.mxu1 %v4957_v11  ;;  %v4963_v14 = vld [vmem:[%s7593_s3 + $0x2c8] sm:$0xff] }
 0x19e   :  { %8105 = vst [vmem:[#allocation67_spill] sm:$0xff] %v4945_v13  ;;  %1237 = vmatpush.msra.mxu3 %v4963_v14  ;;  %v4969_v13 = vld [vmem:[%s7591_s1 + $0x40] sm:$0xff] }
 0x19f   :  { %8106 = vst [vmem:[#allocation68_spill] sm:$0xff] %v4951_v20  ;;  %879 = vmatpush.msrb.mxu0 %v4969_v13  ;;  %v4975_v20 = vld [vmem:[%s7591_s1 + $0x50] sm:$0xff] }
 0x1a0   :  { %8107 = vst [vmem:[#allocation69_spill] sm:$0xff] %v4957_v11  ;;  %919 = vmatpush.msrb.mxu2 %v4975_v20  ;;  %v4981_v11 = vld [vmem:[%s7593_s3 + $0x2a0] sm:$0xff] }
 0x1a1   :  { %8108 = vst [vmem:[#allocation70_spill] sm:$0xff] %v4963_v14  ;;  %1198 = vmatpush.msra.mxu1 %v4981_v11  ;;  %v4987_v14 = vld [vmem:[%s7593_s3 + $0x2a8] sm:$0xff] }
 0x1a2   :  { %8109 = vst [vmem:[#allocation71_spill] sm:$0xff] %v4969_v13  ;;  %1238 = vmatpush.msra.mxu3 %v4987_v14  ;;  %v4993_v13 = vld [vmem:[%s7591_s1 + $0x20] sm:$0xff] }
 0x1a3   :  { %8110 = vst [vmem:[#allocation72_spill] sm:$0xff] %v4975_v20  ;;  %880 = vmatpush.msrb.mxu0 %v4993_v13  ;;  %v4999_v20 = vld [vmem:[%s7591_s1 + $0x30] sm:$0xff] }
 0x1a4   :  { %8111 = vst [vmem:[#allocation73_spill] sm:$0xff] %v4981_v11  ;;  %920 = vmatpush.msrb.mxu2 %v4999_v20  ;;  %v5005_v11 = vld [vmem:[%s7593_s3 + $0x280] sm:$0xff] }
 0x1a5   :  { %8112 = vst [vmem:[#allocation74_spill] sm:$0xff] %v4987_v14  ;;  %1199 = vmatpush.msra.mxu1 %v5005_v11  ;;  %v5011_v14 = vld [vmem:[%s7593_s3 + $0x288] sm:$0xff] }
 0x1a6   :  { %8113 = vst [vmem:[#allocation75_spill] sm:$0xff] %v4993_v13  ;;  %1239 = vmatpush.msra.mxu3 %v5011_v14  ;;  %v5017_v13 = vld [vmem:[%s7591_s1] sm:$0xff] }
 0x1a7   :  { %8114 = vst [vmem:[#allocation76_spill] sm:$0xff] %v4999_v20  ;;  %881 = vmatpush.msrb.mxu0 %v5017_v13  ;;  %v5023_v20 = vld [vmem:[%s7591_s1 + $0x10] sm:$0xff] }
 0x1a8   :  { %8115 = vst [vmem:[#allocation77_spill] sm:$0xff] %v5011_v14  ;;  %921 = vmatpush.msrb.mxu2 %v5023_v20  ;;  %882 = vmatmul.f32.vlgmr.msrb.gmra.mxu0 %v4267_v0  ;;  %v5031_v14 = vld [vmem:[%s7593_s3 + $0x260] sm:$0xff] }
 0x1a9   :  { %8116 = vst [vmem:[#allocation78_spill] sm:$0xff] %v5017_v13  ;;  %922 = vmatmul.f32.vlgmr.msrb.gmra.mxu2 %v4267_v0  ;;  %1200 = vmatpush.msra.mxu1 %v5031_v14  ;;  %v5037_v13 = vld [vmem:[%s7593_s3 + $0x268] sm:$0xff] }
 0x1aa   :  { %8117 = vst [vmem:[#allocation79_spill] sm:$0xff] %v5023_v20  ;;  %1240 = vmatpush.msra.mxu3 %v5037_v13  ;;  %v5043_v20 = vld [vmem:[%s7592_s2 + $0x1e0] sm:$0xff]  ;;  %v5049_v0 = vld [vmem:[%s7592_s2 + $0x1e8] sm:$0xff] }
 0x1ab   :  { %8118 = vst [vmem:[#allocation80_spill] sm:$0xff] %v5031_v14  ;;  %987 = vmatpush.msra.mxu0 %v5043_v20  ;;  %1027 = vmatpush.msra.mxu2 %v5049_v0  ;;  %v5055_v14 = vld [vmem:[%s7593_s3 + $0x240] sm:$0xff] }
 0x1ac   :  { %8119 = vst [vmem:[#allocation81_spill] sm:$0xff] %v5037_v13  ;;  %1201 = vmatpush.msra.mxu1 %v5055_v14  ;;  %v5061_v13 = vld [vmem:[%s7593_s3 + $0x248] sm:$0xff] }
 0x1ad   :  { %8120 = vst [vmem:[#allocation82_spill] sm:$0xff] %v5043_v20  ;;  %1241 = vmatpush.msra.mxu3 %v5061_v13  ;;  %v5067_v20 = vld [vmem:[%s7592_s2 + $0x1c0] sm:$0xff] }
 0x1ae   :  { %8121 = vst [vmem:[#allocation83_spill] sm:$0xff] %v5049_v0  ;;  %988 = vmatpush.msra.mxu0 %v5067_v20  ;;  %v5073_v0 = vld [vmem:[%s7592_s2 + $0x1c8] sm:$0xff] }
 0x1af   :  { %8122 = vst [vmem:[#allocation84_spill] sm:$0xff] %v5055_v14  ;;  %1028 = vmatpush.msra.mxu2 %v5073_v0  ;;  %v5079_v14 = vld [vmem:[%s7593_s3 + $0x220] sm:$0xff] }
 0x1b0   :  { %8123 = vst [vmem:[#allocation85_spill] sm:$0xff] %v5061_v13  ;;  %1202 = vmatpush.msra.mxu1 %v5079_v14  ;;  %v5085_v13 = vld [vmem:[%s7593_s3 + $0x228] sm:$0xff] }
 0x1b1   :  { %8124 = vst [vmem:[#allocation86_spill] sm:$0xff] %v5067_v20  ;;  %1242 = vmatpush.msra.mxu3 %v5085_v13  ;;  %v5091_v20 = vld [vmem:[%s7592_s2 + $0x1a0] sm:$0xff] }
 0x1b2   :  { %8125 = vst [vmem:[#allocation87_spill] sm:$0xff] %v5073_v0  ;;  %989 = vmatpush.msra.mxu0 %v5091_v20  ;;  %v5097_v0 = vld [vmem:[%s7592_s2 + $0x1a8] sm:$0xff] }
 0x1b3   :  { %8126 = vst [vmem:[#allocation88_spill] sm:$0xff] %v5079_v14  ;;  %1029 = vmatpush.msra.mxu2 %v5097_v0  ;;  %v5103_v14 = vld [vmem:[%s7593_s3 + $0x200] sm:$0xff] }
 0x1b4   :  { %8127 = vst [vmem:[#allocation89_spill] sm:$0xff] %v5085_v13  ;;  %1203 = vmatpush.msra.mxu1 %v5103_v14  ;;  %v5109_v13 = vld [vmem:[%s7593_s3 + $0x208] sm:$0xff] }
 0x1b5   :  { %8128 = vst [vmem:[#allocation90_spill] sm:$0xff] %v5091_v20  ;;  %1243 = vmatpush.msra.mxu3 %v5109_v13  ;;  %v5115_v20 = vld [vmem:[%s7593_s3 + $0x3f0] sm:$0xff] }
 0x1b6   :  { %8129 = vst [vmem:[#allocation91_spill] sm:$0xff] %v5097_v0  ;;  %1268 = vmatpush.msrb.mxu1 %v5115_v20  ;;  %v5121_v0 = vld [vmem:[%s7593_s3 + $0x3f8] sm:$0xff] }
 0x1b7   :  { %8130 = vst [vmem:[#allocation92_spill] sm:$0xff] %v5103_v14  ;;  %1308 = vmatpush.msrb.mxu3 %v5121_v0  ;;  %v5127_v14 = vld [vmem:[%s7592_s2 + $0x180] sm:$0xff] }
 0x1b8   :  { %8131 = vst [vmem:[#allocation93_spill] sm:$0xff] %v5109_v13  ;;  %990 = vmatpush.msra.mxu0 %v5127_v14  ;;  %v5133_v13 = vld [vmem:[%s7592_s2 + $0x188] sm:$0xff] }
 0x1b9   :  { %8132 = vst [vmem:[#allocation94_spill] sm:$0xff] %v5115_v20  ;;  %1030 = vmatpush.msra.mxu2 %v5133_v13  ;;  %v5139_v20 = vld [vmem:[%s7593_s3 + $0x3d0] sm:$0xff] }
 0x1ba   :  { %8133 = vst [vmem:[#allocation95_spill] sm:$0xff] %v5121_v0  ;;  %1269 = vmatpush.msrb.mxu1 %v5139_v20  ;;  %v5145_v0 = vld [vmem:[%s7593_s3 + $0x3d8] sm:$0xff] }
 0x1bb   :  { %8134 = vst [vmem:[#allocation96_spill] sm:$0xff] %v5127_v14  ;;  %1309 = vmatpush.msrb.mxu3 %v5145_v0  ;;  %v5151_v14 = vld [vmem:[%s7592_s2 + $0x160] sm:$0xff] }
 0x1bc   :  { %8135 = vst [vmem:[#allocation97_spill] sm:$0xff] %v5133_v13  ;;  %991 = vmatpush.msra.mxu0 %v5151_v14  ;;  %v5157_v13 = vld [vmem:[%s7592_s2 + $0x168] sm:$0xff] }
 0x1bd   :  { %8136 = vst [vmem:[#allocation98_spill] sm:$0xff] %v5139_v20  ;;  %1031 = vmatpush.msra.mxu2 %v5157_v13  ;;  %v5163_v20 = vld [vmem:[%s7593_s3 + $0x3b0] sm:$0xff] }
 0x1be   :  { %8137 = vst [vmem:[#allocation99_spill] sm:$0xff] %v5145_v0  ;;  %1270 = vmatpush.msrb.mxu1 %v5163_v20  ;;  %v5169_v0 = vld [vmem:[%s7593_s3 + $0x3b8] sm:$0xff] }
 0x1bf   :  { %8138 = vst [vmem:[#allocation100_spill] sm:$0xff] %v5151_v14  ;;  %1310 = vmatpush.msrb.mxu3 %v5169_v0  ;;  %v5175_v14 = vld [vmem:[%s7592_s2 + $0x140] sm:$0xff] }
 0x1c0   :  { %8139 = vst [vmem:[#allocation101_spill] sm:$0xff] %v5157_v13  ;;  %992 = vmatpush.msra.mxu0 %v5175_v14  ;;  %v5181_v13 = vld [vmem:[%s7592_s2 + $0x148] sm:$0xff] }
 0x1c1   :  { %8140 = vst [vmem:[#allocation102_spill] sm:$0xff] %v5163_v20  ;;  %1032 = vmatpush.msra.mxu2 %v5181_v13  ;;  %v5187_v20 = vld [vmem:[%s7593_s3 + $0x390] sm:$0xff] }
 0x1c2   :  { %8141 = vst [vmem:[#allocation103_spill] sm:$0xff] %v5169_v0  ;;  %1271 = vmatpush.msrb.mxu1 %v5187_v20  ;;  %v5193_v0 = vld [vmem:[%s7593_s3 + $0x398] sm:$0xff] }
 0x1c3   :  { %8142 = vst [vmem:[#allocation104_spill] sm:$0xff] %v5175_v14  ;;  %1311 = vmatpush.msrb.mxu3 %v5193_v0  ;;  %v5199_v14 = vld [vmem:[%s7592_s2 + $0x120] sm:$0xff] }
 0x1c4   :  { %8143 = vst [vmem:[#allocation105_spill] sm:$0xff] %v5181_v13  ;;  %993 = vmatpush.msra.mxu0 %v5199_v14  ;;  %v5205_v13 = vld [vmem:[%s7592_s2 + $0x128] sm:$0xff] }
 0x1c5   :  { %8144 = vst [vmem:[#allocation106_spill] sm:$0xff] %v5187_v20  ;;  %1033 = vmatpush.msra.mxu2 %v5205_v13  ;;  %v5211_v20 = vld [vmem:[%s7593_s3 + $0x370] sm:$0xff] }
 0x1c6   :  { %8145 = vst [vmem:[#allocation107_spill] sm:$0xff] %v5193_v0  ;;  %1272 = vmatpush.msrb.mxu1 %v5211_v20  ;;  %v5217_v0 = vld [vmem:[%s7593_s3 + $0x378] sm:$0xff] }
 0x1c7   :  { %8146 = vst [vmem:[#allocation108_spill] sm:$0xff] %v5199_v14  ;;  %1312 = vmatpush.msrb.mxu3 %v5217_v0  ;;  %v5223_v14 = vld [vmem:[%s7592_s2 + $0x100] sm:$0xff] }
 0x1c8   :  { %8147 = vst [vmem:[#allocation109_spill] sm:$0xff] %v5205_v13  ;;  %994 = vmatpush.msra.mxu0 %v5223_v14  ;;  %v5229_v13 = vld [vmem:[%s7592_s2 + $0x108] sm:$0xff] }
 0x1c9   :  { %8148 = vst [vmem:[#allocation110_spill] sm:$0xff] %v5211_v20  ;;  %1034 = vmatpush.msra.mxu2 %v5229_v13  ;;  %v5235_v20 = vld [vmem:[%s7593_s3 + $0x350] sm:$0xff] }
 0x1ca   :  { %8149 = vst [vmem:[#allocation111_spill] sm:$0xff] %v5217_v0  ;;  %1273 = vmatpush.msrb.mxu1 %v5235_v20  ;;  %v5241_v0 = vld [vmem:[%s7593_s3 + $0x358] sm:$0xff] }
 0x1cb   :  { %8150 = vst [vmem:[#allocation112_spill] sm:$0xff] %v5223_v14  ;;  %1313 = vmatpush.msrb.mxu3 %v5241_v0  ;;  %v5247_v14 = vld [vmem:[%s7592_s2 + $0xe0] sm:$0xff] }
 0x1cc   :  { %8151 = vst [vmem:[#allocation113_spill] sm:$0xff] %v5229_v13  ;;  %995 = vmatpush.msra.mxu0 %v5247_v14  ;;  %v5253_v13 = vld [vmem:[%s7592_s2 + $0xe8] sm:$0xff] }
 0x1cd   :  { %8152 = vst [vmem:[#allocation114_spill] sm:$0xff] %v5235_v20  ;;  %1035 = vmatpush.msra.mxu2 %v5253_v13  ;;  %v5259_v20 = vld [vmem:[%s7593_s3 + $0x330] sm:$0xff] }
 0x1ce   :  { %8153 = vst [vmem:[#allocation115_spill] sm:$0xff] %v5241_v0  ;;  %1274 = vmatpush.msrb.mxu1 %v5259_v20  ;;  %v5265_v0 = vld [vmem:[%s7593_s3 + $0x338] sm:$0xff] }
 0x1cf   :  { %8154 = vst [vmem:[#allocation116_spill] sm:$0xff] %v5247_v14  ;;  %1314 = vmatpush.msrb.mxu3 %v5265_v0  ;;  %v5271_v14 = vld [vmem:[%s7592_s2 + $0xc0] sm:$0xff] }
 0x1d0   :  { %8155 = vst [vmem:[#allocation117_spill] sm:$0xff] %v5253_v13  ;;  %996 = vmatpush.msra.mxu0 %v5271_v14  ;;  %v5277_v13 = vld [vmem:[%s7592_s2 + $0xc8] sm:$0xff] }
 0x1d1   :  { %8156 = vst [vmem:[#allocation118_spill] sm:$0xff] %v5259_v20  ;;  %1036 = vmatpush.msra.mxu2 %v5277_v13  ;;  %v5283_v20 = vld [vmem:[%s7593_s3 + $0x310] sm:$0xff] }
 0x1d2   :  { %8157 = vst [vmem:[#allocation119_spill] sm:$0xff] %v5265_v0  ;;  %1275 = vmatpush.msrb.mxu1 %v5283_v20  ;;  %v5289_v0 = vld [vmem:[%s7593_s3 + $0x318] sm:$0xff] }
 0x1d3   :  { %8158 = vst [vmem:[#allocation120_spill] sm:$0xff] %v5271_v14  ;;  %1315 = vmatpush.msrb.mxu3 %v5289_v0  ;;  %v5295_v14 = vld [vmem:[%s7592_s2 + $0xa0] sm:$0xff] }
 0x1d4   :  { %8159 = vst [vmem:[#allocation121_spill] sm:$0xff] %v5277_v13  ;;  %997 = vmatpush.msra.mxu0 %v5295_v14  ;;  %v5301_v13 = vld [vmem:[%s7592_s2 + $0xa8] sm:$0xff] }
 0x1d5   :  { %8160 = vst [vmem:[#allocation122_spill] sm:$0xff] %v5283_v20  ;;  %1037 = vmatpush.msra.mxu2 %v5301_v13  ;;  %v5307_v20 = vld [vmem:[%s7593_s3 + $0x2f0] sm:$0xff] }
 0x1d6   :  { %8161 = vst [vmem:[#allocation123_spill] sm:$0xff] %v5289_v0  ;;  %1276 = vmatpush.msrb.mxu1 %v5307_v20  ;;  %v5313_v0 = vld [vmem:[%s7593_s3 + $0x2f8] sm:$0xff] }
 0x1d7   :  { %8162 = vst [vmem:[#allocation124_spill] sm:$0xff] %v5295_v14  ;;  %1316 = vmatpush.msrb.mxu3 %v5313_v0  ;;  %v5319_v14 = vld [vmem:[%s7592_s2 + $0x80] sm:$0xff] }
 0x1d8   :  { %8163 = vst [vmem:[#allocation125_spill] sm:$0xff] %v5301_v13  ;;  %998 = vmatpush.msra.mxu0 %v5319_v14  ;;  %v5325_v13 = vld [vmem:[%s7592_s2 + $0x88] sm:$0xff] }
 0x1d9   :  { %8164 = vst [vmem:[#allocation126_spill] sm:$0xff] %v5307_v20  ;;  %1038 = vmatpush.msra.mxu2 %v5325_v13  ;;  %v5331_v20 = vld [vmem:[%s7593_s3 + $0x2d0] sm:$0xff] }
 0x1da   :  { %8165 = vst [vmem:[#allocation127_spill] sm:$0xff] %v5313_v0  ;;  %1277 = vmatpush.msrb.mxu1 %v5331_v20  ;;  %v5337_v0 = vld [vmem:[%s7593_s3 + $0x2d8] sm:$0xff] }
 0x1db   :  { %8166 = vst [vmem:[#allocation128_spill] sm:$0xff] %v5319_v14  ;;  %1317 = vmatpush.msrb.mxu3 %v5337_v0  ;;  %v5343_v14 = vld [vmem:[%s7592_s2 + $0x60] sm:$0xff] }
 0x1dc   :  { %8167 = vst [vmem:[#allocation129_spill] sm:$0xff] %v5325_v13  ;;  %999 = vmatpush.msra.mxu0 %v5343_v14  ;;  %v5349_v13 = vld [vmem:[%s7592_s2 + $0x68] sm:$0xff] }
 0x1dd   :  { %8168 = vst [vmem:[#allocation130_spill] sm:$0xff] %v5331_v20  ;;  %1039 = vmatpush.msra.mxu2 %v5349_v13  ;;  %v5355_v20 = vld [vmem:[%s7593_s3 + $0x2b0] sm:$0xff] }
 0x1de   :  { %8169 = vst [vmem:[#allocation131_spill] sm:$0xff] %v5337_v0  ;;  %1278 = vmatpush.msrb.mxu1 %v5355_v20  ;;  %v5361_v0 = vld [vmem:[%s7593_s3 + $0x2b8] sm:$0xff] }
 0x1df   :  { %8170 = vst [vmem:[#allocation132_spill] sm:$0xff] %v5343_v14  ;;  %1318 = vmatpush.msrb.mxu3 %v5361_v0  ;;  %v5367_v14 = vld [vmem:[%s7592_s2 + $0x40] sm:$0xff] }
 0x1e0   :  { %8171 = vst [vmem:[#allocation133_spill] sm:$0xff] %v5349_v13  ;;  %1000 = vmatpush.msra.mxu0 %v5367_v14  ;;  %v5373_v13 = vld [vmem:[%s7592_s2 + $0x48] sm:$0xff] }
 0x1e1   :  { %8172 = vst [vmem:[#allocation134_spill] sm:$0xff] %v5355_v20  ;;  %1040 = vmatpush.msra.mxu2 %v5373_v13  ;;  %v5379_v20 = vld [vmem:[%s7593_s3 + $0x290] sm:$0xff] }
 0x1e2   :  { %8173 = vst [vmem:[#allocation135_spill] sm:$0xff] %v5361_v0  ;;  %1279 = vmatpush.msrb.mxu1 %v5379_v20  ;;  %v5385_v0 = vld [vmem:[%s7593_s3 + $0x298] sm:$0xff] }
 0x1e3   :  { %8174 = vst [vmem:[#allocation136_spill] sm:$0xff] %v5367_v14  ;;  %1319 = vmatpush.msrb.mxu3 %v5385_v0  ;;  %v5391_v14 = vld [vmem:[%s7592_s2 + $0x20] sm:$0xff] }
 0x1e4   :  { %8175 = vst [vmem:[#allocation137_spill] sm:$0xff] %v5373_v13  ;;  %1001 = vmatpush.msra.mxu0 %v5391_v14  ;;  %v5397_v13 = vld [vmem:[%s7592_s2 + $0x28] sm:$0xff] }
 0x1e5   :  { %8176 = vst [vmem:[#allocation138_spill] sm:$0xff] %v5379_v20  ;;  %1041 = vmatpush.msra.mxu2 %v5397_v13  ;;  %v5403_v20 = vld [vmem:[%s7593_s3 + $0x270] sm:$0xff] }
 0x1e6   :  { %8177 = vst [vmem:[#allocation139_spill] sm:$0xff] %v5385_v0  ;;  %1280 = vmatpush.msrb.mxu1 %v5403_v20  ;;  %v5409_v0 = vld [vmem:[%s7593_s3 + $0x278] sm:$0xff] }
 0x1e7   :  { %8178 = vst [vmem:[#allocation140_spill] sm:$0xff] %v5391_v14  ;;  %1320 = vmatpush.msrb.mxu3 %v5409_v0  ;;  %v5415_v14 = vld [vmem:[%s7592_s2] sm:$0xff] }
 0x1e8   :  { %8179 = vst [vmem:[#allocation141_spill] sm:$0xff] %v5397_v13  ;;  %1002 = vmatpush.msra.mxu0 %v5415_v14  ;;  %v5421_v13 = vld [vmem:[%s7592_s2 + $0x8] sm:$0xff] }
 0x1e9   :  { %8180 = vst [vmem:[#allocation142_spill] sm:$0xff] %v5403_v20  ;;  %1042 = vmatpush.msra.mxu2 %v5421_v13  ;;  %v5427_v20 = vld [vmem:[%s7593_s3 + $0x250] sm:$0xff] }
 0x1ea   :  { %8181 = vst [vmem:[#allocation143_spill] sm:$0xff] %v5409_v0  ;;  %1281 = vmatpush.msrb.mxu1 %v5427_v20  ;;  %v5433_v0 = vld [vmem:[%s7593_s3 + $0x258] sm:$0xff] }
 0x1eb   :  { %8182 = vst [vmem:[#allocation144_spill] sm:$0xff] %v5415_v14  ;;  %1321 = vmatpush.msrb.mxu3 %v5433_v0  ;;  %v5439_v14 = vld [vmem:[%s7592_s2 + $0x1f0] sm:$0xff] }
 0x1ec   :  { %8183 = vst [vmem:[#allocation145_spill] sm:$0xff] %v5421_v13  ;;  %1067 = vmatpush.msrb.mxu0 %v5439_v14  ;;  %v5445_v13 = vld [vmem:[%s7592_s2 + $0x1f8] sm:$0xff] }
 0x1ed   :  { %8184 = vst [vmem:[#allocation146_spill] sm:$0xff] %v5427_v20  ;;  %1107 = vmatpush.msrb.mxu2 %v5445_v13  ;;  %v5451_v20 = vld [vmem:[%s7593_s3 + $0x230] sm:$0xff] }
 0x1ee   :  { %8185 = vst [vmem:[#allocation147_spill] sm:$0xff] %v5433_v0  ;;  %1282 = vmatpush.msrb.mxu1 %v5451_v20  ;;  %v5457_v0 = vld [vmem:[%s7593_s3 + $0x238] sm:$0xff] }
 0x1ef   :  { %8186 = vst [vmem:[#allocation148_spill] sm:$0xff] %v5439_v14  ;;  %1322 = vmatpush.msrb.mxu3 %v5457_v0  ;;  %v5463_v14 = vld [vmem:[%s7592_s2 + $0x1d0] sm:$0xff] }
 0x1f0   :  { %8187 = vst [vmem:[#allocation149_spill] sm:$0xff] %v5445_v13  ;;  %1068 = vmatpush.msrb.mxu0 %v5463_v14  ;;  %v5469_v13 = vld [vmem:[%s7592_s2 + $0x1d8] sm:$0xff] }
 0x1f1   :  { %8188 = vst [vmem:[#allocation150_spill] sm:$0xff] %v5451_v20  ;;  %1108 = vmatpush.msrb.mxu2 %v5469_v13  ;;  %v5475_v20 = vld [vmem:[%s7593_s3 + $0x210] sm:$0xff] }
 0x1f2   :  { %8189 = vst [vmem:[#allocation151_spill] sm:$0xff] %v5457_v0  ;;  %1283 = vmatpush.msrb.mxu1 %v5475_v20  ;;  %v5481_v0 = vld [vmem:[%s7593_s3 + $0x218] sm:$0xff] }
 0x1f3   :  { %8190 = vst [vmem:[#allocation152_spill] sm:$0xff] %v5463_v14  ;;  %1323 = vmatpush.msrb.mxu3 %v5481_v0  ;;  %v5487_v14 = vld [vmem:[%s7592_s2 + $0x1b0] sm:$0xff] }
 0x1f4   :  { %8191 = vst [vmem:[#allocation153_spill] sm:$0xff] %v5469_v13  ;;  %1069 = vmatpush.msrb.mxu0 %v5487_v14  ;;  %v5493_v13 = vld [vmem:[%s7592_s2 + $0x1b8] sm:$0xff] }
 0x1f5   :  { %8192 = vst [vmem:[#allocation154_spill] sm:$0xff] %v5475_v20  ;;  %1109 = vmatpush.msrb.mxu2 %v5493_v13  ;;  %v5499_v20 = vld [vmem:[%s7592_s2 + $0x190] sm:$0xff] }
 0x1f6   :  { %8193 = vst [vmem:[#allocation155_spill] sm:$0xff] %v5481_v0  ;;  %1070 = vmatpush.msrb.mxu0 %v5499_v20  ;;  %v5505_v0 = vld [vmem:[%s7592_s2 + $0x198] sm:$0xff] }
 0x1f7   :  { %8194 = vst [vmem:[#allocation156_spill] sm:$0xff] %v5487_v14  ;;  %1110 = vmatpush.msrb.mxu2 %v5505_v0  ;;  %v5511_v14 = vld [vmem:[%s7592_s2 + $0x170] sm:$0xff] }
 0x1f8   :  { %8195 = vst [vmem:[#allocation157_spill] sm:$0xff] %v5493_v13  ;;  %1071 = vmatpush.msrb.mxu0 %v5511_v14  ;;  %v5517_v13 = vld [vmem:[%s7592_s2 + $0x178] sm:$0xff] }
 0x1f9   :  { %8196 = vst [vmem:[#allocation158_spill] sm:$0xff] %v5499_v20  ;;  %1111 = vmatpush.msrb.mxu2 %v5517_v13  ;;  %v5523_v20 = vld [vmem:[%s7592_s2 + $0x150] sm:$0xff] }
 0x1fa   :  { %8197 = vst [vmem:[#allocation159_spill] sm:$0xff] %v5505_v0  ;;  %1072 = vmatpush.msrb.mxu0 %v5523_v20  ;;  %v5529_v0 = vld [vmem:[%s7592_s2 + $0x158] sm:$0xff] }
 0x1fb   :  { %1112 = vmatpush.msrb.mxu2 %v5529_v0 }
 0x1fc   :  { %1073 = vmatpush.msrb.mxu0 %v4093_v8  ;;  %v2340_v8 = vld [vmem:[%s7594_s4 + $0x8] sm:$0xf] }
 0x1fd   :  { %1113 = vmatpush.msrb.mxu2 %v4098_v58  ;;  %v5555_v58 = vperm.slane %v2340_v8, 0 }
 0x1fe   :  { %1074 = vmatpush.msrb.mxu0 %v4110_v10  ;;  %v699_v10 = vpop.f32.mrf.mxu0 }
 0x1ff   :  { %1114 = vmatpush.msrb.mxu2 %v4115_v46  ;;  %8198 = vst [vmem:[#allocation160_spill] sm:$0xff] %v5555_v58  ;;  %v700_v46 = vadd.f32 %v699_v10, %v5555_v58 }
 0x200   :  { %1075 = vmatpush.msrb.mxu0 %v4131_v16  ;;  %v719_v16 = vpop.f32.mrf.mxu1 }
 0x201   :  { %1115 = vmatpush.msrb.mxu2 %v4136_v19  ;;  %v720_v19 = vadd.f32 %v719_v16, %v700_v46 }
 0x202   :  { %1076 = vmatpush.msrb.mxu0 %v4148_v23  ;;  %v5558_v23 = vperm.slane %v2340_v8, 1 }
 0x203   :  { %1116 = vmatpush.msrb.mxu2 %v4153_v24  ;;  %v842_v24 = vsub.f32 0.0, %v720_v19 }
 0x204   :  { %1077 = vmatpush.msrb.mxu0 %v4162_v27  ;;  %8199 = vst [vmem:[#allocation161_spill] sm:$0xff] %v5558_v23  ;;  %v759_v27 = vpop.f32.mrf.mxu3 }
 0x205   :  { %1117 = vmatpush.msrb.mxu2 %v4167_v28  ;;  %v739_v28 = vpop.f32.mrf.mxu2 }
 0x206   :  { %1078 = vmatpush.msrb.mxu0 %v4176_v31  ;;  %v843_v31 = vmul.f32 1.442695, %v842_v24 }
 0x207   :  { %1118 = vmatpush.msrb.mxu2 %v4181_v32  ;;  %v740_v32 = vadd.f32 %v739_v28, %v5558_v23 }
 0x208   :  { %1079 = vmatpush.msrb.mxu0 %v4190_v35  ;;  %2378 = vpow2.f32 %v843_v31  ;;  %v799_v16 = vpop.f32.mrf.mxu1 }
 0x209   :  { %1119 = vmatpush.msrb.mxu2 %v4195_v36  ;;  %v760_v35 = vadd.f32 %v759_v27, %v740_v32  ;;  %v5561_v36 = vperm.slane %v2340_v8, 2 }
 0x20a   :  { %1080 = vmatpush.msrb.mxu0 %v4204_v39  ;;  %v779_v39 = vpop.f32.mrf.mxu0 }
 0x20b   :  { %1120 = vmatpush.msrb.mxu2 %v4209_v40  ;;  %8200 = vst [vmem:[#allocation162_spill] sm:$0xff] %v5561_v36  ;;  %v847_v40 = vsub.f32 0.0, %v760_v35 }
 0x20c   :  { %1081 = vmatpush.msrb.mxu0 %v4219_v43  ;;  %v5563_v43 = vperm.slane %v2340_v8, 3  ;;  %v839_v19 = vpop.f32.mrf.mxu3 }
 0x20d   :  { %1121 = vmatpush.msrb.mxu2 %v4224_v3  ;;  %v848_v3 = vmul.f32 1.442695, %v847_v40 }
 0x20e   :  { %1082 = vmatpush.msrb.mxu0 %v4233_v47  ;;  %8201 = vst [vmem:[#allocation163_spill] sm:$0xff] %v5563_v43  ;;  %v780_v47 = vadd.f32 %v779_v39, %v5561_v36  ;;  %v2379_v10 = vpop.eup %2378 }
 0x20f   :  { %1122 = vmatpush.msrb.mxu2 %v4238_v33  ;;  %v819_v33 = vpop.f32.mrf.mxu2  ;;  %2380 = vpow2.f32 %v848_v3  ;;  %v845_v31 = vadd.f32 1.0, %v2379_v10 }
 0x210   :  { %v820_v46 = vadd.f32 %v819_v33, %v5563_v43  ;;  %v800_v24 = vadd.f32 %v799_v16, %v780_v47  ;;  %v903_v47 = vpop.f32.mrf.mxu1 }
 0x212   :  { %v840_v28 = vadd.f32 %v839_v19, %v820_v46  ;;  %2382 = vtanh.f32 %v800_v24  ;;  %v950_v19 = vrot.slane %v903_v47, 6 }
 0x213   :  { %2384 = vrcp.f32 %v845_v31  ;;  %v2341_v31 = vld [vmem:[%s7590_s0 + $0x8] sm:$0xff] }
 0x214   :  { %v853_v27 = vsub.f32 0.0, %v840_v28  ;;  %v943_v10 = vpop.f32.mrf.mxu3 }
 0x215   :  { %v2381_v32 = vpop.eup %2380  ;;  %v952_v24 = vrot.slane %v943_v10, 2 }
 0x216   :  { %v854_v23 = vmul.f32 1.442695, %v853_v27  ;;  %v850_v8 = vadd.f32 1.0, %v2381_v32 }
 0x218   :  { %2386 = vpow2.f32 %v854_v23  ;;  %v2383_v35 = vpop.eup %2382 }
 0x219   :  { %2388 = vrcp.f32 %v850_v8  ;;  %v2385_v39 = vpop.eup %2384 }
 0x21a   :  { %v859_v33 = vmul.f32 %v2385_v39, %v2383_v35 }
 0x21e   :  { %v2387_v40 = vpop.eup %2386 }
 0x21f   :  { %v2389_v36 = vpop.eup %2388  ;;  %v856_v3 = vadd.f32 1.0, %v2387_v40  ;;  %v5584_v40 = vld [vmem:[%s7591_s1 + $0x1e8] sm:$0xff] }
 0x220   :  { %v858_v58 = vmul.f32 0.0, %v2389_v36 }
 0x221   :  { %2390 = vrcp.f32 %v856_v3  ;;  %v5590_v3 = vld [vmem:[%s7591_s1 + $0x1f8] sm:$0xff] }
 0x222   :  { %v5567_v43 = vadd.f32 %v859_v33, %v858_v58 }
 0x224   :  { %2392 = vtanh.f32 %v5567_v43 }
 0x225   :  { %v883_v46 = vpop.f32.mrf.mxu0 }
 0x226   :  { %v953_v36 = vsel %vm434_vm0, %v883_v46, %v950_v19  ;;  %v5596_v46 = vld [vmem:[%s7591_s1 + $0x1c8] sm:$0xff] }
 0x227   :  { %v2391_v28 = vpop.eup %2390 }
 0x22a   :  { %v2393_v27 = vpop.eup %2392 }
 0x22b   :  { %v5576_v8 = vmul.f32 %v2393_v27, %v2391_v28  ;;  %v5614_v28 = vld [vmem:[%s7591_s1 + $0x1b8] sm:$0xff] }
 0x22c   :  { %v923_v16 = vpop.f32.mrf.mxu2 }
 0x22d   :  { %v951_v23 = vrot.slane %v923_v16, 4  ;;  %8202 = vst [vmem:[#allocation164_spill] sm:$0xff] %v5576_v8  ;;  %1204 = vmatmul.f32.vlgmr.msra.gmra.mxu1 %v5576_v8  ;;  %1244 = vmatmul.f32.vlgmr.msra.gmra.mxu3 %v5576_v8  ;;  %v5602_v16 = vld [vmem:[%s7591_s1 + $0x1d8] sm:$0xff] }
 0x22e   :  { %1372 = vmatpush.msra.mxu1 %v5584_v40  ;;  %1412 = vmatpush.msra.mxu3 %v5590_v3 }
 0x22f   :  { %v954_v58 = vsel %vm436_vm1, %v951_v23, %v952_v24  ;;  %v5608_v23 = vld [vmem:[%s7591_s1 + $0x1a8] sm:$0xff] }
 0x230   :  { %v955_v32 = vsel %vm438_vm2, %v953_v36, %v954_v58  ;;  %1373 = vmatpush.msra.mxu1 %v5596_v46  ;;  %1413 = vmatpush.msra.mxu3 %v5602_v16  ;;  %v5620_v36 = vld [vmem:[%s7591_s1 + $0x188] sm:$0xff]  ;;  %v5626_v58 = vld [vmem:[%s7591_s1 + $0x198] sm:$0xff] }
 0x231   :  { %v957_v35 = vadd.f32 %v2341_v31, %v955_v32  ;;  %v5634_v32 = vld [vmem:[%s7591_s1 + $0x168] sm:$0xff] }
 0x232   :  { %1374 = vmatpush.msra.mxu1 %v5608_v23  ;;  %1414 = vmatpush.msra.mxu3 %v5614_v28 }
 0x233   :  { %v958_v39 = vadd.f32 %v957_v35, %v4103_v12  ;;  %v5640_v35 = vld [vmem:[%s7591_s1 + $0x178] sm:$0xff] }
 0x234   :  { %1375 = vmatpush.msra.mxu1 %v5620_v36  ;;  %1415 = vmatpush.msra.mxu3 %v5626_v58  ;;  %8203 = vst [vmem:[#allocation165_spill] sm:$0xff] %v5640_v35 }
 0x235   :  { %v959_v33 = vsub.f32 0.0, %v958_v39  ;;  %v965_v47 = vrot.slane %v958_v39, 2  ;;  %v975_v10 = vrot.slane %v958_v39, 6  ;;  %1284 = vmatmul.f32.vlgmr.msrb.gmra.mxu1 %v5576_v8  ;;  %1324 = vmatmul.f32.vlgmr.msrb.gmra.mxu3 %v5576_v8 }
 0x236   :  { %1376 = vmatpush.msra.mxu1 %v5634_v32  ;;  %1416 = vmatpush.msra.mxu3 %v5640_v35  ;;  %v5731_v35 = vld [vmem:[%s7591_s1 + $0x68] sm:$0xff] }
 0x237   :  { %v960_v19 = vmul.f32 1.442695, %v959_v33  ;;  %v967_v24 = vsub.f32 0.0, %v965_v47  ;;  %v977_v27 = vsub.f32 0.0, %v975_v10  ;;  %v5646_v47 = vld [vmem:[%s7591_s1 + $0x148] sm:$0xff]  ;;  %v5652_v10 = vld [vmem:[%s7591_s1 + $0x158] sm:$0xff] }
 0x238   :  { %8204 = vst [vmem:[#allocation166_spill] sm:$0xff] %v5646_v47  ;;  %1377 = vmatpush.msra.mxu1 %v5646_v47  ;;  %1417 = vmatpush.msra.mxu3 %v5652_v10 }
 0x239   :  { %2394 = vpow2.f32 %v960_v19  ;;  %v968_v31 = vmul.f32 1.442695, %v967_v24  ;;  %v978_v33 = vmul.f32 1.442695, %v977_v27  ;;  %8205 = vst [vmem:[#allocation167_spill] sm:$0xff] %v5652_v10  ;;  %v972_v24 = vrot.slane %v958_v39, 4 }
 0x23a   :  { %v5664_v27 = vld [vmem:[%s7591_s1 + $0x138] sm:$0xff]  ;;  %v5670_v39 = vld [vmem:[%s7591_s1 + $0x108] sm:$0xff] }
 0x23b   :  { %2396 = vpow2.f32 %v968_v31  ;;  %v5658_v31 = vld [vmem:[%s7591_s1 + $0x128] sm:$0xff]  ;;  %8207 = vst [vmem:[#allocation169_spill] sm:$0xff] %v5664_v27  ;;  %1418 = vmatpush.msra.mxu3 %v5664_v27 }
 0x23c   :  { %8206 = vst [vmem:[#allocation168_spill] sm:$0xff] %v5658_v31  ;;  %1378 = vmatpush.msra.mxu1 %v5658_v31  ;;  %2398 = vpow2.f32 %v978_v33  ;;  %v5676_v31 = vld [vmem:[%s7591_s1 + $0x118] sm:$0xff]  ;;  %v5682_v33 = vld [vmem:[%s7591_s1 + $0xe8] sm:$0xff] }
 0x23d   :  { %8208 = vst [vmem:[#allocation170_spill] sm:$0xff] %v5670_v39  ;;  %1419 = vmatpush.msra.mxu3 %v5676_v31 }
 0x23e   :  { %1379 = vmatpush.msra.mxu1 %v5670_v39  ;;  %8209 = vst [vmem:[#allocation171_spill] sm:$0xff] %v5676_v31 }
 0x23f   :  { %v2395_v19 = vpop.eup %2394  ;;  %8210 = vst [vmem:[#allocation172_spill] sm:$0xff] %v5682_v33 }
 0x240   :  { %v962_v8 = vadd.f32 1.0, %v2395_v19  ;;  %1380 = vmatpush.msra.mxu1 %v5682_v33  ;;  %v5688_v19 = vld [vmem:[%s7591_s1 + $0xf8] sm:$0xff] }
 0x241   :  { %v2397_v47 = vpop.eup %2396  ;;  %8211 = vst [vmem:[#allocation173_spill] sm:$0xff] %v5688_v19  ;;  %1420 = vmatpush.msra.mxu3 %v5688_v19  ;;  %v5706_v19 = vld [vmem:[%s7591_s1 + $0xa8] sm:$0xff] }
 0x242   :  { %2400 = vrcp.f32 %v962_v8  ;;  %v970_v10 = vadd.f32 1.0, %v2397_v47  ;;  %v5694_v8 = vld [vmem:[%s7591_s1 + $0xc8] sm:$0xff]  ;;  %v5700_v47 = vld [vmem:[%s7591_s1 + $0xd8] sm:$0xff]  ;;  %8214 = vst [vmem:[#allocation176_spill] sm:$0xff] %v5706_v19 }
 0x243   :  { %2402 = vtanh.f32 %v972_v24  ;;  %8212 = vst [vmem:[#allocation174_spill] sm:$0xff] %v5694_v8  ;;  %1381 = vmatpush.msra.mxu1 %v5694_v8  ;;  %1421 = vmatpush.msra.mxu3 %v5700_v47  ;;  %v2399_v24 = vpop.eup %2398 }
 0x244   :  { %2404 = vrcp.f32 %v970_v10  ;;  %8213 = vst [vmem:[#allocation175_spill] sm:$0xff] %v5700_v47  ;;  %v5712_v10 = vld [vmem:[%s7591_s1 + $0xb8] sm:$0xff]  ;;  %v5718_v47 = vld [vmem:[%s7591_s1 + $0x88] sm:$0xff]  ;;  %v980_v39 = vadd.f32 1.0, %v2399_v24  ;;  %v5782_v24 = vld [vmem:[%s7592_s2 + $0x3e0] sm:$0xff] }
 0x245   :  { %1382 = vmatpush.msra.mxu1 %v5706_v19  ;;  %8215 = vst [vmem:[#allocation177_spill] sm:$0xff] %v5712_v10  ;;  %1422 = vmatpush.msra.mxu3 %v5712_v10  ;;  %v5724_v19 = vld [vmem:[%s7591_s1 + $0x98] sm:$0xff] }
 0x246   :  { %8216 = vst [vmem:[#allocation178_spill] sm:$0xff] %v5718_v47  ;;  %2406 = vrcp.f32 %v980_v39  ;;  %v5770_v39 = vld [vmem:[%s7591_s1 + $0x8] sm:$0xff] }
 0x247   :  { %1383 = vmatpush.msra.mxu1 %v5718_v47  ;;  %8217 = vst [vmem:[#allocation179_spill] sm:$0xff] %v5724_v19  ;;  %1423 = vmatpush.msra.mxu3 %v5724_v19  ;;  %v5737_v47 = vld [vmem:[%s7591_s1 + $0x78] sm:$0xff] }
 0x248   :  { %v2401_v8 = vpop.eup %2400  ;;  %8220 = vst [vmem:[#allocation182_spill] sm:$0xff] %v5770_v39 }
 0x249   :  { %v2403_v33 = vpop.eup %2402  ;;  %1384 = vmatpush.msra.mxu1 %v5731_v35  ;;  %1424 = vmatpush.msra.mxu3 %v5737_v47  ;;  %8222 = vst [vmem:[#allocation184_spill] sm:$0xff] %v5782_v24 }
 0x24a   :  { %v2405_v31 = vpop.eup %2404  ;;  %v983_v27 = vmul.f32 %v2403_v33, %v2401_v8  ;;  %v5764_v33 = vld [vmem:[%s7591_s1 + $0x38] sm:$0xff] }
 0x24b   :  { %v982_v10 = vmul.f32 %v2405_v31, %v4254_v59  ;;  %v5745_v59 = vld [vmem:[%s7591_s1 + $0x48] sm:$0xff]  ;;  %v5751_v31 = vld [vmem:[%s7591_s1 + $0x58] sm:$0xff]  ;;  %8219 = vst [vmem:[#allocation181_spill] sm:$0xff] %v5764_v33 }
 0x24c   :  { %1385 = vmatpush.msra.mxu1 %v5745_v59  ;;  %1425 = vmatpush.msra.mxu3 %v5751_v31  ;;  %v5776_v8 = vld [vmem:[%s7591_s1 + $0x18] sm:$0xff] }
 0x24d   :  { %v5740_v19 = vadd.f32 %v983_v27, %v982_v10  ;;  %v5758_v27 = vld [vmem:[%s7591_s1 + $0x28] sm:$0xff]  ;;  %8221 = vst [vmem:[#allocation183_spill] sm:$0xff] %v5776_v8 }
 0x24e   :  { %8218 = vst [vmem:[#allocation180_spill] sm:$0xff] %v5758_v27  ;;  %1386 = vmatpush.msra.mxu1 %v5758_v27  ;;  %1426 = vmatpush.msra.mxu3 %v5764_v33  ;;  %v5788_v10 = vld [vmem:[%s7592_s2 + $0x3e8] sm:$0xff]  ;;  %v5794_v33 = vld [vmem:[%s7592_s2 + $0x3c0] sm:$0xff] }
 0x24f   :  { %2408 = vtanh.f32 %v5740_v19  ;;  %8223 = vst [vmem:[#allocation185_spill] sm:$0xff] %v5788_v10 }
 0x250   :  { %1387 = vmatpush.msra.mxu1 %v5770_v39  ;;  %1427 = vmatpush.msra.mxu3 %v5776_v8  ;;  %v2407_v39 = vpop.eup %2406  ;;  %8224 = vst [vmem:[#allocation186_spill] sm:$0xff] %v5794_v33  ;;  %v5800_v8 = vld [vmem:[%s7592_s2 + $0x3c8] sm:$0xff] }
 0x252   :  { %1493 = vmatpush.msrb.mxu1 %v5782_v24  ;;  %1533 = vmatpush.msrb.mxu3 %v5788_v10  ;;  %v5808_v10 = vld [vmem:[%s7592_s2 + $0x3a0] sm:$0xff] }
 0x253   :  { %8225 = vst [vmem:[#allocation187_spill] sm:$0xff] %v5808_v10 }
 0x254   :  { %1494 = vmatpush.msrb.mxu1 %v5794_v33  ;;  %1534 = vmatpush.msrb.mxu3 %v5800_v8  ;;  %v5814_v33 = vld [vmem:[%s7592_s2 + $0x3a8] sm:$0xff] }
 0x255   :  { %v2409_v24 = vpop.eup %2408  ;;  %8226 = vst [vmem:[#allocation188_spill] sm:$0xff] %v5814_v33 }
 0x256   :  { %v5803_v27 = vmul.f32 %v2409_v24, %v2407_v39  ;;  %1495 = vmatpush.msrb.mxu1 %v5808_v10  ;;  %1535 = vmatpush.msrb.mxu3 %v5814_v33  ;;  %v5824_v39 = vld [vmem:[%s7593_s3 + $0x1e0] sm:$0xff]  ;;  %v5830_v24 = vld [vmem:[%s7593_s3 + $0x1e8] sm:$0xff] }
 0x257   :  { %8227 = vst [vmem:[#allocation189_spill] sm:$0xff] %v5824_v39  ;;  %v5836_v33 = vld [vmem:[%s7592_s2 + $0x380] sm:$0xff]  ;;  %v5842_v10 = vld [vmem:[%s7592_s2 + $0x388] sm:$0xff] }
 0x258   :  { %1003 = vmatmul.f32.vlgmr.msra.gmra.mxu0 %v5803_v27  ;;  %1043 = vmatmul.f32.vlgmr.msra.gmra.mxu2 %v5803_v27  ;;  %8228 = vst [vmem:[#allocation190_spill] sm:$0xff] %v5830_v24 }
 0x259   :  { %1388 = vmatmul.f32.vlgmr.msra.gmra.mxu1 %v5803_v27  ;;  %1428 = vmatmul.f32.vlgmr.msra.gmra.mxu3 %v5803_v27  ;;  %8229 = vst [vmem:[#allocation191_spill] sm:$0xff] %v5836_v33 }
 0x25a   :  { %1168 = vmatpush.msra.mxu0 %v5824_v39  ;;  %1208 = vmatpush.msra.mxu2 %v5830_v24  ;;  %8230 = vst [vmem:[#allocation192_spill] sm:$0xff] %v5842_v10  ;;  %v5848_v39 = vld [vmem:[%s7593_s3 + $0x1c0] sm:$0xff]  ;;  %v5854_v24 = vld [vmem:[%s7593_s3 + $0x1c8] sm:$0xff] }
 0x25b   :  { %1496 = vmatpush.msrb.mxu1 %v5836_v33  ;;  %1536 = vmatpush.msrb.mxu3 %v5842_v10  ;;  %8231 = vst [vmem:[#allocation193_spill] sm:$0xff] %v5848_v39  ;;  %v5860_v33 = vld [vmem:[%s7592_s2 + $0x360] sm:$0xff]  ;;  %v5866_v10 = vld [vmem:[%s7592_s2 + $0x368] sm:$0xff] }
 0x25c   :  { %1169 = vmatpush.msra.mxu0 %v5848_v39  ;;  %8232 = vst [vmem:[#allocation194_spill] sm:$0xff] %v5854_v24  ;;  %1209 = vmatpush.msra.mxu2 %v5854_v24  ;;  %v5872_v39 = vld [vmem:[%s7593_s3 + $0x1a0] sm:$0xff]  ;;  %v5878_v24 = vld [vmem:[%s7593_s3 + $0x1a8] sm:$0xff] }
 0x25d   :  { %8233 = vst [vmem:[#allocation195_spill] sm:$0xff] %v5860_v33  ;;  %1497 = vmatpush.msrb.mxu1 %v5860_v33  ;;  %1537 = vmatpush.msrb.mxu3 %v5866_v10  ;;  %v5884_v33 = vld [vmem:[%s7592_s2 + $0x340] sm:$0xff] }
 0x25e   :  { %8234 = vst [vmem:[#allocation196_spill] sm:$0xff] %v5866_v10  ;;  %1170 = vmatpush.msra.mxu0 %v5872_v39  ;;  %1210 = vmatpush.msra.mxu2 %v5878_v24  ;;  %v5890_v10 = vld [vmem:[%s7592_s2 + $0x348] sm:$0xff] }
 0x25f   :  { %8235 = vst [vmem:[#allocation197_spill] sm:$0xff] %v5872_v39  ;;  %1498 = vmatpush.msrb.mxu1 %v5884_v33  ;;  %1538 = vmatpush.msrb.mxu3 %v5890_v10  ;;  %v5916_v39 = vld [vmem:[%s7592_s2 + $0x328] sm:$0xff] }
 0x260   :  { %8236 = vst [vmem:[#allocation198_spill] sm:$0xff] %v5878_v24  ;;  %1083 = vmatmul.f32.vlgmr.msrb.gmra.mxu0 %v5803_v27  ;;  %1123 = vmatmul.f32.vlgmr.msrb.gmra.mxu2 %v5803_v27  ;;  %v5898_v24 = vld [vmem:[%s7593_s3 + $0x180] sm:$0xff] }
 0x261   :  { %8237 = vst [vmem:[#allocation199_spill] sm:$0xff] %v5884_v33  ;;  %1171 = vmatpush.msra.mxu0 %v5898_v24  ;;  %v5904_v33 = vld [vmem:[%s7593_s3 + $0x188] sm:$0xff]  ;;  %1539 = vmatpush.msrb.mxu3 %v5916_v39 }
 0x262   :  { %8238 = vst [vmem:[#allocation200_spill] sm:$0xff] %v5890_v10  ;;  %1211 = vmatpush.msra.mxu2 %v5904_v33  ;;  %v5910_v10 = vld [vmem:[%s7592_s2 + $0x320] sm:$0xff] }
 0x263   :  { %8239 = vst [vmem:[#allocation201_spill] sm:$0xff] %v5898_v24  ;;  %1499 = vmatpush.msrb.mxu1 %v5910_v10  ;;  %v5922_v24 = vld [vmem:[%s7593_s3 + $0x160] sm:$0xff] }
 0x264   :  { %8240 = vst [vmem:[#allocation202_spill] sm:$0xff] %v5904_v33  ;;  %1172 = vmatpush.msra.mxu0 %v5922_v24  ;;  %v5928_v33 = vld [vmem:[%s7593_s3 + $0x168] sm:$0xff] }
 0x265   :  { %8241 = vst [vmem:[#allocation203_spill] sm:$0xff] %v5910_v10  ;;  %1212 = vmatpush.msra.mxu2 %v5928_v33  ;;  %v5934_v10 = vld [vmem:[%s7592_s2 + $0x300] sm:$0xff] }
 0x266   :  { %8242 = vst [vmem:[#allocation204_spill] sm:$0xff] %v5916_v39  ;;  %1500 = vmatpush.msrb.mxu1 %v5934_v10  ;;  %v5940_v39 = vld [vmem:[%s7592_s2 + $0x308] sm:$0xff] }
 0x267   :  { %8243 = vst [vmem:[#allocation205_spill] sm:$0xff] %v5922_v24  ;;  %1540 = vmatpush.msrb.mxu3 %v5940_v39  ;;  %v5946_v24 = vld [vmem:[%s7593_s3 + $0x140] sm:$0xff] }
 0x268   :  { %8244 = vst [vmem:[#allocation206_spill] sm:$0xff] %v5928_v33  ;;  %1173 = vmatpush.msra.mxu0 %v5946_v24  ;;  %v5952_v33 = vld [vmem:[%s7593_s3 + $0x148] sm:$0xff] }
 0x269   :  { %8245 = vst [vmem:[#allocation207_spill] sm:$0xff] %v5934_v10  ;;  %1213 = vmatpush.msra.mxu2 %v5952_v33  ;;  %v5958_v10 = vld [vmem:[%s7592_s2 + $0x2e0] sm:$0xff] }
 0x26a   :  { %8246 = vst [vmem:[#allocation208_spill] sm:$0xff] %v5940_v39  ;;  %1501 = vmatpush.msrb.mxu1 %v5958_v10  ;;  %v5964_v39 = vld [vmem:[%s7592_s2 + $0x2e8] sm:$0xff]  ;;  %1174 = vmatpush.msra.mxu0 %v4363_v50  ;;  %v5986_v50 = vld [vmem:[%s7592_s2 + $0x2a0] sm:$0xff] }
 0x26b   :  { %8247 = vst [vmem:[#allocation209_spill] sm:$0xff] %v5952_v33  ;;  %1541 = vmatpush.msrb.mxu3 %v5964_v39  ;;  %1214 = vmatpush.msra.mxu2 %v4368_v38  ;;  %v5972_v33 = vld [vmem:[%s7592_s2 + $0x2c0] sm:$0xff]  ;;  %v5992_v38 = vld [vmem:[%s7592_s2 + $0x2a8] sm:$0xff] }
 0x26c   :  { %8248 = vst [vmem:[#allocation210_spill] sm:$0xff] %v5958_v10  ;;  %1502 = vmatpush.msrb.mxu1 %v5972_v33  ;;  %v5978_v10 = vld [vmem:[%s7592_s2 + $0x2c8] sm:$0xff]  ;;  %1175 = vmatpush.msra.mxu0 %v4373_v1  ;;  %v6000_v1 = vld [vmem:[%s7592_s2 + $0x280] sm:$0xff] }
 0x26d   :  { %8249 = vst [vmem:[#allocation211_spill] sm:$0xff] %v5978_v10  ;;  %1542 = vmatpush.msrb.mxu3 %v5978_v10  ;;  %1215 = vmatpush.msra.mxu2 %v4380_v41  ;;  %v6006_v41 = vld [vmem:[%s7592_s2 + $0x288] sm:$0xff] }
 0x26e   :  { %8250 = vst [vmem:[#allocation212_spill] sm:$0xff] %v5986_v50  ;;  %1503 = vmatpush.msrb.mxu1 %v5986_v50  ;;  %1176 = vmatpush.msra.mxu0 %v4385_v53  ;;  %v6014_v53 = vld [vmem:[%s7592_s2 + $0x260] sm:$0xff] }
 0x26f   :  { %8251 = vst [vmem:[#allocation213_spill] sm:$0xff] %v5992_v38  ;;  %1543 = vmatpush.msrb.mxu3 %v5992_v38  ;;  %1216 = vmatpush.msra.mxu2 %v4390_v63  ;;  %v6020_v63 = vld [vmem:[%s7592_s2 + $0x268] sm:$0xff]  ;;  %v8328_v38 = vld [vmem:[#allocation39_spill] sm:$0xff] }
 0x270   :  { %8252 = vst [vmem:[#allocation214_spill] sm:$0xff] %v6000_v1  ;;  %1504 = vmatpush.msrb.mxu1 %v6000_v1  ;;  %1177 = vmatpush.msra.mxu0 %v4399_v37  ;;  %v6028_v37 = vld [vmem:[%s7592_s2 + $0x240] sm:$0xff] }
 0x271   :  { %8253 = vst [vmem:[#allocation215_spill] sm:$0xff] %v6006_v41  ;;  %1544 = vmatpush.msrb.mxu3 %v6006_v41  ;;  %1217 = vmatpush.msra.mxu2 %v4404_v34  ;;  %v6034_v34 = vld [vmem:[%s7592_s2 + $0x248] sm:$0xff] }
 0x272   :  { %8254 = vst [vmem:[#allocation216_spill] sm:$0xff] %v6014_v53  ;;  %1505 = vmatpush.msrb.mxu1 %v6014_v53  ;;  %1178 = vmatpush.msra.mxu0 %v4411_v54  ;;  %v6042_v54 = vld [vmem:[%s7592_s2 + $0x220] sm:$0xff]  ;;  %v8327_v41 = vld [vmem:[#allocation34_spill] sm:$0xff] }
 0x273   :  { %8255 = vst [vmem:[#allocation217_spill] sm:$0xff] %v6020_v63  ;;  %1545 = vmatpush.msrb.mxu3 %v6020_v63  ;;  %1218 = vmatpush.msra.mxu2 %v4416_v44  ;;  %v6048_v44 = vld [vmem:[%s7592_s2 + $0x228] sm:$0xff] }
 0x274   :  { %8256 = vst [vmem:[#allocation218_spill] sm:$0xff] %v6028_v37  ;;  %1506 = vmatpush.msrb.mxu1 %v6028_v37  ;;  %1179 = vmatpush.msra.mxu0 %v4423_v6  ;;  %v6056_v6 = vld [vmem:[%s7592_s2 + $0x200] sm:$0xff]  ;;  %v8326_v37 = vld [vmem:[#allocation27_spill] sm:$0xff] }
 0x275   :  { %8257 = vst [vmem:[#allocation219_spill] sm:$0xff] %v6034_v34  ;;  %1546 = vmatpush.msrb.mxu3 %v6034_v34  ;;  %1219 = vmatpush.msra.mxu2 %v4428_v48  ;;  %v6062_v48 = vld [vmem:[%s7592_s2 + $0x208] sm:$0xff] }
 0x276   :  { %8258 = vst [vmem:[#allocation220_spill] sm:$0xff] %v6042_v54  ;;  %1507 = vmatpush.msrb.mxu1 %v6042_v54  ;;  %1180 = vmatpush.msra.mxu0 %v4435_v51  ;;  %v6070_v51 = vld [vmem:[%s7592_s2 + $0x3f0] sm:$0xff] }
 0x277   :  { %8259 = vst [vmem:[#allocation221_spill] sm:$0xff] %v6048_v44  ;;  %1547 = vmatpush.msrb.mxu3 %v6048_v44  ;;  %1220 = vmatpush.msra.mxu2 %v4440_v52  ;;  %v6076_v52 = vld [vmem:[%s7592_s2 + $0x3f8] sm:$0xff]  ;;  %v1064_v44 = vpop.f32.mrf.mxu3 }
 0x278   :  { %8260 = vst [vmem:[#allocation222_spill] sm:$0xff] %v6056_v6  ;;  %1508 = vmatpush.msrb.mxu1 %v6056_v6  ;;  %1181 = vmatpush.msra.mxu0 %v4447_v45  ;;  %v6084_v45 = vld [vmem:[%s7592_s2 + $0x3d0] sm:$0xff] }
 0x279   :  { %8261 = vst [vmem:[#allocation223_spill] sm:$0xff] %v6062_v48  ;;  %1548 = vmatpush.msrb.mxu3 %v6062_v48  ;;  %1221 = vmatpush.msra.mxu2 %v4452_v55  ;;  %v6090_v55 = vld [vmem:[%s7592_s2 + $0x3d8] sm:$0xff]  ;;  %v1024_v48 = vpop.f32.mrf.mxu1 }
 0x27a   :  { %8262 = vst [vmem:[#allocation224_spill] sm:$0xff] %v6070_v51  ;;  %1573 = vmatpush.msra.mxu1 %v6070_v51  ;;  %1182 = vmatpush.msra.mxu0 %v4459_v56  ;;  %v8266_v56 = vld [vmem:[#allocation5_spill] sm:$0xff] }
 0x27b   :  { %8263 = vst [vmem:[#allocation225_spill] sm:$0xff] %v6076_v52  ;;  %1613 = vmatpush.msra.mxu3 %v6076_v52  ;;  %1222 = vmatpush.msra.mxu2 %v4464_v49  ;;  %v6100_v49 = vld [vmem:[%s7592_s2 + $0x3b0] sm:$0xff]  ;;  %v8325_v52 = vld [vmem:[#allocation20_spill] sm:$0xff] }
 0x27c   :  { %8264 = vst [vmem:[#allocation226_spill] sm:$0xff] %v6084_v45  ;;  %1574 = vmatpush.msra.mxu1 %v6084_v45  ;;  %1183 = vmatpush.msra.mxu0 %v4471_v61  ;;  %v6106_v45 = vld [vmem:[%s7592_s2 + $0x3b8] sm:$0xff]  ;;  %v8269_v61 = vld [vmem:[#allocation6_spill] sm:$0xff] }
 0x27d   :  { %8265 = vst [vmem:[#allocation227_spill] sm:$0xff] %v6090_v55  ;;  %1614 = vmatpush.msra.mxu3 %v6090_v55  ;;  %1223 = vmatpush.msra.mxu2 %v4476_v60  ;;  %v8270_v60 = vld [vmem:[#allocation7_spill] sm:$0xff] }
 0x27e   :  { %1248 = vmatpush.msrb.mxu0 %v4483_v62  ;;  %8267 = vst [vmem:[#allocation5_spill] sm:$0xff] %v6100_v49  ;;  %1575 = vmatpush.msra.mxu1 %v6100_v49  ;;  %v6114_v62 = vld [vmem:[%s7592_s2 + $0x390] sm:$0xff]  ;;  %v8273_v49 = vld [vmem:[#allocation8_spill] sm:$0xff] }
 0x27f   :  { %1288 = vmatpush.msrb.mxu2 %v8266_v56  ;;  %8268 = vst [vmem:[#allocation228_spill] sm:$0xff] %v6106_v45  ;;  %1615 = vmatpush.msra.mxu3 %v6106_v45  ;;  %v6120_v56 = vld [vmem:[%s7592_s2 + $0x398] sm:$0xff]  ;;  %v8274_v45 = vld [vmem:[#allocation9_spill] sm:$0xff] }
 0x280   :  { %1249 = vmatpush.msrb.mxu0 %v8269_v61  ;;  %8271 = vst [vmem:[#allocation6_spill] sm:$0xff] %v6114_v62  ;;  %1576 = vmatpush.msra.mxu1 %v6114_v62  ;;  %v6128_v61 = vld [vmem:[%s7592_s2 + $0x370] sm:$0xff] }
 0x281   :  { %1289 = vmatpush.msrb.mxu2 %v8270_v60  ;;  %8272 = vst [vmem:[#allocation7_spill] sm:$0xff] %v6120_v56  ;;  %1616 = vmatpush.msra.mxu3 %v6120_v56  ;;  %v6134_v60 = vld [vmem:[%s7592_s2 + $0x378] sm:$0xff]  ;;  %v8277_v62 = vld [vmem:[#allocation10_spill] sm:$0xff] }
 0x282   :  { %1250 = vmatpush.msrb.mxu0 %v8273_v49  ;;  %8275 = vst [vmem:[#allocation8_spill] sm:$0xff] %v6128_v61  ;;  %1577 = vmatpush.msra.mxu1 %v6128_v61  ;;  %v8278_v56 = vld [vmem:[#allocation11_spill] sm:$0xff]  ;;  %v8281_v61 = vld [vmem:[#allocation12_spill] sm:$0xff] }
 0x283   :  { %1290 = vmatpush.msrb.mxu2 %v8274_v45  ;;  %8276 = vst [vmem:[#allocation9_spill] sm:$0xff] %v6134_v60  ;;  %1617 = vmatpush.msra.mxu3 %v6134_v60  ;;  %v6142_v45 = vld [vmem:[%s7592_s2 + $0x350] sm:$0xff]  ;;  %v6148_v49 = vld [vmem:[%s7592_s2 + $0x358] sm:$0xff]  ;;  %v8282_v60 = vld [vmem:[#allocation13_spill] sm:$0xff] }
 0x284   :  { %1251 = vmatpush.msrb.mxu0 %v8277_v62  ;;  %8279 = vst [vmem:[#allocation10_spill] sm:$0xff] %v6142_v45  ;;  %1578 = vmatpush.msra.mxu1 %v6142_v45  ;;  %v6156_v62 = vld [vmem:[%s7592_s2 + $0x330] sm:$0xff] }
 0x285   :  { %1291 = vmatpush.msrb.mxu2 %v8278_v56  ;;  %8280 = vst [vmem:[#allocation11_spill] sm:$0xff] %v6148_v49  ;;  %1618 = vmatpush.msra.mxu3 %v6148_v49  ;;  %v6162_v56 = vld [vmem:[%s7592_s2 + $0x338] sm:$0xff]  ;;  %v8285_v45 = vld [vmem:[#allocation14_spill] sm:$0xff] }
 0x286   :  { %1252 = vmatpush.msrb.mxu0 %v8281_v61  ;;  %8283 = vst [vmem:[#allocation12_spill] sm:$0xff] %v6156_v62  ;;  %1579 = vmatpush.msra.mxu1 %v6156_v62  ;;  %v8286_v49 = vld [vmem:[#allocation15_spill] sm:$0xff]  ;;  %v8289_v62 = vld [vmem:[#allocation16_spill] sm:$0xff] }
 0x287   :  { %1292 = vmatpush.msrb.mxu2 %v8282_v60  ;;  %8284 = vst [vmem:[#allocation13_spill] sm:$0xff] %v6162_v56  ;;  %1619 = vmatpush.msra.mxu3 %v6162_v56  ;;  %v6170_v61 = vld [vmem:[%s7592_s2 + $0x310] sm:$0xff]  ;;  %v6176_v60 = vld [vmem:[%s7592_s2 + $0x318] sm:$0xff]  ;;  %v8290_v56 = vld [vmem:[#allocation17_spill] sm:$0xff] }
 0x288   :  { %1253 = vmatpush.msrb.mxu0 %v8285_v45  ;;  %8287 = vst [vmem:[#allocation14_spill] sm:$0xff] %v6170_v61  ;;  %1580 = vmatpush.msra.mxu1 %v6170_v61  ;;  %v6184_v45 = vld [vmem:[%s7592_s2 + $0x2f0] sm:$0xff] }
 0x289   :  { %1293 = vmatpush.msrb.mxu2 %v8286_v49  ;;  %8288 = vst [vmem:[#allocation15_spill] sm:$0xff] %v6176_v60  ;;  %1620 = vmatpush.msra.mxu3 %v6176_v60  ;;  %v6190_v49 = vld [vmem:[%s7592_s2 + $0x2f8] sm:$0xff]  ;;  %v8293_v61 = vld [vmem:[#allocation18_spill] sm:$0xff] }
 0x28a   :  { %1254 = vmatpush.msrb.mxu0 %v8289_v62  ;;  %8291 = vst [vmem:[#allocation16_spill] sm:$0xff] %v6184_v45  ;;  %1581 = vmatpush.msra.mxu1 %v6184_v45  ;;  %v8294_v60 = vld [vmem:[#allocation19_spill] sm:$0xff]  ;;  %v8297_v45 = vld [vmem:[#allocation21_spill] sm:$0xff] }
 0x28b   :  { %1294 = vmatpush.msrb.mxu2 %v8290_v56  ;;  %8292 = vst [vmem:[#allocation17_spill] sm:$0xff] %v6190_v49  ;;  %1621 = vmatpush.msra.mxu3 %v6190_v49  ;;  %v6198_v62 = vld [vmem:[%s7592_s2 + $0x2d0] sm:$0xff]  ;;  %v6204_v56 = vld [vmem:[%s7592_s2 + $0x2d8] sm:$0xff] }
 0x28c   :  { %1255 = vmatpush.msrb.mxu0 %v8293_v61  ;;  %8295 = vst [vmem:[#allocation18_spill] sm:$0xff] %v6198_v62  ;;  %1582 = vmatpush.msra.mxu1 %v6198_v62  ;;  %v8298_v49 = vld [vmem:[#allocation22_spill] sm:$0xff]  ;;  %v8301_v62 = vld [vmem:[#allocation23_spill] sm:$0xff] }
 0x28d   :  { %1295 = vmatpush.msrb.mxu2 %v8294_v60  ;;  %8296 = vst [vmem:[#allocation19_spill] sm:$0xff] %v6204_v56  ;;  %1622 = vmatpush.msra.mxu3 %v6204_v56  ;;  %v6212_v61 = vld [vmem:[%s7592_s2 + $0x2b0] sm:$0xff]  ;;  %v6218_v60 = vld [vmem:[%s7592_s2 + $0x2b8] sm:$0xff] }
 0x28e   :  { %1256 = vmatpush.msrb.mxu0 %v8297_v45  ;;  %8299 = vst [vmem:[#allocation21_spill] sm:$0xff] %v6212_v61  ;;  %1583 = vmatpush.msra.mxu1 %v6212_v61  ;;  %v8302_v56 = vld [vmem:[#allocation24_spill] sm:$0xff]  ;;  %v6226_v45 = vld [vmem:[%s7592_s2 + $0x290] sm:$0xff]  ;;  %v8305_v61 = vld [vmem:[#allocation25_spill] sm:$0xff] }
 0x28f   :  { %1296 = vmatpush.msrb.mxu2 %v8298_v49  ;;  %8300 = vst [vmem:[#allocation22_spill] sm:$0xff] %v6218_v60  ;;  %1623 = vmatpush.msra.mxu3 %v6218_v60  ;;  %v6232_v49 = vld [vmem:[%s7592_s2 + $0x298] sm:$0xff]  ;;  %v8306_v60 = vld [vmem:[#allocation26_spill] sm:$0xff] }
 0x290   :  { %1257 = vmatpush.msrb.mxu0 %v8301_v62  ;;  %8303 = vst [vmem:[#allocation23_spill] sm:$0xff] %v6226_v45  ;;  %1584 = vmatpush.msra.mxu1 %v6226_v45  ;;  %v6240_v62 = vld [vmem:[%s7592_s2 + $0x270] sm:$0xff]  ;;  %v8309_v45 = vld [vmem:[#allocation28_spill] sm:$0xff] }
 0x291   :  { %1297 = vmatpush.msrb.mxu2 %v8302_v56  ;;  %8304 = vst [vmem:[#allocation24_spill] sm:$0xff] %v6232_v49  ;;  %1624 = vmatpush.msra.mxu3 %v6232_v49  ;;  %v6246_v56 = vld [vmem:[%s7592_s2 + $0x278] sm:$0xff]  ;;  %v8310_v49 = vld [vmem:[#allocation29_spill] sm:$0xff] }
 0x292   :  { %1258 = vmatpush.msrb.mxu0 %v8305_v61  ;;  %8307 = vst [vmem:[#allocation25_spill] sm:$0xff] %v6240_v62  ;;  %1585 = vmatpush.msra.mxu1 %v6240_v62  ;;  %v6254_v61 = vld [vmem:[%s7592_s2 + $0x250] sm:$0xff] }
 0x293   :  { %1298 = vmatpush.msrb.mxu2 %v8306_v60  ;;  %8308 = vst [vmem:[#allocation26_spill] sm:$0xff] %v6246_v56  ;;  %1625 = vmatpush.msra.mxu3 %v6246_v56  ;;  %v6260_v60 = vld [vmem:[%s7592_s2 + $0x258] sm:$0xff]  ;;  %v8313_v62 = vld [vmem:[#allocation30_spill] sm:$0xff] }
 0x294   :  { %1259 = vmatpush.msrb.mxu0 %v8309_v45  ;;  %8311 = vst [vmem:[#allocation28_spill] sm:$0xff] %v6254_v61  ;;  %1586 = vmatpush.msra.mxu1 %v6254_v61  ;;  %v8314_v56 = vld [vmem:[#allocation31_spill] sm:$0xff]  ;;  %v8317_v61 = vld [vmem:[#allocation32_spill] sm:$0xff] }
 0x295   :  { %1299 = vmatpush.msrb.mxu2 %v8310_v49  ;;  %8312 = vst [vmem:[#allocation29_spill] sm:$0xff] %v6260_v60  ;;  %1626 = vmatpush.msra.mxu3 %v6260_v60  ;;  %v6268_v45 = vld [vmem:[%s7592_s2 + $0x230] sm:$0xff]  ;;  %v6274_v49 = vld [vmem:[%s7592_s2 + $0x238] sm:$0xff]  ;;  %v8318_v60 = vld [vmem:[#allocation33_spill] sm:$0xff] }
 0x296   :  { %1260 = vmatpush.msrb.mxu0 %v8313_v62  ;;  %8315 = vst [vmem:[#allocation30_spill] sm:$0xff] %v6268_v45  ;;  %1587 = vmatpush.msra.mxu1 %v6268_v45  ;;  %v6282_v62 = vld [vmem:[%s7592_s2 + $0x210] sm:$0xff] }
 0x297   :  { %1300 = vmatpush.msrb.mxu2 %v8314_v56  ;;  %8316 = vst [vmem:[#allocation31_spill] sm:$0xff] %v6274_v49  ;;  %1627 = vmatpush.msra.mxu3 %v6274_v49  ;;  %v6288_v56 = vld [vmem:[%s7592_s2 + $0x218] sm:$0xff] }
 0x298   :  { %1261 = vmatpush.msrb.mxu0 %v8317_v61  ;;  %8319 = vst [vmem:[#allocation32_spill] sm:$0xff] %v6282_v62  ;;  %1588 = vmatpush.msra.mxu1 %v6282_v62  ;;  %v8321_v45 = vld [vmem:[#allocation35_spill] sm:$0xff]  ;;  %v8322_v49 = vld [vmem:[#allocation36_spill] sm:$0xff]  ;;  %v8323_v61 = vld [vmem:[#allocation37_spill] sm:$0xff] }
 0x299   :  { %1301 = vmatpush.msrb.mxu2 %v8318_v60  ;;  %8320 = vst [vmem:[#allocation33_spill] sm:$0xff] %v6288_v56  ;;  %1628 = vmatpush.msra.mxu3 %v6288_v56  ;;  %v8324_v60 = vld [vmem:[#allocation38_spill] sm:$0xff] }
 0x29a   :  { %1262 = vmatpush.msrb.mxu0 %v8321_v45 }
 0x29b   :  { %1302 = vmatpush.msrb.mxu2 %v8322_v49 }
 0x29c   :  { %1263 = vmatpush.msrb.mxu0 %v8323_v61 }
 0x29d   :  { %1303 = vmatpush.msrb.mxu2 %v8324_v60 }
 0x2d5   :  { %v1004_v55 = vpop.f32.mrf.mxu0 }
 0x2d6   :  { %v1005_v51 = vadd.f32 %v1004_v55, %v8325_v52  ;;  %v1104_v52 = vpop.f32.mrf.mxu1 }
 0x2d8   :  { %v1025_v62 = vadd.f32 %v1024_v48, %v1005_v51  ;;  %v1144_v48 = vpop.f32.mrf.mxu3 }
 0x2da   :  { %v1147_v6 = vsub.f32 0.0, %v1025_v62 }
 0x2db   :  { %v1044_v54 = vpop.f32.mrf.mxu2 }
 0x2dc   :  { %v1148_v34 = vmul.f32 1.442695, %v1147_v6  ;;  %v1045_v63 = vadd.f32 %v1044_v54, %v8326_v37 }
 0x2dd   :  { %v1084_v45 = vpop.f32.mrf.mxu0 }
 0x2de   :  { %2410 = vpow2.f32 %v1148_v34  ;;  %v1065_v56 = vadd.f32 %v1064_v44, %v1045_v63  ;;  %v1085_v61 = vadd.f32 %v1084_v45, %v8327_v41 }
 0x2e0   :  { %v1152_v53 = vsub.f32 0.0, %v1065_v56  ;;  %v1105_v51 = vadd.f32 %v1104_v52, %v1085_v61 }
 0x2e2   :  { %v1153_v49 = vmul.f32 1.442695, %v1152_v53 }
 0x2e3   :  { %v1124_v1 = vpop.f32.mrf.mxu2 }
 0x2e4   :  { %v2411_v60 = vpop.eup %2410  ;;  %2412 = vpow2.f32 %v1153_v49  ;;  %v1125_v55 = vadd.f32 %v1124_v1, %v8328_v38 }
 0x2e5   :  { %v1150_v50 = vadd.f32 1.0, %v2411_v60  ;;  %2414 = vtanh.f32 %v1105_v51  ;;  %v8349_v51 = vld [vmem:[#allocation60_spill] sm:$0xff] }
 0x2e6   :  { %v1145_v62 = vadd.f32 %v1144_v48, %v1125_v55  ;;  %v8347_v55 = vld [vmem:[#allocation58_spill] sm:$0xff]  ;;  %v8348_v48 = vld [vmem:[#allocation59_spill] sm:$0xff] }
 0x2e7   :  { %2416 = vrcp.f32 %v1150_v50  ;;  %v8346_v50 = vld [vmem:[#allocation57_spill] sm:$0xff] }
 0x2e8   :  { %v1158_v6 = vsub.f32 0.0, %v1145_v62  ;;  %v8350_v62 = vld [vmem:[#allocation61_spill] sm:$0xff] }
 0x2ea   :  { %v2413_v10 = vpop.eup %2412  ;;  %v1159_v34 = vmul.f32 1.442695, %v1158_v6  ;;  %v8351_v6 = vld [vmem:[#allocation62_spill] sm:$0xff] }
 0x2eb   :  { %v1155_v63 = vadd.f32 1.0, %v2413_v10  ;;  %v2415_v53 = vpop.eup %2414  ;;  %v8345_v10 = vld [vmem:[#allocation56_spill] sm:$0xff] }
 0x2ec   :  { %2418 = vpow2.f32 %v1159_v34  ;;  %v8352_v34 = vld [vmem:[#allocation63_spill] sm:$0xff] }
 0x2ed   :  { %2420 = vrcp.f32 %v1155_v63  ;;  %v2417_v54 = vpop.eup %2416  ;;  %v8353_v63 = vld [vmem:[#allocation64_spill] sm:$0xff] }
 0x2ee   :  { %v1164_v49 = vmul.f32 %v2417_v54, %v2415_v53  ;;  %v8354_v53 = vld [vmem:[#allocation65_spill] sm:$0xff]  ;;  %v8355_v54 = vld [vmem:[#allocation66_spill] sm:$0xff] }
 0x2f2   :  { %v2419_v44 = vpop.eup %2418 }
 0x2f3   :  { %v2421_v56 = vpop.eup %2420  ;;  %v1161_v45 = vadd.f32 1.0, %v2419_v44  ;;  %v8356_v44 = vld [vmem:[#allocation67_spill] sm:$0xff] }
 0x2f4   :  { %v1163_v1 = vmul.f32 %v2421_v56, %v4687_v22  ;;  %v8329_v22 = vld [vmem:[#allocation40_spill] sm:$0xff] }
 0x2f5   :  { %2422 = vrcp.f32 %v1161_v45  ;;  %v8357_v56 = vld [vmem:[#allocation68_spill] sm:$0xff]  ;;  %v8358_v45 = vld [vmem:[#allocation69_spill] sm:$0xff] }
 0x2f6   :  { %v6300_v38 = vadd.f32 %v1164_v49, %v1163_v1  ;;  %v8359_v1 = vld [vmem:[#allocation70_spill] sm:$0xff]  ;;  %v8360_v49 = vld [vmem:[#allocation71_spill] sm:$0xff] }
 0x2f8   :  { %2424 = vtanh.f32 %v6300_v38 }
 0x2fb   :  { %v2423_v52 = vpop.eup %2422 }
 0x2fe   :  { %v2425_v61 = vpop.eup %2424 }
 0x2ff   :  { %v1167_v60 = vmul.f32 %v2425_v61, %v2423_v52  ;;  %v8361_v52 = vld [vmem:[#allocation72_spill] sm:$0xff]  ;;  %v8362_v61 = vld [vmem:[#allocation73_spill] sm:$0xff] }
 0x301   :  { %1184 = vmatmul.f32.vlgmr.msra.gmra.mxu0 %v1167_v60  ;;  %1224 = vmatmul.f32.vlgmr.msra.gmra.mxu2 %v1167_v60 }
 0x302   :  { %1352 = vmatpush.msra.mxu0 %v4693_v7  ;;  %1392 = vmatpush.msra.mxu2 %v4699_v4  ;;  %v8330_v7 = vld [vmem:[#allocation41_spill] sm:$0xff]  ;;  %v8331_v4 = vld [vmem:[#allocation42_spill] sm:$0xff] }
 0x303   :  { %1509 = vmatmul.f32.vlgmr.msrb.gmra.mxu1 %v1167_v60  ;;  %1549 = vmatmul.f32.vlgmr.msrb.gmra.mxu3 %v1167_v60 }
 0x304   :  { %1353 = vmatpush.msra.mxu0 %v4705_v9  ;;  %1393 = vmatpush.msra.mxu2 %v4711_v17  ;;  %v8332_v9 = vld [vmem:[#allocation43_spill] sm:$0xff]  ;;  %v8333_v17 = vld [vmem:[#allocation44_spill] sm:$0xff] }
 0x305   :  { %1674 = vmatpush.msrb.mxu1 %v4717_v18  ;;  %1714 = vmatpush.msrb.mxu3 %v4723_v21  ;;  %v8334_v18 = vld [vmem:[#allocation45_spill] sm:$0xff]  ;;  %v8335_v21 = vld [vmem:[#allocation46_spill] sm:$0xff] }
 0x306   :  { %1354 = vmatpush.msra.mxu0 %v4729_v29  ;;  %1394 = vmatpush.msra.mxu2 %v4735_v15  ;;  %v8336_v29 = vld [vmem:[#allocation47_spill] sm:$0xff]  ;;  %v8337_v15 = vld [vmem:[#allocation48_spill] sm:$0xff] }
 0x307   :  { %1675 = vmatpush.msrb.mxu1 %v4741_v42  ;;  %1715 = vmatpush.msrb.mxu3 %v4747_v57  ;;  %v8338_v42 = vld [vmem:[#allocation49_spill] sm:$0xff]  ;;  %v8339_v57 = vld [vmem:[#allocation50_spill] sm:$0xff] }
 0x308   :  { %1355 = vmatpush.msra.mxu0 %v4753_v26  ;;  %1395 = vmatpush.msra.mxu2 %v4759_v30  ;;  %v8340_v26 = vld [vmem:[#allocation51_spill] sm:$0xff]  ;;  %v8341_v30 = vld [vmem:[#allocation52_spill] sm:$0xff] }
 0x309   :  { %1264 = vmatmul.f32.vlgmr.msrb.gmra.mxu0 %v1167_v60  ;;  %1304 = vmatmul.f32.vlgmr.msrb.gmra.mxu2 %v1167_v60 }
 0x30a   :  { %1356 = vmatpush.msra.mxu0 %v4765_v5  ;;  %1396 = vmatpush.msra.mxu2 %v4771_v25  ;;  %v8342_v5 = vld [vmem:[#allocation53_spill] sm:$0xff]  ;;  %v8343_v25 = vld [vmem:[#allocation54_spill] sm:$0xff] }
 0x30b   :  { %1589 = vmatmul.f32.vlgmr.msra.gmra.mxu1 %v1167_v60  ;;  %1629 = vmatmul.f32.vlgmr.msra.gmra.mxu3 %v1167_v60  ;;  %v8363_v60 = vld [vmem:[#allocation74_spill] sm:$0xff] }
 0x30c   :  { %1357 = vmatpush.msra.mxu0 %v4777_v2  ;;  %1397 = vmatpush.msra.mxu2 %v8329_v22  ;;  %v8344_v2 = vld [vmem:[#allocation55_spill] sm:$0xff] }
 0x30d   :  { %1676 = vmatpush.msrb.mxu1 %v8330_v7  ;;  %1716 = vmatpush.msrb.mxu3 %v8331_v4  ;;  %v8364_v22 = vld [vmem:[#allocation75_spill] sm:$0xff]  ;;  %v8365_v7 = vld [vmem:[#allocation76_spill] sm:$0xff]  ;;  %v8366_v4 = vld [vmem:[#allocation77_spill] sm:$0xff] }
 0x30e   :  { %1358 = vmatpush.msra.mxu0 %v8332_v9  ;;  %1398 = vmatpush.msra.mxu2 %v8333_v17  ;;  %v8367_v9 = vld [vmem:[#allocation78_spill] sm:$0xff]  ;;  %v8368_v17 = vld [vmem:[#allocation79_spill] sm:$0xff] }
 0x30f   :  { %1677 = vmatpush.msrb.mxu1 %v8334_v18  ;;  %1717 = vmatpush.msrb.mxu3 %v8335_v21  ;;  %v8369_v18 = vld [vmem:[#allocation80_spill] sm:$0xff]  ;;  %v8370_v21 = vld [vmem:[#allocation81_spill] sm:$0xff] }
 0x310   :  { %1359 = vmatpush.msra.mxu0 %v8336_v29  ;;  %1399 = vmatpush.msra.mxu2 %v8337_v15  ;;  %v8371_v29 = vld [vmem:[#allocation82_spill] sm:$0xff]  ;;  %v8372_v15 = vld [vmem:[#allocation83_spill] sm:$0xff] }
 0x311   :  { %1678 = vmatpush.msrb.mxu1 %v8338_v42  ;;  %1718 = vmatpush.msrb.mxu3 %v8339_v57  ;;  %v8373_v42 = vld [vmem:[#allocation84_spill] sm:$0xff]  ;;  %v8375_v57 = vld [vmem:[#allocation86_spill] sm:$0xff] }
 0x312   :  { %1360 = vmatpush.msra.mxu0 %v8340_v26  ;;  %1400 = vmatpush.msra.mxu2 %v8341_v30  ;;  %v8376_v26 = vld [vmem:[#allocation87_spill] sm:$0xff]  ;;  %v8377_v30 = vld [vmem:[#allocation88_spill] sm:$0xff] }
 0x313   :  { %1679 = vmatpush.msrb.mxu1 %v8342_v5  ;;  %1719 = vmatpush.msrb.mxu3 %v8343_v25  ;;  %v8378_v5 = vld [vmem:[#allocation89_spill] sm:$0xff]  ;;  %v8380_v25 = vld [vmem:[#allocation91_spill] sm:$0xff] }
 0x314   :  { %1361 = vmatpush.msra.mxu0 %v8344_v2  ;;  %1401 = vmatpush.msra.mxu2 %v8345_v10  ;;  %v8381_v2 = vld [vmem:[#allocation92_spill] sm:$0xff]  ;;  %v8382_v10 = vld [vmem:[#allocation93_spill] sm:$0xff] }
 0x315   :  { %1680 = vmatpush.msrb.mxu1 %v8346_v50  ;;  %1720 = vmatpush.msrb.mxu3 %v8347_v55  ;;  %v8383_v50 = vld [vmem:[#allocation94_spill] sm:$0xff]  ;;  %v8384_v55 = vld [vmem:[#allocation95_spill] sm:$0xff] }
 0x316   :  { %1362 = vmatpush.msra.mxu0 %v8348_v48  ;;  %1402 = vmatpush.msra.mxu2 %v8349_v51  ;;  %v8385_v48 = vld [vmem:[#allocation96_spill] sm:$0xff]  ;;  %v8386_v51 = vld [vmem:[#allocation97_spill] sm:$0xff] }
 0x317   :  { %1681 = vmatpush.msrb.mxu1 %v8350_v62  ;;  %1721 = vmatpush.msrb.mxu3 %v8351_v6  ;;  %v8387_v62 = vld [vmem:[#allocation98_spill] sm:$0xff]  ;;  %v8388_v6 = vld [vmem:[#allocation99_spill] sm:$0xff] }
 0x318   :  { %1363 = vmatpush.msra.mxu0 %v8352_v34  ;;  %1403 = vmatpush.msra.mxu2 %v8353_v63  ;;  %v8389_v34 = vld [vmem:[#allocation100_spill] sm:$0xff]  ;;  %v8390_v63 = vld [vmem:[#allocation101_spill] sm:$0xff] }
 0x319   :  { %1682 = vmatpush.msrb.mxu1 %v8354_v53  ;;  %1722 = vmatpush.msrb.mxu3 %v8355_v54  ;;  %v8391_v53 = vld [vmem:[#allocation102_spill] sm:$0xff]  ;;  %v8392_v54 = vld [vmem:[#allocation103_spill] sm:$0xff] }
 0x31a   :  { %1364 = vmatpush.msra.mxu0 %v8356_v44  ;;  %1404 = vmatpush.msra.mxu2 %v8357_v56  ;;  %v8393_v44 = vld [vmem:[#allocation104_spill] sm:$0xff]  ;;  %v8394_v56 = vld [vmem:[#allocation105_spill] sm:$0xff] }
 0x31b   :  { %1683 = vmatpush.msrb.mxu1 %v8358_v45  ;;  %1723 = vmatpush.msrb.mxu3 %v8359_v1  ;;  %v8395_v45 = vld [vmem:[#allocation106_spill] sm:$0xff]  ;;  %v8396_v1 = vld [vmem:[#allocation107_spill] sm:$0xff] }
 0x31c   :  { %1365 = vmatpush.msra.mxu0 %v8360_v49  ;;  %1405 = vmatpush.msra.mxu2 %v8361_v52  ;;  %v8397_v49 = vld [vmem:[#allocation108_spill] sm:$0xff]  ;;  %v8398_v52 = vld [vmem:[#allocation109_spill] sm:$0xff] }
 0x31d   :  { %1684 = vmatpush.msrb.mxu1 %v8362_v61  ;;  %1724 = vmatpush.msrb.mxu3 %v8363_v60  ;;  %v8399_v61 = vld [vmem:[#allocation110_spill] sm:$0xff]  ;;  %v8400_v60 = vld [vmem:[#allocation111_spill] sm:$0xff] }
 0x31e   :  { %1366 = vmatpush.msra.mxu0 %v8364_v22  ;;  %1406 = vmatpush.msra.mxu2 %v8365_v7  ;;  %v8401_v22 = vld [vmem:[#allocation112_spill] sm:$0xff]  ;;  %v8402_v7 = vld [vmem:[#allocation113_spill] sm:$0xff] }
 0x31f   :  { %1685 = vmatpush.msrb.mxu1 %v5005_v11  ;;  %1725 = vmatpush.msrb.mxu3 %v8366_v4  ;;  %v8374_v11 = vld [vmem:[#allocation85_spill] sm:$0xff]  ;;  %v8403_v4 = vld [vmem:[#allocation114_spill] sm:$0xff] }
 0x320   :  { %1367 = vmatpush.msra.mxu0 %v8367_v9  ;;  %1407 = vmatpush.msra.mxu2 %v8368_v17  ;;  %v8404_v9 = vld [vmem:[#allocation115_spill] sm:$0xff]  ;;  %v8405_v17 = vld [vmem:[#allocation116_spill] sm:$0xff] }
 0x321   :  { %1368 = vmatmul.f32.vlgmr.msra.gmra.mxu0 %v5803_v27  ;;  %1408 = vmatmul.f32.vlgmr.msra.gmra.mxu2 %v5803_v27  ;;  %v8379_v27 = vld [vmem:[#allocation90_spill] sm:$0xff] }
 0x322   :  { %1686 = vmatpush.msrb.mxu1 %v8369_v18  ;;  %1726 = vmatpush.msrb.mxu3 %v8370_v21  ;;  %v8406_v18 = vld [vmem:[#allocation117_spill] sm:$0xff]  ;;  %v8407_v21 = vld [vmem:[#allocation118_spill] sm:$0xff] }
 0x323   :  { %1473 = vmatpush.msrb.mxu0 %v8371_v29  ;;  %1513 = vmatpush.msrb.mxu2 %v8372_v15  ;;  %v8408_v29 = vld [vmem:[#allocation119_spill] sm:$0xff]  ;;  %v8409_v15 = vld [vmem:[#allocation120_spill] sm:$0xff] }
 0x324   :  { %1687 = vmatpush.msrb.mxu1 %v8373_v42  ;;  %1727 = vmatpush.msrb.mxu3 %v8374_v11  ;;  %v8410_v42 = vld [vmem:[#allocation121_spill] sm:$0xff]  ;;  %v8411_v11 = vld [vmem:[#allocation122_spill] sm:$0xff] }
 0x325   :  { %1474 = vmatpush.msrb.mxu0 %v8375_v57  ;;  %1514 = vmatpush.msrb.mxu2 %v8376_v26  ;;  %v8412_v57 = vld [vmem:[#allocation123_spill] sm:$0xff]  ;;  %v8413_v26 = vld [vmem:[#allocation124_spill] sm:$0xff] }
 0x326   :  { %1688 = vmatpush.msrb.mxu1 %v8377_v30  ;;  %1728 = vmatpush.msrb.mxu3 %v8378_v5  ;;  %v8414_v30 = vld [vmem:[#allocation125_spill] sm:$0xff]  ;;  %v8415_v5 = vld [vmem:[#allocation126_spill] sm:$0xff] }
 0x327   :  { %1475 = vmatpush.msrb.mxu0 %v8379_v27  ;;  %1515 = vmatpush.msrb.mxu2 %v8380_v25  ;;  %v8416_v27 = vld [vmem:[#allocation127_spill] sm:$0xff]  ;;  %v8417_v25 = vld [vmem:[#allocation128_spill] sm:$0xff] }
 0x328   :  { %1689 = vmatpush.msrb.mxu1 %v8381_v2  ;;  %1729 = vmatpush.msrb.mxu3 %v8382_v10  ;;  %v8418_v2 = vld [vmem:[#allocation129_spill] sm:$0xff]  ;;  %v8419_v10 = vld [vmem:[#allocation130_spill] sm:$0xff] }
 0x329   :  { %1476 = vmatpush.msrb.mxu0 %v8385_v48  ;;  %1516 = vmatpush.msrb.mxu2 %v8386_v51  ;;  %v8422_v48 = vld [vmem:[#allocation133_spill] sm:$0xff]  ;;  %v8423_v51 = vld [vmem:[#allocation134_spill] sm:$0xff] }
 0x32a   :  { %1754 = vmatpush.msra.mxu1 %v8383_v50  ;;  %1794 = vmatpush.msra.mxu3 %v8384_v55  ;;  %v8420_v50 = vld [vmem:[#allocation131_spill] sm:$0xff]  ;;  %v8421_v55 = vld [vmem:[#allocation132_spill] sm:$0xff] }
 0x32b   :  { %1477 = vmatpush.msrb.mxu0 %v8389_v34  ;;  %1517 = vmatpush.msrb.mxu2 %v8390_v63  ;;  %v8426_v34 = vld [vmem:[#allocation137_spill] sm:$0xff]  ;;  %v8427_v63 = vld [vmem:[#allocation138_spill] sm:$0xff] }
 0x32c   :  { %1755 = vmatpush.msra.mxu1 %v8387_v62  ;;  %1795 = vmatpush.msra.mxu3 %v8388_v6  ;;  %v8424_v62 = vld [vmem:[#allocation135_spill] sm:$0xff]  ;;  %v8425_v6 = vld [vmem:[#allocation136_spill] sm:$0xff] }
 0x32d   :  { %1478 = vmatpush.msrb.mxu0 %v8393_v44  ;;  %1518 = vmatpush.msrb.mxu2 %v8394_v56  ;;  %v8430_v44 = vld [vmem:[#allocation141_spill] sm:$0xff]  ;;  %v8431_v56 = vld [vmem:[#allocation142_spill] sm:$0xff] }
 0x32e   :  { %1756 = vmatpush.msra.mxu1 %v8391_v53  ;;  %1796 = vmatpush.msra.mxu3 %v8392_v54  ;;  %v8428_v53 = vld [vmem:[#allocation139_spill] sm:$0xff]  ;;  %v8429_v54 = vld [vmem:[#allocation140_spill] sm:$0xff] }
 0x32f   :  { %1479 = vmatpush.msrb.mxu0 %v8397_v49  ;;  %1519 = vmatpush.msrb.mxu2 %v8398_v52  ;;  %v8434_v49 = vld [vmem:[#allocation145_spill] sm:$0xff]  ;;  %v8435_v52 = vld [vmem:[#allocation146_spill] sm:$0xff] }
 0x330   :  { %1757 = vmatpush.msra.mxu1 %v8395_v45  ;;  %1797 = vmatpush.msra.mxu3 %v8396_v1  ;;  %v8432_v45 = vld [vmem:[#allocation143_spill] sm:$0xff]  ;;  %v8433_v1 = vld [vmem:[#allocation144_spill] sm:$0xff] }
 0x331   :  { %1480 = vmatpush.msrb.mxu0 %v8401_v22  ;;  %1520 = vmatpush.msrb.mxu2 %v8402_v7  ;;  %v8438_v22 = vld [vmem:[#allocation149_spill] sm:$0xff]  ;;  %v8439_v7 = vld [vmem:[#allocation150_spill] sm:$0xff] }
 0x332   :  { %1758 = vmatpush.msra.mxu1 %v8399_v61  ;;  %1798 = vmatpush.msra.mxu3 %v8400_v60  ;;  %v8436_v61 = vld [vmem:[#allocation147_spill] sm:$0xff]  ;;  %v8437_v60 = vld [vmem:[#allocation148_spill] sm:$0xff] }
 0x333   :  { %1481 = vmatpush.msrb.mxu0 %v8405_v17  ;;  %1521 = vmatpush.msrb.mxu2 %v8406_v18  ;;  %v8442_v17 = vld [vmem:[#allocation153_spill] sm:$0xff]  ;;  %v8443_v18 = vld [vmem:[#allocation154_spill] sm:$0xff] }
 0x334   :  { %1759 = vmatpush.msra.mxu1 %v8403_v4  ;;  %1799 = vmatpush.msra.mxu3 %v8404_v9  ;;  %v8440_v4 = vld [vmem:[#allocation151_spill] sm:$0xff]  ;;  %v8441_v9 = vld [vmem:[#allocation152_spill] sm:$0xff] }
 0x335   :  { %1482 = vmatpush.msrb.mxu0 %v8409_v15  ;;  %1522 = vmatpush.msrb.mxu2 %v8410_v42  ;;  %v8446_v15 = vld [vmem:[#allocation157_spill] sm:$0xff]  ;;  %v8447_v42 = vld [vmem:[#allocation158_spill] sm:$0xff] }
 0x336   :  { %1760 = vmatpush.msra.mxu1 %v8407_v21  ;;  %1800 = vmatpush.msra.mxu3 %v8408_v29  ;;  %v8444_v21 = vld [vmem:[#allocation155_spill] sm:$0xff]  ;;  %v8445_v29 = vld [vmem:[#allocation156_spill] sm:$0xff] }
 0x337   :  { %1483 = vmatpush.msrb.mxu0 %v8413_v26  ;;  %1523 = vmatpush.msrb.mxu2 %v8414_v30  ;;  %v6454_v26 = vld [vmem:[%s7592_s2 + $0x138] sm:$0xff]  ;;  %v6484_v30 = vld [vmem:[%s7592_s2 + $0xd0] sm:$0xff] }
 0x338   :  { %1761 = vmatpush.msra.mxu1 %v8411_v11  ;;  %1801 = vmatpush.msra.mxu3 %v8412_v57  ;;  %v8448_v11 = vld [vmem:[#allocation159_spill] sm:$0xff] }
 0x339   :  { %1484 = vmatpush.msrb.mxu0 %v8417_v25  ;;  %1524 = vmatpush.msrb.mxu2 %v8418_v2  ;;  %v6448_v57 = vld [vmem:[%s7592_s2 + $0x130] sm:$0xff]  ;;  %v6502_v25 = vld [vmem:[%s7592_s2 + $0xb8] sm:$0xff] }
 0x33a   :  { %1762 = vmatpush.msra.mxu1 %v8415_v5  ;;  %1802 = vmatpush.msra.mxu3 %v8416_v27  ;;  %v6490_v5 = vld [vmem:[%s7592_s2 + $0xd8] sm:$0xff]  ;;  %v6496_v27 = vld [vmem:[%s7592_s2 + $0xb0] sm:$0xff] }
 0x33b   :  { %1485 = vmatpush.msrb.mxu0 %v8421_v55  ;;  %1525 = vmatpush.msrb.mxu2 %v8422_v48  ;;  %v6508_v2 = vld [vmem:[%s7592_s2 + $0x90] sm:$0xff]  ;;  %v6526_v55 = vld [vmem:[%s7592_s2 + $0x78] sm:$0xff] }
 0x33c   :  { %1763 = vmatpush.msra.mxu1 %v8419_v10  ;;  %1803 = vmatpush.msra.mxu3 %v8420_v50  ;;  %v6514_v10 = vld [vmem:[%s7592_s2 + $0x98] sm:$0xff]  ;;  %v6520_v50 = vld [vmem:[%s7592_s2 + $0x70] sm:$0xff] }
 0x33d   :  { %1486 = vmatpush.msrb.mxu0 %v8425_v6  ;;  %1526 = vmatpush.msrb.mxu2 %v8426_v34  ;;  %v6532_v48 = vld [vmem:[%s7592_s2 + $0x50] sm:$0xff]  ;;  %v6550_v6 = vld [vmem:[%s7592_s2 + $0x38] sm:$0xff] }
 0x33e   :  { %1764 = vmatpush.msra.mxu1 %v8423_v51  ;;  %1804 = vmatpush.msra.mxu3 %v8424_v62  ;;  %v6538_v51 = vld [vmem:[%s7592_s2 + $0x58] sm:$0xff]  ;;  %v6544_v62 = vld [vmem:[%s7592_s2 + $0x30] sm:$0xff] }
 0x33f   :  { %1487 = vmatpush.msrb.mxu0 %v8429_v54  ;;  %1527 = vmatpush.msrb.mxu2 %v8430_v44  ;;  %v6556_v34 = vld [vmem:[%s7592_s2 + $0x10] sm:$0xff]  ;;  %v8450_v54 = vld [vmem:[#allocation160_spill] sm:$0xff] }
 0x340   :  { %1765 = vmatpush.msra.mxu1 %v8427_v63  ;;  %1805 = vmatpush.msra.mxu3 %v8428_v53  ;;  %v6562_v63 = vld [vmem:[%s7592_s2 + $0x18] sm:$0xff] }
 0x341   :  { %1488 = vmatpush.msrb.mxu0 %v8433_v1  ;;  %1528 = vmatpush.msrb.mxu2 %v8434_v49  ;;  %8449 = vst [vmem:[#allocation35_spill] sm:$0xff] %v6562_v63  ;;  %v1245_v49 = vpop.f32.mrf.mxu3 }
 0x342   :  { %1766 = vmatpush.msra.mxu1 %v8431_v56  ;;  %1806 = vmatpush.msra.mxu3 %v8432_v45  ;;  %v1205_v56 = vpop.f32.mrf.mxu1 }
 0x343   :  { %1553 = vmatpush.msra.mxu0 %v8437_v60  ;;  %1593 = vmatpush.msra.mxu2 %v8438_v22  ;;  %v8451_v60 = vld [vmem:[#allocation161_spill] sm:$0xff] }
 0x344   :  { %1767 = vmatpush.msra.mxu1 %v8435_v52  ;;  %1807 = vmatpush.msra.mxu3 %v8436_v61 }
 0x345   :  { %1554 = vmatpush.msra.mxu0 %v8441_v9  ;;  %1594 = vmatpush.msra.mxu2 %v8442_v17 }
 0x346   :  { %1768 = vmatpush.msra.mxu1 %v8439_v7  ;;  %1808 = vmatpush.msra.mxu3 %v8440_v4 }
 0x347   :  { %1555 = vmatpush.msra.mxu0 %v8445_v29  ;;  %1595 = vmatpush.msra.mxu2 %v8446_v15 }
 0x348   :  { %1769 = vmatpush.msra.mxu1 %v8443_v18  ;;  %1809 = vmatpush.msra.mxu3 %v8444_v21  ;;  %v8452_v18 = vld [vmem:[#allocation162_spill] sm:$0xff] }
 0x349   :  { %1556 = vmatpush.msra.mxu0 %v8447_v42  ;;  %1596 = vmatpush.msra.mxu2 %v8448_v11  ;;  %v8453_v42 = vld [vmem:[#allocation163_spill] sm:$0xff] }
 0x34b   :  { %1557 = vmatpush.msra.mxu0 %v5511_v14  ;;  %1597 = vmatpush.msra.mxu2 %v5517_v13  ;;  %v6466_v14 = vld [vmem:[%s7592_s2 + $0x118] sm:$0xff]  ;;  %v6472_v13 = vld [vmem:[%s7592_s2 + $0xf0] sm:$0xff] }
 0x34d   :  { %1558 = vmatpush.msra.mxu0 %v5523_v20  ;;  %1598 = vmatpush.msra.mxu2 %v5529_v0  ;;  %v6460_v20 = vld [vmem:[%s7592_s2 + $0x110] sm:$0xff]  ;;  %v6478_v0 = vld [vmem:[%s7592_s2 + $0xf8] sm:$0xff] }
 0x34f   :  { %1559 = vmatpush.msra.mxu0 %v6448_v57  ;;  %1599 = vmatpush.msra.mxu2 %v6454_v26 }
 0x351   :  { %1560 = vmatpush.msra.mxu0 %v6460_v20  ;;  %1600 = vmatpush.msra.mxu2 %v6466_v14 }
 0x353   :  { %1561 = vmatpush.msra.mxu0 %v6472_v13  ;;  %1601 = vmatpush.msra.mxu2 %v6478_v0 }
 0x355   :  { %1562 = vmatpush.msra.mxu0 %v6484_v30  ;;  %1602 = vmatpush.msra.mxu2 %v6490_v5 }
 0x357   :  { %1563 = vmatpush.msra.mxu0 %v6496_v27  ;;  %1603 = vmatpush.msra.mxu2 %v6502_v25 }
 0x359   :  { %1564 = vmatpush.msra.mxu0 %v6508_v2  ;;  %1604 = vmatpush.msra.mxu2 %v6514_v10 }
 0x35b   :  { %1565 = vmatpush.msra.mxu0 %v6520_v50  ;;  %1605 = vmatpush.msra.mxu2 %v6526_v55 }
 0x35d   :  { %1566 = vmatpush.msra.mxu0 %v6532_v48  ;;  %1606 = vmatpush.msra.mxu2 %v6538_v51 }
 0x35f   :  { %1567 = vmatpush.msra.mxu0 %v6544_v62  ;;  %1607 = vmatpush.msra.mxu2 %v6550_v6 }
 0x361   :  { %1568 = vmatpush.msra.mxu0 %v6556_v34  ;;  %1608 = vmatpush.msra.mxu2 %v6562_v63 }
 0x37e   :  { %v1185_v53 = vpop.f32.mrf.mxu0 }
 0x37f   :  { %v1186_v44 = vadd.f32 %v1185_v53, %v8450_v54  ;;  %v1285_v53 = vpop.f32.mrf.mxu1 }
 0x381   :  { %v1206_v45 = vadd.f32 %v1205_v56, %v1186_v44  ;;  %v1325_v44 = vpop.f32.mrf.mxu3 }
 0x383   :  { %v1328_v1 = vsub.f32 0.0, %v1206_v45 }
 0x384   :  { %v1225_v52 = vpop.f32.mrf.mxu2 }
 0x385   :  { %v1329_v61 = vmul.f32 1.442695, %v1328_v1  ;;  %v1226_v22 = vadd.f32 %v1225_v52, %v8451_v60 }
 0x386   :  { %v1265_v4 = vpop.f32.mrf.mxu0 }
 0x387   :  { %2426 = vpow2.f32 %v1329_v61  ;;  %v1246_v7 = vadd.f32 %v1245_v49, %v1226_v22  ;;  %v1266_v21 = vadd.f32 %v1265_v4, %v8452_v18 }
 0x389   :  { %v1333_v9 = vsub.f32 0.0, %v1246_v7  ;;  %v1286_v56 = vadd.f32 %v1285_v53, %v1266_v21  ;;  %v1389_v21 = vpop.f32.mrf.mxu1 }
 0x38b   :  { %v1334_v17 = vmul.f32 1.442695, %v1333_v9 }
 0x38c   :  { %v1305_v29 = vpop.f32.mrf.mxu2 }
 0x38d   :  { %v2427_v15 = vpop.eup %2426  ;;  %2428 = vpow2.f32 %v1334_v17  ;;  %v1306_v11 = vadd.f32 %v1305_v29, %v8453_v42 }
 0x38e   :  { %v1331_v54 = vadd.f32 1.0, %v2427_v15  ;;  %2430 = vtanh.f32 %v1286_v56  ;;  %v1429_v15 = vpop.f32.mrf.mxu3 }
 0x38f   :  { %v1326_v45 = vadd.f32 %v1325_v44, %v1306_v11  ;;  %v1438_v53 = vrot.slane %v1429_v15, 2 }
 0x390   :  { %2432 = vrcp.f32 %v1331_v54 }
 0x391   :  { %v1339_v1 = vsub.f32 0.0, %v1326_v45  ;;  %v2342_v45 = vld [vmem:[%s7590_s0 + $0x10] sm:$0xff] }
 0x393   :  { %v2429_v63 = vpop.eup %2428  ;;  %v1340_v52 = vmul.f32 1.442695, %v1339_v1 }
 0x394   :  { %v1336_v49 = vadd.f32 1.0, %v2429_v63  ;;  %v2431_v61 = vpop.eup %2430  ;;  %v1436_v63 = vrot.slane %v1389_v21, 6 }
 0x395   :  { %2434 = vpow2.f32 %v1340_v52 }
 0x396   :  { %2436 = vrcp.f32 %v1336_v49  ;;  %v2433_v22 = vpop.eup %2432 }
 0x397   :  { %v1345_v29 = vmul.f32 %v2433_v22, %v2431_v61 }
 0x39b   :  { %v2435_v7 = vpop.eup %2434 }
 0x39c   :  { %v2437_v4 = vpop.eup %2436  ;;  %v1342_v9 = vadd.f32 1.0, %v2435_v7 }
 0x39d   :  { %v1344_v17 = vmul.f32 %v2437_v4, %v5567_v43 }
 0x39e   :  { %2438 = vrcp.f32 %v1342_v9  ;;  %v1369_v11 = vpop.f32.mrf.mxu0 }
 0x39f   :  { %v6570_v42 = vadd.f32 %v1345_v29, %v1344_v17  ;;  %v1439_v43 = vsel %vm434_vm0, %v1369_v11, %v1436_v63 }
 0x3a1   :  { %2440 = vtanh.f32 %v6570_v42 }
 0x3a4   :  { %v1409_v54 = vpop.f32.mrf.mxu2  ;;  %v2439_v56 = vpop.eup %2438 }
 0x3a5   :  { %v1437_v44 = vrot.slane %v1409_v54, 4  ;;  %v8457_v54 = vld [vmem:[#allocation168_spill] sm:$0xff] }
 0x3a7   :  { %v2441_v1 = vpop.eup %2440  ;;  %v1440_v52 = vsel %vm436_vm1, %v1437_v44, %v1438_v53  ;;  %v8459_v53 = vld [vmem:[#allocation170_spill] sm:$0xff]  ;;  %v8460_v44 = vld [vmem:[#allocation171_spill] sm:$0xff] }
 0x3a8   :  { %v1441_v49 = vsel %vm438_vm2, %v1439_v43, %v1440_v52  ;;  %v6579_v61 = vmul.f32 %v2441_v1, %v2439_v56  ;;  %v8461_v56 = vld [vmem:[#allocation172_spill] sm:$0xff]  ;;  %v8463_v1 = vld [vmem:[#allocation174_spill] sm:$0xff]  ;;  %v8464_v43 = vld [vmem:[#allocation175_spill] sm:$0xff] }
 0x3a9   :  { %v1443_v22 = vadd.f32 %v2342_v45, %v1441_v49  ;;  %v8462_v45 = vld [vmem:[#allocation173_spill] sm:$0xff]  ;;  %v8465_v49 = vld [vmem:[#allocation176_spill] sm:$0xff] }
 0x3aa   :  { %1690 = vmatmul.f32.vlgmr.msrb.gmra.mxu1 %v6579_v61  ;;  %1730 = vmatmul.f32.vlgmr.msrb.gmra.mxu3 %v6579_v61 }
 0x3ab   :  { %v1444_v7 = vadd.f32 %v1443_v22, %v4103_v12  ;;  %1858 = vmatpush.msrb.mxu1 %v5584_v40  ;;  %1898 = vmatpush.msrb.mxu3 %v5590_v3  ;;  %v8454_v40 = vld [vmem:[#allocation165_spill] sm:$0xff] }
 0x3ac   :  { %v8466_v22 = vld [vmem:[#allocation177_spill] sm:$0xff] }
 0x3ad   :  { %v1445_v4 = vsub.f32 0.0, %v1444_v7  ;;  %v1451_v9 = vrot.slane %v1444_v7, 2  ;;  %v1461_v17 = vrot.slane %v1444_v7, 6  ;;  %1859 = vmatpush.msrb.mxu1 %v5596_v46  ;;  %1899 = vmatpush.msrb.mxu3 %v5602_v16  ;;  %v8455_v46 = vld [vmem:[#allocation166_spill] sm:$0xff]  ;;  %v8456_v16 = vld [vmem:[#allocation167_spill] sm:$0xff] }
 0x3af   :  { %v1446_v29 = vmul.f32 1.442695, %v1445_v4  ;;  %v1453_v21 = vsub.f32 0.0, %v1451_v9  ;;  %1860 = vmatpush.msrb.mxu1 %v5608_v23  ;;  %1900 = vmatpush.msrb.mxu3 %v5614_v28  ;;  %v1463_v11 = vsub.f32 0.0, %v1461_v17  ;;  %v1458_v28 = vrot.slane %v1444_v7, 4  ;;  %v8467_v9 = vld [vmem:[#allocation178_spill] sm:$0xff] }
 0x3b0   :  { %v8468_v17 = vld [vmem:[#allocation179_spill] sm:$0xff] }
 0x3b1   :  { %2442 = vpow2.f32 %v1446_v29  ;;  %v1454_v15 = vmul.f32 1.442695, %v1453_v21  ;;  %1861 = vmatpush.msrb.mxu1 %v5620_v36  ;;  %1901 = vmatpush.msrb.mxu3 %v5626_v58  ;;  %v1464_v3 = vmul.f32 1.442695, %v1463_v11  ;;  %v8458_v36 = vld [vmem:[#allocation169_spill] sm:$0xff] }
 0x3b2   :  { %1770 = vmatmul.f32.vlgmr.msra.gmra.mxu1 %v6579_v61  ;;  %1810 = vmatmul.f32.vlgmr.msra.gmra.mxu3 %v6579_v61 }
 0x3b3   :  { %2444 = vpow2.f32 %v1454_v15  ;;  %1862 = vmatpush.msrb.mxu1 %v5634_v32  ;;  %1902 = vmatpush.msrb.mxu3 %v8454_v40 }
 0x3b4   :  { %2446 = vpow2.f32 %v1464_v3  ;;  %v8469_v3 = vld [vmem:[#allocation180_spill] sm:$0xff] }
 0x3b5   :  { %1863 = vmatpush.msrb.mxu1 %v8455_v46  ;;  %1903 = vmatpush.msrb.mxu3 %v8456_v16  ;;  %v8470_v46 = vld [vmem:[#allocation181_spill] sm:$0xff]  ;;  %v8471_v16 = vld [vmem:[#allocation182_spill] sm:$0xff] }
 0x3b7   :  { %v2443_v23 = vpop.eup %2442  ;;  %1864 = vmatpush.msrb.mxu1 %v8457_v54  ;;  %1904 = vmatpush.msrb.mxu3 %v8458_v36  ;;  %v8476_v54 = vld [vmem:[#allocation187_spill] sm:$0xff]  ;;  %v8477_v36 = vld [vmem:[#allocation188_spill] sm:$0xff] }
 0x3b8   :  { %v1448_v58 = vadd.f32 1.0, %v2443_v23 }
 0x3b9   :  { %v2445_v63 = vpop.eup %2444  ;;  %1865 = vmatpush.msrb.mxu1 %v8459_v53  ;;  %1905 = vmatpush.msrb.mxu3 %v8460_v44  ;;  %v8481_v53 = vld [vmem:[#allocation192_spill] sm:$0xff]  ;;  %v8482_v44 = vld [vmem:[#allocation193_spill] sm:$0xff] }
 0x3ba   :  { %2448 = vrcp.f32 %v1448_v58  ;;  %v1456_v32 = vadd.f32 1.0, %v2445_v63  ;;  %v2447_v52 = vpop.eup %2446  ;;  %v8478_v58 = vld [vmem:[#allocation189_spill] sm:$0xff]  ;;  %v8479_v63 = vld [vmem:[#allocation190_spill] sm:$0xff] }
 0x3bb   :  { %2450 = vtanh.f32 %v1458_v28  ;;  %1866 = vmatpush.msrb.mxu1 %v8461_v56  ;;  %1906 = vmatpush.msrb.mxu3 %v8462_v45  ;;  %v1466_v21 = vadd.f32 1.0, %v2447_v52  ;;  %v8475_v28 = vld [vmem:[#allocation186_spill] sm:$0xff]  ;;  %v8484_v56 = vld [vmem:[#allocation195_spill] sm:$0xff]  ;;  %v8485_v45 = vld [vmem:[#allocation196_spill] sm:$0xff] }
 0x3bc   :  { %2452 = vrcp.f32 %v1456_v32  ;;  %v8483_v32 = vld [vmem:[#allocation194_spill] sm:$0xff]  ;;  %v8488_v52 = vld [vmem:[#allocation199_spill] sm:$0xff] }
 0x3bd   :  { %1867 = vmatpush.msrb.mxu1 %v8463_v1  ;;  %1907 = vmatpush.msrb.mxu3 %v8464_v43  ;;  %2454 = vrcp.f32 %v1466_v21  ;;  %v8486_v1 = vld [vmem:[#allocation197_spill] sm:$0xff]  ;;  %v8487_v43 = vld [vmem:[#allocation198_spill] sm:$0xff]  ;;  %v8496_v21 = vld [vmem:[#allocation207_spill] sm:$0xff] }
 0x3bf   :  { %1868 = vmatpush.msrb.mxu1 %v8465_v49  ;;  %1908 = vmatpush.msrb.mxu3 %v8466_v22  ;;  %v8489_v49 = vld [vmem:[#allocation200_spill] sm:$0xff]  ;;  %v8490_v22 = vld [vmem:[#allocation201_spill] sm:$0xff] }
 0x3c0   :  { %v2449_v7 = vpop.eup %2448 }
 0x3c1   :  { %v2451_v4 = vpop.eup %2450  ;;  %1869 = vmatpush.msrb.mxu1 %v8467_v9  ;;  %1909 = vmatpush.msrb.mxu3 %v8468_v17  ;;  %v8493_v9 = vld [vmem:[#allocation204_spill] sm:$0xff]  ;;  %v8494_v17 = vld [vmem:[#allocation205_spill] sm:$0xff] }
 0x3c2   :  { %v2453_v29 = vpop.eup %2452  ;;  %v1469_v11 = vmul.f32 %v2451_v4, %v2449_v7  ;;  %v8491_v7 = vld [vmem:[#allocation202_spill] sm:$0xff]  ;;  %v8492_v4 = vld [vmem:[#allocation203_spill] sm:$0xff] }
 0x3c3   :  { %v1468_v15 = vmul.f32 %v2453_v29, %v5740_v19  ;;  %1870 = vmatpush.msrb.mxu1 %v5731_v35  ;;  %1910 = vmatpush.msrb.mxu3 %v5737_v47  ;;  %v8472_v19 = vld [vmem:[#allocation183_spill] sm:$0xff]  ;;  %v8473_v35 = vld [vmem:[#allocation184_spill] sm:$0xff]  ;;  %v8474_v47 = vld [vmem:[#allocation185_spill] sm:$0xff]  ;;  %v2455_v23 = vpop.eup %2454 }
 0x3c4   :  { %v8495_v29 = vld [vmem:[#allocation206_spill] sm:$0xff] }
 0x3c5   :  { %v6613_v40 = vadd.f32 %v1469_v11, %v1468_v15  ;;  %1871 = vmatpush.msrb.mxu1 %v5745_v59  ;;  %1911 = vmatpush.msrb.mxu3 %v5751_v31  ;;  %v8497_v15 = vld [vmem:[#allocation208_spill] sm:$0xff]  ;;  %v8498_v11 = vld [vmem:[#allocation209_spill] sm:$0xff] }
 0x3c7   :  { %2456 = vtanh.f32 %v6613_v40  ;;  %1872 = vmatpush.msrb.mxu1 %v8469_v3  ;;  %1912 = vmatpush.msrb.mxu3 %v8470_v46  ;;  %v8499_v3 = vld [vmem:[#allocation210_spill] sm:$0xff]  ;;  %v6663_v46 = vld [vmem:[%s7593_s3 + $0x120] sm:$0xff] }
 0x3c9   :  { %1873 = vmatpush.msrb.mxu1 %v8471_v16  ;;  %1913 = vmatpush.msrb.mxu3 %v8472_v19  ;;  %v6669_v16 = vld [vmem:[%s7593_s3 + $0x128] sm:$0xff] }
 0x3ca   :  { %v6683_v19 = vld [vmem:[%s7593_s3 + $0x108] sm:$0xff] }
 0x3cb   :  { %1979 = vmatpush.msra.mxu1 %v8473_v35  ;;  %2019 = vmatpush.msra.mxu3 %v8474_v47  ;;  %v8501_v35 = vld [vmem:[#allocation212_spill] sm:$0xff]  ;;  %v8502_v47 = vld [vmem:[#allocation213_spill] sm:$0xff] }
 0x3cd   :  { %1980 = vmatpush.msra.mxu1 %v8475_v28  ;;  %2020 = vmatpush.msra.mxu3 %v5800_v8  ;;  %v2457_v59 = vpop.eup %2456  ;;  %v8480_v8 = vld [vmem:[#allocation191_spill] sm:$0xff]  ;;  %v8503_v28 = vld [vmem:[#allocation214_spill] sm:$0xff] }
 0x3ce   :  { %v6626_v31 = vmul.f32 %v2457_v59, %v2455_v23  ;;  %v6697_v23 = vld [vmem:[%s7593_s3 + $0xe8] sm:$0xff]  ;;  %v8504_v59 = vld [vmem:[#allocation215_spill] sm:$0xff] }
 0x3cf   :  { %1981 = vmatpush.msra.mxu1 %v8476_v54  ;;  %2021 = vmatpush.msra.mxu3 %v8477_v36  ;;  %v6705_v54 = vld [vmem:[%s7593_s3 + $0xc0] sm:$0xff]  ;;  %v6711_v36 = vld [vmem:[%s7593_s3 + $0xc8] sm:$0xff] }
 0x3d0   :  { %1489 = vmatmul.f32.vlgmr.msrb.gmra.mxu0 %v6626_v31  ;;  %1529 = vmatmul.f32.vlgmr.msrb.gmra.mxu2 %v6626_v31 }
 0x3d1   :  { %1874 = vmatmul.f32.vlgmr.msrb.gmra.mxu1 %v6626_v31  ;;  %1914 = vmatmul.f32.vlgmr.msrb.gmra.mxu3 %v6626_v31 }
 0x3d2   :  { %1654 = vmatpush.msrb.mxu0 %v8478_v58  ;;  %1694 = vmatpush.msrb.mxu2 %v8479_v63  ;;  %v8505_v58 = vld [vmem:[#allocation216_spill] sm:$0xff]  ;;  %v8506_v63 = vld [vmem:[#allocation217_spill] sm:$0xff] }
 0x3d3   :  { %1982 = vmatpush.msra.mxu1 %v8480_v8  ;;  %2022 = vmatpush.msra.mxu3 %v8481_v53  ;;  %v6719_v8 = vld [vmem:[%s7593_s3 + $0xa0] sm:$0xff]  ;;  %v6725_v53 = vld [vmem:[%s7593_s3 + $0xa8] sm:$0xff] }
 0x3d4   :  { %1655 = vmatpush.msrb.mxu0 %v8482_v44  ;;  %1695 = vmatpush.msrb.mxu2 %v8483_v32  ;;  %v8507_v44 = vld [vmem:[#allocation218_spill] sm:$0xff]  ;;  %v8508_v32 = vld [vmem:[#allocation219_spill] sm:$0xff] }
 0x3d5   :  { %1983 = vmatpush.msra.mxu1 %v8484_v56  ;;  %2023 = vmatpush.msra.mxu3 %v8485_v45  ;;  %v6733_v56 = vld [vmem:[%s7593_s3 + $0x80] sm:$0xff]  ;;  %v6739_v45 = vld [vmem:[%s7593_s3 + $0x88] sm:$0xff] }
 0x3d6   :  { %1656 = vmatpush.msrb.mxu0 %v8486_v1  ;;  %1696 = vmatpush.msrb.mxu2 %v8487_v43  ;;  %v8509_v1 = vld [vmem:[#allocation220_spill] sm:$0xff]  ;;  %v8510_v43 = vld [vmem:[#allocation221_spill] sm:$0xff] }
 0x3d7   :  { %1984 = vmatpush.msra.mxu1 %v8488_v52  ;;  %2024 = vmatpush.msra.mxu3 %v8489_v49  ;;  %v6747_v52 = vld [vmem:[%s7593_s3 + $0x60] sm:$0xff]  ;;  %v6753_v49 = vld [vmem:[%s7593_s3 + $0x68] sm:$0xff] }
 0x3d8   :  { %1569 = vmatmul.f32.vlgmr.msra.gmra.mxu0 %v6626_v31  ;;  %1609 = vmatmul.f32.vlgmr.msra.gmra.mxu2 %v6626_v31 }
 0x3d9   :  { %1657 = vmatpush.msrb.mxu0 %v8490_v22  ;;  %1697 = vmatpush.msrb.mxu2 %v8491_v7  ;;  %v8511_v22 = vld [vmem:[#allocation222_spill] sm:$0xff]  ;;  %v8512_v7 = vld [vmem:[#allocation223_spill] sm:$0xff] }
 0x3da   :  { %1985 = vmatpush.msra.mxu1 %v8492_v4  ;;  %2025 = vmatpush.msra.mxu3 %v8493_v9  ;;  %v6761_v4 = vld [vmem:[%s7593_s3 + $0x40] sm:$0xff]  ;;  %v6767_v9 = vld [vmem:[%s7593_s3 + $0x48] sm:$0xff] }
 0x3db   :  { %1658 = vmatpush.msrb.mxu0 %v8494_v17  ;;  %1698 = vmatpush.msrb.mxu2 %v8495_v29  ;;  %8513 = vst [vmem:[#allocation36_spill] sm:$0xff] %v6767_v9  ;;  %v8514_v17 = vld [vmem:[#allocation224_spill] sm:$0xff]  ;;  %v8515_v29 = vld [vmem:[#allocation225_spill] sm:$0xff] }
 0x3dc   :  { %1986 = vmatpush.msra.mxu1 %v8496_v21  ;;  %2026 = vmatpush.msra.mxu3 %v8497_v15  ;;  %v6775_v21 = vld [vmem:[%s7593_s3 + $0x20] sm:$0xff]  ;;  %v6781_v15 = vld [vmem:[%s7593_s3 + $0x28] sm:$0xff] }
 0x3dd   :  { %1659 = vmatpush.msrb.mxu0 %v5946_v24  ;;  %1699 = vmatpush.msrb.mxu2 %v8498_v11  ;;  %v8500_v24 = vld [vmem:[#allocation211_spill] sm:$0xff]  ;;  %8516 = vst [vmem:[#allocation37_spill] sm:$0xff] %v6775_v21  ;;  %v8518_v11 = vld [vmem:[#allocation226_spill] sm:$0xff] }
 0x3de   :  { %1987 = vmatpush.msra.mxu1 %v8499_v3  ;;  %2027 = vmatpush.msra.mxu3 %v5964_v39  ;;  %v6677_v39 = vld [vmem:[%s7593_s3 + $0x100] sm:$0xff]  ;;  %8517 = vst [vmem:[#allocation38_spill] sm:$0xff] %v6781_v15  ;;  %v8519_v3 = vld [vmem:[#allocation227_spill] sm:$0xff] }
 0x3df   :  { %1660 = vmatpush.msrb.mxu0 %v6663_v46  ;;  %1700 = vmatpush.msrb.mxu2 %v6669_v16 }
 0x3e0   :  { %1988 = vmatpush.msra.mxu1 %v5972_v33  ;;  %2028 = vmatpush.msra.mxu3 %v8500_v24  ;;  %v6691_v33 = vld [vmem:[%s7593_s3 + $0xe0] sm:$0xff] }
 0x3e1   :  { %1661 = vmatpush.msrb.mxu0 %v6677_v39  ;;  %1701 = vmatpush.msrb.mxu2 %v6683_v19  ;;  %v6789_v24 = vld [vmem:[%s7593_s3] sm:$0xff] }
 0x3e2   :  { %1989 = vmatpush.msra.mxu1 %v8501_v35  ;;  %2029 = vmatpush.msra.mxu3 %v8502_v47  ;;  %8520 = vst [vmem:[#allocation27_spill] sm:$0xff] %v6789_v24  ;;  %v6795_v35 = vld [vmem:[%s7593_s3 + $0x8] sm:$0xff]  ;;  %v6801_v47 = vld [vmem:[%s7593_s3 + $0x1f0] sm:$0xff] }
 0x3e3   :  { %1662 = vmatpush.msrb.mxu0 %v6691_v33  ;;  %1702 = vmatpush.msrb.mxu2 %v6697_v23  ;;  %8521 = vst [vmem:[#allocation34_spill] sm:$0xff] %v6795_v35 }
 0x3e4   :  { %1990 = vmatpush.msra.mxu1 %v8503_v28  ;;  %2030 = vmatpush.msra.mxu3 %v8504_v59  ;;  %8522 = vst [vmem:[#allocation40_spill] sm:$0xff] %v6801_v47  ;;  %v6807_v28 = vld [vmem:[%s7593_s3 + $0x1f8] sm:$0xff]  ;;  %v8524_v59 = vld [vmem:[#allocation5_spill] sm:$0xff] }
 0x3e5   :  { %1663 = vmatpush.msrb.mxu0 %v6705_v54  ;;  %1703 = vmatpush.msrb.mxu2 %v6711_v36  ;;  %8523 = vst [vmem:[#allocation41_spill] sm:$0xff] %v6807_v28 }
 0x3e6   :  { %1991 = vmatpush.msra.mxu1 %v8505_v58  ;;  %2031 = vmatpush.msra.mxu3 %v8506_v63  ;;  %v8525_v58 = vld [vmem:[#allocation228_spill] sm:$0xff]  ;;  %v6815_v63 = vld [vmem:[%s7593_s3 + $0x1d0] sm:$0xff] }
 0x3e7   :  { %1664 = vmatpush.msrb.mxu0 %v6719_v8  ;;  %1704 = vmatpush.msrb.mxu2 %v6725_v53  ;;  %8526 = vst [vmem:[#allocation42_spill] sm:$0xff] %v6815_v63 }
 0x3e8   :  { %1992 = vmatpush.msra.mxu1 %v8507_v44  ;;  %2032 = vmatpush.msra.mxu3 %v8508_v32  ;;  %v6821_v44 = vld [vmem:[%s7593_s3 + $0x1d8] sm:$0xff]  ;;  %v8528_v32 = vld [vmem:[#allocation6_spill] sm:$0xff] }
 0x3e9   :  { %1665 = vmatpush.msrb.mxu0 %v6733_v56  ;;  %1705 = vmatpush.msrb.mxu2 %v6739_v45  ;;  %8527 = vst [vmem:[#allocation43_spill] sm:$0xff] %v6821_v44 }
 0x3ea   :  { %1993 = vmatpush.msra.mxu1 %v8509_v1  ;;  %2033 = vmatpush.msra.mxu3 %v8510_v43  ;;  %v8529_v1 = vld [vmem:[#allocation7_spill] sm:$0xff] }
 0x3eb   :  { %1666 = vmatpush.msrb.mxu0 %v6747_v52  ;;  %1706 = vmatpush.msrb.mxu2 %v6753_v49  ;;  %v6829_v43 = vld [vmem:[%s7593_s3 + $0x1b0] sm:$0xff] }
 0x3ec   :  { %1994 = vmatpush.msra.mxu1 %v8511_v22  ;;  %2034 = vmatpush.msra.mxu3 %v8512_v7  ;;  %8530 = vst [vmem:[#allocation44_spill] sm:$0xff] %v6829_v43  ;;  %v6835_v22 = vld [vmem:[%s7593_s3 + $0x1b8] sm:$0xff] }
 0x3ed   :  { %1667 = vmatpush.msrb.mxu0 %v6761_v4  ;;  %1707 = vmatpush.msrb.mxu2 %v6767_v9  ;;  %8531 = vst [vmem:[#allocation45_spill] sm:$0xff] %v6835_v22  ;;  %v8532_v7 = vld [vmem:[#allocation8_spill] sm:$0xff] }
 0x3ee   :  { %2059 = vmatpush.msrb.mxu1 %v8514_v17  ;;  %2099 = vmatpush.msrb.mxu3 %v8515_v29  ;;  %v8533_v17 = vld [vmem:[#allocation9_spill] sm:$0xff]  ;;  %v6843_v29 = vld [vmem:[%s7593_s3 + $0x190] sm:$0xff] }
 0x3ef   :  { %1668 = vmatpush.msrb.mxu0 %v6775_v21  ;;  %1708 = vmatpush.msrb.mxu2 %v6781_v15  ;;  %8534 = vst [vmem:[#allocation46_spill] sm:$0xff] %v6843_v29  ;;  %v8583_v15 = vld [vmem:[#allocation39_spill] sm:$0xff] }
 0x3f0   :  { %2060 = vmatpush.msrb.mxu1 %v8518_v11  ;;  %2100 = vmatpush.msrb.mxu3 %v8519_v3  ;;  %v6849_v11 = vld [vmem:[%s7593_s3 + $0x198] sm:$0xff]  ;;  %v8536_v3 = vld [vmem:[#allocation10_spill] sm:$0xff] }
 0x3f1   :  { %1669 = vmatpush.msrb.mxu0 %v6789_v24  ;;  %1709 = vmatpush.msrb.mxu2 %v6795_v35  ;;  %8535 = vst [vmem:[#allocation47_spill] sm:$0xff] %v6849_v11 }
 0x3f2   :  { %2061 = vmatpush.msrb.mxu1 %v8524_v59  ;;  %2101 = vmatpush.msrb.mxu3 %v8525_v58  ;;  %v8537_v59 = vld [vmem:[#allocation11_spill] sm:$0xff] }
 0x3f3   :  { %1734 = vmatpush.msra.mxu0 %v6801_v47  ;;  %1774 = vmatpush.msra.mxu2 %v6807_v28  ;;  %v6857_v58 = vld [vmem:[%s7593_s3 + $0x170] sm:$0xff] }
 0x3f4   :  { %2062 = vmatpush.msrb.mxu1 %v8528_v32  ;;  %2102 = vmatpush.msrb.mxu3 %v8529_v1  ;;  %8538 = vst [vmem:[#allocation48_spill] sm:$0xff] %v6857_v58  ;;  %v6863_v32 = vld [vmem:[%s7593_s3 + $0x178] sm:$0xff] }
 0x3f5   :  { %1735 = vmatpush.msra.mxu0 %v6815_v63  ;;  %1775 = vmatpush.msra.mxu2 %v6821_v44  ;;  %8539 = vst [vmem:[#allocation49_spill] sm:$0xff] %v6863_v32  ;;  %v8540_v1 = vld [vmem:[#allocation12_spill] sm:$0xff] }
 0x3f6   :  { %2063 = vmatpush.msrb.mxu1 %v8532_v7  ;;  %2103 = vmatpush.msrb.mxu3 %v8533_v17  ;;  %v8541_v7 = vld [vmem:[#allocation13_spill] sm:$0xff]  ;;  %v6871_v17 = vld [vmem:[%s7593_s3 + $0x150] sm:$0xff] }
 0x3f7   :  { %1736 = vmatpush.msra.mxu0 %v6829_v43  ;;  %1776 = vmatpush.msra.mxu2 %v6835_v22  ;;  %8542 = vst [vmem:[#allocation50_spill] sm:$0xff] %v6871_v17 }
 0x3f8   :  { %2064 = vmatpush.msrb.mxu1 %v8536_v3  ;;  %2104 = vmatpush.msrb.mxu3 %v8537_v59  ;;  %v6877_v3 = vld [vmem:[%s7593_s3 + $0x158] sm:$0xff]  ;;  %v8544_v59 = vld [vmem:[#allocation14_spill] sm:$0xff] }
 0x3f9   :  { %1737 = vmatpush.msra.mxu0 %v6843_v29  ;;  %1777 = vmatpush.msra.mxu2 %v6849_v11  ;;  %8543 = vst [vmem:[#allocation51_spill] sm:$0xff] %v6877_v3  ;;  %v1550_v29 = vpop.f32.mrf.mxu3 }
 0x3fa   :  { %2065 = vmatpush.msrb.mxu1 %v8540_v1  ;;  %2105 = vmatpush.msrb.mxu3 %v8541_v7  ;;  %v6885_v1 = vld [vmem:[%s7593_s3 + $0x130] sm:$0xff]  ;;  %v6891_v7 = vld [vmem:[%s7593_s3 + $0x138] sm:$0xff] }
 0x3fb   :  { %1738 = vmatpush.msra.mxu0 %v6857_v58  ;;  %1778 = vmatpush.msra.mxu2 %v6863_v32  ;;  %v8545_v32 = vld [vmem:[#allocation15_spill] sm:$0xff]  ;;  %8546 = vst [vmem:[#allocation52_spill] sm:$0xff] %v6885_v1  ;;  %v1510_v58 = vpop.f32.mrf.mxu1 }
 0x3fc   :  { %2066 = vmatpush.msrb.mxu1 %v8544_v59  ;;  %2106 = vmatpush.msrb.mxu3 %v8545_v32  ;;  %8547 = vst [vmem:[#allocation53_spill] sm:$0xff] %v6891_v7  ;;  %v6899_v32 = vld [vmem:[%s7593_s3 + $0x110] sm:$0xff]  ;;  %v6905_v59 = vld [vmem:[%s7593_s3 + $0x118] sm:$0xff] }
 0x3fd   :  { %1739 = vmatpush.msra.mxu0 %v6871_v17  ;;  %1779 = vmatpush.msra.mxu2 %v6877_v3  ;;  %v8548_v17 = vld [vmem:[#allocation16_spill] sm:$0xff]  ;;  %v8549_v3 = vld [vmem:[#allocation17_spill] sm:$0xff]  ;;  %8550 = vst [vmem:[#allocation54_spill] sm:$0xff] %v6899_v32 }
 0x3fe   :  { %2067 = vmatpush.msrb.mxu1 %v8548_v17  ;;  %2107 = vmatpush.msrb.mxu3 %v8549_v3  ;;  %8551 = vst [vmem:[#allocation55_spill] sm:$0xff] %v6905_v59  ;;  %v6913_v17 = vld [vmem:[%s7593_s3 + $0xf0] sm:$0xff]  ;;  %v6919_v3 = vld [vmem:[%s7593_s3 + $0xf8] sm:$0xff] }
 0x3ff   :  { %1740 = vmatpush.msra.mxu0 %v6885_v1  ;;  %1780 = vmatpush.msra.mxu2 %v6891_v7  ;;  %v8552_v1 = vld [vmem:[#allocation18_spill] sm:$0xff]  ;;  %v8553_v7 = vld [vmem:[#allocation19_spill] sm:$0xff]  ;;  %8554 = vst [vmem:[#allocation56_spill] sm:$0xff] %v6913_v17 }
 0x400   :  { %2068 = vmatpush.msrb.mxu1 %v8552_v1  ;;  %2108 = vmatpush.msrb.mxu3 %v8553_v7  ;;  %8555 = vst [vmem:[#allocation57_spill] sm:$0xff] %v6919_v3  ;;  %v6927_v1 = vld [vmem:[%s7593_s3 + $0xd0] sm:$0xff]  ;;  %v6933_v7 = vld [vmem:[%s7593_s3 + $0xd8] sm:$0xff] }
 0x401   :  { %1741 = vmatpush.msra.mxu0 %v6899_v32  ;;  %1781 = vmatpush.msra.mxu2 %v6905_v59  ;;  %v8556_v32 = vld [vmem:[#allocation21_spill] sm:$0xff]  ;;  %v8557_v59 = vld [vmem:[#allocation22_spill] sm:$0xff]  ;;  %8558 = vst [vmem:[#allocation58_spill] sm:$0xff] %v6927_v1 }
 0x402   :  { %2069 = vmatpush.msrb.mxu1 %v8556_v32  ;;  %2109 = vmatpush.msrb.mxu3 %v8557_v59  ;;  %8559 = vst [vmem:[#allocation59_spill] sm:$0xff] %v6933_v7  ;;  %v6941_v32 = vld [vmem:[%s7593_s3 + $0xb0] sm:$0xff]  ;;  %v6947_v59 = vld [vmem:[%s7593_s3 + $0xb8] sm:$0xff] }
 0x403   :  { %1742 = vmatpush.msra.mxu0 %v6913_v17  ;;  %1782 = vmatpush.msra.mxu2 %v6919_v3  ;;  %v8560_v17 = vld [vmem:[#allocation23_spill] sm:$0xff]  ;;  %v8561_v3 = vld [vmem:[#allocation24_spill] sm:$0xff]  ;;  %8562 = vst [vmem:[#allocation60_spill] sm:$0xff] %v6941_v32 }
 0x404   :  { %2070 = vmatpush.msrb.mxu1 %v8560_v17  ;;  %2110 = vmatpush.msrb.mxu3 %v8561_v3  ;;  %8563 = vst [vmem:[#allocation61_spill] sm:$0xff] %v6947_v59  ;;  %v6955_v17 = vld [vmem:[%s7593_s3 + $0x90] sm:$0xff]  ;;  %v6961_v3 = vld [vmem:[%s7593_s3 + $0x98] sm:$0xff] }
 0x405   :  { %1743 = vmatpush.msra.mxu0 %v6927_v1  ;;  %1783 = vmatpush.msra.mxu2 %v6933_v7  ;;  %v8564_v1 = vld [vmem:[#allocation25_spill] sm:$0xff]  ;;  %v8565_v7 = vld [vmem:[#allocation26_spill] sm:$0xff]  ;;  %8566 = vst [vmem:[#allocation62_spill] sm:$0xff] %v6955_v17 }
 0x406   :  { %2071 = vmatpush.msrb.mxu1 %v8564_v1  ;;  %2111 = vmatpush.msrb.mxu3 %v8565_v7  ;;  %8567 = vst [vmem:[#allocation63_spill] sm:$0xff] %v6961_v3  ;;  %v6969_v1 = vld [vmem:[%s7593_s3 + $0x70] sm:$0xff]  ;;  %v6975_v7 = vld [vmem:[%s7593_s3 + $0x78] sm:$0xff] }
 0x407   :  { %1744 = vmatpush.msra.mxu0 %v6941_v32  ;;  %1784 = vmatpush.msra.mxu2 %v6947_v59  ;;  %v8568_v32 = vld [vmem:[#allocation28_spill] sm:$0xff]  ;;  %v8569_v59 = vld [vmem:[#allocation29_spill] sm:$0xff]  ;;  %8570 = vst [vmem:[#allocation64_spill] sm:$0xff] %v6969_v1 }
 0x408   :  { %2072 = vmatpush.msrb.mxu1 %v8568_v32  ;;  %2112 = vmatpush.msrb.mxu3 %v8569_v59  ;;  %8571 = vst [vmem:[#allocation65_spill] sm:$0xff] %v6975_v7  ;;  %v6983_v32 = vld [vmem:[%s7593_s3 + $0x50] sm:$0xff]  ;;  %v6989_v59 = vld [vmem:[%s7593_s3 + $0x58] sm:$0xff] }
 0x409   :  { %1745 = vmatpush.msra.mxu0 %v6955_v17  ;;  %1785 = vmatpush.msra.mxu2 %v6961_v3  ;;  %v8572_v17 = vld [vmem:[#allocation30_spill] sm:$0xff]  ;;  %v8573_v3 = vld [vmem:[#allocation31_spill] sm:$0xff]  ;;  %8574 = vst [vmem:[#allocation66_spill] sm:$0xff] %v6983_v32 }
 0x40a   :  { %2073 = vmatpush.msrb.mxu1 %v8572_v17  ;;  %2113 = vmatpush.msrb.mxu3 %v8573_v3  ;;  %8575 = vst [vmem:[#allocation67_spill] sm:$0xff] %v6989_v59  ;;  %v6997_v17 = vld [vmem:[%s7593_s3 + $0x30] sm:$0xff]  ;;  %v7003_v3 = vld [vmem:[%s7593_s3 + $0x38] sm:$0xff] }
 0x40b   :  { %1746 = vmatpush.msra.mxu0 %v6969_v1  ;;  %1786 = vmatpush.msra.mxu2 %v6975_v7  ;;  %v8576_v1 = vld [vmem:[#allocation32_spill] sm:$0xff]  ;;  %v8577_v7 = vld [vmem:[#allocation33_spill] sm:$0xff]  ;;  %8578 = vst [vmem:[#allocation68_spill] sm:$0xff] %v6997_v17 }
 0x40c   :  { %2074 = vmatpush.msrb.mxu1 %v8576_v1  ;;  %2114 = vmatpush.msrb.mxu3 %v8577_v7  ;;  %8579 = vst [vmem:[#allocation69_spill] sm:$0xff] %v7003_v3  ;;  %v7009_v1 = vld [vmem:[%s7593_s3 + $0x10] sm:$0xff]  ;;  %v7015_v7 = vld [vmem:[%s7593_s3 + $0x18] sm:$0xff] }
 0x40d   :  { %1747 = vmatpush.msra.mxu0 %v6983_v32  ;;  %1787 = vmatpush.msra.mxu2 %v6989_v59  ;;  %8580 = vst [vmem:[#allocation70_spill] sm:$0xff] %v7009_v1  ;;  %v8582_v59 = vld [vmem:[#allocation20_spill] sm:$0xff] }
 0x40e   :  { %8581 = vst [vmem:[#allocation71_spill] sm:$0xff] %v7015_v7 }
 0x40f   :  { %1748 = vmatpush.msra.mxu0 %v6997_v17  ;;  %1788 = vmatpush.msra.mxu2 %v7003_v3 }
 0x411   :  { %1749 = vmatpush.msra.mxu0 %v7009_v1  ;;  %1789 = vmatpush.msra.mxu2 %v7015_v7 }
 0x44d   :  { %v1490_v17 = vpop.f32.mrf.mxu0 }
 0x44e   :  { %v1491_v32 = vadd.f32 %v1490_v17, %v8582_v59  ;;  %v1590_v59 = vpop.f32.mrf.mxu1 }
 0x450   :  { %v1511_v11 = vadd.f32 %v1510_v58, %v1491_v32  ;;  %v1630_v58 = vpop.f32.mrf.mxu3 }
 0x452   :  { %v1633_v3 = vsub.f32 0.0, %v1511_v11 }
 0x453   :  { %v1530_v22 = vpop.f32.mrf.mxu2 }
 0x454   :  { %v1634_v43 = vmul.f32 1.442695, %v1633_v3  ;;  %v1531_v44 = vadd.f32 %v1530_v22, %v8326_v37 }
 0x455   :  { %v1570_v63 = vpop.f32.mrf.mxu0 }
 0x456   :  { %2458 = vpow2.f32 %v1634_v43  ;;  %v1551_v1 = vadd.f32 %v1550_v29, %v1531_v44  ;;  %v1571_v35 = vadd.f32 %v1570_v63, %v8327_v41 }
 0x458   :  { %v1638_v28 = vsub.f32 0.0, %v1551_v1  ;;  %v1591_v11 = vadd.f32 %v1590_v59, %v1571_v35 }
 0x45a   :  { %v1639_v47 = vmul.f32 1.442695, %v1638_v28 }
 0x45b   :  { %v1610_v24 = vpop.f32.mrf.mxu2 }
 0x45c   :  { %v2459_v7 = vpop.eup %2458  ;;  %2460 = vpow2.f32 %v1639_v47  ;;  %v1611_v17 = vadd.f32 %v1610_v24, %v8583_v15 }
 0x45d   :  { %v1636_v21 = vadd.f32 1.0, %v2459_v7  ;;  %2462 = vtanh.f32 %v1591_v11  ;;  %v2863_v11 = vld [vmem:[%s7593_s3 + $0x3e8] sm:$0xff] }
 0x45e   :  { %v1631_v32 = vadd.f32 %v1630_v58, %v1611_v17  ;;  %v2861_v17 = vld [vmem:[%s7591_s1 + $0x1d0] sm:$0xff]  ;;  %v2862_v58 = vld [vmem:[%s7593_s3 + $0x3e0] sm:$0xff] }
 0x45f   :  { %2464 = vrcp.f32 %v1636_v21  ;;  %v2860_v21 = vld [vmem:[%s7591_s1 + $0x1c0] sm:$0xff] }
 0x460   :  { %v1644_v3 = vsub.f32 0.0, %v1631_v32  ;;  %v2864_v32 = vld [vmem:[%s7591_s1 + $0x1a0] sm:$0xff] }
 0x462   :  { %v2461_v9 = vpop.eup %2460  ;;  %v1645_v43 = vmul.f32 1.442695, %v1644_v3  ;;  %v2865_v3 = vld [vmem:[%s7591_s1 + $0x1b0] sm:$0xff] }
 0x463   :  { %v1641_v44 = vadd.f32 1.0, %v2461_v9  ;;  %v2463_v28 = vpop.eup %2462  ;;  %v2858_v9 = vld [vmem:[%s7591_s1 + $0x1e0] sm:$0xff] }
 0x464   :  { %2466 = vpow2.f32 %v1645_v43  ;;  %v2866_v43 = vld [vmem:[%s7593_s3 + $0x3c0] sm:$0xff] }
 0x465   :  { %2468 = vrcp.f32 %v1641_v44  ;;  %v2465_v63 = vpop.eup %2464  ;;  %v2867_v44 = vld [vmem:[%s7593_s3 + $0x3c8] sm:$0xff] }
 0x466   :  { %v1650_v1 = vmul.f32 %v2465_v63, %v2463_v28  ;;  %v2868_v28 = vld [vmem:[%s7591_s1 + $0x180] sm:$0xff]  ;;  %v2869_v63 = vld [vmem:[%s7591_s1 + $0x190] sm:$0xff] }
 0x46a   :  { %v2467_v22 = vpop.eup %2466 }
 0x46b   :  { %v2469_v29 = vpop.eup %2468  ;;  %v1647_v47 = vadd.f32 1.0, %v2467_v22  ;;  %v2870_v22 = vld [vmem:[%s7591_s1 + $0x160] sm:$0xff] }
 0x46c   :  { %v1649_v24 = vmul.f32 %v2469_v29, %v6300_v38  ;;  %v2859_v38 = vld [vmem:[%s7591_s1 + $0x1f0] sm:$0xff] }
 0x46d   :  { %2470 = vrcp.f32 %v1647_v47  ;;  %v2871_v29 = vld [vmem:[%s7591_s1 + $0x170] sm:$0xff]  ;;  %v2872_v47 = vld [vmem:[%s7591_s1 + $0x140] sm:$0xff] }
 0x46e   :  { %v7023_v15 = vadd.f32 %v1650_v1, %v1649_v24  ;;  %v2873_v24 = vld [vmem:[%s7591_s1 + $0x150] sm:$0xff]  ;;  %v2874_v1 = vld [vmem:[%s7593_s3 + $0x3a0] sm:$0xff] }
 0x470   :  { %2472 = vtanh.f32 %v7023_v15 }
 0x473   :  { %v2471_v35 = vpop.eup %2470 }
 0x476   :  { %v2473_v59 = vpop.eup %2472 }
 0x477   :  { %v1653_v7 = vmul.f32 %v2473_v59, %v2471_v35  ;;  %v2875_v35 = vld [vmem:[%s7593_s3 + $0x3a8] sm:$0xff]  ;;  %v2876_v59 = vld [vmem:[%s7591_s1 + $0x120] sm:$0xff] }
 0x479   :  { %1670 = vmatmul.f32.vlgmr.msrb.gmra.mxu0 %v1653_v7  ;;  %1710 = vmatmul.f32.vlgmr.msrb.gmra.mxu2 %v1653_v7 }
 0x47a   :  { %1838 = vmatpush.msrb.mxu0 %v2858_v9  ;;  %1878 = vmatpush.msrb.mxu2 %v2859_v38  ;;  %v2878_v9 = vld [vmem:[%s7593_s3 + $0x380] sm:$0xff]  ;;  %v2879_v38 = vld [vmem:[%s7593_s3 + $0x388] sm:$0xff] }
 0x47b   :  { %1995 = vmatmul.f32.vlgmr.msra.gmra.mxu1 %v1653_v7  ;;  %2035 = vmatmul.f32.vlgmr.msra.gmra.mxu3 %v1653_v7 }
 0x47c   :  { %1839 = vmatpush.msrb.mxu0 %v2860_v21  ;;  %1879 = vmatpush.msrb.mxu2 %v2861_v17  ;;  %v2880_v21 = vld [vmem:[%s7591_s1 + $0x100] sm:$0xff]  ;;  %v2881_v17 = vld [vmem:[%s7591_s1 + $0x110] sm:$0xff] }
 0x47d   :  { %2160 = vmatpush.msra.mxu1 %v2862_v58  ;;  %2200 = vmatpush.msra.mxu3 %v2863_v11  ;;  %v2882_v58 = vld [vmem:[%s7593_s3 + $0x360] sm:$0xff]  ;;  %v2883_v11 = vld [vmem:[%s7593_s3 + $0x368] sm:$0xff] }
 0x47e   :  { %1840 = vmatpush.msrb.mxu0 %v2864_v32  ;;  %1880 = vmatpush.msrb.mxu2 %v2865_v3  ;;  %v2884_v32 = vld [vmem:[%s7591_s1 + $0xe0] sm:$0xff]  ;;  %v2885_v3 = vld [vmem:[%s7591_s1 + $0xf0] sm:$0xff] }
 0x47f   :  { %2161 = vmatpush.msra.mxu1 %v2866_v43  ;;  %2201 = vmatpush.msra.mxu3 %v2867_v44  ;;  %v2886_v43 = vld [vmem:[%s7593_s3 + $0x340] sm:$0xff]  ;;  %v2887_v44 = vld [vmem:[%s7593_s3 + $0x348] sm:$0xff] }
 0x480   :  { %1841 = vmatpush.msrb.mxu0 %v2868_v28  ;;  %1881 = vmatpush.msrb.mxu2 %v2869_v63  ;;  %v2888_v28 = vld [vmem:[%s7591_s1 + $0xc0] sm:$0xff]  ;;  %v2889_v63 = vld [vmem:[%s7591_s1 + $0xd0] sm:$0xff] }
 0x481   :  { %1750 = vmatmul.f32.vlgmr.msra.gmra.mxu0 %v1653_v7  ;;  %1790 = vmatmul.f32.vlgmr.msra.gmra.mxu2 %v1653_v7 }
 0x482   :  { %1842 = vmatpush.msrb.mxu0 %v2870_v22  ;;  %1882 = vmatpush.msrb.mxu2 %v2871_v29  ;;  %v2890_v22 = vld [vmem:[%s7593_s3 + $0x320] sm:$0xff]  ;;  %v2891_v29 = vld [vmem:[%s7593_s3 + $0x328] sm:$0xff] }
 0x483   :  { %2075 = vmatmul.f32.vlgmr.msrb.gmra.mxu1 %v1653_v7  ;;  %2115 = vmatmul.f32.vlgmr.msrb.gmra.mxu3 %v1653_v7  ;;  %v2877_v7 = vld [vmem:[%s7591_s1 + $0x130] sm:$0xff] }
 0x484   :  { %1843 = vmatpush.msrb.mxu0 %v2872_v47  ;;  %1883 = vmatpush.msrb.mxu2 %v2873_v24  ;;  %v2892_v47 = vld [vmem:[%s7591_s1 + $0xa0] sm:$0xff]  ;;  %v2893_v24 = vld [vmem:[%s7591_s1 + $0xb0] sm:$0xff] }
 0x485   :  { %2162 = vmatpush.msra.mxu1 %v2874_v1  ;;  %2202 = vmatpush.msra.mxu3 %v2875_v35  ;;  %v2894_v1 = vld [vmem:[%s7593_s3 + $0x300] sm:$0xff]  ;;  %v2895_v35 = vld [vmem:[%s7593_s3 + $0x308] sm:$0xff] }
 0x486   :  { %1844 = vmatpush.msrb.mxu0 %v2876_v59  ;;  %1884 = vmatpush.msrb.mxu2 %v2877_v7  ;;  %v2896_v59 = vld [vmem:[%s7591_s1 + $0x80] sm:$0xff]  ;;  %v2897_v7 = vld [vmem:[%s7591_s1 + $0x90] sm:$0xff] }
 0x487   :  { %2163 = vmatpush.msra.mxu1 %v2878_v9  ;;  %2203 = vmatpush.msra.mxu3 %v2879_v38  ;;  %v2898_v9 = vld [vmem:[%s7593_s3 + $0x2e0] sm:$0xff]  ;;  %v2899_v38 = vld [vmem:[%s7593_s3 + $0x2e8] sm:$0xff] }
 0x488   :  { %1845 = vmatpush.msrb.mxu0 %v2880_v21  ;;  %1885 = vmatpush.msrb.mxu2 %v2881_v17  ;;  %v2900_v21 = vld [vmem:[%s7591_s1 + $0x60] sm:$0xff]  ;;  %v2901_v17 = vld [vmem:[%s7591_s1 + $0x70] sm:$0xff] }
 0x489   :  { %2164 = vmatpush.msra.mxu1 %v2882_v58  ;;  %2204 = vmatpush.msra.mxu3 %v2883_v11  ;;  %v2902_v58 = vld [vmem:[%s7593_s3 + $0x2c0] sm:$0xff]  ;;  %v2903_v11 = vld [vmem:[%s7593_s3 + $0x2c8] sm:$0xff] }
 0x48a   :  { %1846 = vmatpush.msrb.mxu0 %v2884_v32  ;;  %1886 = vmatpush.msrb.mxu2 %v2885_v3  ;;  %v2904_v32 = vld [vmem:[%s7591_s1 + $0x40] sm:$0xff]  ;;  %v2905_v3 = vld [vmem:[%s7591_s1 + $0x50] sm:$0xff] }
 0x48b   :  { %2165 = vmatpush.msra.mxu1 %v2886_v43  ;;  %2205 = vmatpush.msra.mxu3 %v2887_v44  ;;  %v2906_v43 = vld [vmem:[%s7593_s3 + $0x2a0] sm:$0xff]  ;;  %v2907_v44 = vld [vmem:[%s7593_s3 + $0x2a8] sm:$0xff] }
 0x48c   :  { %1847 = vmatpush.msrb.mxu0 %v2888_v28  ;;  %1887 = vmatpush.msrb.mxu2 %v2889_v63  ;;  %v2908_v28 = vld [vmem:[%s7591_s1 + $0x20] sm:$0xff]  ;;  %v2909_v63 = vld [vmem:[%s7591_s1 + $0x30] sm:$0xff] }
 0x48d   :  { %2166 = vmatpush.msra.mxu1 %v2890_v22  ;;  %2206 = vmatpush.msra.mxu3 %v2891_v29  ;;  %v2910_v22 = vld [vmem:[%s7593_s3 + $0x280] sm:$0xff]  ;;  %v2911_v29 = vld [vmem:[%s7593_s3 + $0x288] sm:$0xff] }
 0x48e   :  { %1848 = vmatpush.msrb.mxu0 %v2892_v47  ;;  %1888 = vmatpush.msrb.mxu2 %v2893_v24  ;;  %v2912_v47 = vld [vmem:[%s7591_s1] sm:$0xff]  ;;  %v2913_v24 = vld [vmem:[%s7591_s1 + $0x10] sm:$0xff] }
 0x48f   :  { %2167 = vmatpush.msra.mxu1 %v2894_v1  ;;  %2207 = vmatpush.msra.mxu3 %v2895_v35  ;;  %v2914_v1 = vld [vmem:[%s7593_s3 + $0x260] sm:$0xff]  ;;  %v2915_v35 = vld [vmem:[%s7593_s3 + $0x268] sm:$0xff] }
 0x490   :  { %1849 = vmatpush.msrb.mxu0 %v2896_v59  ;;  %1889 = vmatpush.msrb.mxu2 %v2897_v7  ;;  %v2916_v59 = vld [vmem:[%s7592_s2 + $0x1e0] sm:$0xff]  ;;  %v2917_v7 = vld [vmem:[%s7592_s2 + $0x1e8] sm:$0xff] }
 0x491   :  { %2168 = vmatpush.msra.mxu1 %v2898_v9  ;;  %2208 = vmatpush.msra.mxu3 %v2899_v38  ;;  %v2919_v9 = vld [vmem:[%s7593_s3 + $0x248] sm:$0xff]  ;;  %v2920_v38 = vld [vmem:[%s7592_s2 + $0x1c0] sm:$0xff] }
 0x492   :  { %1850 = vmatpush.msrb.mxu0 %v2900_v21  ;;  %1890 = vmatpush.msrb.mxu2 %v2901_v17  ;;  %v2921_v21 = vld [vmem:[%s7592_s2 + $0x1c8] sm:$0xff]  ;;  %v2922_v17 = vld [vmem:[%s7593_s3 + $0x220] sm:$0xff] }
 0x493   :  { %2169 = vmatpush.msra.mxu1 %v2902_v58  ;;  %2209 = vmatpush.msra.mxu3 %v2903_v11  ;;  %v2923_v58 = vld [vmem:[%s7593_s3 + $0x228] sm:$0xff]  ;;  %v2924_v11 = vld [vmem:[%s7592_s2 + $0x1a0] sm:$0xff] }
 0x494   :  { %1851 = vmatpush.msrb.mxu0 %v2904_v32  ;;  %1891 = vmatpush.msrb.mxu2 %v2905_v3  ;;  %v2925_v32 = vld [vmem:[%s7592_s2 + $0x1a8] sm:$0xff]  ;;  %v2926_v3 = vld [vmem:[%s7593_s3 + $0x200] sm:$0xff] }
 0x495   :  { %2170 = vmatpush.msra.mxu1 %v2906_v43  ;;  %2210 = vmatpush.msra.mxu3 %v2907_v44  ;;  %v2927_v43 = vld [vmem:[%s7593_s3 + $0x208] sm:$0xff]  ;;  %v2928_v44 = vld [vmem:[%s7593_s3 + $0x3f0] sm:$0xff] }
 0x496   :  { %1852 = vmatpush.msrb.mxu0 %v2908_v28  ;;  %1892 = vmatpush.msrb.mxu2 %v2909_v63  ;;  %v2929_v28 = vld [vmem:[%s7593_s3 + $0x3f8] sm:$0xff]  ;;  %v2930_v63 = vld [vmem:[%s7592_s2 + $0x180] sm:$0xff] }
 0x497   :  { %2171 = vmatpush.msra.mxu1 %v2910_v22  ;;  %2211 = vmatpush.msra.mxu3 %v2911_v29  ;;  %v2931_v22 = vld [vmem:[%s7592_s2 + $0x188] sm:$0xff]  ;;  %v2932_v29 = vld [vmem:[%s7593_s3 + $0x3d0] sm:$0xff] }
 0x498   :  { %1853 = vmatpush.msrb.mxu0 %v2912_v47  ;;  %1893 = vmatpush.msrb.mxu2 %v2913_v24  ;;  %v2933_v47 = vld [vmem:[%s7593_s3 + $0x3d8] sm:$0xff]  ;;  %v2934_v24 = vld [vmem:[%s7592_s2 + $0x160] sm:$0xff] }
 0x499   :  { %1854 = vmatmul.f32.vlgmr.msrb.gmra.mxu0 %v6626_v31  ;;  %1894 = vmatmul.f32.vlgmr.msrb.gmra.mxu2 %v6626_v31  ;;  %v2918_v31 = vld [vmem:[%s7593_s3 + $0x240] sm:$0xff] }
 0x49a   :  { %2172 = vmatpush.msra.mxu1 %v2914_v1  ;;  %2212 = vmatpush.msra.mxu3 %v2915_v35  ;;  %v2935_v1 = vld [vmem:[%s7592_s2 + $0x168] sm:$0xff]  ;;  %v2936_v35 = vld [vmem:[%s7593_s3 + $0x3b0] sm:$0xff] }
 0x49b   :  { %1959 = vmatpush.msra.mxu0 %v2916_v59  ;;  %1999 = vmatpush.msra.mxu2 %v2917_v7  ;;  %v2937_v59 = vld [vmem:[%s7593_s3 + $0x3b8] sm:$0xff]  ;;  %v2938_v7 = vld [vmem:[%s7592_s2 + $0x140] sm:$0xff] }
 0x49c   :  { %2173 = vmatpush.msra.mxu1 %v2918_v31  ;;  %2213 = vmatpush.msra.mxu3 %v2919_v9  ;;  %v2939_v31 = vld [vmem:[%s7592_s2 + $0x148] sm:$0xff]  ;;  %v2940_v9 = vld [vmem:[%s7593_s3 + $0x390] sm:$0xff] }
 0x49d   :  { %1960 = vmatpush.msra.mxu0 %v2920_v38  ;;  %2000 = vmatpush.msra.mxu2 %v2921_v21  ;;  %v2941_v38 = vld [vmem:[%s7593_s3 + $0x398] sm:$0xff]  ;;  %v2942_v21 = vld [vmem:[%s7592_s2 + $0x120] sm:$0xff] }
 0x49e   :  { %2174 = vmatpush.msra.mxu1 %v2922_v17  ;;  %2214 = vmatpush.msra.mxu3 %v2923_v58  ;;  %v2943_v17 = vld [vmem:[%s7592_s2 + $0x128] sm:$0xff]  ;;  %v2944_v58 = vld [vmem:[%s7593_s3 + $0x370] sm:$0xff] }
 0x49f   :  { %1961 = vmatpush.msra.mxu0 %v2924_v11  ;;  %2001 = vmatpush.msra.mxu2 %v2925_v32  ;;  %v2945_v11 = vld [vmem:[%s7593_s3 + $0x378] sm:$0xff]  ;;  %v2946_v32 = vld [vmem:[%s7592_s2 + $0x100] sm:$0xff] }
 0x4a0   :  { %2175 = vmatpush.msra.mxu1 %v2926_v3  ;;  %2215 = vmatpush.msra.mxu3 %v2927_v43  ;;  %v2947_v3 = vld [vmem:[%s7592_s2 + $0x108] sm:$0xff]  ;;  %v2948_v43 = vld [vmem:[%s7593_s3 + $0x350] sm:$0xff] }
 0x4a1   :  { %1962 = vmatpush.msra.mxu0 %v2930_v63  ;;  %2002 = vmatpush.msra.mxu2 %v2931_v22  ;;  %v2951_v63 = vld [vmem:[%s7592_s2 + $0xe8] sm:$0xff]  ;;  %v2952_v22 = vld [vmem:[%s7593_s3 + $0x330] sm:$0xff] }
 0x4a2   :  { %2240 = vmatpush.msrb.mxu1 %v2928_v44  ;;  %2280 = vmatpush.msrb.mxu3 %v2929_v28  ;;  %v2949_v44 = vld [vmem:[%s7593_s3 + $0x358] sm:$0xff]  ;;  %v2950_v28 = vld [vmem:[%s7592_s2 + $0xe0] sm:$0xff] }
 0x4a3   :  { %1963 = vmatpush.msra.mxu0 %v2934_v24  ;;  %2003 = vmatpush.msra.mxu2 %v2935_v1  ;;  %v2955_v24 = vld [vmem:[%s7592_s2 + $0xc8] sm:$0xff]  ;;  %v2956_v1 = vld [vmem:[%s7593_s3 + $0x310] sm:$0xff] }
 0x4a4   :  { %2241 = vmatpush.msrb.mxu1 %v2932_v29  ;;  %2281 = vmatpush.msrb.mxu3 %v2933_v47  ;;  %v2953_v29 = vld [vmem:[%s7593_s3 + $0x338] sm:$0xff]  ;;  %v2954_v47 = vld [vmem:[%s7592_s2 + $0xc0] sm:$0xff] }
 0x4a5   :  { %1964 = vmatpush.msra.mxu0 %v2938_v7  ;;  %2004 = vmatpush.msra.mxu2 %v2939_v31  ;;  %v2959_v7 = vld [vmem:[%s7592_s2 + $0xa8] sm:$0xff]  ;;  %v2960_v31 = vld [vmem:[%s7593_s3 + $0x2f0] sm:$0xff] }
 0x4a6   :  { %2242 = vmatpush.msrb.mxu1 %v2936_v35  ;;  %2282 = vmatpush.msrb.mxu3 %v2937_v59  ;;  %v2957_v35 = vld [vmem:[%s7593_s3 + $0x318] sm:$0xff]  ;;  %v2958_v59 = vld [vmem:[%s7592_s2 + $0xa0] sm:$0xff] }
 0x4a7   :  { %1965 = vmatpush.msra.mxu0 %v2942_v21  ;;  %2005 = vmatpush.msra.mxu2 %v2943_v17  ;;  %v2963_v21 = vld [vmem:[%s7592_s2 + $0x88] sm:$0xff]  ;;  %v2964_v17 = vld [vmem:[%s7593_s3 + $0x2d0] sm:$0xff] }
 0x4a8   :  { %2243 = vmatpush.msrb.mxu1 %v2940_v9  ;;  %2283 = vmatpush.msrb.mxu3 %v2941_v38  ;;  %v2961_v9 = vld [vmem:[%s7593_s3 + $0x2f8] sm:$0xff]  ;;  %v2962_v38 = vld [vmem:[%s7592_s2 + $0x80] sm:$0xff] }
 0x4a9   :  { %1966 = vmatpush.msra.mxu0 %v2946_v32  ;;  %2006 = vmatpush.msra.mxu2 %v2947_v3  ;;  %v2967_v32 = vld [vmem:[%s7592_s2 + $0x68] sm:$0xff]  ;;  %v2968_v3 = vld [vmem:[%s7593_s3 + $0x2b0] sm:$0xff] }
 0x4aa   :  { %2244 = vmatpush.msrb.mxu1 %v2944_v58  ;;  %2284 = vmatpush.msrb.mxu3 %v2945_v11  ;;  %v2965_v58 = vld [vmem:[%s7593_s3 + $0x2d8] sm:$0xff]  ;;  %v2966_v11 = vld [vmem:[%s7592_s2 + $0x60] sm:$0xff] }
 0x4ab   :  { %1967 = vmatpush.msra.mxu0 %v2950_v28  ;;  %2007 = vmatpush.msra.mxu2 %v2951_v63  ;;  %v2971_v28 = vld [vmem:[%s7592_s2 + $0x48] sm:$0xff]  ;;  %v2972_v63 = vld [vmem:[%s7593_s3 + $0x290] sm:$0xff] }
 0x4ac   :  { %2245 = vmatpush.msrb.mxu1 %v2948_v43  ;;  %2285 = vmatpush.msrb.mxu3 %v2949_v44  ;;  %v2969_v43 = vld [vmem:[%s7593_s3 + $0x2b8] sm:$0xff]  ;;  %v2970_v44 = vld [vmem:[%s7592_s2 + $0x40] sm:$0xff] }
 0x4ad   :  { %1968 = vmatpush.msra.mxu0 %v2954_v47  ;;  %2008 = vmatpush.msra.mxu2 %v2955_v24  ;;  %v2975_v47 = vld [vmem:[%s7592_s2 + $0x28] sm:$0xff]  ;;  %v2976_v24 = vld [vmem:[%s7593_s3 + $0x270] sm:$0xff] }
 0x4ae   :  { %2246 = vmatpush.msrb.mxu1 %v2952_v22  ;;  %2286 = vmatpush.msrb.mxu3 %v2953_v29  ;;  %v2973_v22 = vld [vmem:[%s7593_s3 + $0x298] sm:$0xff]  ;;  %v2974_v29 = vld [vmem:[%s7592_s2 + $0x20] sm:$0xff] }
 0x4af   :  { %1969 = vmatpush.msra.mxu0 %v2958_v59  ;;  %2009 = vmatpush.msra.mxu2 %v2959_v7  ;;  %v2979_v59 = vld [vmem:[%s7592_s2 + $0x8] sm:$0xff]  ;;  %v2980_v7 = vld [vmem:[%s7593_s3 + $0x250] sm:$0xff] }
 0x4b0   :  { %2247 = vmatpush.msrb.mxu1 %v2956_v1  ;;  %2287 = vmatpush.msrb.mxu3 %v2957_v35  ;;  %v2977_v1 = vld [vmem:[%s7593_s3 + $0x278] sm:$0xff]  ;;  %v2978_v35 = vld [vmem:[%s7592_s2] sm:$0xff] }
 0x4b1   :  { %1970 = vmatpush.msra.mxu0 %v2962_v38  ;;  %2010 = vmatpush.msra.mxu2 %v2963_v21  ;;  %v2983_v38 = vld [vmem:[%s7592_s2 + $0x1f8] sm:$0xff]  ;;  %v2984_v21 = vld [vmem:[%s7593_s3 + $0x230] sm:$0xff] }
 0x4b2   :  { %2248 = vmatpush.msrb.mxu1 %v2960_v31  ;;  %2288 = vmatpush.msrb.mxu3 %v2961_v9  ;;  %v2981_v31 = vld [vmem:[%s7593_s3 + $0x258] sm:$0xff]  ;;  %v2982_v9 = vld [vmem:[%s7592_s2 + $0x1f0] sm:$0xff] }
 0x4b3   :  { %1971 = vmatpush.msra.mxu0 %v2966_v11  ;;  %2011 = vmatpush.msra.mxu2 %v2967_v32  ;;  %v2987_v11 = vld [vmem:[%s7592_s2 + $0x1d8] sm:$0xff]  ;;  %v2988_v32 = vld [vmem:[%s7593_s3 + $0x210] sm:$0xff] }
 0x4b4   :  { %2249 = vmatpush.msrb.mxu1 %v2964_v17  ;;  %2289 = vmatpush.msrb.mxu3 %v2965_v58  ;;  %v2985_v17 = vld [vmem:[%s7593_s3 + $0x238] sm:$0xff]  ;;  %v2986_v58 = vld [vmem:[%s7592_s2 + $0x1d0] sm:$0xff] }
 0x4b5   :  { %1972 = vmatpush.msra.mxu0 %v2970_v44  ;;  %2012 = vmatpush.msra.mxu2 %v2971_v28  ;;  %v2991_v44 = vld [vmem:[%s7592_s2 + $0x1b8] sm:$0xff]  ;;  %v2992_v28 = vld [vmem:[%s7592_s2 + $0x190] sm:$0xff] }
 0x4b6   :  { %2250 = vmatpush.msrb.mxu1 %v2968_v3  ;;  %2290 = vmatpush.msrb.mxu3 %v2969_v43  ;;  %v2989_v3 = vld [vmem:[%s7593_s3 + $0x218] sm:$0xff]  ;;  %v2990_v43 = vld [vmem:[%s7592_s2 + $0x1b0] sm:$0xff] }
 0x4b7   :  { %1973 = vmatpush.msra.mxu0 %v2974_v29  ;;  %2013 = vmatpush.msra.mxu2 %v2975_v47  ;;  %v2995_v29 = vld [vmem:[%s7592_s2 + $0x178] sm:$0xff]  ;;  %v2996_v47 = vld [vmem:[%s7592_s2 + $0x150] sm:$0xff] }
 0x4b8   :  { %2251 = vmatpush.msrb.mxu1 %v2972_v63  ;;  %2291 = vmatpush.msrb.mxu3 %v2973_v22  ;;  %v2993_v63 = vld [vmem:[%s7592_s2 + $0x198] sm:$0xff]  ;;  %v2994_v22 = vld [vmem:[%s7592_s2 + $0x170] sm:$0xff] }
 0x4b9   :  { %1974 = vmatpush.msra.mxu0 %v2978_v35  ;;  %2014 = vmatpush.msra.mxu2 %v2979_v59 }
 0x4ba   :  { %2252 = vmatpush.msrb.mxu1 %v2976_v24  ;;  %2292 = vmatpush.msrb.mxu3 %v2977_v1  ;;  %v2997_v24 = vld [vmem:[%s7592_s2 + $0x158] sm:$0xff]  ;;  %s2330_s2 = sshll.u32 %s7595_s5, 4  ;;  %s2331_s2 = int_to_ptr.hbm [resolvable:$true] %s2330_s2 }
 0x4bb   :  { %2039 = vmatpush.msrb.mxu0 %v2982_v9  ;;  %2079 = vmatpush.msrb.mxu2 %v2983_v38 }
 0x4bc   :  { %2253 = vmatpush.msrb.mxu1 %v2980_v7  ;;  %2293 = vmatpush.msrb.mxu3 %v2981_v31 }
 0x4bd   :  { %2040 = vmatpush.msrb.mxu0 %v2986_v58  ;;  %2080 = vmatpush.msrb.mxu2 %v2987_v11 }
 0x4be   :  { %2254 = vmatpush.msrb.mxu1 %v2984_v21  ;;  %2294 = vmatpush.msrb.mxu3 %v2985_v17 }
 0x4bf   :  { %2041 = vmatpush.msrb.mxu0 %v2990_v43  ;;  %2081 = vmatpush.msrb.mxu2 %v2991_v44 }
 0x4c0   :  { %2255 = vmatpush.msrb.mxu1 %v2988_v32  ;;  %2295 = vmatpush.msrb.mxu3 %v2989_v3 }
 0x4c1   :  { %2042 = vmatpush.msrb.mxu0 %v2992_v28  ;;  %2082 = vmatpush.msrb.mxu2 %v2993_v63 }
 0x4c3   :  { %2043 = vmatpush.msrb.mxu0 %v2994_v22  ;;  %2083 = vmatpush.msrb.mxu2 %v2995_v29 }
 0x4c5   :  { %2044 = vmatpush.msrb.mxu0 %v2996_v47  ;;  %2084 = vmatpush.msrb.mxu2 %v2997_v24 }
 0x4c7   :  { %2045 = vmatpush.msrb.mxu0 %v6448_v57  ;;  %2085 = vmatpush.msrb.mxu2 %v6454_v26  ;;  %v8584_v57 = vld [vmem:[#allocation35_spill] sm:$0xff] }
 0x4c9   :  { %2046 = vmatpush.msrb.mxu0 %v6460_v20  ;;  %2086 = vmatpush.msrb.mxu2 %v6466_v14  ;;  %v8585_v20 = vld [vmem:[#allocation160_spill] sm:$0xff] }
 0x4cb   :  { %2047 = vmatpush.msrb.mxu0 %v6472_v13  ;;  %2087 = vmatpush.msrb.mxu2 %v6478_v0  ;;  %v1691_v13 = vpop.f32.mrf.mxu1 }
 0x4cd   :  { %2048 = vmatpush.msrb.mxu0 %v6484_v30  ;;  %2088 = vmatpush.msrb.mxu2 %v6490_v5  ;;  %v1731_v5 = vpop.f32.mrf.mxu3 }
 0x4cf   :  { %2049 = vmatpush.msrb.mxu0 %v6496_v27  ;;  %2089 = vmatpush.msrb.mxu2 %v6502_v25 }
 0x4d1   :  { %2050 = vmatpush.msrb.mxu0 %v6508_v2  ;;  %2090 = vmatpush.msrb.mxu2 %v6514_v10 }
 0x4d3   :  { %2051 = vmatpush.msrb.mxu0 %v6520_v50  ;;  %2091 = vmatpush.msrb.mxu2 %v6526_v55  ;;  %v1771_v35 = vpop.f32.mrf.mxu1 }
 0x4d5   :  { %2052 = vmatpush.msrb.mxu0 %v6532_v48  ;;  %2092 = vmatpush.msrb.mxu2 %v6538_v51  ;;  %v1811_v59 = vpop.f32.mrf.mxu3 }
 0x4d7   :  { %2053 = vmatpush.msrb.mxu0 %v6544_v62  ;;  %2093 = vmatpush.msrb.mxu2 %v6550_v6 }
 0x4d9   :  { %2054 = vmatpush.msrb.mxu0 %v6556_v34  ;;  %2094 = vmatpush.msrb.mxu2 %v8584_v57  ;;  %v8586_v34 = vld [vmem:[#allocation163_spill] sm:$0xff] }
 0x4db   :  { %v1875_v29 = vpop.f32.mrf.mxu1 }
 0x4dd   :  { %v1915_v47 = vpop.f32.mrf.mxu3 }
 0x4f6   :  { %v1671_v26 = vpop.f32.mrf.mxu0 }
 0x4f7   :  { %v1672_v14 = vadd.f32 %v1671_v26, %v8585_v20  ;;  %v1922_v26 = vrot.slane %v1875_v29, 6 }
 0x4f9   :  { %v1692_v0 = vadd.f32 %v1691_v13, %v1672_v14  ;;  %v1924_v14 = vrot.slane %v1915_v47, 2 }
 0x4fb   :  { %v1814_v30 = vsub.f32 0.0, %v1692_v0 }
 0x4fc   :  { %v1711_v27 = vpop.f32.mrf.mxu2 }
 0x4fd   :  { %v1815_v25 = vmul.f32 1.442695, %v1814_v30  ;;  %v1712_v2 = vadd.f32 %v1711_v27, %v8451_v60  ;;  %v2343_v30 = vld [vmem:[%s7590_s0 + $0x18] sm:$0xff] }
 0x4fe   :  { %v1751_v50 = vpop.f32.mrf.mxu0 }
 0x4ff   :  { %2474 = vpow2.f32 %v1815_v25  ;;  %v1732_v10 = vadd.f32 %v1731_v5, %v1712_v2  ;;  %v1752_v51 = vadd.f32 %v1751_v50, %v8452_v18 }
 0x501   :  { %v1819_v55 = vsub.f32 0.0, %v1732_v10  ;;  %v1772_v7 = vadd.f32 %v1771_v35, %v1752_v51  ;;  %v8587_v10 = vld [vmem:[#allocation164_spill] sm:$0xff] }
 0x502   :  { %v1349_v50 = vadd.f32 %v6579_v61, %v8587_v10  ;;  %v8603_v10 = vld [vmem:[#allocation50_spill] sm:$0xff] }
 0x503   :  { %v1820_v48 = vmul.f32 1.442695, %v1819_v55 }
 0x504   :  { %v1791_v62 = vpop.f32.mrf.mxu2 }
 0x505   :  { %v2475_v6 = vpop.eup %2474  ;;  %2476 = vpow2.f32 %v1820_v48  ;;  %v1792_v1 = vadd.f32 %v1791_v62, %v8586_v34 }
 0x506   :  { %v1817_v9 = vadd.f32 1.0, %v2475_v6  ;;  %2478 = vtanh.f32 %v1772_v7 }
 0x507   :  { %v1812_v31 = vadd.f32 %v1811_v59, %v1792_v1 }
 0x508   :  { %2480 = vrcp.f32 %v1817_v9 }
 0x509   :  { %v1825_v38 = vsub.f32 0.0, %v1812_v31 }
 0x50b   :  { %v2477_v21 = vpop.eup %2476  ;;  %v1826_v17 = vmul.f32 1.442695, %v1825_v38 }
 0x50c   :  { %v1822_v58 = vadd.f32 1.0, %v2477_v21  ;;  %v2479_v11 = vpop.eup %2478 }
 0x50d   :  { %2482 = vpow2.f32 %v1826_v17 }
 0x50e   :  { %2484 = vrcp.f32 %v1822_v58  ;;  %v2481_v32 = vpop.eup %2480 }
 0x50f   :  { %v1831_v63 = vmul.f32 %v2481_v32, %v2479_v11 }
 0x513   :  { %v2483_v3 = vpop.eup %2482 }
 0x514   :  { %v2485_v43 = vpop.eup %2484  ;;  %v1828_v44 = vadd.f32 1.0, %v2483_v3 }
 0x515   :  { %v1830_v28 = vmul.f32 %v2485_v43, %v6570_v42 }
 0x516   :  { %2486 = vrcp.f32 %v1828_v44  ;;  %v1855_v24 = vpop.f32.mrf.mxu0 }
 0x517   :  { %v7473_v22 = vadd.f32 %v1831_v63, %v1830_v28  ;;  %v1925_v42 = vsel %vm434_vm0, %v1855_v24, %v1922_v26  ;;  %v2999_v26 = vld [vmem:[%s7593_s3 + $0x1e8] sm:$0xff] }
 0x519   :  { %2488 = vtanh.f32 %v7473_v22 }
 0x51c   :  { %v1895_v57 = vpop.f32.mrf.mxu2  ;;  %v2487_v0 = vpop.eup %2486 }
 0x51d   :  { %v1923_v13 = vrot.slane %v1895_v57, 4  ;;  %v2998_v57 = vld [vmem:[%s7593_s3 + $0x1e0] sm:$0xff] }
 0x51f   :  { %v2489_v5 = vpop.eup %2488  ;;  %v1926_v27 = vsel %vm436_vm1, %v1923_v13, %v1924_v14  ;;  %v3001_v14 = vld [vmem:[%s7593_s3 + $0x1c8] sm:$0xff]  ;;  %v3002_v13 = vld [vmem:[%s7593_s3 + $0x1a0] sm:$0xff] }
 0x520   :  { %v1927_v25 = vsel %vm438_vm2, %v1925_v42, %v1926_v27  ;;  %v1834_v2 = vmul.f32 %v2489_v5, %v2487_v0  ;;  %v3003_v0 = vld [vmem:[%s7593_s3 + $0x1a8] sm:$0xff]  ;;  %v3006_v42 = vld [vmem:[%s7593_s3 + $0x160] sm:$0xff] }
 0x521   :  { %v1929_v55 = vadd.f32 %v2343_v30, %v1927_v25  ;;  %v3004_v30 = vld [vmem:[%s7593_s3 + $0x180] sm:$0xff]  ;;  %v3005_v5 = vld [vmem:[%s7593_s3 + $0x188] sm:$0xff] }
 0x522   :  { %2176 = vmatmul.f32.vlgmr.msra.gmra.mxu1 %v1834_v2  ;;  %2216 = vmatmul.f32.vlgmr.msra.gmra.mxu3 %v1834_v2  ;;  %v7484_v48 = vadd.f32 %v1834_v2, %v1349_v50  ;;  %v3007_v27 = vld [vmem:[%s7593_s3 + $0x168] sm:$0xff]  ;;  %v3008_v25 = vld [vmem:[%s7593_s3 + $0x140] sm:$0xff]  ;;  %v8604_v50 = vld [vmem:[#allocation51_spill] sm:$0xff] }
 0x523   :  { %v1930_v51 = vadd.f32 %v1929_v55, %v4103_v12  ;;  %v8605_v55 = vld [vmem:[#allocation52_spill] sm:$0xff] }
 0x525   :  { %v1931_v62 = vsub.f32 0.0, %v1930_v51  ;;  %v1937_v6 = vrot.slane %v1930_v51, 2  ;;  %v1947_v1 = vrot.slane %v1930_v51, 6  ;;  %v1944_v38 = vrot.slane %v1930_v51, 4  ;;  %v8606_v51 = vld [vmem:[#allocation53_spill] sm:$0xff] }
 0x527   :  { %v1932_v35 = vmul.f32 1.442695, %v1931_v62  ;;  %v1939_v59 = vsub.f32 0.0, %v1937_v6  ;;  %v1949_v31 = vsub.f32 0.0, %v1947_v1  ;;  %v8607_v62 = vld [vmem:[#allocation54_spill] sm:$0xff]  ;;  %v8608_v6 = vld [vmem:[#allocation55_spill] sm:$0xff] }
 0x528   :  { %v8609_v1 = vld [vmem:[#allocation56_spill] sm:$0xff] }
 0x529   :  { %2490 = vpow2.f32 %v1932_v35  ;;  %v1940_v7 = vmul.f32 1.442695, %v1939_v59  ;;  %v1950_v9 = vmul.f32 1.442695, %v1949_v31  ;;  %v8610_v35 = vld [vmem:[#allocation57_spill] sm:$0xff]  ;;  %v8611_v59 = vld [vmem:[#allocation58_spill] sm:$0xff] }
 0x52a   :  { %2256 = vmatmul.f32.vlgmr.msrb.gmra.mxu1 %v1834_v2  ;;  %2296 = vmatmul.f32.vlgmr.msrb.gmra.mxu3 %v1834_v2  ;;  %v3009_v2 = vld [vmem:[%s7593_s3 + $0x148] sm:$0xff]  ;;  %v8613_v31 = vld [vmem:[#allocation60_spill] sm:$0xff] }
 0x52b   :  { %2492 = vpow2.f32 %v1940_v7  ;;  %v8612_v7 = vld [vmem:[#allocation59_spill] sm:$0xff] }
 0x52c   :  { %2494 = vpow2.f32 %v1950_v9  ;;  %v8614_v9 = vld [vmem:[#allocation61_spill] sm:$0xff] }
 0x52f   :  { %v2491_v61 = vpop.eup %2490 }
 0x530   :  { %v1934_v21 = vadd.f32 1.0, %v2491_v61  ;;  %v8615_v61 = vld [vmem:[#allocation62_spill] sm:$0xff] }
 0x531   :  { %v2493_v17 = vpop.eup %2492 }
 0x532   :  { %2496 = vrcp.f32 %v1934_v21  ;;  %v1942_v58 = vadd.f32 1.0, %v2493_v17  ;;  %v2495_v12 = vpop.eup %2494  ;;  %v8617_v21 = vld [vmem:[#allocation64_spill] sm:$0xff]  ;;  %v8618_v17 = vld [vmem:[#allocation65_spill] sm:$0xff] }
 0x533   :  { %2498 = vtanh.f32 %v1944_v38  ;;  %v1952_v43 = vadd.f32 1.0, %v2495_v12  ;;  %v8616_v38 = vld [vmem:[#allocation63_spill] sm:$0xff] }
 0x534   :  { %2500 = vrcp.f32 %v1942_v58  ;;  %v8619_v58 = vld [vmem:[#allocation66_spill] sm:$0xff]  ;;  %v8620_v12 = vld [vmem:[#allocation67_spill] sm:$0xff] }
 0x535   :  { %2502 = vrcp.f32 %v1952_v43  ;;  %v8624_v43 = vld [vmem:[#allocation71_spill] sm:$0xff] }
 0x538   :  { %v2497_v11 = vpop.eup %2496 }
 0x539   :  { %v2499_v32 = vpop.eup %2498 }
 0x53a   :  { %v2501_v3 = vpop.eup %2500  ;;  %v1955_v28 = vmul.f32 %v2499_v32, %v2497_v11  ;;  %v8621_v11 = vld [vmem:[#allocation68_spill] sm:$0xff]  ;;  %v8622_v32 = vld [vmem:[#allocation69_spill] sm:$0xff] }
 0x53b   :  { %v1954_v44 = vmul.f32 %v2501_v3, %v6613_v40  ;;  %v2503_v29 = vpop.eup %2502  ;;  %v3000_v40 = vld [vmem:[%s7593_s3 + $0x1c0] sm:$0xff]  ;;  %v8623_v3 = vld [vmem:[#allocation70_spill] sm:$0xff]  ;;  %s3037_s3 = smov [#allocation2]  }
 0x53c   :  { %s2328_s6 = sshll.u32 %s3037_s3, 4  ;;  %s2329_s6 = int_to_ptr.vmem [resolvable:$true] %s2328_s6 }
 0x53d   :  { %v1956_v63 = vadd.f32 %v1955_v28, %v1954_v44  ;;  %v8625_v28 = vld [vmem:[#allocation20_spill] sm:$0xff] }
 0x53f   :  { %2504 = vtanh.f32 %v1956_v63 }
 0x545   :  { %v2505_v47 = vpop.eup %2504 }
 0x546   :  { %v1958_v24 = vmul.f32 %v2505_v47, %v2503_v29  ;;  %v1996_v29 = vpop.f32.mrf.mxu1 }
 0x548   :  { %1975 = vmatmul.f32.vlgmr.msra.gmra.mxu0 %v1958_v24  ;;  %2015 = vmatmul.f32.vlgmr.msra.gmra.mxu2 %v1958_v24 }
 0x549   :  { %2140 = vmatpush.msra.mxu0 %v2998_v57  ;;  %2180 = vmatpush.msra.mxu2 %v2999_v26  ;;  %v2036_v57 = vpop.f32.mrf.mxu3 }
 0x54b   :  { %2141 = vmatpush.msra.mxu0 %v3000_v40  ;;  %2181 = vmatpush.msra.mxu2 %v3001_v14 }
 0x54d   :  { %2142 = vmatpush.msra.mxu0 %v3002_v13  ;;  %2182 = vmatpush.msra.mxu2 %v3003_v0 }
 0x54f   :  { %2143 = vmatpush.msra.mxu0 %v3004_v30  ;;  %2183 = vmatpush.msra.mxu2 %v3005_v5 }
 0x550   :  { %2055 = vmatmul.f32.vlgmr.msrb.gmra.mxu0 %v1958_v24  ;;  %2095 = vmatmul.f32.vlgmr.msrb.gmra.mxu2 %v1958_v24 }
 0x551   :  { %2144 = vmatpush.msra.mxu0 %v3006_v42  ;;  %2184 = vmatpush.msra.mxu2 %v3007_v27 }
 0x553   :  { %2145 = vmatpush.msra.mxu0 %v3008_v25  ;;  %2185 = vmatpush.msra.mxu2 %v3009_v2  ;;  %v8626_v2 = vld [vmem:[#allocation39_spill] sm:$0xff] }
 0x555   :  { %2146 = vmatpush.msra.mxu0 %v6663_v46  ;;  %2186 = vmatpush.msra.mxu2 %v6669_v16  ;;  %v8588_v46 = vld [vmem:[#allocation36_spill] sm:$0xff]  ;;  %v8589_v16 = vld [vmem:[#allocation37_spill] sm:$0xff] }
 0x557   :  { %2147 = vmatpush.msra.mxu0 %v6677_v39  ;;  %2187 = vmatpush.msra.mxu2 %v6683_v19  ;;  %v8590_v39 = vld [vmem:[#allocation38_spill] sm:$0xff]  ;;  %v8591_v19 = vld [vmem:[#allocation27_spill] sm:$0xff] }
 0x559   :  { %2148 = vmatpush.msra.mxu0 %v6691_v33  ;;  %2188 = vmatpush.msra.mxu2 %v6697_v23  ;;  %v8592_v33 = vld [vmem:[#allocation34_spill] sm:$0xff]  ;;  %v8593_v23 = vld [vmem:[#allocation40_spill] sm:$0xff] }
 0x55b   :  { %2149 = vmatpush.msra.mxu0 %v6705_v54  ;;  %2189 = vmatpush.msra.mxu2 %v6711_v36  ;;  %v8594_v54 = vld [vmem:[#allocation41_spill] sm:$0xff]  ;;  %v8595_v36 = vld [vmem:[#allocation42_spill] sm:$0xff] }
 0x55d   :  { %2150 = vmatpush.msra.mxu0 %v6719_v8  ;;  %2190 = vmatpush.msra.mxu2 %v6725_v53  ;;  %v8596_v8 = vld [vmem:[#allocation43_spill] sm:$0xff]  ;;  %v8597_v53 = vld [vmem:[#allocation44_spill] sm:$0xff] }
 0x55f   :  { %2151 = vmatpush.msra.mxu0 %v6733_v56  ;;  %2191 = vmatpush.msra.mxu2 %v6739_v45  ;;  %v8598_v56 = vld [vmem:[#allocation45_spill] sm:$0xff]  ;;  %v8599_v45 = vld [vmem:[#allocation46_spill] sm:$0xff] }
 0x561   :  { %2152 = vmatpush.msra.mxu0 %v6747_v52  ;;  %2192 = vmatpush.msra.mxu2 %v6753_v49  ;;  %v8600_v52 = vld [vmem:[#allocation47_spill] sm:$0xff]  ;;  %v8601_v49 = vld [vmem:[#allocation48_spill] sm:$0xff] }
 0x563   :  { %2153 = vmatpush.msra.mxu0 %v6761_v4  ;;  %2193 = vmatpush.msra.mxu2 %v8588_v46  ;;  %v8602_v4 = vld [vmem:[#allocation49_spill] sm:$0xff] }
 0x565   :  { %2154 = vmatpush.msra.mxu0 %v8589_v16  ;;  %2194 = vmatpush.msra.mxu2 %v8590_v39  ;;  %v2076_v16 = vpop.f32.mrf.mxu1  ;;  %v2116_v39 = vpop.f32.mrf.mxu3 }
 0x567   :  { %2155 = vmatpush.msra.mxu0 %v8591_v19  ;;  %2195 = vmatpush.msra.mxu2 %v8592_v33 }
 0x569   :  { %2220 = vmatpush.msrb.mxu0 %v8593_v23  ;;  %2260 = vmatpush.msrb.mxu2 %v8594_v54 }
 0x56b   :  { %2221 = vmatpush.msrb.mxu0 %v8595_v36  ;;  %2261 = vmatpush.msrb.mxu2 %v8596_v8 }
 0x56d   :  { %2222 = vmatpush.msrb.mxu0 %v8597_v53  ;;  %2262 = vmatpush.msrb.mxu2 %v8598_v56 }
 0x56f   :  { %2223 = vmatpush.msrb.mxu0 %v8599_v45  ;;  %2263 = vmatpush.msrb.mxu2 %v8600_v52 }
 0x571   :  { %2224 = vmatpush.msrb.mxu0 %v8601_v49  ;;  %2264 = vmatpush.msrb.mxu2 %v8602_v4 }
 0x573   :  { %2225 = vmatpush.msrb.mxu0 %v8603_v10  ;;  %2265 = vmatpush.msrb.mxu2 %v8604_v50 }
 0x575   :  { %2226 = vmatpush.msrb.mxu0 %v8605_v55  ;;  %2266 = vmatpush.msrb.mxu2 %v8606_v51 }
 0x577   :  { %2227 = vmatpush.msrb.mxu0 %v8607_v62  ;;  %2267 = vmatpush.msrb.mxu2 %v8608_v6 }
 0x579   :  { %2228 = vmatpush.msrb.mxu0 %v8609_v1  ;;  %2268 = vmatpush.msrb.mxu2 %v8610_v35 }
 0x57b   :  { %2229 = vmatpush.msrb.mxu0 %v8611_v59  ;;  %2269 = vmatpush.msrb.mxu2 %v8612_v7 }
 0x57d   :  { %2230 = vmatpush.msrb.mxu0 %v8613_v31  ;;  %2270 = vmatpush.msrb.mxu2 %v8614_v9 }
 0x57f   :  { %2231 = vmatpush.msrb.mxu0 %v8615_v61  ;;  %2271 = vmatpush.msrb.mxu2 %v8616_v38 }
 0x581   :  { %2232 = vmatpush.msrb.mxu0 %v8617_v21  ;;  %2272 = vmatpush.msrb.mxu2 %v8618_v17 }
 0x583   :  { %2233 = vmatpush.msrb.mxu0 %v8619_v58  ;;  %2273 = vmatpush.msrb.mxu2 %v8620_v12 }
 0x585   :  { %2234 = vmatpush.msrb.mxu0 %v8621_v11  ;;  %2274 = vmatpush.msrb.mxu2 %v8622_v32 }
 0x587   :  { %2235 = vmatpush.msrb.mxu0 %v8623_v3  ;;  %2275 = vmatpush.msrb.mxu2 %v8624_v43 }
 0x59f   :  { %v2177_v1 = vpop.f32.mrf.mxu1 }
 0x5a5   :  { %v2217_v7 = vpop.f32.mrf.mxu3 }
 0x5a7   :  { %v2257_v32 = vpop.f32.mrf.mxu1 }
 0x5ad   :  { %v2297_v3 = vpop.f32.mrf.mxu3 }
 0x5c5   :  { %v1976_v44 = vpop.f32.mrf.mxu0 }
 0x5c6   :  { %v1977_v63 = vadd.f32 %v1976_v44, %v8625_v28 }
 0x5c8   :  { %v1997_v47 = vadd.f32 %v1996_v29, %v1977_v63 }
 0x5ca   :  { %v2119_v24 = vsub.f32 0.0, %v1997_v47 }
 0x5cb   :  { %v2016_v26 = vpop.f32.mrf.mxu2 }
 0x5cc   :  { %v2120_v40 = vmul.f32 1.442695, %v2119_v24  ;;  %v2017_v14 = vadd.f32 %v2016_v26, %v8326_v37 }
 0x5cd   :  { %v2056_v0 = vpop.f32.mrf.mxu0 }
 0x5ce   :  { %2506 = vpow2.f32 %v2120_v40  ;;  %v2037_v13 = vadd.f32 %v2036_v57, %v2017_v14  ;;  %v2057_v42 = vadd.f32 %v2056_v0, %v8327_v41 }
 0x5d0   :  { %v2124_v30 = vsub.f32 0.0, %v2037_v13  ;;  %v2077_v19 = vadd.f32 %v2076_v16, %v2057_v42 }
 0x5d2   :  { %v2125_v5 = vmul.f32 1.442695, %v2124_v30 }
 0x5d3   :  { %v2096_v27 = vpop.f32.mrf.mxu2 }
 0x5d4   :  { %v2507_v25 = vpop.eup %2506  ;;  %2508 = vpow2.f32 %v2125_v5  ;;  %v2097_v46 = vadd.f32 %v2096_v27, %v8626_v2 }
 0x5d5   :  { %v2122_v23 = vadd.f32 1.0, %v2507_v25  ;;  %2510 = vtanh.f32 %v2077_v19 }
 0x5d6   :  { %v2117_v33 = vadd.f32 %v2116_v39, %v2097_v46 }
 0x5d7   :  { %2512 = vrcp.f32 %v2122_v23 }
 0x5d8   :  { %v2130_v54 = vsub.f32 0.0, %v2117_v33 }
 0x5da   :  { %v2509_v36 = vpop.eup %2508  ;;  %v2131_v37 = vmul.f32 1.442695, %v2130_v54 }
 0x5db   :  { %v2127_v8 = vadd.f32 1.0, %v2509_v36  ;;  %v2511_v53 = vpop.eup %2510 }
 0x5dc   :  { %2514 = vpow2.f32 %v2131_v37 }
 0x5dd   :  { %2516 = vrcp.f32 %v2127_v8  ;;  %v2513_v41 = vpop.eup %2512 }
 0x5de   :  { %v2136_v4 = vmul.f32 %v2513_v41, %v2511_v53 }
 0x5e2   :  { %v2515_v56 = vpop.eup %2514 }
 0x5e3   :  { %v2517_v45 = vpop.eup %2516  ;;  %v2133_v52 = vadd.f32 1.0, %v2515_v56 }
 0x5e4   :  { %v2135_v49 = vmul.f32 %v2517_v45, %v7023_v15 }
 0x5e5   :  { %2518 = vrcp.f32 %v2133_v52 }
 0x5e6   :  { %v2137_v10 = vadd.f32 %v2136_v4, %v2135_v49 }
 0x5e8   :  { %2520 = vtanh.f32 %v2137_v10 }
 0x5eb   :  { %v2519_v50 = vpop.eup %2518 }
 0x5ee   :  { %v2521_v55 = vpop.eup %2520 }
 0x5ef   :  { %v2139_v51 = vmul.f32 %v2521_v55, %v2519_v50 }
 0x5f1   :  { %2156 = vmatmul.f32.vlgmr.msra.gmra.mxu0 %v2139_v51  ;;  %2196 = vmatmul.f32.vlgmr.msra.gmra.mxu2 %v2139_v51 }
 0x5f9   :  { %2236 = vmatmul.f32.vlgmr.msrb.gmra.mxu0 %v2139_v51  ;;  %2276 = vmatmul.f32.vlgmr.msrb.gmra.mxu2 %v2139_v51 }
 0x66e   :  { %v2157_v62 = vpop.f32.mrf.mxu0 }
 0x66f   :  { %v2158_v6 = vadd.f32 %v2157_v62, %v8585_v20 }
 0x671   :  { %v2178_v35 = vadd.f32 %v2177_v1, %v2158_v6 }
 0x673   :  { %v2300_v59 = vsub.f32 0.0, %v2178_v35 }
 0x674   :  { %v2197_v31 = vpop.f32.mrf.mxu2 }
 0x675   :  { %v2301_v15 = vmul.f32 1.442695, %v2300_v59  ;;  %v2198_v9 = vadd.f32 %v2197_v31, %v8451_v60 }
 0x676   :  { %v2237_v38 = vpop.f32.mrf.mxu0 }
 0x677   :  { %2522 = vpow2.f32 %v2301_v15  ;;  %v2218_v61 = vadd.f32 %v2217_v7, %v2198_v9  ;;  %v2238_v58 = vadd.f32 %v2237_v38, %v8452_v18 }
 0x679   :  { %v2305_v21 = vsub.f32 0.0, %v2218_v61  ;;  %v2258_v43 = vadd.f32 %v2257_v32, %v2238_v58 }
 0x67b   :  { %v2306_v17 = vmul.f32 1.442695, %v2305_v21 }
 0x67c   :  { %v2277_v12 = vpop.f32.mrf.mxu2 }
 0x67d   :  { %v2523_v11 = vpop.eup %2522  ;;  %2524 = vpow2.f32 %v2306_v17  ;;  %v2278_v20 = vadd.f32 %v2277_v12, %v8586_v34 }
 0x67e   :  { %v2303_v28 = vadd.f32 1.0, %v2523_v11  ;;  %2526 = vtanh.f32 %v2258_v43 }
 0x67f   :  { %v2298_v44 = vadd.f32 %v2297_v3, %v2278_v20 }
 0x680   :  { %2528 = vrcp.f32 %v2303_v28 }
 0x681   :  { %v2311_v63 = vsub.f32 0.0, %v2298_v44 }
 0x683   :  { %v2525_v29 = vpop.eup %2524  ;;  %v2312_v60 = vmul.f32 1.442695, %v2311_v63 }
 0x684   :  { %v2308_v47 = vadd.f32 1.0, %v2525_v29  ;;  %v2527_v24 = vpop.eup %2526 }
 0x685   :  { %2530 = vpow2.f32 %v2312_v60 }
 0x686   :  { %2532 = vrcp.f32 %v2308_v47  ;;  %v2529_v18 = vpop.eup %2528 }
 0x687   :  { %v2317_v14 = vmul.f32 %v2529_v18, %v2527_v24 }
 0x68b   :  { %v2531_v57 = vpop.eup %2530 }
 0x68c   :  { %v2533_v26 = vpop.eup %2532  ;;  %v2314_v40 = vadd.f32 1.0, %v2531_v57 }
 0x68d   :  { %v2316_v34 = vmul.f32 %v2533_v26, %v7473_v22 }
 0x68e   :  { %2534 = vrcp.f32 %v2314_v40 }
 0x68f   :  { %v2318_v13 = vadd.f32 %v2317_v14, %v2316_v34 }
 0x691   :  { %2536 = vtanh.f32 %v2318_v13 }
 0x694   :  { %v2535_v0 = vpop.eup %2534 }
 0x697   :  { %v2537_v30 = vpop.eup %2536 }
 0x698   :  { %v2320_v5 = vmul.f32 %v2537_v30, %v2535_v0 }
 0x69a   :  { %v2321_v42 = vadd.f32 %v2320_v5, %v7484_v48 }
 0x69c   :  { %2322 = vst [vmem:[#allocation2] sm:$0x3] %v2321_v42 }
 0x69d   :  { %2333 = dma.vmem_to_hbm [thread:$0]  %s2329_s6, 32, %s2331_s2, [#allocation3]  }
 0x69e   :  { %3034 = dma.done.wait [#allocation3], 32  }
 0x69f   :  { %3035 = vsyncadd [#allocation3], 4294967264 }
 0x6a0   :  { %2338 = vsyncpa [#allocation3], 1 }

</bundles_post_ra>
